<compile_context>
chip_gen: v7x
topology: tpu7x:2x2x1
jax: 0.10.0
libtpu: 0.0.40
codegen_flags: <defaults>
</compile_context>

<pallas_src>
import functools

import jax
import jax.numpy as jnp
from jax.experimental import pallas as pl
from jax.experimental.pallas import tpu as pltpu


def _round_up(v, m):
    return (v + m - 1) // m * m


def _bottleneck_kernel(d,
                       x_ref, xt_ref, xb_ref,
                       w1_ref, b1_ref,
                       w2_ref, b2_ref,
                       w3_ref, b3_ref,
                       o_ref, pad_ref):
    """One (image n, row-strip h) grid step.

    x_ref  : (1, TH, W, Cin)  bf16  current row strip
    xt_ref : (1, d,  W, Cin)  bf16  d rows just above the strip.  The index map
                                    is clamped at the top image border; those
                                    rows are overwritten by the conv2
                                    zero-padding rows written below.
    xb_ref : (1, d,  W, Cin)  bf16  d rows just below the strip (clamped at the
                                    bottom border, likewise overwritten).
    o_ref  : (1, TH, W, Cout) out dtype (bf16 or f32)
    pad_ref: (TH+2d, W+2d, P) bf16 VMEM scratch = zero-padded conv2 input
    """
    _, TH, W, Cin = x_ref.shape
    P = w1_ref.shape[1]
    Cout = w3_ref.shape[1]
    He = TH + 2 * d            # strip rows incl. halo
    Mi = TH * W                # interior pixels (flattened)
    f32 = jnp.float32
    bf16 = pad_ref.dtype

    h = pl.program_id(1)
    nh = pl.num_programs(1)

    # ---- conv1 (1x1, bn1 scale folded into w1) + bias + relu ----------------
    def conv1_rows(rows):                      # (R, W, Cin) -> (R, W, P) bf16
        R = rows.shape[0]
        o = jnp.dot(rows.reshape(R * W, Cin), w1_ref[...],
                    preferred_element_type=f32)
        o = jnp.maximum(o + b1_ref[...], 0.0)
        return o.astype(bf16).reshape(R, W, P)

    # Stage straight into the zero-padded conv2 scratch.  Halo rows are
    # recomputed through the cheap 1x1 conv so strips stay independent.
    pad_ref[0:d, d:W + d, :] = conv1_rows(xt_ref[0])
    pad_ref[d:d + TH, d:W + d, :] = conv1_rows(x_ref[0])
    pad_ref[d + TH:He, d:W + d, :] = conv1_rows(xb_ref[0])

    # Left / right conv2 zero padding (only the 2d-wide column border).
    pad_ref[:, 0:d, :] = jnp.zeros((He, d, P), bf16)
    pad_ref[:, W + d:, :] = jnp.zeros((He, d, P), bf16)

    # Top / bottom image borders: the conv2 zero padding must override the
    # clamped halo rows staged above (program order on pad_ref guarantees it).
    @pl.when(h == 0)
    def _():
        pad_ref[0:d, :, :] = jnp.zeros((d, W + 2 * d, P), bf16)

    @pl.when(h == nh - 1)
    def _():
        pad_ref[He - d:, :, :] = jnp.zeros((d, W + 2 * d, P), bf16)

    # ---- conv2 (3x3, dilation d, stride 1): 9 shifted bf16 taps, f32 acc ----
    # TODO(synk): the kx taps are sublane-offset slices of the scratch; routing
    # the shift through pltpu.roll / an im2col K=9*P contraction is left for a
    # later revision (kept as ref slices here for lowering robustness).
    def tap(ky, kx):
        t = pad_ref[ky * d:ky * d + TH, kx * d:kx * d + W, :]
        return jnp.dot(t.reshape(Mi, P), w2_ref[ky, kx],
                       preferred_element_type=f32)

    acc = tap(0, 0)                            # seed with the first tap's dot
    for ky in range(3):
        for kx in range(3):
            if ky == 0 and kx == 0:
                continue
            acc = acc + tap(ky, kx)
    o2 = jnp.maximum(acc + b2_ref[...], 0.0)   # (Mi, P) f32, bn2 folded into w2

    # ---- conv3 (1x1, bn3 folded) + residual add + relu -----------------------
    o3 = jnp.dot(o2.astype(w3_ref.dtype), w3_ref[...],
                 preferred_element_type=f32) + b3_ref[...]
    res = x_ref[0].reshape(Mi, Cin).astype(f32)      # Cin == Cout (identity)
    o_ref[0] = jnp.maximum(o3 + res, 0.0).reshape(TH, W, Cout).astype(o_ref.dtype)


def bottleneck_forward(x_nchw, params, *, dilation=1, row_tile=None,
                       out_dtype=None):
    """Bottleneck forward (style='pytorch', stride=1, identity shortcut).

    x_nchw: (N, Cin, H, W).  params = (w1, s1, b1, w2, s2, b2, w3, s3, b3) with
    w1:(Cin,P), w2:(3,3,P,P) HWIO, w3:(P,Cout) and sX/bX folded BN scale/bias
    of shape (1, C).  Returns (N, Cout, H, W) in `out_dtype` (default x.dtype;
    pass jnp.bfloat16 when chaining blocks to halve the HBM output traffic).
    """
    w1, s1, b1, w2, s2, b2, w3, s3, b3 = params
    N, Cin, H, W = x_nchw.shape
    P = w1.shape[1]
    Cout = w3.shape[1]
    d = dilation
    assert Cout == Cin, "identity shortcut requires inplanes == planes*expansion"
    # TODO(synk): ragged H (H % dilation != 0, prime H, ...) needs masked row
    # strips and is not supported here.
    assert H % d == 0, "H must be divisible by the dilation for halo blocking"
    if out_dtype is None:
        out_dtype = x_nchw.dtype
    out_itemsize = jnp.dtype(out_dtype).itemsize

    # ---- per-generation tiling: derive strip height from VMEM capacity ------
    try:
        vmem_cap = int(pltpu.get_tpu_info().vmem_capacity_bytes)
    except Exception:
        vmem_cap = 64 * 1024 * 1024           # conservative (v7x-sized) default
    if row_tile is None:
        row_tile = 32 if vmem_cap >= 96 * 1024 * 1024 else 16

    # Largest TH <= row_tile with H % TH == 0 and TH % d == 0 (halo blocking).
    TH = 0
    for t in range(min(row_tile, H), 0, -1):
        if H % t == 0 and t % d == 0:
            TH = t
            break
    assert TH > 0, "no row tile compatible with H and dilation"
    # Keep both v7x TensorCores busy when N == 1: ensure at least two strips.
    if N == 1 and H // TH < 2:
        for t in range(TH - 1, 0, -1):
            if H % t == 0 and t % d == 0:
                TH = t
                break

    # ---- lane-dense channel padding (padded channels stay exact zeros) ------
    LANE = 128
    Cin_p = _round_up(Cin, LANE)
    P_p = _round_up(P, LANE)
    Cout_p = _round_up(Cout, LANE)

    x = jnp.transpose(x_nchw, (0, 2, 3, 1))                    # NHWC
    if Cin_p != Cin:
        x = jnp.pad(x, ((0, 0), (0, 0), (0, 0), (0, Cin_p - Cin)))
    x = x.astype(jnp.bfloat16)

    # Fold BN scales into the conv weights; only bias + relu stay in-kernel.
    def pad2(a, r, c):
        return jnp.pad(a, ((0, r - a.shape[0]), (0, c - a.shape[1])))

    w1p = pad2(w1 * s1, Cin_p, P_p).astype(jnp.bfloat16)
    w2p = jnp.pad(w2 * s2[0], ((0, 0), (0, 0), (0, P_p - P),
                               (0, P_p - P))).astype(jnp.bfloat16)
    w3p = pad2(w3 * s3, P_p, Cout_p).astype(jnp.bfloat16)
    b1p = pad2(b1, 1, P_p).astype(jnp.float32)
    b2p = pad2(b2, 1, P_p).astype(jnp.float32)
    b3p = pad2(b3, 1, Cout_p).astype(jnp.float32)

    nH = H // TH
    nHd = H // d
    THd = TH // d

    # ---- VMEM budget & advisory cost -----------------------------------------
    wbytes = (w1p.size + w2p.size + w3p.size) * 2
    bbytes = (b1p.size + b2p.size + b3p.size) * 4
    vmem_est = (2 * TH * W * Cin_p * 2                # x strip (double-buffered bf16)
                + 2 * 2 * d * W * Cin_p * 2           # two halo strips
                + 2 * TH * W * Cout_p * out_itemsize  # output strip
                + 2 * (wbytes + bbytes)               # worst case: double-buffered
                + (TH + 2 * d) * (W + 2 * d) * P_p * 2   # bf16 conv2 scratch
                + 4 * TH * W * P_p * 4)               # f32 temporaries headroom
    vmem_limit = int(min(max(2 * vmem_est, 32 * 1024 * 1024),
                         (vmem_cap * 9) // 10))

    flops = 2 * N * W * ((H + 2 * d * nH) * Cin_p * P_p   # conv1 incl. halo recompute
                         + H * 9 * P_p * P_p              # conv2
                         + H * P_p * Cout_p)              # conv3
    bytes_accessed = int(N * H * W * Cin_p * 2 * (1 + 2 * d / TH)   # strips + halos
                         + N * H * W * Cout_p * out_itemsize        # output
                         + wbytes + bbytes)
    cost = pl.CostEstimate(flops=int(flops), transcendentals=0,
                           bytes_accessed=bytes_accessed)

    def make_call(single_buffer_weights):
        if single_buffer_weights:
            # Grid-invariant blocks: request a single VMEM buffer (they are
            # fetched once; double-buffering them only wastes VMEM).
            resident = lambda a: pl.BlockSpec(
                a.shape, lambda n, h: (0,) * a.ndim,
                pipeline_mode=pl.Buffered(1))
        else:
            resident = lambda a: pl.BlockSpec(a.shape, lambda n, h: (0,) * a.ndim)
        return pl.pallas_call(
            functools.partial(_bottleneck_kernel, d),
            out_shape=jax.ShapeDtypeStruct((N, H, W, Cout_p), out_dtype),
            grid_spec=pltpu.PrefetchScalarGridSpec(
                num_scalar_prefetch=0,
                grid=(N, nH),
                in_specs=[
                    # current strip
                    pl.BlockSpec((1, TH, W, Cin_p), lambda n, h: (n, h, 0, 0)),
                    # d rows above (block index clamped at the top border; the
                    # clamped contents are replaced by conv2 zero padding)
                    pl.BlockSpec((1, d, W, Cin_p),
                                 lambda n, h: (n, jnp.maximum(h * THd - 1, 0), 0, 0)),
                    # d rows below (clamped at the bottom border, same deal)
                    pl.BlockSpec((1, d, W, Cin_p),
                                 lambda n, h: (n, jnp.minimum(h * THd + THd, nHd - 1), 0, 0)),
                    resident(w1p), resident(b1p),
                    resident(w2p), resident(b2p),
                    resident(w3p), resident(b3p),
                ],
                out_specs=pl.BlockSpec((1, TH, W, Cout_p), lambda n, h: (n, h, 0, 0)),
                scratch_shapes=[pltpu.VMEM((TH + 2 * d, W + 2 * d, P_p),
                                           jnp.bfloat16)],
            ),
            compiler_params=pltpu.CompilerParams(
                dimension_semantics=("parallel", "parallel"),
                vmem_limit_bytes=vmem_limit),
            cost_estimate=cost,
        )

    args = (x, x, x, w1p, b1p, w2p, b2p, w3p, b3p)
    try:
        out = make_call(True)(*args)
    except Exception:
        # This JAX build rejects pl.Buffered(1) single-buffering of the
        # resident weight blocks; fall back to default pipelining.
        out = make_call(False)(*args)

    out = out[..., :Cout]
    return jnp.transpose(out, (0, 3, 1, 2))                    # NCHW


def _fold_bn(gamma, beta, mean, var, eps=1e-5):
    scale = gamma / jnp.sqrt(var + eps)
    bias = beta - mean * scale
    return scale[None, :], bias[None, :]              # (1, C) for row broadcast


def _reference(x_nchw, params, *, dilation=1):
    """Pure-JAX f32 reference (matches the PyTorch forward)."""
    x = jnp.transpose(x_nchw, (0, 2, 3, 1))
    w1, s1, b1, w2, s2, b2, w3, s3, b3 = params
    dn = ("NHWC", "HWIO", "NHWC")
    o = jax.lax.conv_general_dilated(x, w1[None, None], (1, 1), "VALID",
                                     dimension_numbers=dn)
    o = jnp.maximum(o * s1[0] + b1[0], 0.0)
    o = jax.lax.conv_general_dilated(o, w2, (1, 1),
                                     [(dilation, dilation), (dilation, dilation)],
                                     rhs_dilation=(dilation, dilation),
                                     dimension_numbers=dn)
    o = jnp.maximum(o * s2[0] + b2[0], 0.0)
    o = jax.lax.conv_general_dilated(o, w3[None, None], (1, 1), "VALID",
                                     dimension_numbers=dn)
    o = o * s3[0] + b3[0]
    o = jnp.maximum(o + x, 0.0)
    return jnp.transpose(o, (0, 3, 1, 2))


if __name__ == "__main__":
    # Small config with inplanes == planes * expansion (identity, no downsample).
    N, planes, H, W = 2, 8, 16, 16
    expansion = 4
    inplanes = planes * expansion          # 32
    cout = planes * expansion              # 32

    key = jax.random.PRNGKey(0)
    ks = jax.random.split(key, 8)

    x = jax.random.normal(ks[0], (N, inplanes, H, W), jnp.float32)

    # Conv weights (bias=False) in matmul-friendly layouts:
    w1 = jax.random.normal(ks[1], (inplanes, planes), jnp.float32) * 0.1       # 1x1
    w2 = jax.random.normal(ks[2], (3, 3, planes, planes), jnp.float32) * 0.1   # HWIO
    w3 = jax.random.normal(ks[3], (planes, cout), jnp.float32) * 0.1           # 1x1

    def bn_params(k, c):
        k1, k2, k3, k4 = jax.random.split(k, 4)
        gamma = 1.0 + 0.1 * jax.random.normal(k1, (c,), jnp.float32)
        beta = 0.1 * jax.random.normal(k2, (c,), jnp.float32)
        mean = 0.1 * jax.random.normal(k3, (c,), jnp.float32)
        var = jnp.abs(jax.random.normal(k4, (c,), jnp.float32)) + 0.5
        return _fold_bn(gamma, beta, mean, var)

    s1, b1 = bn_params(ks[4], planes)
    s2, b2 = bn_params(ks[5], planes)
    s3, b3 = bn_params(ks[6], cout)

    params = (w1, s1, b1, w2, s2, b2, w3, s3, b3)

    # Run 1: dilation=1, f32 output (PyTorch-matching path), 8-row strips so the
    # halo exchange is actually exercised (nH = 2).
    out1 = jax.block_until_ready(
        bottleneck_forward(x, params, dilation=1, row_tile=8,
                           out_dtype=jnp.float32))
    ref1 = jax.block_until_ready(_reference(x, params, dilation=1))
    assert out1.shape == (N, cout, H, W)
    err1 = float(jnp.max(jnp.abs(out1 - ref1)))
    assert jnp.allclose(out1, ref1, rtol=3e-2, atol=3e-2), err1

    # Run 2: dilation=2, bf16 output (chained-block configuration).
    out2 = bottleneck_forward(x, params, dilation=2, row_tile=8,
                              out_dtype=jnp.bfloat16)
    out2 = jax.block_until_ready(out2).astype(jnp.float32)
    ref2 = jax.block_until_ready(_reference(x, params, dilation=2))
    assert out2.shape == (N, cout, H, W)
    err2 = float(jnp.max(jnp.abs(out2 - ref2)))
    assert jnp.allclose(out2, ref2, rtol=5e-2, atol=5e-2), err2

    print("KERNEL_OK")
</pallas_src>

<mosaic_0001>
module attributes {stable_mosaic.version = 11 : i64} {
  func.func @_bottleneck_kernel(%arg0: i32, %arg1: i32, %arg2: memref<1x8x16x128xbf16, #tpu.memory_space<vmem>>, %arg3: memref<1x1x16x128xbf16, #tpu.memory_space<vmem>>, %arg4: memref<1x1x16x128xbf16, #tpu.memory_space<vmem>>, %arg5: memref<128x128xbf16, #tpu.memory_space<vmem>>, %arg6: memref<1x128xf32, #tpu.memory_space<vmem>>, %arg7: memref<3x3x128x128xbf16, #tpu.memory_space<vmem>>, %arg8: memref<1x128xf32, #tpu.memory_space<vmem>>, %arg9: memref<128x128xbf16, #tpu.memory_space<vmem>>, %arg10: memref<1x128xf32, #tpu.memory_space<vmem>>, %arg11: memref<1x8x16x128xf32, #tpu.memory_space<vmem>>, %arg12: memref<10x18x128xbf16, #tpu.memory_space<vmem>>) attributes {dimension_semantics = [#tpu.dimension_semantics<parallel>, #tpu.dimension_semantics<parallel>], iteration_bounds = array<i64: 2, 2>, scalar_prefetch = 0 : i64, scratch_operands = 1 : i64, tpu.core_type = #tpu.core_type<tc>, window_params = [{transform_indices = @transform_0, window_bounds = array<i64: 1, 8, 16, 128>}, {transform_indices = @transform_1, window_bounds = array<i64: 1, 1, 16, 128>}, {transform_indices = @transform_2, window_bounds = array<i64: 1, 1, 16, 128>}, {pipeline_mode = #tpu.pipeline_mode<synchronous>, transform_indices = @transform_3, window_bounds = array<i64: 128, 128>}, {pipeline_mode = #tpu.pipeline_mode<synchronous>, transform_indices = @transform_4, window_bounds = array<i64: 1, 128>}, {pipeline_mode = #tpu.pipeline_mode<synchronous>, transform_indices = @transform_5, window_bounds = array<i64: 3, 3, 128, 128>}, {pipeline_mode = #tpu.pipeline_mode<synchronous>, transform_indices = @transform_6, window_bounds = array<i64: 1, 128>}, {pipeline_mode = #tpu.pipeline_mode<synchronous>, transform_indices = @transform_7, window_bounds = array<i64: 128, 128>}, {pipeline_mode = #tpu.pipeline_mode<synchronous>, transform_indices = @transform_8, window_bounds = array<i64: 1, 128>}, {transform_indices = @transform_9, window_bounds = array<i64: 1, 8, 16, 128>}]} {
    %c0 = arith.constant 0 : index
    %c0_0 = arith.constant 0 : index
    %c0_1 = arith.constant 0 : index
    %c0_2 = arith.constant 0 : index
    %0 = vector.load %arg3[%c0, %c0_0, %c0_1, %c0_2] : memref<1x1x16x128xbf16, #tpu.memory_space<vmem>>, vector<1x1x16x128xbf16>
    %1 = vector.shape_cast %0 : vector<1x1x16x128xbf16> to vector<1x16x128xbf16>
    %2 = vector.shape_cast %1 : vector<1x16x128xbf16> to vector<16x128xbf16>
    %c0_3 = arith.constant 0 : index
    %c0_4 = arith.constant 0 : index
    %3 = vector.load %arg5[%c0_3, %c0_4] : memref<128x128xbf16, #tpu.memory_space<vmem>>, vector<128x128xbf16>
    %cst = arith.constant dense<0.000000e+00> : vector<16x128xf32>
    %4 = tpu.matmul %2, %3, %cst {dimension_numbers = #tpu.dot_dimension_numbers<[1], [0], [0], [1], [0, 0, 1, 1], [], []>} : vector<16x128xbf16>, vector<128x128xbf16>, vector<16x128xf32> -> vector<16x128xf32>
    %c0_5 = arith.constant 0 : index
    %c0_6 = arith.constant 0 : index
    %5 = vector.load %arg6[%c0_5, %c0_6] : memref<1x128xf32, #tpu.memory_space<vmem>>, vector<1x128xf32>
    %6 = vector.broadcast %5 : vector<1x128xf32> to vector<16x128xf32>
    %7 = arith.addf %4, %6 : vector<16x128xf32>
    %cst_7 = arith.constant 0.000000e+00 : f32
    %8 = vector.broadcast %cst_7 : f32 to vector<16x128xf32>
    %9 = arith.maximumf %7, %8 : vector<16x128xf32>
    %10 = arith.truncf %9 : vector<16x128xf32> to vector<16x128xbf16>
    %11 = vector.shape_cast %10 : vector<16x128xbf16> to vector<1x16x128xbf16>
    %c0_8 = arith.constant 0 : index
    %c1 = arith.constant 1 : index
    %c0_9 = arith.constant 0 : index
    %12 = vector.load %arg12[%c0_8, %c1, %c0_9] : memref<10x18x128xbf16, #tpu.memory_space<vmem>>, vector<1x16x128xbf16>
    tpu.vector_store %arg12[%c0_8, %c1, %c0_9], %11 {strides = array<i32>} : memref<10x18x128xbf16, #tpu.memory_space<vmem>>, vector<1x16x128xbf16>,
    %c0_10 = arith.constant 0 : index
    %c0_11 = arith.constant 0 : index
    %c0_12 = arith.constant 0 : index
    %c0_13 = arith.constant 0 : index
    %13 = vector.load %arg2[%c0_10, %c0_11, %c0_12, %c0_13] : memref<1x8x16x128xbf16, #tpu.memory_space<vmem>>, vector<1x8x16x128xbf16>
    %14 = vector.shape_cast %13 : vector<1x8x16x128xbf16> to vector<8x16x128xbf16>
    %15 = vector.shape_cast %14 : vector<8x16x128xbf16> to vector<128x128xbf16>
    %c0_14 = arith.constant 0 : index
    %c0_15 = arith.constant 0 : index
    %16 = vector.load %arg5[%c0_14, %c0_15] : memref<128x128xbf16, #tpu.memory_space<vmem>>, vector<128x128xbf16>
    %cst_16 = arith.constant dense<0.000000e+00> : vector<128x128xf32>
    %17 = tpu.matmul %15, %16, %cst_16 {dimension_numbers = #tpu.dot_dimension_numbers<[1], [0], [0], [1], [0, 0, 1, 1], [], []>} : vector<128x128xbf16>, vector<128x128xbf16>, vector<128x128xf32> -> vector<128x128xf32>
    %c0_17 = arith.constant 0 : index
    %c0_18 = arith.constant 0 : index
    %18 = vector.load %arg6[%c0_17, %c0_18] : memref<1x128xf32, #tpu.memory_space<vmem>>, vector<1x128xf32>
    %19 = vector.broadcast %18 : vector<1x128xf32> to vector<128x128xf32>
    %20 = arith.addf %17, %19 : vector<128x128xf32>
    %cst_19 = arith.constant 0.000000e+00 : f32
    %21 = vector.broadcast %cst_19 : f32 to vector<128x128xf32>
    %22 = arith.maximumf %20, %21 : vector<128x128xf32>
    %23 = arith.truncf %22 : vector<128x128xf32> to vector<128x128xbf16>
    %24 = vector.shape_cast %23 : vector<128x128xbf16> to vector<8x16x128xbf16>
    %c1_20 = arith.constant 1 : index
    %c1_21 = arith.constant 1 : index
    %c0_22 = arith.constant 0 : index
    %25 = vector.load %arg12[%c1_20, %c1_21, %c0_22] : memref<10x18x128xbf16, #tpu.memory_space<vmem>>, vector<8x16x128xbf16>
    tpu.vector_store %arg12[%c1_20, %c1_21, %c0_22], %24 {strides = array<i32>} : memref<10x18x128xbf16, #tpu.memory_space<vmem>>, vector<8x16x128xbf16>,
    %c0_23 = arith.constant 0 : index
    %c0_24 = arith.constant 0 : index
    %c0_25 = arith.constant 0 : index
    %c0_26 = arith.constant 0 : index
    %26 = vector.load %arg4[%c0_23, %c0_24, %c0_25, %c0_26] : memref<1x1x16x128xbf16, #tpu.memory_space<vmem>>, vector<1x1x16x128xbf16>
    %27 = vector.shape_cast %26 : vector<1x1x16x128xbf16> to vector<1x16x128xbf16>
    %28 = vector.shape_cast %27 : vector<1x16x128xbf16> to vector<16x128xbf16>
    %c0_27 = arith.constant 0 : index
    %c0_28 = arith.constant 0 : index
    %29 = vector.load %arg5[%c0_27, %c0_28] : memref<128x128xbf16, #tpu.memory_space<vmem>>, vector<128x128xbf16>
    %cst_29 = arith.constant dense<0.000000e+00> : vector<16x128xf32>
    %30 = tpu.matmul %28, %29, %cst_29 {dimension_numbers = #tpu.dot_dimension_numbers<[1], [0], [0], [1], [0, 0, 1, 1], [], []>} : vector<16x128xbf16>, vector<128x128xbf16>, vector<16x128xf32> -> vector<16x128xf32>
    %c0_30 = arith.constant 0 : index
    %c0_31 = arith.constant 0 : index
    %31 = vector.load %arg6[%c0_30, %c0_31] : memref<1x128xf32, #tpu.memory_space<vmem>>, vector<1x128xf32>
    %32 = vector.broadcast %31 : vector<1x128xf32> to vector<16x128xf32>
    %33 = arith.addf %30, %32 : vector<16x128xf32>
    %cst_32 = arith.constant 0.000000e+00 : f32
    %34 = vector.broadcast %cst_32 : f32 to vector<16x128xf32>
    %35 = arith.maximumf %33, %34 : vector<16x128xf32>
    %36 = arith.truncf %35 : vector<16x128xf32> to vector<16x128xbf16>
    %37 = vector.shape_cast %36 : vector<16x128xbf16> to vector<1x16x128xbf16>
    %c9 = arith.constant 9 : index
    %c1_33 = arith.constant 1 : index
    %c0_34 = arith.constant 0 : index
    %38 = vector.load %arg12[%c9, %c1_33, %c0_34] : memref<10x18x128xbf16, #tpu.memory_space<vmem>>, vector<1x16x128xbf16>
    tpu.vector_store %arg12[%c9, %c1_33, %c0_34], %37 {strides = array<i32>} : memref<10x18x128xbf16, #tpu.memory_space<vmem>>, vector<1x16x128xbf16>,
    %cst_35 = arith.constant 0.000000e+00 : bf16
    %39 = vector.broadcast %cst_35 : bf16 to vector<10x1x128xbf16>
    %c0_36 = arith.constant 0 : index
    %c0_37 = arith.constant 0 : index
    %c0_38 = arith.constant 0 : index
    %40 = vector.load %arg12[%c0_36, %c0_37, %c0_38] : memref<10x18x128xbf16, #tpu.memory_space<vmem>>, vector<10x1x128xbf16>
    tpu.vector_store %arg12[%c0_36, %c0_37, %c0_38], %39 {strides = array<i32>} : memref<10x18x128xbf16, #tpu.memory_space<vmem>>, vector<10x1x128xbf16>,
    %cst_39 = arith.constant 0.000000e+00 : bf16
    %41 = vector.broadcast %cst_39 : bf16 to vector<10x1x128xbf16>
    %c0_40 = arith.constant 0 : index
    %c17 = arith.constant 17 : index
    %c0_41 = arith.constant 0 : index
    %42 = vector.load %arg12[%c0_40, %c17, %c0_41] : memref<10x18x128xbf16, #tpu.memory_space<vmem>>, vector<10x1x128xbf16>
    tpu.vector_store %arg12[%c0_40, %c17, %c0_41], %41 {strides = array<i32>} : memref<10x18x128xbf16, #tpu.memory_space<vmem>>, vector<10x1x128xbf16>,
    %c0_i32 = arith.constant 0 : i32
    %43 = arith.cmpi eq, %arg1, %c0_i32 : i32
    %44 = arith.extui %43 : i1 to i32
    %c0_i32_42 = arith.constant 0 : i32
    %45 = arith.cmpi ne, %44, %c0_i32_42 : i32
    scf.if %45 {
      %cst_132 = arith.constant 0.000000e+00 : bf16
      %124 = vector.broadcast %cst_132 : bf16 to vector<1x18x128xbf16>
      %c0_133 = arith.constant 0 : index
      %c0_134 = arith.constant 0 : index
      %c0_135 = arith.constant 0 : index
      %125 = vector.load %arg12[%c0_133, %c0_134, %c0_135] : memref<10x18x128xbf16, #tpu.memory_space<vmem>>, vector<1x18x128xbf16>
      tpu.vector_store %arg12[%c0_133, %c0_134, %c0_135], %124 {strides = array<i32>} : memref<10x18x128xbf16, #tpu.memory_space<vmem>>, vector<1x18x128xbf16>,
    } else {
    }
    %c1_i32 = arith.constant 1 : i32
    %46 = arith.cmpi eq, %arg1, %c1_i32 : i32
    %47 = arith.extui %46 : i1 to i32
    %c0_i32_43 = arith.constant 0 : i32
    %48 = arith.cmpi ne, %47, %c0_i32_43 : i32
    scf.if %48 {
      %cst_132 = arith.constant 0.000000e+00 : bf16
      %124 = vector.broadcast %cst_132 : bf16 to vector<1x18x128xbf16>
      %c9_133 = arith.constant 9 : index
      %c0_134 = arith.constant 0 : index
      %c0_135 = arith.constant 0 : index
      %125 = vector.load %arg12[%c9_133, %c0_134, %c0_135] : memref<10x18x128xbf16, #tpu.memory_space<vmem>>, vector<1x18x128xbf16>
      tpu.vector_store %arg12[%c9_133, %c0_134, %c0_135], %124 {strides = array<i32>} : memref<10x18x128xbf16, #tpu.memory_space<vmem>>, vector<1x18x128xbf16>,
    } else {
    }
    %c0_44 = arith.constant 0 : index
    %c0_45 = arith.constant 0 : index
    %c0_46 = arith.constant 0 : index
    %49 = vector.load %arg12[%c0_44, %c0_45, %c0_46] : memref<10x18x128xbf16, #tpu.memory_space<vmem>>, vector<8x16x128xbf16>
    %50 = vector.shape_cast %49 : vector<8x16x128xbf16> to vector<128x128xbf16>
    %c0_47 = arith.constant 0 : index
    %c0_48 = arith.constant 0 : index
    %c0_49 = arith.constant 0 : index
    %c0_50 = arith.constant 0 : index
    %51 = vector.load %arg7[%c0_47, %c0_48, %c0_49, %c0_50] : memref<3x3x128x128xbf16, #tpu.memory_space<vmem>>, vector<1x1x128x128xbf16>
    %52 = vector.shape_cast %51 : vector<1x1x128x128xbf16> to vector<128x128xbf16>
    %cst_51 = arith.constant dense<0.000000e+00> : vector<128x128xf32>
    %53 = tpu.matmul %50, %52, %cst_51 {dimension_numbers = #tpu.dot_dimension_numbers<[1], [0], [0], [1], [0, 0, 1, 1], [], []>} : vector<128x128xbf16>, vector<128x128xbf16>, vector<128x128xf32> -> vector<128x128xf32>
    %c0_52 = arith.constant 0 : index
    %c1_53 = arith.constant 1 : index
    %c0_54 = arith.constant 0 : index
    %54 = vector.load %arg12[%c0_52, %c1_53, %c0_54] : memref<10x18x128xbf16, #tpu.memory_space<vmem>>, vector<8x16x128xbf16>
    %55 = vector.shape_cast %54 : vector<8x16x128xbf16> to vector<128x128xbf16>
    %c0_55 = arith.constant 0 : index
    %c1_56 = arith.constant 1 : index
    %c0_57 = arith.constant 0 : index
    %c0_58 = arith.constant 0 : index
    %56 = vector.load %arg7[%c0_55, %c1_56, %c0_57, %c0_58] : memref<3x3x128x128xbf16, #tpu.memory_space<vmem>>, vector<1x1x128x128xbf16>
    %57 = vector.shape_cast %56 : vector<1x1x128x128xbf16> to vector<128x128xbf16>
    %cst_59 = arith.constant dense<0.000000e+00> : vector<128x128xf32>
    %58 = tpu.matmul %55, %57, %cst_59 {dimension_numbers = #tpu.dot_dimension_numbers<[1], [0], [0], [1], [0, 0, 1, 1], [], []>} : vector<128x128xbf16>, vector<128x128xbf16>, vector<128x128xf32> -> vector<128x128xf32>
    %59 = arith.addf %53, %58 : vector<128x128xf32>
    %c0_60 = arith.constant 0 : index
    %c2 = arith.constant 2 : index
    %c0_61 = arith.constant 0 : index
    %60 = vector.load %arg12[%c0_60, %c2, %c0_61] : memref<10x18x128xbf16, #tpu.memory_space<vmem>>, vector<8x16x128xbf16>
    %61 = vector.shape_cast %60 : vector<8x16x128xbf16> to vector<128x128xbf16>
    %c0_62 = arith.constant 0 : index
    %c2_63 = arith.constant 2 : index
    %c0_64 = arith.constant 0 : index
    %c0_65 = arith.constant 0 : index
    %62 = vector.load %arg7[%c0_62, %c2_63, %c0_64, %c0_65] : memref<3x3x128x128xbf16, #tpu.memory_space<vmem>>, vector<1x1x128x128xbf16>
    %63 = vector.shape_cast %62 : vector<1x1x128x128xbf16> to vector<128x128xbf16>
    %cst_66 = arith.constant dense<0.000000e+00> : vector<128x128xf32>
    %64 = tpu.matmul %61, %63, %cst_66 {dimension_numbers = #tpu.dot_dimension_numbers<[1], [0], [0], [1], [0, 0, 1, 1], [], []>} : vector<128x128xbf16>, vector<128x128xbf16>, vector<128x128xf32> -> vector<128x128xf32>
    %65 = arith.addf %59, %64 : vector<128x128xf32>
    %c1_67 = arith.constant 1 : index
    %c0_68 = arith.constant 0 : index
    %c0_69 = arith.constant 0 : index
    %66 = vector.load %arg12[%c1_67, %c0_68, %c0_69] : memref<10x18x128xbf16, #tpu.memory_space<vmem>>, vector<8x16x128xbf16>
    %67 = vector.shape_cast %66 : vector<8x16x128xbf16> to vector<128x128xbf16>
    %c1_70 = arith.constant 1 : index
    %c0_71 = arith.constant 0 : index
    %c0_72 = arith.constant 0 : index
    %c0_73 = arith.constant 0 : index
    %68 = vector.load %arg7[%c1_70, %c0_71, %c0_72, %c0_73] : memref<3x3x128x128xbf16, #tpu.memory_space<vmem>>, vector<1x1x128x128xbf16>
    %69 = vector.shape_cast %68 : vector<1x1x128x128xbf16> to vector<128x128xbf16>
    %cst_74 = arith.constant dense<0.000000e+00> : vector<128x128xf32>
    %70 = tpu.matmul %67, %69, %cst_74 {dimension_numbers = #tpu.dot_dimension_numbers<[1], [0], [0], [1], [0, 0, 1, 1], [], []>} : vector<128x128xbf16>, vector<128x128xbf16>, vector<128x128xf32> -> vector<128x128xf32>
    %71 = arith.addf %65, %70 : vector<128x128xf32>
    %c1_75 = arith.constant 1 : index
    %c1_76 = arith.constant 1 : index
    %c0_77 = arith.constant 0 : index
    %72 = vector.load %arg12[%c1_75, %c1_76, %c0_77] : memref<10x18x128xbf16, #tpu.memory_space<vmem>>, vector<8x16x128xbf16>
    %73 = vector.shape_cast %72 : vector<8x16x128xbf16> to vector<128x128xbf16>
    %c1_78 = arith.constant 1 : index
    %c1_79 = arith.constant 1 : index
    %c0_80 = arith.constant 0 : index
    %c0_81 = arith.constant 0 : index
    %74 = vector.load %arg7[%c1_78, %c1_79, %c0_80, %c0_81] : memref<3x3x128x128xbf16, #tpu.memory_space<vmem>>, vector<1x1x128x128xbf16>
    %75 = vector.shape_cast %74 : vector<1x1x128x128xbf16> to vector<128x128xbf16>
    %cst_82 = arith.constant dense<0.000000e+00> : vector<128x128xf32>
    %76 = tpu.matmul %73, %75, %cst_82 {dimension_numbers = #tpu.dot_dimension_numbers<[1], [0], [0], [1], [0, 0, 1, 1], [], []>} : vector<128x128xbf16>, vector<128x128xbf16>, vector<128x128xf32> -> vector<128x128xf32>
    %77 = arith.addf %71, %76 : vector<128x128xf32>
    %c1_83 = arith.constant 1 : index
    %c2_84 = arith.constant 2 : index
    %c0_85 = arith.constant 0 : index
    %78 = vector.load %arg12[%c1_83, %c2_84, %c0_85] : memref<10x18x128xbf16, #tpu.memory_space<vmem>>, vector<8x16x128xbf16>
    %79 = vector.shape_cast %78 : vector<8x16x128xbf16> to vector<128x128xbf16>
    %c1_86 = arith.constant 1 : index
    %c2_87 = arith.constant 2 : index
    %c0_88 = arith.constant 0 : index
    %c0_89 = arith.constant 0 : index
    %80 = vector.load %arg7[%c1_86, %c2_87, %c0_88, %c0_89] : memref<3x3x128x128xbf16, #tpu.memory_space<vmem>>, vector<1x1x128x128xbf16>
    %81 = vector.shape_cast %80 : vector<1x1x128x128xbf16> to vector<128x128xbf16>
    %cst_90 = arith.constant dense<0.000000e+00> : vector<128x128xf32>
    %82 = tpu.matmul %79, %81, %cst_90 {dimension_numbers = #tpu.dot_dimension_numbers<[1], [0], [0], [1], [0, 0, 1, 1], [], []>} : vector<128x128xbf16>, vector<128x128xbf16>, vector<128x128xf32> -> vector<128x128xf32>
    %83 = arith.addf %77, %82 : vector<128x128xf32>
    %c2_91 = arith.constant 2 : index
    %c0_92 = arith.constant 0 : index
    %c0_93 = arith.constant 0 : index
    %84 = vector.load %arg12[%c2_91, %c0_92, %c0_93] : memref<10x18x128xbf16, #tpu.memory_space<vmem>>, vector<8x16x128xbf16>
    %85 = vector.shape_cast %84 : vector<8x16x128xbf16> to vector<128x128xbf16>
    %c2_94 = arith.constant 2 : index
    %c0_95 = arith.constant 0 : index
    %c0_96 = arith.constant 0 : index
    %c0_97 = arith.constant 0 : index
    %86 = vector.load %arg7[%c2_94, %c0_95, %c0_96, %c0_97] : memref<3x3x128x128xbf16, #tpu.memory_space<vmem>>, vector<1x1x128x128xbf16>
    %87 = vector.shape_cast %86 : vector<1x1x128x128xbf16> to vector<128x128xbf16>
    %cst_98 = arith.constant dense<0.000000e+00> : vector<128x128xf32>
    %88 = tpu.matmul %85, %87, %cst_98 {dimension_numbers = #tpu.dot_dimension_numbers<[1], [0], [0], [1], [0, 0, 1, 1], [], []>} : vector<128x128xbf16>, vector<128x128xbf16>, vector<128x128xf32> -> vector<128x128xf32>
    %89 = arith.addf %83, %88 : vector<128x128xf32>
    %c2_99 = arith.constant 2 : index
    %c1_100 = arith.constant 1 : index
    %c0_101 = arith.constant 0 : index
    %90 = vector.load %arg12[%c2_99, %c1_100, %c0_101] : memref<10x18x128xbf16, #tpu.memory_space<vmem>>, vector<8x16x128xbf16>
    %91 = vector.shape_cast %90 : vector<8x16x128xbf16> to vector<128x128xbf16>
    %c2_102 = arith.constant 2 : index
    %c1_103 = arith.constant 1 : index
    %c0_104 = arith.constant 0 : index
    %c0_105 = arith.constant 0 : index
    %92 = vector.load %arg7[%c2_102, %c1_103, %c0_104, %c0_105] : memref<3x3x128x128xbf16, #tpu.memory_space<vmem>>, vector<1x1x128x128xbf16>
    %93 = vector.shape_cast %92 : vector<1x1x128x128xbf16> to vector<128x128xbf16>
    %cst_106 = arith.constant dense<0.000000e+00> : vector<128x128xf32>
    %94 = tpu.matmul %91, %93, %cst_106 {dimension_numbers = #tpu.dot_dimension_numbers<[1], [0], [0], [1], [0, 0, 1, 1], [], []>} : vector<128x128xbf16>, vector<128x128xbf16>, vector<128x128xf32> -> vector<128x128xf32>
    %95 = arith.addf %89, %94 : vector<128x128xf32>
    %c2_107 = arith.constant 2 : index
    %c2_108 = arith.constant 2 : index
    %c0_109 = arith.constant 0 : index
    %96 = vector.load %arg12[%c2_107, %c2_108, %c0_109] : memref<10x18x128xbf16, #tpu.memory_space<vmem>>, vector<8x16x128xbf16>
    %97 = vector.shape_cast %96 : vector<8x16x128xbf16> to vector<128x128xbf16>
    %c2_110 = arith.constant 2 : index
    %c2_111 = arith.constant 2 : index
    %c0_112 = arith.constant 0 : index
    %c0_113 = arith.constant 0 : index
    %98 = vector.load %arg7[%c2_110, %c2_111, %c0_112, %c0_113] : memref<3x3x128x128xbf16, #tpu.memory_space<vmem>>, vector<1x1x128x128xbf16>
    %99 = vector.shape_cast %98 : vector<1x1x128x128xbf16> to vector<128x128xbf16>
    %cst_114 = arith.constant dense<0.000000e+00> : vector<128x128xf32>
    %100 = tpu.matmul %97, %99, %cst_114 {dimension_numbers = #tpu.dot_dimension_numbers<[1], [0], [0], [1], [0, 0, 1, 1], [], []>} : vector<128x128xbf16>, vector<128x128xbf16>, vector<128x128xf32> -> vector<128x128xf32>
    %101 = arith.addf %95, %100 : vector<128x128xf32>
    %c0_115 = arith.constant 0 : index
    %c0_116 = arith.constant 0 : index
    %102 = vector.load %arg8[%c0_115, %c0_116] : memref<1x128xf32, #tpu.memory_space<vmem>>, vector<1x128xf32>
    %103 = vector.broadcast %102 : vector<1x128xf32> to vector<128x128xf32>
    %104 = arith.addf %101, %103 : vector<128x128xf32>
    %cst_117 = arith.constant 0.000000e+00 : f32
    %105 = vector.broadcast %cst_117 : f32 to vector<128x128xf32>
    %106 = arith.maximumf %104, %105 : vector<128x128xf32>
    %107 = arith.truncf %106 : vector<128x128xf32> to vector<128x128xbf16>
    %c0_118 = arith.constant 0 : index
    %c0_119 = arith.constant 0 : index
    %108 = vector.load %arg9[%c0_118, %c0_119] : memref<128x128xbf16, #tpu.memory_space<vmem>>, vector<128x128xbf16>
    %cst_120 = arith.constant dense<0.000000e+00> : vector<128x128xf32>
    %109 = tpu.matmul %107, %108, %cst_120 {dimension_numbers = #tpu.dot_dimension_numbers<[1], [0], [0], [1], [0, 0, 1, 1], [], []>} : vector<128x128xbf16>, vector<128x128xbf16>, vector<128x128xf32> -> vector<128x128xf32>
    %c0_121 = arith.constant 0 : index
    %c0_122 = arith.constant 0 : index
    %110 = vector.load %arg10[%c0_121, %c0_122] : memref<1x128xf32, #tpu.memory_space<vmem>>, vector<1x128xf32>
    %111 = vector.broadcast %110 : vector<1x128xf32> to vector<128x128xf32>
    %112 = arith.addf %109, %111 : vector<128x128xf32>
    %c0_123 = arith.constant 0 : index
    %c0_124 = arith.constant 0 : index
    %c0_125 = arith.constant 0 : index
    %c0_126 = arith.constant 0 : index
    %113 = vector.load %arg2[%c0_123, %c0_124, %c0_125, %c0_126] : memref<1x8x16x128xbf16, #tpu.memory_space<vmem>>, vector<1x8x16x128xbf16>
    %114 = vector.shape_cast %113 : vector<1x8x16x128xbf16> to vector<8x16x128xbf16>
    %115 = vector.shape_cast %114 : vector<8x16x128xbf16> to vector<128x128xbf16>
    %116 = arith.extf %115 : vector<128x128xbf16> to vector<128x128xf32>
    %117 = arith.addf %112, %116 : vector<128x128xf32>
    %cst_127 = arith.constant 0.000000e+00 : f32
    %118 = vector.broadcast %cst_127 : f32 to vector<128x128xf32>
    %119 = arith.maximumf %117, %118 : vector<128x128xf32>
    %120 = vector.shape_cast %119 : vector<128x128xf32> to vector<8x16x128xf32>
    %c0_128 = arith.constant 0 : index
    %c0_129 = arith.constant 0 : index
    %c0_130 = arith.constant 0 : index
    %c0_131 = arith.constant 0 : index
    %121 = vector.load %arg11[%c0_128, %c0_129, %c0_130, %c0_131] : memref<1x8x16x128xf32, #tpu.memory_space<vmem>>, vector<1x8x16x128xf32>
    %122 = vector.shape_cast %121 : vector<1x8x16x128xf32> to vector<8x16x128xf32>
    %123 = vector.shape_cast %120 : vector<8x16x128xf32> to vector<1x8x16x128xf32>
    tpu.vector_store %arg11[%c0_128, %c0_129, %c0_130, %c0_131], %123 {strides = array<i32>} : memref<1x8x16x128xf32, #tpu.memory_space<vmem>>, vector<1x8x16x128xf32>,
    return
  }
  func.func @transform_0(%arg0: i32, %arg1: i32) -> (i32, i32, i32, i32) {
    %c0_i32 = arith.constant 0 : i32
    %c0_i32_0 = arith.constant 0 : i32
    %c0_i32_1 = arith.constant 0 : i32
    return %arg0, %arg1, %c0_i32, %c0_i32_0 : i32, i32, i32, i32
  }
  func.func @transform_1(%arg0: i32, %arg1: i32) -> (i32, i32, i32, i32) {
    %c8_i32 = arith.constant 8 : i32
    %0 = arith.muli %arg1, %c8_i32 : i32
    %c1_i32 = arith.constant 1 : i32
    %1 = arith.subi %0, %c1_i32 : i32
    %c0_i32 = arith.constant 0 : i32
    %2 = arith.maxsi %1, %c0_i32 : i32
    %c0_i32_0 = arith.constant 0 : i32
    %c0_i32_1 = arith.constant 0 : i32
    %c0_i32_2 = arith.constant 0 : i32
    return %arg0, %2, %c0_i32_0, %c0_i32_1 : i32, i32, i32, i32
  }
  func.func @transform_2(%arg0: i32, %arg1: i32) -> (i32, i32, i32, i32) {
    %c8_i32 = arith.constant 8 : i32
    %0 = arith.muli %arg1, %c8_i32 : i32
    %c8_i32_0 = arith.constant 8 : i32
    %1 = arith.addi %0, %c8_i32_0 : i32
    %c15_i32 = arith.constant 15 : i32
    %2 = arith.minsi %1, %c15_i32 : i32
    %c0_i32 = arith.constant 0 : i32
    %c0_i32_1 = arith.constant 0 : i32
    %c0_i32_2 = arith.constant 0 : i32
    return %arg0, %2, %c0_i32, %c0_i32_1 : i32, i32, i32, i32
  }
  func.func @transform_3(%arg0: i32, %arg1: i32) -> (i32, i32) {
    %c0_i32 = arith.constant 0 : i32
    %c0_i32_0 = arith.constant 0 : i32
    %c0_i32_1 = arith.constant 0 : i32
    return %c0_i32, %c0_i32_0 : i32, i32
  }
  func.func @transform_4(%arg0: i32, %arg1: i32) -> (i32, i32) {
    %c0_i32 = arith.constant 0 : i32
    %c0_i32_0 = arith.constant 0 : i32
    %c0_i32_1 = arith.constant 0 : i32
    return %c0_i32, %c0_i32_0 : i32, i32
  }
  func.func @transform_5(%arg0: i32, %arg1: i32) -> (i32, i32, i32, i32) {
    %c0_i32 = arith.constant 0 : i32
    %c0_i32_0 = arith.constant 0 : i32
    %c0_i32_1 = arith.constant 0 : i32
    %c0_i32_2 = arith.constant 0 : i32
    %c0_i32_3 = arith.constant 0 : i32
    return %c0_i32, %c0_i32_0, %c0_i32_1, %c0_i32_2 : i32, i32, i32, i32
  }
  func.func @transform_6(%arg0: i32, %arg1: i32) -> (i32, i32) {
    %c0_i32 = arith.constant 0 : i32
    %c0_i32_0 = arith.constant 0 : i32
    %c0_i32_1 = arith.constant 0 : i32
    return %c0_i32, %c0_i32_0 : i32, i32
  }
  func.func @transform_7(%arg0: i32, %arg1: i32) -> (i32, i32) {
    %c0_i32 = arith.constant 0 : i32
    %c0_i32_0 = arith.constant 0 : i32
    %c0_i32_1 = arith.constant 0 : i32
    return %c0_i32, %c0_i32_0 : i32, i32
  }
  func.func @transform_8(%arg0: i32, %arg1: i32) -> (i32, i32) {
    %c0_i32 = arith.constant 0 : i32
    %c0_i32_0 = arith.constant 0 : i32
    %c0_i32_1 = arith.constant 0 : i32
    return %c0_i32, %c0_i32_0 : i32, i32
  }
  func.func @transform_9(%arg0: i32, %arg1: i32) -> (i32, i32, i32, i32) {
    %c0_i32 = arith.constant 0 : i32
    %c0_i32_0 = arith.constant 0 : i32
    %c0_i32_1 = arith.constant 0 : i32
    return %arg0, %arg1, %c0_i32, %c0_i32_0 : i32, i32, i32, i32
  }
}

module attributes {stable_mosaic.version = 11 : i64} {
  func.func @_bottleneck_kernel(%arg0: i32, %arg1: i32, %arg2: memref<1x8x16x128xbf16, #tpu.memory_space<vmem>>, %arg3: memref<1x1x16x128xbf16, #tpu.memory_space<vmem>>, %arg4: memref<1x1x16x128xbf16, #tpu.memory_space<vmem>>, %arg5: memref<128x128xbf16, #tpu.memory_space<vmem>>, %arg6: memref<1x128xf32, #tpu.memory_space<vmem>>, %arg7: memref<3x3x128x128xbf16, #tpu.memory_space<vmem>>, %arg8: memref<1x128xf32, #tpu.memory_space<vmem>>, %arg9: memref<128x128xbf16, #tpu.memory_space<vmem>>, %arg10: memref<1x128xf32, #tpu.memory_space<vmem>>, %arg11: memref<1x8x16x128xf32, #tpu.memory_space<vmem>>, %arg12: memref<10x18x128xbf16, #tpu.memory_space<vmem>>) attributes {dimension_semantics = [#tpu.dimension_semantics<parallel>, #tpu.dimension_semantics<parallel>], iteration_bounds = array<i64: 2, 2>, scalar_prefetch = 0 : i64, scratch_operands = 1 : i64, tpu.core_type = #tpu.core_type<tc>, window_params = [{transform_indices = @transform_0, window_bounds = array<i64: 1, 8, 16, 128>}, {transform_indices = @transform_1, window_bounds = array<i64: 1, 1, 16, 128>}, {transform_indices = @transform_2, window_bounds = array<i64: 1, 1, 16, 128>}, {pipeline_mode = #tpu.pipeline_mode<synchronous>, transform_indices = @transform_3, window_bounds = array<i64: 128, 128>}, {pipeline_mode = #tpu.pipeline_mode<synchronous>, transform_indices = @transform_4, window_bounds = array<i64: 1, 128>}, {pipeline_mode = #tpu.pipeline_mode<synchronous>, transform_indices = @transform_5, window_bounds = array<i64: 3, 3, 128, 128>}, {pipeline_mode = #tpu.pipeline_mode<synchronous>, transform_indices = @transform_6, window_bounds = array<i64: 1, 128>}, {pipeline_mode = #tpu.pipeline_mode<synchronous>, transform_indices = @transform_7, window_bounds = array<i64: 128, 128>}, {pipeline_mode = #tpu.pipeline_mode<synchronous>, transform_indices = @transform_8, window_bounds = array<i64: 1, 128>}, {transform_indices = @transform_9, window_bounds = array<i64: 1, 8, 16, 128>}]} {
    %c0 = arith.constant 0 : index
    %c0_0 = arith.constant 0 : index
    %c0_1 = arith.constant 0 : index
    %c0_2 = arith.constant 0 : index
    %0 = vector.load %arg3[%c0, %c0_0, %c0_1, %c0_2] : memref<1x1x16x128xbf16, #tpu.memory_space<vmem>>, vector<1x1x16x128xbf16>
    %1 = vector.shape_cast %0 : vector<1x1x16x128xbf16> to vector<1x16x128xbf16>
    %2 = vector.shape_cast %1 : vector<1x16x128xbf16> to vector<16x128xbf16>
    %c0_3 = arith.constant 0 : index
    %c0_4 = arith.constant 0 : index
    %3 = vector.load %arg5[%c0_3, %c0_4] : memref<128x128xbf16, #tpu.memory_space<vmem>>, vector<128x128xbf16>
    %cst = arith.constant dense<0.000000e+00> : vector<16x128xf32>
    %4 = tpu.matmul %2, %3, %cst {dimension_numbers = #tpu.dot_dimension_numbers<[1], [0], [0], [1], [0, 0, 1, 1], [], []>} : vector<16x128xbf16>, vector<128x128xbf16>, vector<16x128xf32> -> vector<16x128xf32>
    %c0_5 = arith.constant 0 : index
    %c0_6 = arith.constant 0 : index
    %5 = vector.load %arg6[%c0_5, %c0_6] : memref<1x128xf32, #tpu.memory_space<vmem>>, vector<1x128xf32>
    %6 = vector.broadcast %5 : vector<1x128xf32> to vector<16x128xf32>
    %7 = arith.addf %4, %6 : vector<16x128xf32>
    %cst_7 = arith.constant 0.000000e+00 : f32
    %8 = vector.broadcast %cst_7 : f32 to vector<16x128xf32>
    %9 = arith.maximumf %7, %8 : vector<16x128xf32>
    %10 = arith.truncf %9 : vector<16x128xf32> to vector<16x128xbf16>
    %11 = vector.shape_cast %10 : vector<16x128xbf16> to vector<1x16x128xbf16>
    %c0_8 = arith.constant 0 : index
    %c1 = arith.constant 1 : index
    %c0_9 = arith.constant 0 : index
    %12 = vector.load %arg12[%c0_8, %c1, %c0_9] : memref<10x18x128xbf16, #tpu.memory_space<vmem>>, vector<1x16x128xbf16>
    tpu.vector_store %arg12[%c0_8, %c1, %c0_9], %11 {strides = array<i32>} : memref<10x18x128xbf16, #tpu.memory_space<vmem>>, vector<1x16x128xbf16>,
    %c0_10 = arith.constant 0 : index
    %c0_11 = arith.constant 0 : index
    %c0_12 = arith.constant 0 : index
    %c0_13 = arith.constant 0 : index
    %13 = vector.load %arg2[%c0_10, %c0_11, %c0_12, %c0_13] : memref<1x8x16x128xbf16, #tpu.memory_space<vmem>>, vector<1x8x16x128xbf16>
    %14 = vector.shape_cast %13 : vector<1x8x16x128xbf16> to vector<8x16x128xbf16>
    %15 = vector.shape_cast %14 : vector<8x16x128xbf16> to vector<128x128xbf16>
    %c0_14 = arith.constant 0 : index
    %c0_15 = arith.constant 0 : index
    %16 = vector.load %arg5[%c0_14, %c0_15] : memref<128x128xbf16, #tpu.memory_space<vmem>>, vector<128x128xbf16>
    %cst_16 = arith.constant dense<0.000000e+00> : vector<128x128xf32>
    %17 = tpu.matmul %15, %16, %cst_16 {dimension_numbers = #tpu.dot_dimension_numbers<[1], [0], [0], [1], [0, 0, 1, 1], [], []>} : vector<128x128xbf16>, vector<128x128xbf16>, vector<128x128xf32> -> vector<128x128xf32>
    %c0_17 = arith.constant 0 : index
    %c0_18 = arith.constant 0 : index
    %18 = vector.load %arg6[%c0_17, %c0_18] : memref<1x128xf32, #tpu.memory_space<vmem>>, vector<1x128xf32>
    %19 = vector.broadcast %18 : vector<1x128xf32> to vector<128x128xf32>
    %20 = arith.addf %17, %19 : vector<128x128xf32>
    %cst_19 = arith.constant 0.000000e+00 : f32
    %21 = vector.broadcast %cst_19 : f32 to vector<128x128xf32>
    %22 = arith.maximumf %20, %21 : vector<128x128xf32>
    %23 = arith.truncf %22 : vector<128x128xf32> to vector<128x128xbf16>
    %24 = vector.shape_cast %23 : vector<128x128xbf16> to vector<8x16x128xbf16>
    %c1_20 = arith.constant 1 : index
    %c1_21 = arith.constant 1 : index
    %c0_22 = arith.constant 0 : index
    %25 = vector.load %arg12[%c1_20, %c1_21, %c0_22] : memref<10x18x128xbf16, #tpu.memory_space<vmem>>, vector<8x16x128xbf16>
    tpu.vector_store %arg12[%c1_20, %c1_21, %c0_22], %24 {strides = array<i32>} : memref<10x18x128xbf16, #tpu.memory_space<vmem>>, vector<8x16x128xbf16>,
    %c0_23 = arith.constant 0 : index
    %c0_24 = arith.constant 0 : index
    %c0_25 = arith.constant 0 : index
    %c0_26 = arith.constant 0 : index
    %26 = vector.load %arg4[%c0_23, %c0_24, %c0_25, %c0_26] : memref<1x1x16x128xbf16, #tpu.memory_space<vmem>>, vector<1x1x16x128xbf16>
    %27 = vector.shape_cast %26 : vector<1x1x16x128xbf16> to vector<1x16x128xbf16>
    %28 = vector.shape_cast %27 : vector<1x16x128xbf16> to vector<16x128xbf16>
    %c0_27 = arith.constant 0 : index
    %c0_28 = arith.constant 0 : index
    %29 = vector.load %arg5[%c0_27, %c0_28] : memref<128x128xbf16, #tpu.memory_space<vmem>>, vector<128x128xbf16>
    %cst_29 = arith.constant dense<0.000000e+00> : vector<16x128xf32>
    %30 = tpu.matmul %28, %29, %cst_29 {dimension_numbers = #tpu.dot_dimension_numbers<[1], [0], [0], [1], [0, 0, 1, 1], [], []>} : vector<16x128xbf16>, vector<128x128xbf16>, vector<16x128xf32> -> vector<16x128xf32>
    %c0_30 = arith.constant 0 : index
    %c0_31 = arith.constant 0 : index
    %31 = vector.load %arg6[%c0_30, %c0_31] : memref<1x128xf32, #tpu.memory_space<vmem>>, vector<1x128xf32>
    %32 = vector.broadcast %31 : vector<1x128xf32> to vector<16x128xf32>
    %33 = arith.addf %30, %32 : vector<16x128xf32>
    %cst_32 = arith.constant 0.000000e+00 : f32
    %34 = vector.broadcast %cst_32 : f32 to vector<16x128xf32>
    %35 = arith.maximumf %33, %34 : vector<16x128xf32>
    %36 = arith.truncf %35 : vector<16x128xf32> to vector<16x128xbf16>
    %37 = vector.shape_cast %36 : vector<16x128xbf16> to vector<1x16x128xbf16>
    %c9 = arith.constant 9 : index
    %c1_33 = arith.constant 1 : index
    %c0_34 = arith.constant 0 : index
    %38 = vector.load %arg12[%c9, %c1_33, %c0_34] : memref<10x18x128xbf16, #tpu.memory_space<vmem>>, vector<1x16x128xbf16>
    tpu.vector_store %arg12[%c9, %c1_33, %c0_34], %37 {strides = array<i32>} : memref<10x18x128xbf16, #tpu.memory_space<vmem>>, vector<1x16x128xbf16>,
    %cst_35 = arith.constant 0.000000e+00 : bf16
    %39 = vector.broadcast %cst_35 : bf16 to vector<10x1x128xbf16>
    %c0_36 = arith.constant 0 : index
    %c0_37 = arith.constant 0 : index
    %c0_38 = arith.constant 0 : index
    %40 = vector.load %arg12[%c0_36, %c0_37, %c0_38] : memref<10x18x128xbf16, #tpu.memory_space<vmem>>, vector<10x1x128xbf16>
    tpu.vector_store %arg12[%c0_36, %c0_37, %c0_38], %39 {strides = array<i32>} : memref<10x18x128xbf16, #tpu.memory_space<vmem>>, vector<10x1x128xbf16>,
    %cst_39 = arith.constant 0.000000e+00 : bf16
    %41 = vector.broadcast %cst_39 : bf16 to vector<10x1x128xbf16>
    %c0_40 = arith.constant 0 : index
    %c17 = arith.constant 17 : index
    %c0_41 = arith.constant 0 : index
    %42 = vector.load %arg12[%c0_40, %c17, %c0_41] : memref<10x18x128xbf16, #tpu.memory_space<vmem>>, vector<10x1x128xbf16>
    tpu.vector_store %arg12[%c0_40, %c17, %c0_41], %41 {strides = array<i32>} : memref<10x18x128xbf16, #tpu.memory_space<vmem>>, vector<10x1x128xbf16>,
    %c0_i32 = arith.constant 0 : i32
    %43 = arith.cmpi eq, %arg1, %c0_i32 : i32
    %44 = arith.extui %43 : i1 to i32
    %c0_i32_42 = arith.constant 0 : i32
    %45 = arith.cmpi ne, %44, %c0_i32_42 : i32
    scf.if %45 {
      %cst_132 = arith.constant 0.000000e+00 : bf16
      %124 = vector.broadcast %cst_132 : bf16 to vector<1x18x128xbf16>
      %c0_133 = arith.constant 0 : index
      %c0_134 = arith.constant 0 : index
      %c0_135 = arith.constant 0 : index
      %125 = vector.load %arg12[%c0_133, %c0_134, %c0_135] : memref<10x18x128xbf16, #tpu.memory_space<vmem>>, vector<1x18x128xbf16>
      tpu.vector_store %arg12[%c0_133, %c0_134, %c0_135], %124 {strides = array<i32>} : memref<10x18x128xbf16, #tpu.memory_space<vmem>>, vector<1x18x128xbf16>,
    } else {
    }
    %c1_i32 = arith.constant 1 : i32
    %46 = arith.cmpi eq, %arg1, %c1_i32 : i32
    %47 = arith.extui %46 : i1 to i32
    %c0_i32_43 = arith.constant 0 : i32
    %48 = arith.cmpi ne, %47, %c0_i32_43 : i32
    scf.if %48 {
      %cst_132 = arith.constant 0.000000e+00 : bf16
      %124 = vector.broadcast %cst_132 : bf16 to vector<1x18x128xbf16>
      %c9_133 = arith.constant 9 : index
      %c0_134 = arith.constant 0 : index
      %c0_135 = arith.constant 0 : index
      %125 = vector.load %arg12[%c9_133, %c0_134, %c0_135] : memref<10x18x128xbf16, #tpu.memory_space<vmem>>, vector<1x18x128xbf16>
      tpu.vector_store %arg12[%c9_133, %c0_134, %c0_135], %124 {strides = array<i32>} : memref<10x18x128xbf16, #tpu.memory_space<vmem>>, vector<1x18x128xbf16>,
    } else {
    }
    %c0_44 = arith.constant 0 : index
    %c0_45 = arith.constant 0 : index
    %c0_46 = arith.constant 0 : index
    %49 = vector.load %arg12[%c0_44, %c0_45, %c0_46] : memref<10x18x128xbf16, #tpu.memory_space<vmem>>, vector<8x16x128xbf16>
    %50 = vector.shape_cast %49 : vector<8x16x128xbf16> to vector<128x128xbf16>
    %c0_47 = arith.constant 0 : index
    %c0_48 = arith.constant 0 : index
    %c0_49 = arith.constant 0 : index
    %c0_50 = arith.constant 0 : index
    %51 = vector.load %arg7[%c0_47, %c0_48, %c0_49, %c0_50] : memref<3x3x128x128xbf16, #tpu.memory_space<vmem>>, vector<1x1x128x128xbf16>
    %52 = vector.shape_cast %51 : vector<1x1x128x128xbf16> to vector<128x128xbf16>
    %cst_51 = arith.constant dense<0.000000e+00> : vector<128x128xf32>
    %53 = tpu.matmul %50, %52, %cst_51 {dimension_numbers = #tpu.dot_dimension_numbers<[1], [0], [0], [1], [0, 0, 1, 1], [], []>} : vector<128x128xbf16>, vector<128x128xbf16>, vector<128x128xf32> -> vector<128x128xf32>
    %c0_52 = arith.constant 0 : index
    %c1_53 = arith.constant 1 : index
    %c0_54 = arith.constant 0 : index
    %54 = vector.load %arg12[%c0_52, %c1_53, %c0_54] : memref<10x18x128xbf16, #tpu.memory_space<vmem>>, vector<8x16x128xbf16>
    %55 = vector.shape_cast %54 : vector<8x16x128xbf16> to vector<128x128xbf16>
    %c0_55 = arith.constant 0 : index
    %c1_56 = arith.constant 1 : index
    %c0_57 = arith.constant 0 : index
    %c0_58 = arith.constant 0 : index
    %56 = vector.load %arg7[%c0_55, %c1_56, %c0_57, %c0_58] : memref<3x3x128x128xbf16, #tpu.memory_space<vmem>>, vector<1x1x128x128xbf16>
    %57 = vector.shape_cast %56 : vector<1x1x128x128xbf16> to vector<128x128xbf16>
    %cst_59 = arith.constant dense<0.000000e+00> : vector<128x128xf32>
    %58 = tpu.matmul %55, %57, %cst_59 {dimension_numbers = #tpu.dot_dimension_numbers<[1], [0], [0], [1], [0, 0, 1, 1], [], []>} : vector<128x128xbf16>, vector<128x128xbf16>, vector<128x128xf32> -> vector<128x128xf32>
    %59 = arith.addf %53, %58 : vector<128x128xf32>
    %c0_60 = arith.constant 0 : index
    %c2 = arith.constant 2 : index
    %c0_61 = arith.constant 0 : index
    %60 = vector.load %arg12[%c0_60, %c2, %c0_61] : memref<10x18x128xbf16, #tpu.memory_space<vmem>>, vector<8x16x128xbf16>
    %61 = vector.shape_cast %60 : vector<8x16x128xbf16> to vector<128x128xbf16>
    %c0_62 = arith.constant 0 : index
    %c2_63 = arith.constant 2 : index
    %c0_64 = arith.constant 0 : index
    %c0_65 = arith.constant 0 : index
    %62 = vector.load %arg7[%c0_62, %c2_63, %c0_64, %c0_65] : memref<3x3x128x128xbf16, #tpu.memory_space<vmem>>, vector<1x1x128x128xbf16>
    %63 = vector.shape_cast %62 : vector<1x1x128x128xbf16> to vector<128x128xbf16>
    %cst_66 = arith.constant dense<0.000000e+00> : vector<128x128xf32>
    %64 = tpu.matmul %61, %63, %cst_66 {dimension_numbers = #tpu.dot_dimension_numbers<[1], [0], [0], [1], [0, 0, 1, 1], [], []>} : vector<128x128xbf16>, vector<128x128xbf16>, vector<128x128xf32> -> vector<128x128xf32>
    %65 = arith.addf %59, %64 : vector<128x128xf32>
    %c1_67 = arith.constant 1 : index
    %c0_68 = arith.constant 0 : index
    %c0_69 = arith.constant 0 : index
    %66 = vector.load %arg12[%c1_67, %c0_68, %c0_69] : memref<10x18x128xbf16, #tpu.memory_space<vmem>>, vector<8x16x128xbf16>
    %67 = vector.shape_cast %66 : vector<8x16x128xbf16> to vector<128x128xbf16>
    %c1_70 = arith.constant 1 : index
    %c0_71 = arith.constant 0 : index
    %c0_72 = arith.constant 0 : index
    %c0_73 = arith.constant 0 : index
    %68 = vector.load %arg7[%c1_70, %c0_71, %c0_72, %c0_73] : memref<3x3x128x128xbf16, #tpu.memory_space<vmem>>, vector<1x1x128x128xbf16>
    %69 = vector.shape_cast %68 : vector<1x1x128x128xbf16> to vector<128x128xbf16>
    %cst_74 = arith.constant dense<0.000000e+00> : vector<128x128xf32>
    %70 = tpu.matmul %67, %69, %cst_74 {dimension_numbers = #tpu.dot_dimension_numbers<[1], [0], [0], [1], [0, 0, 1, 1], [], []>} : vector<128x128xbf16>, vector<128x128xbf16>, vector<128x128xf32> -> vector<128x128xf32>
    %71 = arith.addf %65, %70 : vector<128x128xf32>
    %c1_75 = arith.constant 1 : index
    %c1_76 = arith.constant 1 : index
    %c0_77 = arith.constant 0 : index
    %72 = vector.load %arg12[%c1_75, %c1_76, %c0_77] : memref<10x18x128xbf16, #tpu.memory_space<vmem>>, vector<8x16x128xbf16>
    %73 = vector.shape_cast %72 : vector<8x16x128xbf16> to vector<128x128xbf16>
    %c1_78 = arith.constant 1 : index
    %c1_79 = arith.constant 1 : index
    %c0_80 = arith.constant 0 : index
    %c0_81 = arith.constant 0 : index
    %74 = vector.load %arg7[%c1_78, %c1_79, %c0_80, %c0_81] : memref<3x3x128x128xbf16, #tpu.memory_space<vmem>>, vector<1x1x128x128xbf16>
    %75 = vector.shape_cast %74 : vector<1x1x128x128xbf16> to vector<128x128xbf16>
    %cst_82 = arith.constant dense<0.000000e+00> : vector<128x128xf32>
    %76 = tpu.matmul %73, %75, %cst_82 {dimension_numbers = #tpu.dot_dimension_numbers<[1], [0], [0], [1], [0, 0, 1, 1], [], []>} : vector<128x128xbf16>, vector<128x128xbf16>, vector<128x128xf32> -> vector<128x128xf32>
    %77 = arith.addf %71, %76 : vector<128x128xf32>
    %c1_83 = arith.constant 1 : index
    %c2_84 = arith.constant 2 : index
    %c0_85 = arith.constant 0 : index
    %78 = vector.load %arg12[%c1_83, %c2_84, %c0_85] : memref<10x18x128xbf16, #tpu.memory_space<vmem>>, vector<8x16x128xbf16>
    %79 = vector.shape_cast %78 : vector<8x16x128xbf16> to vector<128x128xbf16>
    %c1_86 = arith.constant 1 : index
    %c2_87 = arith.constant 2 : index
    %c0_88 = arith.constant 0 : index
    %c0_89 = arith.constant 0 : index
    %80 = vector.load %arg7[%c1_86, %c2_87, %c0_88, %c0_89] : memref<3x3x128x128xbf16, #tpu.memory_space<vmem>>, vector<1x1x128x128xbf16>
    %81 = vector.shape_cast %80 : vector<1x1x128x128xbf16> to vector<128x128xbf16>
    %cst_90 = arith.constant dense<0.000000e+00> : vector<128x128xf32>
    %82 = tpu.matmul %79, %81, %cst_90 {dimension_numbers = #tpu.dot_dimension_numbers<[1], [0], [0], [1], [0, 0, 1, 1], [], []>} : vector<128x128xbf16>, vector<128x128xbf16>, vector<128x128xf32> -> vector<128x128xf32>
    %83 = arith.addf %77, %82 : vector<128x128xf32>
    %c2_91 = arith.constant 2 : index
    %c0_92 = arith.constant 0 : index
    %c0_93 = arith.constant 0 : index
    %84 = vector.load %arg12[%c2_91, %c0_92, %c0_93] : memref<10x18x128xbf16, #tpu.memory_space<vmem>>, vector<8x16x128xbf16>
    %85 = vector.shape_cast %84 : vector<8x16x128xbf16> to vector<128x128xbf16>
    %c2_94 = arith.constant 2 : index
    %c0_95 = arith.constant 0 : index
    %c0_96 = arith.constant 0 : index
    %c0_97 = arith.constant 0 : index
    %86 = vector.load %arg7[%c2_94, %c0_95, %c0_96, %c0_97] : memref<3x3x128x128xbf16, #tpu.memory_space<vmem>>, vector<1x1x128x128xbf16>
    %87 = vector.shape_cast %86 : vector<1x1x128x128xbf16> to vector<128x128xbf16>
    %cst_98 = arith.constant dense<0.000000e+00> : vector<128x128xf32>
    %88 = tpu.matmul %85, %87, %cst_98 {dimension_numbers = #tpu.dot_dimension_numbers<[1], [0], [0], [1], [0, 0, 1, 1], [], []>} : vector<128x128xbf16>, vector<128x128xbf16>, vector<128x128xf32> -> vector<128x128xf32>
    %89 = arith.addf %83, %88 : vector<128x128xf32>
    %c2_99 = arith.constant 2 : index
    %c1_100 = arith.constant 1 : index
    %c0_101 = arith.constant 0 : index
    %90 = vector.load %arg12[%c2_99, %c1_100, %c0_101] : memref<10x18x128xbf16, #tpu.memory_space<vmem>>, vector<8x16x128xbf16>
    %91 = vector.shape_cast %90 : vector<8x16x128xbf16> to vector<128x128xbf16>
    %c2_102 = arith.constant 2 : index
    %c1_103 = arith.constant 1 : index
    %c0_104 = arith.constant 0 : index
    %c0_105 = arith.constant 0 : index
    %92 = vector.load %arg7[%c2_102, %c1_103, %c0_104, %c0_105] : memref<3x3x128x128xbf16, #tpu.memory_space<vmem>>, vector<1x1x128x128xbf16>
    %93 = vector.shape_cast %92 : vector<1x1x128x128xbf16> to vector<128x128xbf16>
    %cst_106 = arith.constant dense<0.000000e+00> : vector<128x128xf32>
    %94 = tpu.matmul %91, %93, %cst_106 {dimension_numbers = #tpu.dot_dimension_numbers<[1], [0], [0], [1], [0, 0, 1, 1], [], []>} : vector<128x128xbf16>, vector<128x128xbf16>, vector<128x128xf32> -> vector<128x128xf32>
    %95 = arith.addf %89, %94 : vector<128x128xf32>
    %c2_107 = arith.constant 2 : index
    %c2_108 = arith.constant 2 : index
    %c0_109 = arith.constant 0 : index
    %96 = vector.load %arg12[%c2_107, %c2_108, %c0_109] : memref<10x18x128xbf16, #tpu.memory_space<vmem>>, vector<8x16x128xbf16>
    %97 = vector.shape_cast %96 : vector<8x16x128xbf16> to vector<128x128xbf16>
    %c2_110 = arith.constant 2 : index
    %c2_111 = arith.constant 2 : index
    %c0_112 = arith.constant 0 : index
    %c0_113 = arith.constant 0 : index
    %98 = vector.load %arg7[%c2_110, %c2_111, %c0_112, %c0_113] : memref<3x3x128x128xbf16, #tpu.memory_space<vmem>>, vector<1x1x128x128xbf16>
    %99 = vector.shape_cast %98 : vector<1x1x128x128xbf16> to vector<128x128xbf16>
    %cst_114 = arith.constant dense<0.000000e+00> : vector<128x128xf32>
    %100 = tpu.matmul %97, %99, %cst_114 {dimension_numbers = #tpu.dot_dimension_numbers<[1], [0], [0], [1], [0, 0, 1, 1], [], []>} : vector<128x128xbf16>, vector<128x128xbf16>, vector<128x128xf32> -> vector<128x128xf32>
    %101 = arith.addf %95, %100 : vector<128x128xf32>
    %c0_115 = arith.constant 0 : index
    %c0_116 = arith.constant 0 : index
    %102 = vector.load %arg8[%c0_115, %c0_116] : memref<1x128xf32, #tpu.memory_space<vmem>>, vector<1x128xf32>
    %103 = vector.broadcast %102 : vector<1x128xf32> to vector<128x128xf32>
    %104 = arith.addf %101, %103 : vector<128x128xf32>
    %cst_117 = arith.constant 0.000000e+00 : f32
    %105 = vector.broadcast %cst_117 : f32 to vector<128x128xf32>
    %106 = arith.maximumf %104, %105 : vector<128x128xf32>
    %107 = arith.truncf %106 : vector<128x128xf32> to vector<128x128xbf16>
    %c0_118 = arith.constant 0 : index
    %c0_119 = arith.constant 0 : index
    %108 = vector.load %arg9[%c0_118, %c0_119] : memref<128x128xbf16, #tpu.memory_space<vmem>>, vector<128x128xbf16>
    %cst_120 = arith.constant dense<0.000000e+00> : vector<128x128xf32>
    %109 = tpu.matmul %107, %108, %cst_120 {dimension_numbers = #tpu.dot_dimension_numbers<[1], [0], [0], [1], [0, 0, 1, 1], [], []>} : vector<128x128xbf16>, vector<128x128xbf16>, vector<128x128xf32> -> vector<128x128xf32>
    %c0_121 = arith.constant 0 : index
    %c0_122 = arith.constant 0 : index
    %110 = vector.load %arg10[%c0_121, %c0_122] : memref<1x128xf32, #tpu.memory_space<vmem>>, vector<1x128xf32>
    %111 = vector.broadcast %110 : vector<1x128xf32> to vector<128x128xf32>
    %112 = arith.addf %109, %111 : vector<128x128xf32>
    %c0_123 = arith.constant 0 : index
    %c0_124 = arith.constant 0 : index
    %c0_125 = arith.constant 0 : index
    %c0_126 = arith.constant 0 : index
    %113 = vector.load %arg2[%c0_123, %c0_124, %c0_125, %c0_126] : memref<1x8x16x128xbf16, #tpu.memory_space<vmem>>, vector<1x8x16x128xbf16>
    %114 = vector.shape_cast %113 : vector<1x8x16x128xbf16> to vector<8x16x128xbf16>
    %115 = vector.shape_cast %114 : vector<8x16x128xbf16> to vector<128x128xbf16>
    %116 = arith.extf %115 : vector<128x128xbf16> to vector<128x128xf32>
    %117 = arith.addf %112, %116 : vector<128x128xf32>
    %cst_127 = arith.constant 0.000000e+00 : f32
    %118 = vector.broadcast %cst_127 : f32 to vector<128x128xf32>
    %119 = arith.maximumf %117, %118 : vector<128x128xf32>
    %120 = vector.shape_cast %119 : vector<128x128xf32> to vector<8x16x128xf32>
    %c0_128 = arith.constant 0 : index
    %c0_129 = arith.constant 0 : index
    %c0_130 = arith.constant 0 : index
    %c0_131 = arith.constant 0 : index
    %121 = vector.load %arg11[%c0_128, %c0_129, %c0_130, %c0_131] : memref<1x8x16x128xf32, #tpu.memory_space<vmem>>, vector<1x8x16x128xf32>
    %122 = vector.shape_cast %121 : vector<1x8x16x128xf32> to vector<8x16x128xf32>
    %123 = vector.shape_cast %120 : vector<8x16x128xf32> to vector<1x8x16x128xf32>
    tpu.vector_store %arg11[%c0_128, %c0_129, %c0_130, %c0_131], %123 {strides = array<i32>} : memref<1x8x16x128xf32, #tpu.memory_space<vmem>>, vector<1x8x16x128xf32>,
    return
  }
  func.func @transform_0(%arg0: i32, %arg1: i32) -> (i32, i32, i32, i32) {
    %c0_i32 = arith.constant 0 : i32
    %c0_i32_0 = arith.constant 0 : i32
    %c0_i32_1 = arith.constant 0 : i32
    return %arg0, %arg1, %c0_i32, %c0_i32_0 : i32, i32, i32, i32
  }
  func.func @transform_1(%arg0: i32, %arg1: i32) -> (i32, i32, i32, i32) {
    %c8_i32 = arith.constant 8 : i32
    %0 = arith.muli %arg1, %c8_i32 : i32
    %c1_i32 = arith.constant 1 : i32
    %1 = arith.subi %0, %c1_i32 : i32
    %c0_i32 = arith.constant 0 : i32
    %2 = arith.maxsi %1, %c0_i32 : i32
    %c0_i32_0 = arith.constant 0 : i32
    %c0_i32_1 = arith.constant 0 : i32
    %c0_i32_2 = arith.constant 0 : i32
    return %arg0, %2, %c0_i32_0, %c0_i32_1 : i32, i32, i32, i32
  }
  func.func @transform_2(%arg0: i32, %arg1: i32) -> (i32, i32, i32, i32) {
    %c8_i32 = arith.constant 8 : i32
    %0 = arith.muli %arg1, %c8_i32 : i32
    %c8_i32_0 = arith.constant 8 : i32
    %1 = arith.addi %0, %c8_i32_0 : i32
    %c15_i32 = arith.constant 15 : i32
    %2 = arith.minsi %1, %c15_i32 : i32
    %c0_i32 = arith.constant 0 : i32
    %c0_i32_1 = arith.constant 0 : i32
    %c0_i32_2 = arith.constant 0 : i32
    return %arg0, %2, %c0_i32, %c0_i32_1 : i32, i32, i32, i32
  }
  func.func @transform_3(%arg0: i32, %arg1: i32) -> (i32, i32) {
    %c0_i32 = arith.constant 0 : i32
    %c0_i32_0 = arith.constant 0 : i32
    %c0_i32_1 = arith.constant 0 : i32
    return %c0_i32, %c0_i32_0 : i32, i32
  }
  func.func @transform_4(%arg0: i32, %arg1: i32) -> (i32, i32) {
    %c0_i32 = arith.constant 0 : i32
    %c0_i32_0 = arith.constant 0 : i32
    %c0_i32_1 = arith.constant 0 : i32
    return %c0_i32, %c0_i32_0 : i32, i32
  }
  func.func @transform_5(%arg0: i32, %arg1: i32) -> (i32, i32, i32, i32) {
    %c0_i32 = arith.constant 0 : i32
    %c0_i32_0 = arith.constant 0 : i32
    %c0_i32_1 = arith.constant 0 : i32
    %c0_i32_2 = arith.constant 0 : i32
    %c0_i32_3 = arith.constant 0 : i32
    return %c0_i32, %c0_i32_0, %c0_i32_1, %c0_i32_2 : i32, i32, i32, i32
  }
  func.func @transform_6(%arg0: i32, %arg1: i32) -> (i32, i32) {
    %c0_i32 = arith.constant 0 : i32
    %c0_i32_0 = arith.constant 0 : i32
    %c0_i32_1 = arith.constant 0 : i32
    return %c0_i32, %c0_i32_0 : i32, i32
  }
  func.func @transform_7(%arg0: i32, %arg1: i32) -> (i32, i32) {
    %c0_i32 = arith.constant 0 : i32
    %c0_i32_0 = arith.constant 0 : i32
    %c0_i32_1 = arith.constant 0 : i32
    return %c0_i32, %c0_i32_0 : i32, i32
  }
  func.func @transform_8(%arg0: i32, %arg1: i32) -> (i32, i32) {
    %c0_i32 = arith.constant 0 : i32
    %c0_i32_0 = arith.constant 0 : i32
    %c0_i32_1 = arith.constant 0 : i32
    return %c0_i32, %c0_i32_0 : i32, i32
  }
  func.func @transform_9(%arg0: i32, %arg1: i32) -> (i32, i32, i32, i32) {
    %c0_i32 = arith.constant 0 : i32
    %c0_i32_0 = arith.constant 0 : i32
    %c0_i32_1 = arith.constant 0 : i32
    return %arg0, %arg1, %c0_i32, %c0_i32_0 : i32, i32, i32, i32
  }
}

</mosaic_0001>

<bundles_post_ra>
// kernel: tpu_custom_call.1
= control target key start
LH: loop header
LB: loop body
LE: loop exit
PB: predicated region body
PF: predicated region fallthrough
CT: control target
= control target key end

     0   :  { %s8053_s0 = inlined_call_operand.hbm [shape: bf16[2,16,16,128], index: 0, kind: input, shape index: {}]   ;;  %s8054_s1 = inlined_call_operand.hbm [shape: bf16[2,16,16,128], index: 1, kind: input, shape index: {}]   ;;  %s8055_s2 = inlined_call_operand.hbm [shape: bf16[2,16,16,128], index: 2, kind: input, shape index: {}]   ;;  %s8056_s3 = inlined_call_operand.hbm [shape: bf16[128,128], index: 3, kind: input, shape index: {}]   ;;  %s8057_s4 = inlined_call_operand.vmem [shape: f32[1,128], index: 4, kind: input, shape index: {}]   ;;  %s8058_s5 = inlined_call_operand.hbm [shape: bf16[3,3,128,128], index: 5, kind: input, shape index: {}]   ;;  %s8059_s6 = inlined_call_operand.vmem [shape: f32[1,128], index: 6, kind: input, shape index: {}]   ;;  %s8060_s7 = inlined_call_operand.hbm [shape: bf16[128,128], index: 7, kind: input, shape index: {}]   ;;  %s8061_s8 = inlined_call_operand.vmem [shape: f32[1,128], index: 8, kind: input, shape index: {}]   ;;  %s8062_s9 = inlined_call_operand.hbm [shape: f32[2,16,16,128], index: 9, kind: output, shape index: {}]  }
   0x1   :  { %8104 = sst [smem:[#allocation46_spill]] %s8053_s0 }
   0x2   :  { %8105 = sst [smem:[#allocation47_spill]] %s8054_s1 }
   0x3   :  { %8106 = sst [smem:[#allocation48_spill]] %s8055_s2 }
   0x4   :  { %8107 = sst [smem:[#allocation49_spill]] %s8056_s3 }
   0x5   :  { %8108 = sst [smem:[#allocation50_spill]] %s8057_s4 }
   0x6   :  { %8109 = sst [smem:[#allocation51_spill]] %s8058_s5 }
   0x7   :  { %8110 = sst [smem:[#allocation52_spill]] %s8059_s6 }
   0x8   :  { %8111 = sst [smem:[#allocation53_spill]] %s8060_s7 }
   0x9   :  { %8112 = sst [smem:[#allocation54_spill]] %s8061_s8 }
   0xa   :  { %8113 = sst [smem:[#allocation55_spill]] %s8062_s9 }
   0xb   :  { %14 = vsyncpa [#allocation4], 0 }
   0xc   :  { %16 = vsyncpa [#allocation4 + $0x1], 0 }
   0xd   :  { %17 = vsyncpa [#allocation7], 0 }
   0xe   :  { %19 = vsyncpa [#allocation7 + $0x1], 0 }
   0xf   :  { %20 = vsyncpa [#allocation10], 0 }
  0x10   :  { %21 = vsyncpa [#allocation13], 0 }
  0x11   :  { %22 = vsyncpa [#allocation5], 0 }
  0x12   :  { %24 = vsyncpa [#allocation5 + $0x1], 0  ;;  %s6554_s30 = smov 0   ;;  %s6556_s10 = smov 0  }
  0x13   :  { %s6558_s11 = smov 0   ;;  %s6560_s12 = smov 0  }
  0x14   :  { %s6562_s13 = smov 0   ;;  %s6564_s14 = smov 0  }
  0x15   :  { %s6566_s15 = smov 0   ;;  %s6568_s16 = smov 0  }
  0x16   :  { %s6570_s17 = smov 0   ;;  %s6572_s18 = smov 0  }
  0x17   :  { %s6574_s19 = smov 0   ;;  %s6576_s20 = smov 0  }
  0x18   :  { %s6578_s21 = smov 0   ;;  %s6580_s22 = smov 0  }
  0x19 LB: > { %8114 = sst [smem:[#allocation21_spill]] %s6435_s30  ;;  %s6625_s23 = sadd.s32 4294967295, %s6487_s22   ;;  %s6487_s22 = sphi %s6580_s22, %s30_s22   ;;  %s6483_s21 = sphi %s6578_s21, %s8229_s21   ;;  %s6479_s20 = sphi %s6576_s20, %s8228_s20   ;;  %s6475_s19 = sphi %s6574_s19, %s8237_s19   ;;  %s6471_s18 = sphi %s6572_s18, %s8226_s18   ;;  %s6467_s17 = sphi %s6570_s17, %s8236_s17   ;;  %s6463_s16 = sphi %s6568_s16, %s8235_s16   ;;  %s6459_s15 = sphi %s6566_s15, %s8234_s15   ;;  %s6455_s14 = sphi %s6564_s14, %s8233_s14   ;;  %s6451_s13 = sphi %s6562_s13, %s8232_s13   ;;  %s6447_s12 = sphi %s6560_s12, %s8231_s12   ;;  %s6443_s11 = sphi %s6558_s11, %s8230_s11   ;;  %s6439_s10 = sphi %s6556_s10, %s8222_s10   ;;  %s6435_s30 = sphi %s6554_s30, %s8221_s30  }
  0x1a   : > { %8115 = sst [smem:[#allocation22_spill]] %s6439_s10  ;;  %p4777_p0 = scmp.ge.s32.totalorder %s6487_s22, 1 }
  0x1b   : > { %8116 = sst [smem:[#allocation23_spill]] %s6443_s11  ;;  %p8064_p1 = scmp.eq.s32.totalorder %s6625_s23, 0 }
  0x1c   : > { %8117 = sst [smem:[#allocation24_spill]] %s6451_s13  ;;  %p301_p3 = scmp.lt.s32.totalorder %s6487_s22, 5 }
  0x1d   : > { %8118 = sst [smem:[#allocation25_spill]] %s6471_s18  ;;  %s6489_s25 = smov [#allocation9]  }
  0x1e   : > { %8119 = sst [smem:[#allocation26_spill]] %s6475_s19  ;;  %p6631_p4 = pnand %p4777_p0, %p301_p3 }
  0x1f   : > { %8120 = sst [smem:[#allocation27_spill]] %s6479_s20  ;;  %s313_s26 = sshll.u32 %s6489_s25, 4  ;;  %s314_s26 = int_to_ptr.vmem [resolvable:$true] %s313_s26 }
  0x20   : > { %8121 = sst [smem:[#allocation28_spill]] %s6483_s21  ;;  %p5845_p5 = pneg %p6631_p4 }
  0x21   : > { %s8122_s24 = scalar_select %p6631_p4, 1, 0 }
  0x22   : > { %p6639_p6 = pnand %p5845_p5, %p8064_p1  ;;  %s8125_s3 = sld [smem:[#allocation49_spill]] }
  0x23   : > { %8123 = sst [smem:[#allocation29_spill]] %s8122_s24 }
  0x24   : > { %s8124_s27 = scalar_select %p6639_p6, 1, 0 }
  0x25   : > { %p6651_p8 = pneg %p6639_p6 }
  0x28   : > { %s6151_s9 = scalar_lea.hbm %s8125_s3, 1024 }
  0x29   : > { %p6152_p7 = scmp.ne.s32.totalorder %s8125_s3, %s6151_s9  ;;  %p6158_p11 = scmp.lt.u32.totalorder %s6151_s9, %s8125_s3 }
  0x2b   : > { %p6154_p9 = pnand %p6651_p8, %p6152_p7 }
  0x2d   : > { %p6155_p10 = pneg %p6154_p9 }
  0x2f   : > { %p6160_p12 = pnand %p6158_p11, %p6155_p10 }
  0x31   : > { %6163 = shalt.err (!%p6160_p12)
}
  0x32   : > { %s6164_s28 = scalar_lea.vmem %s314_s26, 1024  ;;  %p6172_p5 = scmp.lt.s32.totalorder %s314_s26, %s314_s26 }
  0x33   : > { %p6165_p13 = scmp.ne.s32.totalorder %s314_s26, %s6164_s28  ;;  %p6173_p2 = scmp.lt.s32.totalorder %s6164_s28, %s6164_s28 }
  0x35   : > { %p6167_p0 = pnand %p6165_p13, %p6651_p8  ;;  %p6174_p1 = por %p6173_p2, %p6172_p5 }
  0x37   : > { %p6168_p3 = pneg %p6167_p0 }
  0x39   : > { %p6175_p4 = pnand %p6174_p1, %p6168_p3 }
  0x3b   : > { %6178 = shalt.err (!%p6175_p4)
}
  0x3c   : > { %s8068_s8 = smov 64   ;;  %s8070_s6 = smov 4  }
  0x3d   : > { %5848 = dma.hbm_to_vmem [thread:$0]  (!%p6639_p6), %s8125_s3, 1024, %s314_s26, [#allocation10], %s8068_s8, %s8068_s8, %s8070_s6  }
  0x3e   : > { %s39_s19 = sadd.s32 1, %s6479_s20  ;;  %s42_s29 = sadd.s32 1, %s6483_s21 }
  0x3f   : > { %p40_p1 = scmp.ge.s32.totalorder %s39_s19, 2  ;;  %p8084_p2 = scmp.eq.s32.totalorder %s6487_s22, 0 }
  0x40   : > { %s4771_s28 = sshll.u32 %s6479_s20, 3  ;;  %s87_s4 = sadd.s32 1, %s6455_s14 }
  0x41   : > { %s8239_s19 = smov (%p40_p1, %s39_s19), 0  ;;  %s8241_s29 = smov (!%p40_p1, %s42_s29), %s6483_s21 }
  0x42   : > { %8127 = sst [smem:[#allocation30_spill]] %s8239_s19  ;;  %s47_s24 = ssub.s32 %s6479_s20, %s8239_s19 }
  0x43   : > { %s4772_s2 = sadd.s32 4294967295, %s4771_s28  ;;  %p44_p4 = scmp.ge.s32.totalorder %s8241_s29, 2 }
  0x44   : > { %p76_p7 = scmp.gt.s32.totalorder %s4772_s2, 0  ;;  %s4773_s26 = sshll.u32 %s8239_s19, 3 }
  0x45   : > { %p94_p9 = scmp.ne.s32.totalorder %s6455_s14, %s6451_s13  ;;  %s8243_s29 = smov (%p44_p4, %s8241_s29), 0 }
  0x46   : > { %8128 = sst [smem:[#allocation31_spill]] %s8243_s29  ;;  %s8245_s2 = smov (!%p76_p7, %s4772_s2), 0 }
  0x47   : > { %s6687_s9 = ssub.s32 %s6483_s21, %s8243_s29  ;;  %s4774_s18 = sadd.s32 4294967295, %s4773_s26 }
  0x48   : > { %8129 = sst [smem:[#allocation32_spill]] %s6687_s9  ;;  %s6690_s8 = sor.u32 %s47_s24, %s6687_s9 }
  0x49   : > { %p80_p10 = scmp.gt.s32.totalorder %s4774_s18, 0  ;;  %p6695_p12 = por %p94_p9, %p8084_p2 }
  0x4a   : > { %p100_p13 = scmp.ne.s32.totalorder %s6451_s13, %s6447_s12  ;;  %s6701_s3 = sadd.s32 8, %s4771_s28 }
  0x4b   : > { %s8247_s18 = smov (!%p80_p10, %s4774_s18), 0  ;;  %8131 = sst [smem:[#allocation33_spill]] %s6701_s3 }
  0x4c   : > { %s83_s29 = ssub.s32 %s8245_s2, %s8247_s18  ;;  %p8132_p3 = scmp.eq.s32.totalorder %s6625_s23, 0 }
  0x4d   : > { %s84_s24 = sor.u32 %s83_s29, %s6687_s9  ;;  %s6711_s30 = sadd.s32 8, %s4773_s26 }
  0x4e   : > { %p6707_p5 = por %p100_p13, %p8132_p3  ;;  %p85_p1 = scmp.eq.s32.totalorder %s84_s24, 0 }
  0x4f   : > { %p8083_p7 = scmp.lt.s32.totalorder %s6487_s22, 4  ;;  %s6719_s28 = sshll.u32 %s6483_s21, 5 }
  0x50   : > { %s8133_s19 = scalar_select %p6707_p5, 1, 0 }
  0x51   : > { %s6716_s12 = scalar_select %p85_p1, %s6455_s14, %s87_s4  }
  0x52   : > { %8134 = sst [smem:[#allocation34_spill]] %s8133_s19  ;;  %s386_s18 = sand.u32 1, %s6487_s22  }
  0x53   : > { %s388_s29 = sand.u32 1, %s6455_s14   ;;  %s4790_s9 = sshll.u32 %s8245_s2, 1 }
  0x54   : > { %s4787_s13 = sshll.u32 %s388_s29, 3  ;;  %s400_s10 = sadd.s32 %s4790_s9, %s6719_s28 }
  0x55   : > { %s4792_s3 = sshll.u32 %s400_s10, 6  ;;  %s390_s19 = scalar_lea.vmem [#allocation6], %s4787_s13 }
  0x56   : > { %s403_s24 = sshll.u32 %s390_s19, 4  ;;  %s8135_s1 = sld [smem:[#allocation47_spill]]  ;;  %s6729_s24 = int_to_ptr.vmem [resolvable:$true] %s403_s24 }
  0x57   : > { %p6735_p9 = pnand %p8083_p7, %p6695_p12  ;;  %s6492_s2 = smov [#allocation11]  }
  0x58   : > { %s329_s10 = sshll.u32 %s6492_s2, 4  ;;  %s6741_s0 = scalar_lea.sflag [#allocation7], %s386_s18  ;;  %s6739_s10 = int_to_ptr.vmem [resolvable:$true] %s329_s10 }
  0x59   : > { %p6181_p13 = pneg %p6735_p9 }
  0x5c   : > { %s6727_s26 = scalar_lea.hbm %s8135_s1, %s4792_s3  ;;  %s6184_s6 = scalar_lea.hbm %s8135_s1, 4096 }
  0x5d   : > { %s6179_s3 = scalar_lea.hbm %s6727_s26, 128  ;;  %p6185_p12 = scmp.lt.u32.totalorder %s6727_s26, %s8135_s1 }
  0x5e   : > { %p6180_p10 = scmp.ne.s32.totalorder %s6727_s26, %s6179_s3  ;;  %p6186_p4 = scmp.lt.u32.totalorder %s6184_s6, %s6179_s3 }
  0x5f   : > { %p6188_p7 = scmp.lt.u32.totalorder %s6179_s3, %s6727_s26 }
  0x60   : > { %p6182_p3 = pnand %p6181_p13, %p6180_p10  ;;  %p6187_p0 = por %p6186_p4, %p6185_p12 }
  0x62   : > { %p6183_p1 = pneg %p6182_p3  ;;  %p6189_p2 = por %p6188_p7, %p6187_p0 }
  0x64   : > { %p6190_p11 = pnand %p6189_p2, %p6183_p1 }
  0x66   : > { %6193 = shalt.err (!%p6190_p11)
}
  0x67   : > { %s6194_s18 = scalar_lea.vmem %s6729_s24, 128  ;;  %s6493_s29 = smov [#allocation6]  }
  0x68   : > { %p6195_p10 = scmp.ne.s32.totalorder %s6729_s24, %s6194_s18  ;;  %s6199_s2 = sshll.u32 %s6493_s29, 4  ;;  %s6200_s2 = int_to_ptr.vmem [resolvable:$false] %s6199_s2 }
  0x69   : > { %s6201_s11 = scalar_lea.vmem %s6200_s2, 256  ;;  %p6202_p6 = scmp.lt.s32.totalorder %s6729_s24, %s6200_s2 }
  0x6a   : > { %p6197_p3 = pnand %p6195_p10, %p6181_p13  ;;  %p6203_p4 = scmp.lt.s32.totalorder %s6201_s11, %s6194_s18 }
  0x6c   : > { %p6198_p5 = pneg %p6197_p3  ;;  %p6204_p12 = por %p6203_p4, %p6202_p6 }
  0x6e   : > { %p6205_p0 = pnand %p6204_p12, %p6198_p5 }
  0x70   : > { %6208 = shalt.err (!%p6205_p0)
}
  0x71   : > { %s8137_s3 = smov 4   ;;  %s8138_s13 = smov 64  }
  0x72   : > { %5861 = dma.hbm_to_vmem [thread:$0]  (!%p6735_p9), %s6727_s26, 128, %s6729_s24, %s6741_s0, %s8138_s13, %s8138_s13, %s8137_s3  }
  0x73   : > { %s8139_s5 = sld [smem:[#allocation51_spill]] }
  0x79   : > { %s6209_s9 = scalar_lea.hbm %s8139_s5, 9216 }
  0x7a   : > { %p6210_p6 = scmp.ne.s32.totalorder %s8139_s5, %s6209_s9  ;;  %p6216_p5 = scmp.lt.u32.totalorder %s6209_s9, %s8139_s5 }
  0x7c   : > { %p6212_p2 = pnand %p6210_p6, %p6651_p8 }
  0x7e   : > { %p6213_p11 = pneg %p6212_p2 }
  0x80   : > { %p6218_p7 = pnand %p6216_p5, %p6213_p11 }
  0x82   : > { %6221 = shalt.err (!%p6218_p7)
}
  0x83   : > { %s6222_s24 = scalar_lea.vmem %s6739_s10, 9216  ;;  %p6230_p10 = scmp.lt.s32.totalorder %s6739_s10, %s6739_s10 }
  0x84   : > { %p6223_p9 = scmp.ne.s32.totalorder %s6739_s10, %s6222_s24  ;;  %p6231_p3 = scmp.lt.s32.totalorder %s6222_s24, %s6222_s24 }
  0x86   : > { %p6225_p13 = pnand %p6223_p9, %p6651_p8  ;;  %p6232_p4 = por %p6231_p3, %p6230_p10 }
  0x88   : > { %p6226_p1 = pneg %p6225_p13 }
  0x8a   : > { %p6233_p12 = pnand %p6232_p4, %p6226_p1 }
  0x8c   : > { %6236 = shalt.err (!%p6233_p12)
}
  0x8d   : > { %p8140_p0 = scmp.ne.s32.totalorder %s8124_s27, 0  ;;  %s6494_s6 = smov [#allocation12]  }
  0x8e   : > { %s345_s19 = sshll.u32 %s6494_s6, 4  ;;  %s8141_s7 = sld [smem:[#allocation53_spill]]  ;;  %s346_s19 = int_to_ptr.vmem [resolvable:$true] %s345_s19 }
  0x8f   : > { %5851 = dma.hbm_to_vmem [thread:$0]  (!%p8140_p0), %s8139_s5, 9216, %s6739_s10, [#allocation10], %s8138_s13, %s8138_s13, %s8137_s3  }
  0x94   : > { %s6237_s2 = scalar_lea.hbm %s8141_s7, 1024 }
  0x95   : > { %p6238_p6 = scmp.ne.s32.totalorder %s8141_s7, %s6237_s2  ;;  %p6244_p5 = scmp.lt.u32.totalorder %s6237_s2, %s8141_s7 }
  0x97   : > { %p6240_p2 = pnand %p6238_p6, %p6651_p8 }
  0x99   : > { %p6241_p11 = pneg %p6240_p2 }
  0x9b   : > { %p6246_p7 = pnand %p6244_p5, %p6241_p11 }
  0x9d   : > { %6249 = shalt.err (!%p6246_p7)
}
  0x9e   : > { %s6250_s10 = scalar_lea.vmem %s346_s19, 1024  ;;  %p6258_p10 = scmp.lt.s32.totalorder %s346_s19, %s346_s19 }
  0x9f   : > { %p6251_p9 = scmp.ne.s32.totalorder %s346_s19, %s6250_s10  ;;  %p6259_p3 = scmp.lt.s32.totalorder %s6250_s10, %s6250_s10 }
  0xa1   : > { %p6253_p13 = pnand %p6251_p9, %p6651_p8  ;;  %p6260_p4 = por %p6259_p3, %p6258_p10 }
  0xa3   : > { %p6254_p1 = pneg %p6253_p13 }
  0xa5   : > { %p6261_p12 = pnand %p6260_p4, %p6254_p1 }
  0xa7   : > { %6264 = shalt.err (!%p6261_p12)
}
  0xa8   : > { %5854 = dma.hbm_to_vmem [thread:$0]  (!%p8140_p0), %s8141_s7, 1024, %s346_s19, [#allocation13], %s8138_s13, %s8138_s13, %s8137_s3  }
  0xa9   : > { %s4770_s27 = sadd.s32 4294967294, %s6487_s22   ;;  %s51_s25 = sadd.s32 1, %s6467_s17 }
  0xaa   : > { %p8142_p8 = scmp.eq.s32.totalorder %s6690_s8, 0  ;;  %p58_p6 = scmp.ne.s32.totalorder %s6467_s17, %s6463_s16 }
  0xab   : > { %p64_p2 = scmp.ne.s32.totalorder %s6463_s16, %s6459_s15  ;;  %p294_p11 = scmp.eq.s32.totalorder %s4770_s27, 3 }
  0xac   : > { %s6824_s11 = scalar_select %p8142_p8, %s6467_s17, %s51_s25  }
  0xad   : > { %s362_s6 = sand.u32 1, %s6467_s17   ;;  %p8144_p5 = scmp.eq.s32.totalorder %s6487_s22, 0 }
  0xae   : > { %8143 = sst [smem:[#allocation35_spill]] %s6824_s11  ;;  %p8145_p9 = scmp.eq.s32.totalorder %s6625_s23, 0 }
  0xaf   : > { %p60_p7 = por %p8144_p5, %p58_p6  ;;  %p8147_p1 = scmp.eq.s32.totalorder %s6625_s23, 3 }
  0xb0   : > { %p6835_p13 = por %p8145_p9, %p64_p2  ;;  %p6845_p0 = por %p294_p11, %p64_p2 }
  0xb1   : > { %p6841_p10 = por %p8147_p1, %p58_p6  ;;  %s4782_s29 = sshll.u32 %s362_s6, 6 }
  0xb2   : > { %s8149_s8 = scalar_select %p6845_p0, 1, 0 }
  0xb3   : > { %s8148_s19 = scalar_select %p6841_p10, 1, 0 }
  0xb4   : > { %8150 = sst [smem:[#allocation36_spill]] %s8149_s8  ;;  %s5050_s2 = sshll.u32 %s6479_s20, 4 }
  0xb5   : > { %s373_s4 = sadd.s32 %s5050_s2, %s6719_s28  ;;  %s366_s18 = scalar_lea.vmem [#allocation3], %s4782_s29 }
  0xb6   : > { %s376_s24 = sshll.u32 %s366_s18, 4  ;;  %s4786_s10 = sshll.u32 %s373_s4, 6  ;;  %s6851_s24 = int_to_ptr.vmem [resolvable:$true] %s376_s24 }
  0xb7   : > { %s8151_s27 = sld [smem:[#allocation46_spill]]  ;;  %p8152_p3 = scmp.lt.s32.totalorder %s6487_s22, 4 }
  0xb8   : > { %s6864_s29 = scalar_lea.sflag [#allocation4], %s362_s6 }
  0xb9   : > { %p6860_p4 = pnand %p8152_p3, %p60_p7 }
  0xbb   : > { %p6267_p8 = pneg %p6860_p4 }
  0xbd   : > { %s6856_s25 = scalar_lea.hbm %s8151_s27, %s4786_s10  ;;  %s6270_s10 = scalar_lea.hbm %s8151_s27, 4096 }
  0xbe   : > { %s6265_s2 = scalar_lea.hbm %s6856_s25, 1024  ;;  %p6271_p11 = scmp.lt.u32.totalorder %s6856_s25, %s8151_s27 }
  0xbf   : > { %p6266_p12 = scmp.ne.s32.totalorder %s6856_s25, %s6265_s2  ;;  %p6272_p5 = scmp.lt.u32.totalorder %s6270_s10, %s6265_s2 }
  0xc0   : > { %p6274_p9 = scmp.lt.u32.totalorder %s6265_s2, %s6856_s25 }
  0xc1   : > { %p6268_p6 = pnand %p6267_p8, %p6266_p12  ;;  %p6273_p7 = por %p6272_p5, %p6271_p11 }
  0xc3   : > { %p6269_p2 = pneg %p6268_p6  ;;  %p6275_p1 = por %p6274_p9, %p6273_p7 }
  0xc5   : > { %p6276_p3 = pnand %p6275_p1, %p6269_p2 }
  0xc7   : > { %6279 = shalt.err (!%p6276_p3)
}
  0xc8   : > { %s6280_s6 = scalar_lea.vmem %s6851_s24, 1024  ;;  %s6495_s4 = smov [#allocation3]  }
  0xc9   : > { %p6281_p12 = scmp.ne.s32.totalorder %s6851_s24, %s6280_s6  ;;  %s6285_s18 = sshll.u32 %s6495_s4, 4  ;;  %s6286_s18 = int_to_ptr.vmem [resolvable:$false] %s6285_s18 }
  0xca   : > { %s6287_s1 = scalar_lea.vmem %s6286_s18, 2048  ;;  %p6288_p10 = scmp.lt.s32.totalorder %s6851_s24, %s6286_s18 }
  0xcb   : > { %p6283_p6 = pnand %p6281_p12, %p6267_p8  ;;  %p6289_p11 = scmp.lt.s32.totalorder %s6287_s1, %s6280_s6 }
  0xcd   : > { %p6284_p0 = pneg %p6283_p6  ;;  %p6290_p5 = por %p6289_p11, %p6288_p10 }
  0xcf   : > { %p6291_p7 = pnand %p6290_p5, %p6284_p0 }
  0xd1   : > { %6294 = shalt.err (!%p6291_p7)
}
  0xd2   : > { %s8154_s2 = sld [smem:[#allocation23_spill]]  ;;  %s8155_s10 = sld [smem:[#allocation33_spill]] }
  0xd3   : > { %s8156_s26 = sld [smem:[#allocation22_spill]]  ;;  %s8158_s6 = sld [smem:[#allocation32_spill]] }
  0xd4   : > { %s8157_s4 = sld [smem:[#allocation21_spill]]  ;;  %p8160_p0 = scmp.lt.s32.totalorder %s6711_s30, 15 }
  0xd5   : > { %5858 = dma.hbm_to_vmem [thread:$0]  (!%p6860_p4), %s6856_s25, 1024, %s6851_s24, %s6864_s29, %s8138_s13, %s8138_s13, %s8137_s3  }
  0xd6   : > { %s8251_s30 = smov (!%p8160_p0, %s6711_s30), 15  ;;  %p8161_p9 = scmp.eq.s32.totalorder %s6487_s22, 0 }
  0xd7   : > { %p8162_p12 = scmp.eq.s32.totalorder %s6625_s23, 0  ;;  %s8164_s11 = sld [smem:[#allocation48_spill]] }
  0xd8   : > { %s123_s5 = sadd.s32 1, %s8154_s2  ;;  %p8159_p10 = scmp.lt.s32.totalorder %s8155_s10, 15 }
  0xd9   : > { %p130_p8 = scmp.ne.s32.totalorder %s8154_s2, %s8156_s26  ;;  %s415_s1 = sand.u32 1, %s8154_s2  }
  0xda   : > { %s8249_s10 = smov (!%p8159_p10, %s8155_s10), 15  ;;  %p136_p2 = scmp.ne.s32.totalorder %s8156_s26, %s8157_s4 }
  0xdb   : > { %s119_s18 = ssub.s32 %s8249_s10, %s8251_s30  ;;  %p132_p1 = por %p130_p8, %p8161_p9 }
  0xdc   : > { %s120_s7 = sor.u32 %s119_s18, %s8158_s6  ;;  %p6912_p6 = por %p136_p2, %p8162_p12 }
  0xdd   : > { %p121_p3 = scmp.eq.s32.totalorder %s120_s7, 0  ;;  %s4793_s24 = sshll.u32 %s415_s1, 3 }
  0xde   : > { %s8163_s27 = scalar_select %p6912_p6, 1, 0 }
  0xdf   : > { %s4795_s25 = sshll.u32 %s8249_s10, 1  ;;  %s8253_s2 = smov (!%p121_p3, %s8154_s2), %s123_s5 }
  0xe0   : > { %s427_s29 = sadd.s32 %s4795_s25, %s6719_s28  ;;  %s417_s20 = scalar_lea.vmem [#allocation8], %s4793_s24 }
  0xe1   : > { %s4797_s21 = sshll.u32 %s427_s29, 6  ;;  %s430_s26 = sshll.u32 %s417_s20, 4  ;;  %s6925_s26 = int_to_ptr.vmem [resolvable:$true] %s430_s26 }
  0xe2   : > { %s8165_s8 = smov %s8164_s11  ;;  %s6923_s6 = scalar_lea.hbm %s8164_s11, %s4797_s21 }
  0xe3   : > { %p8166_p4 = scmp.lt.s32.totalorder %s6487_s22, 4  ;;  %s6295_s28 = scalar_lea.hbm %s6923_s6, 128 }
  0xe4   : > { %p6296_p5 = scmp.ne.s32.totalorder %s6923_s6, %s6295_s28  ;;  %s6300_s11 = scalar_lea.hbm %s8165_s8, 4096 }
  0xe5   : > { %p6929_p11 = pnand %p8166_p4, %p132_p1  ;;  %p6301_p8 = scmp.lt.u32.totalorder %s6923_s6, %s8165_s8 }
  0xe6   : > { %p6302_p2 = scmp.lt.u32.totalorder %s6300_s11, %s6295_s28  ;;  %p6304_p1 = scmp.lt.u32.totalorder %s6295_s28, %s6923_s6 }
  0xe7   : > { %p6297_p7 = pneg %p6929_p11 }
  0xe8   : > { %p6303_p9 = por %p6302_p2, %p6301_p8 }
  0xe9   : > { %p6298_p10 = pnand %p6297_p7, %p6296_p5 }
  0xea   : > { %p6305_p3 = por %p6304_p1, %p6303_p9 }
  0xeb   : > { %p6299_p0 = pneg %p6298_p10 }
  0xed   : > { %p6306_p12 = pnand %p6305_p3, %p6299_p0 }
  0xef   : > { %6309 = shalt.err (!%p6306_p12)
}
  0xf0   : > { %s6310_s18 = scalar_lea.vmem %s6925_s26, 128  ;;  %s6496_s1 = smov [#allocation8]  }
  0xf1   : > { %p6311_p4 = scmp.ne.s32.totalorder %s6925_s26, %s6310_s18  ;;  %s6315_s24 = sshll.u32 %s6496_s1, 4  ;;  %s6316_s24 = int_to_ptr.vmem [resolvable:$false] %s6315_s24 }
  0xf2   : > { %s6317_s25 = scalar_lea.vmem %s6316_s24, 256  ;;  %p6318_p6 = scmp.lt.s32.totalorder %s6925_s26, %s6316_s24 }
  0xf3   : > { %p6313_p5 = pnand %p6311_p4, %p6297_p7  ;;  %p6319_p8 = scmp.lt.s32.totalorder %s6317_s25, %s6310_s18 }
  0xf5   : > { %p6314_p10 = pneg %p6313_p5  ;;  %p6320_p2 = por %p6319_p8, %p6318_p6 }
  0xf7   : > { %p6321_p9 = pnand %p6320_p2, %p6314_p10 }
  0xf9   : > { %6324 = shalt.err (!%p6321_p9)
}
  0xfa   : > { %5864 = dma.hbm_to_vmem [thread:$0]  (!%p6929_p11), %s6923_s6, 128, %s6925_s26, %s6741_s0, %s8138_s13, %s8138_s13, %s8137_s3  }
  0xfb   : > { %s8168_s29 = sld [smem:[#allocation29_spill]] }
 0x101   : > { %p8169_p7 = scmp.ne.s32.totalorder %s8168_s29, 0 }
 0x103   : > { %442 = sbr.rel (%p8169_p7) target bundleno = 1367 (0x557), region = 56 }
 0x10a   : > { %s6965_s4 = sand.u32 1, %s6463_s16  }
 0x10b   : > { %s4799_s30 = sshll.u32 %s6965_s4, 6  ;;  %s445_s28 = scalar_lea.sflag [#allocation4], %s6965_s4 }
 0x10c   : > { %s6969_s20 = scalar_lea.vmem [#allocation3], %s4799_s30 }
 0x10d   : > { %6410 = dma.done.wait (%p6835_p13), %s445_s28, 1024  }
 0x10e   : > { %6412 = vsyncadd (%p6835_p13), %s445_s28, 4294966272  ;;  %s8170_s0 = sld [smem:[#allocation24_spill]]  ;;  %s8171_s3 = sld [smem:[#allocation34_spill]] }
 0x10f   : > { %s453_s13 = sand.u32 1, %s6625_s23  }
 0x110   : > { %s454_s7 = scalar_lea.sflag [#allocation7], %s453_s13 }
 0x114   : > { %s455_s26 = sand.u32 1, %s8170_s0   ;;  %p8172_p6 = scmp.ne.s32.totalorder %s8171_s3, 0 }
 0x115   : > { %s6977_s6 = sshll.u32 %s455_s26, 3 }
 0x116   : > { %s457_s21 = scalar_lea.vmem [#allocation6], %s6977_s6 }
 0x117   : > { %6414 = dma.done.wait (%p8172_p6), %s454_s7, 128  }
 0x118   : > { %6416 = vsyncadd (%p8172_p6), %s454_s7, 4294967168  ;;  %s8173_s11 = sld [smem:[#allocation22_spill]]  ;;  %p8174_p13 = scmp.ne.s32.totalorder %s8163_s27, 0 }
 0x11e   : > { %s464_s10 = sand.u32 1, %s8173_s11  }
 0x11f   : > { %s6985_s9 = sshll.u32 %s464_s10, 3 }
 0x120   : > { %s466_s5 = scalar_lea.vmem [#allocation8], %s6985_s9 }
 0x121   : > { %6418 = dma.done.wait (%p8174_p13), %s454_s7, 128  }
 0x122   : > { %6420 = vsyncadd (%p8174_p13), %s454_s7, 4294967168  ;;  %p8175_p11 = scmp.eq.s32.totalorder %s6625_s23, 0 }
 0x124   : > { %6422 = dma.done.wait (%p8175_p11), [#allocation10], 10240   ;;  %p8176_p0 = pmov %p8175_p11 }
 0x126   : > { %6424 = vsyncadd (%p8176_p0), [#allocation10], 4294957056  ;;  %p8177_p1 = pmov %p8176_p0 }
 0x127   : > { %p8178_p3 = pmov %p8176_p0 }
 0x128   : > { %6426 = dma.done.wait (%p8177_p1), [#allocation13], 1024  }
 0x129   : > { %6428 = vsyncadd (%p8178_p3), [#allocation13], 4294966272  ;;  %s4805_s18 = sshll.u32 %s6965_s4, 7  ;;  %v6497_v0 = vmov 0.0   ;;  %vm6498_vm0 = vmmov 0   ;;  %v6000_v1 = vld [vmem:[#allocation9] sm:$0xff]  }
 0x12a   : > { %5305 = vmatprep.subr.bf16.mxu0 %v6497_v0  ;;  %5321 = vmatprep.mubr.msk.bf16.mxu0 %vm6498_vm0, %v6497_v0  ;;  %v6001_v2 = vld [vmem:[#allocation9 + $0x8] sm:$0xff]   ;;  %v6002_v3 = vld [vmem:[#allocation9 + $0x10] sm:$0xff]   ;;  %v6003_v4 = vld [vmem:[#allocation9 + $0x18] sm:$0xff]   ;;  %s8179_s1 = sld [smem:[#allocation50_spill]]  ;;  %vm685_vm1 = vcmask 1043456   ;;  %vm692_vm4 = vcmask 1040384  }
 0x12b   : > { %5306 = vmatpush3.bf16.msra.mxu0 %v6000_v1  ;;  %v6004_v5 = vld [vmem:[#allocation9 + $0x20] sm:$0xff]   ;;  %v6005_v6 = vld [vmem:[#allocation9 + $0x28] sm:$0xff]   ;;  %v6006_v7 = vld [vmem:[#allocation9 + $0x30] sm:$0xff]   ;;  %vm686_vm2 = vsmask.f32 7938  ;;  %s7196_s24 = scalar_lea.vmem [#allocation14], %s4805_s18 }
 0x12c   : > { %5307 = vmatprep.subr.bf16.mxu0 %v6497_v0  ;;  %v6007_v8 = vld [vmem:[#allocation9 + $0x38] sm:$0xff]   ;;  %v6009_v9 = vld [vmem:[#allocation9] sm:$0xff]   ;;  %v6010_v12 = vld [vmem:[#allocation9 + $0x8] sm:$0xff]   ;;  %vm662_vm3 = vsmask.f32 256  ;;  %s8188_s25 = sld [smem:[#allocation25_spill]] }
 0x12d   : > { %v6008_v10 = vld [vmem:[%s457_s21] sm:$0xff]   ;;  %v6011_v13 = vld [vmem:[#allocation9 + $0x10] sm:$0xff]   ;;  %v6012_v14 = vld [vmem:[#allocation9 + $0x18] sm:$0xff]   ;;  %vm663_vm5 = vsmask.f32 4368 }
 0x12e   : > { %v6017_v11 = vld [vmem:[%s6969_s20] sm:$0xff]   ;;  %v6014_v16 = vld [vmem:[#allocation9 + $0x28] sm:$0xff]   ;;  %v6015_v17 = vld [vmem:[#allocation9 + $0x30] sm:$0xff]  }
 0x12f   : > { %5308 = vmatpush3.bf16.msra.mxu0 %v6001_v2  ;;  %v6013_v15 = vld [vmem:[#allocation9 + $0x20] sm:$0xff]   ;;  %v6016_v18 = vld [vmem:[#allocation9 + $0x38] sm:$0xff]   ;;  %v6018_v19 = vld [vmem:[%s6969_s20 + $0x8] sm:$0xff]  }
 0x130   : > { %5309 = vmatprep.subr.bf16.mxu0 %v6497_v0  ;;  %v6019_v20 = vld [vmem:[#allocation9] sm:$0xff]   ;;  %v6021_v21 = vld [vmem:[%s6969_s20 + $0x10] sm:$0xff]   ;;  %v6020_v22 = vld [vmem:[#allocation9 + $0x8] sm:$0xff]  }
 0x131   : > { %v6022_v23 = vld [vmem:[%s6969_s20 + $0x18] sm:$0xff]   ;;  %v6023_v24 = vld [vmem:[#allocation9 + $0x10] sm:$0xff]   ;;  %v6025_v25 = vld [vmem:[%s6969_s20 + $0x20] sm:$0xff]  }
 0x132   : > { %v6024_v26 = vld [vmem:[#allocation9 + $0x18] sm:$0xff]   ;;  %v6026_v27 = vld [vmem:[%s6969_s20 + $0x28] sm:$0xff]   ;;  %v6027_v28 = vld [vmem:[#allocation9 + $0x20] sm:$0xff]   ;;  %p4863_p12 = scmp.ne.s32.totalorder %s8188_s25, 0 }
 0x133   : > { %5310 = vmatpush3.bf16.msra.mxu0 %v6002_v3  ;;  %v6029_v29 = vld [vmem:[%s6969_s20 + $0x30] sm:$0xff]   ;;  %v6028_v30 = vld [vmem:[#allocation9 + $0x28] sm:$0xff]   ;;  %v6030_v31 = vld [vmem:[%s6969_s20 + $0x38] sm:$0xff]  }
 0x134   : > { %5311 = vmatprep.subr.bf16.mxu0 %v6497_v0  ;;  %v6031_v32 = vld [vmem:[#allocation9 + $0x30] sm:$0xff]   ;;  %v6032_v33 = vld [vmem:[#allocation9 + $0x38] sm:$0xff]   ;;  %v7036_v35 = vld [vmem:[%s8179_s1] ss:$0 sm:$0xff] }
 0x135   : > { %v6033_v34 = vld [vmem:[%s466_s5] sm:$0xff]   ;;  %vm7041_vm6 = vmand %vm685_vm1, %vm686_vm2  ;;  %v688_v51 = vld [vmem:[#allocation2] sm:$0xf] }
 0x136   : > { %vm7046_vm7 = vmand %vm692_vm4, %vm662_vm3  ;;  %v694_v58 = vld [vmem:[#allocation2 + $0x8] sm:$0x1] }
 0x137   : > { %5312 = vmatpush3.bf16.msra.mxu0 %v6003_v4  ;;  %vm7050_vm8 = vmor %vm662_vm3, %vm663_vm5 }
 0x138   : > { %5313 = vmatprep.subr.bf16.mxu0 %v6497_v0  ;;  %vm7062_vm9 = vmand %vm692_vm4, %vm686_vm2 }
 0x13b   : > { %5314 = vmatpush3.bf16.msra.mxu0 %v6004_v5 }
 0x13c   : > { %5315 = vmatprep.subr.bf16.mxu0 %v6497_v0 }
 0x13f   : > { %5316 = vmatpush3.bf16.msra.mxu0 %v6005_v6 }
 0x140   : > { %5317 = vmatprep.subr.bf16.mxu0 %v6497_v0 }
 0x143   : > { %5318 = vmatpush3.bf16.msra.mxu0 %v6006_v7 }
 0x144   : > { %5319 = vmatprep.subr.bf16.mxu0 %v6497_v0 }
 0x147   : > { %5320 = vmatpush3.bf16.msra.mxu0 %v6007_v8 }
 0x148   : > { %5325 = vmatprep.subr.bf16.mxu0 %v6009_v9 }
 0x14a   : > { %5322 = vmatmul.mubr.bf16.vlgmr.msra.gmra.mrb[0].mxu0 %v6008_v10 }
 0x14b   : > { %5326 = vmatpush3.bf16.msra.mxu0 %v6009_v9  ;;  %5341 = vmatprep.mubr.bf16.mxu0 %v6017_v11 }
 0x14c   : > { %5327 = vmatprep.subr.bf16.mxu0 %v6010_v12 }
 0x14f   : > { %5328 = vmatpush3.bf16.msra.mxu0 %v6010_v12 }
 0x150   : > { %5329 = vmatprep.subr.bf16.mxu0 %v6011_v13 }
 0x153   : > { %5330 = vmatpush3.bf16.msra.mxu0 %v6011_v13 }
 0x154   : > { %5331 = vmatprep.subr.bf16.mxu0 %v6012_v14 }
 0x157   : > { %5332 = vmatpush3.bf16.msra.mxu0 %v6012_v14 }
 0x158   : > { %5333 = vmatprep.subr.bf16.mxu0 %v6013_v15 }
 0x15b   : > { %5334 = vmatpush3.bf16.msra.mxu0 %v6013_v15 }
 0x15c   : > { %5335 = vmatprep.subr.bf16.mxu0 %v6014_v16 }
 0x15f   : > { %5336 = vmatpush3.bf16.msra.mxu0 %v6014_v16 }
 0x160   : > { %5337 = vmatprep.subr.bf16.mxu0 %v6015_v17 }
 0x163   : > { %5338 = vmatpush3.bf16.msra.mxu0 %v6015_v17 }
 0x164   : > { %5339 = vmatprep.subr.bf16.mxu0 %v6016_v18 }
 0x167   : > { %5340 = vmatpush3.bf16.msra.mxu0 %v6016_v18 }
 0x168   : > { %5357 = vmatprep.subr.bf16.mxu0 %v6497_v0 }
 0x16a   : > { %5342 = vmatmul.mubr.bf16.vlgmr.msra.gmra.mrb[4].mxu0 %v6018_v19 }
 0x16b   : > { %5358 = vmatpush3.bf16.msra.mxu0 %v6019_v20  ;;  %5345 = vmatprep.mubr.bf16.mxu0 %v6021_v21 }
 0x16c   : > { %5359 = vmatprep.subr.bf16.mxu0 %v6497_v0 }
 0x16f   : > { %5360 = vmatpush3.bf16.msra.mxu0 %v6020_v22 }
 0x170   : > { %5361 = vmatprep.subr.bf16.mxu0 %v6497_v0 }
 0x172   : > { %5346 = vmatmul.mubr.bf16.gmra.mrb[8].mxu0 %v6022_v23 }
 0x173   : > { %5362 = vmatpush3.bf16.msra.mxu0 %v6023_v24  ;;  %5349 = vmatprep.mubr.bf16.mxu0 %v6025_v25 }
 0x174   : > { %5363 = vmatprep.subr.bf16.mxu0 %v6497_v0 }
 0x177   : > { %5364 = vmatpush3.bf16.msra.mxu0 %v6024_v26 }
 0x178   : > { %5365 = vmatprep.subr.bf16.mxu0 %v6497_v0 }
 0x17a   : > { %5350 = vmatmul.mubr.bf16.gmra.mrb[12].mxu0 %v6026_v27 }
 0x17b   : > { %5366 = vmatpush3.bf16.msra.mxu0 %v6027_v28  ;;  %5353 = vmatprep.mubr.bf16.mxu0 %v6029_v29 }
 0x17c   : > { %5367 = vmatprep.subr.bf16.mxu0 %v6497_v0 }
 0x17f   : > { %5368 = vmatpush3.bf16.msra.mxu0 %v6028_v30 }
 0x180   : > { %5369 = vmatprep.subr.bf16.mxu0 %v6497_v0 }
 0x182   : > { %5354 = vmatmul.mubr.bf16.gmra.mrb[16].mxu0 %v6030_v31  ;;  %v1161_v31 = vld [vmem:[#allocation2 + $0x18] sm:$0xf] }
 0x183   : > { %5370 = vmatpush3.bf16.msra.mxu0 %v6031_v32  ;;  %5373 = vmatprep.mubr.msk.bf16.mxu0 %vm6498_vm0, %v6497_v0 }
 0x184   : > { %5371 = vmatprep.subr.bf16.mxu0 %v6497_v0 }
 0x187   : > { %5372 = vmatpush3.bf16.msra.mxu0 %v6032_v33 }
 0x18a   : > { %5374 = vmatmul.mubr.bf16.vlgmr.msra.gmra.mrb[20].mxu0 %v6033_v34 }
 0x21d   : > { %v647_v36 = vpop.f32.mrb[0].mxu0 }
 0x21e   : > { %v648_v37 = vadd.f32 %v7036_v35, %v647_v36  ;;  %v5323_v38 = vpop.f32.mrb[1].mxu0 }
 0x21f   : > { %v650_v39 = vpop.f32.mrb[2].mxu0 }
 0x220   : > { %v654_v40 = vmax.f32 %v648_v37, 0.0  ;;  %v651_v41 = vadd.f32 %v7036_v35, %v650_v39  ;;  %v5324_v42 = vpop.f32.mrb[3].mxu0 }
 0x222   : > { %v5051_v43 = vpack.c.bf16 %v654_v40, %v654_v40  ;;  %v655_v44 = vmax.f32 %v651_v41, 0.0  ;;  %v1154_v40 = vld [vmem:[#allocation2 + $0xc] sm:$0xf] }
 0x224   : > { %v666_v45 = vshrl.u32 %v5051_v43, 16  ;;  %v669_v46 = vshll.u32 %v5051_v43, 16  ;;  %v5052_v47 = vpack.c.bf16 %v655_v44, %v655_v44 }
 0x226   : > { %v668_v48 = vrot.slane %v666_v45, 7  ;;  %v674_v49 = vshrl.u32 %v5052_v47, 16  ;;  %v677_v56 = vshll.u32 %v5052_v47, 16 }
 0x228   : > { %v671_v52 = vor.u32 %v669_v46, %v668_v48  ;;  %v672_v53 = vrot.slane %v668_v48, 4  ;;  %v676_v55 = vrot.slane %v674_v49, 7  ;;  %v1165_v46 = vld [vmem:[#allocation2 + $0x20] sm:$0x1] }
 0x22a   : > { %v689_v59 = vsel %vm7041_vm6, %v671_v52, %v688_v51  ;;  %v679_v60 = vor.u32 %v677_v56, %v676_v55  ;;  %v681_v61 = vrot.slane %v676_v55, 4 }
 0x22b   : > { %690 = vst [vmem:[#allocation2] sm:$0xf] %v689_v59 }
 0x22c   : > { %v680_v62 = vsel %vm7050_vm8, %v672_v53, %v679_v60  ;;  %v695_v63 = vsel %vm7046_vm7, %v681_v61, %v694_v58  ;;  %v1158_v53 = vld [vmem:[#allocation2 + $0x14] sm:$0x1] }
 0x22d   : > { %691 = vst [vmem:[#allocation2 + $0x4] sm:$0xf] %v680_v62  ;;  %696 = vst [vmem:[#allocation2 + $0x8] sm:$0x1] %v695_v63 }
 0x232   : > { %v1366_v0 = vld [vmem:[#allocation2] sm:$0x1] }
 0x233   : > { %v1367_v2 = vsel %vm7046_vm7, 0, %v1366_v0 }
 0x234   : > { %1368 = vst [vmem:[#allocation2] sm:$0x1] %v1367_v2  ;;  %v1397_v3 = vld [vmem:[#allocation2 + $0x8] sm:$0x1] }
 0x235   : > { %v1398_v4 = vsel %vm7062_vm9, 0, %v1397_v3 }
 0x236   : > { %1399 = vst [vmem:[#allocation2 + $0x8] sm:$0x1] %v1398_v4 }
 0x23d   : > { %v5343_v5 = vpop.f32.mrb[4].mxu0 }
 0x23e   : > { %v875_v6 = vadd.f32 %v5343_v5, %v7036_v35  ;;  %v866_v7 = vpop.f32.mrb[5].mxu0 }
 0x23f   : > { %v867_v8 = vadd.f32 %v7036_v35, %v866_v7  ;;  %v5344_v9 = vpop.f32.mrb[6].mxu0 }
 0x240   : > { %v931_v10 = vmax.f32 %v875_v6, 0.0  ;;  %v878_v11 = vadd.f32 %v5344_v9, %v7036_v35  ;;  %v869_v12 = vpop.f32.mrb[7].mxu0 }
 0x241   : > { %v929_v13 = vmax.f32 %v867_v8, 0.0  ;;  %v870_v14 = vadd.f32 %v7036_v35, %v869_v12 }
 0x242   : > { %v5055_v15 = vpack.c.bf16 %v931_v10, %v931_v10  ;;  %v932_v16 = vmax.f32 %v878_v11, 0.0  ;;  %v1175_v11 = vld [vmem:[#allocation2 + $0x30] sm:$0xf] }
 0x243   : > { %v5053_v17 = vpack.c.bf16 %v929_v13, %v929_v13  ;;  %v930_v18 = vmax.f32 %v870_v14, 0.0 }
 0x244   : > { %v1011_v19 = vshrl.u32 %v5055_v15, 16  ;;  %v5056_v20 = vpack.c.bf16 %v932_v16, %v932_v16  ;;  %v1014_v21 = vshll.u32 %v5055_v15, 16 }
 0x245   : > { %v994_v22 = vshrl.u32 %v5053_v17, 16  ;;  %v997_v23 = vshll.u32 %v5053_v17, 16  ;;  %v5054_v24 = vpack.c.bf16 %v930_v18, %v930_v18  ;;  %v5347_v25 = vpop.f32.mrb[8].mxu0  ;;  %v1168_v17 = vld [vmem:[#allocation2 + $0x24] sm:$0xf] }
 0x246   : > { %v1013_v26 = vrot.slane %v1011_v19, 7  ;;  %v1019_v27 = vshrl.u32 %v5056_v20, 16  ;;  %v1022_v28 = vshll.u32 %v5056_v20, 16  ;;  %v891_v29 = vadd.f32 %v5347_v25, %v7036_v35  ;;  %v882_v30 = vpop.f32.mrb[9].mxu0 }
 0x247   : > { %v996_v32 = vrot.slane %v994_v22, 7  ;;  %v1002_v33 = vshrl.u32 %v5054_v24, 16  ;;  %v1005_v34 = vshll.u32 %v5054_v24, 16  ;;  %v883_v36 = vadd.f32 %v7036_v35, %v882_v30  ;;  %v5348_v37 = vpop.f32.mrb[10].mxu0 }
 0x248   : > { %v1016_v38 = vor.u32 %v1014_v21, %v1013_v26  ;;  %v1017_v39 = vrot.slane %v1013_v26, 4  ;;  %v1021_v41 = vrot.slane %v1019_v27, 7  ;;  %v935_v42 = vmax.f32 %v891_v29, 0.0  ;;  %v885_v43 = vpop.f32.mrb[11].mxu0 }
 0x249   : > { %v999_v44 = vor.u32 %v997_v23, %v996_v32  ;;  %v1000_v45 = vrot.slane %v996_v32, 4  ;;  %v1004_v47 = vrot.slane %v1002_v33, 7  ;;  %v933_v48 = vmax.f32 %v883_v36, 0.0 }
 0x24a   : > { %v1162_v49 = vsel %vm7041_vm6, %v1016_v38, %v1161_v31  ;;  %v1024_v51 = vor.u32 %v1022_v28, %v1021_v41  ;;  %v1026_v52 = vrot.slane %v1021_v41, 4  ;;  %v5059_v55 = vpack.c.bf16 %v935_v42, %v935_v42 }
 0x24b   : > { %1163 = vst [vmem:[#allocation2 + $0x18] sm:$0xf] %v1162_v49  ;;  %v1155_v56 = vsel %vm7041_vm6, %v999_v44, %v1154_v40  ;;  %v1007_v58 = vor.u32 %v1005_v34, %v1004_v47  ;;  %v1009_v59 = vrot.slane %v1004_v47, 4  ;;  %v5057_v60 = vpack.c.bf16 %v933_v48, %v933_v48  ;;  %v1179_v44 = vld [vmem:[#allocation2 + $0x38] sm:$0x1] }
 0x24c   : > { %1156 = vst [vmem:[#allocation2 + $0xc] sm:$0xf] %v1155_v56  ;;  %v1025_v61 = vsel %vm7050_vm8, %v1017_v39, %v1024_v51  ;;  %v1166_v62 = vsel %vm7046_vm7, %v1026_v52, %v1165_v46  ;;  %v1045_v63 = vshrl.u32 %v5059_v55, 16  ;;  %v1048_v3 = vshll.u32 %v5059_v55, 16 }
 0x24d   : > { %1164 = vst [vmem:[#allocation2 + $0x1c] sm:$0xf] %v1025_v61  ;;  %1167 = vst [vmem:[#allocation2 + $0x20] sm:$0x1] %v1166_v62  ;;  %v1008_v0 = vsel %vm7050_vm8, %v1000_v45, %v1007_v58  ;;  %v1159_v2 = vsel %vm7046_vm7, %v1009_v59, %v1158_v53  ;;  %v1028_v4 = vshrl.u32 %v5057_v60, 16  ;;  %v5351_v5 = vpop.f32.mrb[12].mxu0  ;;  %v894_v7 = vadd.f32 %v5348_v37, %v7036_v35 }
 0x24e   : > { %1157 = vst [vmem:[#allocation2 + $0x10] sm:$0xf] %v1008_v0  ;;  %1160 = vst [vmem:[#allocation2 + $0x14] sm:$0x1] %v1159_v2  ;;  %v7088_v6 = vrot.slane %v1045_v63, 7  ;;  %v886_v8 = vadd.f32 %v7036_v35, %v885_v43  ;;  %v907_v9 = vadd.f32 %v5351_v5, %v7036_v35  ;;  %v898_v10 = vpop.f32.mrb[13].mxu0 }
 0x24f   : > { %v7093_v12 = vrot.slane %v1028_v4, 7  ;;  %v1031_v13 = vshll.u32 %v5057_v60, 16  ;;  %v899_v14 = vadd.f32 %v7036_v35, %v898_v10  ;;  %v5352_v15 = vpop.f32.mrb[14].mxu0  ;;  %v936_v18 = vmax.f32 %v894_v7, 0.0  ;;  %v1172_v53 = vld [vmem:[#allocation2 + $0x2c] sm:$0x1] }
 0x250   : > { %v1050_v16 = vor.u32 %v1048_v3, %v7088_v6  ;;  %v934_v19 = vmax.f32 %v886_v8, 0.0  ;;  %v901_v20 = vpop.f32.mrb[15].mxu0  ;;  %v1051_v21 = vrot.slane %v7088_v6, 4  ;;  %v939_v23 = vmax.f32 %v907_v9, 0.0  ;;  %v1189_v2 = vld [vmem:[#allocation2 + $0x48] sm:$0xf] }
 0x251   : > { %v1033_v22 = vor.u32 %v1031_v13, %v7093_v12  ;;  %v937_v24 = vmax.f32 %v899_v14, 0.0  ;;  %v5060_v27 = vpack.c.bf16 %v936_v18, %v936_v18  ;;  %v910_v29 = vadd.f32 %v5352_v15, %v7036_v35  ;;  %v1182_v14 = vld [vmem:[#allocation2 + $0x3c] sm:$0xf] }
 0x252   : > { %v1372_v25 = vld [vmem:[#allocation2 + $0x18] sm:$0x1]  ;;  %v1176_v26 = vsel %vm7041_vm6, %v1050_v16, %v1175_v11  ;;  %v5058_v28 = vpack.c.bf16 %v934_v19, %v934_v19  ;;  %v5063_v33 = vpack.c.bf16 %v939_v23, %v939_v23  ;;  %v1034_v38 = vrot.slane %v7093_v12, 4 }
 0x253   : > { %v1373_v30 = vsel %vm7046_vm7, 0, %v1372_v25  ;;  %v1369_v31 = vld [vmem:[#allocation2 + $0xc] sm:$0x1]  ;;  %1177 = vst [vmem:[#allocation2 + $0x30] sm:$0xf] %v1176_v26  ;;  %v1169_v32 = vsel %vm7041_vm6, %v1033_v22, %v1168_v17  ;;  %v5061_v34 = vpack.c.bf16 %v937_v24, %v937_v24  ;;  %v1053_v39 = vshrl.u32 %v5060_v27, 16 }
 0x254   : > { %1374 = vst [vmem:[#allocation2 + $0x18] sm:$0x1] %v1373_v30  ;;  %v1370_v36 = vsel %vm7046_vm7, 0, %v1369_v31  ;;  %v1403_v37 = vld [vmem:[#allocation2 + $0x20] sm:$0x1]  ;;  %v1036_v40 = vshrl.u32 %v5058_v28, 16  ;;  %v902_v59 = vadd.f32 %v7036_v35, %v901_v20 }
 0x255   : > { %1170 = vst [vmem:[#allocation2 + $0x24] sm:$0xf] %v1169_v32  ;;  %1371 = vst [vmem:[#allocation2 + $0xc] sm:$0x1] %v1370_v36  ;;  %v1404_v41 = vsel %vm7062_vm9, 0, %v1403_v37  ;;  %v1056_v43 = vshll.u32 %v5060_v27, 16 }
 0x256   : > { %v1400_v42 = vld [vmem:[#allocation2 + $0x14] sm:$0x1]  ;;  %v1039_v45 = vshll.u32 %v5058_v28, 16  ;;  %v1079_v46 = vshrl.u32 %v5063_v33, 16  ;;  %1405 = vst [vmem:[#allocation2 + $0x20] sm:$0x1] %v1404_v41 }
 0x257   : > { %v1401_v47 = vsel %vm7062_vm9, 0, %v1400_v42  ;;  %v1055_v48 = vrot.slane %v1053_v39, 7  ;;  %v1038_v49 = vrot.slane %v1036_v40, 7  ;;  %v1062_v51 = vshrl.u32 %v5061_v34, 16  ;;  %v5355_v52 = vpop.f32.mrb[16].mxu0 }
 0x258   : > { %1402 = vst [vmem:[#allocation2 + $0x14] sm:$0x1] %v1401_v47  ;;  %v7113_v55 = vrot.slane %v1079_v46, 7  ;;  %v1082_v56 = vshll.u32 %v5063_v33, 16  ;;  %v940_v58 = vmax.f32 %v910_v29, 0.0  ;;  %v914_v60 = vpop.f32.mrb[17].mxu0  ;;  %v923_v24 = vadd.f32 %v5355_v52, %v7036_v35 }
 0x259   : > { %v1058_v61 = vor.u32 %v1056_v43, %v1055_v48  ;;  %v1060_v62 = vrot.slane %v1055_v48, 4  ;;  %v1041_v63 = vor.u32 %v1039_v45, %v1038_v49  ;;  %v1043_v0 = vrot.slane %v1038_v49, 4  ;;  %v5356_v3 = vpop.f32.mrb[18].mxu0  ;;  %v1193_v33 = vld [vmem:[#allocation2 + $0x50] sm:$0x1] }
 0x25a   : > { %v1084_v4 = vor.u32 %v1082_v56, %v7113_v55  ;;  %v7117_v5 = vrot.slane %v1062_v51, 7  ;;  %v1065_v6 = vshll.u32 %v5061_v34, 16  ;;  %v5064_v7 = vpack.c.bf16 %v940_v58, %v940_v58  ;;  %v917_v8 = vpop.f32.mrb[19].mxu0  ;;  %v1378_v9 = vld [vmem:[#allocation2 + $0x30] sm:$0x1] }
 0x25b   : > { %v1059_v10 = vsel %vm7050_vm8, %v1051_v21, %v1058_v61  ;;  %v1180_v11 = vsel %vm7046_vm7, %v1060_v62, %v1179_v44  ;;  %v1042_v12 = vsel %vm7050_vm8, %v1034_v38, %v1041_v63  ;;  %v1173_v13 = vsel %vm7046_vm7, %v1043_v0, %v1172_v53  ;;  %v1186_v46 = vld [vmem:[#allocation2 + $0x44] sm:$0x1] }
 0x25c   : > { %v1379_v15 = vsel %vm7046_vm7, 0, %v1378_v9  ;;  %v1375_v16 = vld [vmem:[#allocation2 + $0x24] sm:$0x1]  ;;  %1178 = vst [vmem:[#allocation2 + $0x34] sm:$0xf] %v1059_v10  ;;  %v1190_v17 = vsel %vm7041_vm6, %v1084_v4, %v1189_v2  ;;  %v1067_v18 = vor.u32 %v1065_v6, %v7117_v5  ;;  %v1085_v20 = vrot.slane %v7113_v55, 4 }
 0x25d   : > { %1181 = vst [vmem:[#allocation2 + $0x38] sm:$0x1] %v1180_v11  ;;  %1171 = vst [vmem:[#allocation2 + $0x28] sm:$0xf] %v1042_v12  ;;  %v1376_v19 = vsel %vm7046_vm7, 0, %v1375_v16  ;;  %v1087_v21 = vshrl.u32 %v5064_v7, 16  ;;  %v915_v25 = vadd.f32 %v7036_v35, %v914_v60  ;;  %v926_v26 = vadd.f32 %v5356_v3, %v7036_v35 }
 0x25e   : > { %1174 = vst [vmem:[#allocation2 + $0x2c] sm:$0x1] %v1173_v13  ;;  %1380 = vst [vmem:[#allocation2 + $0x30] sm:$0x1] %v1379_v15  ;;  %v938_v22 = vmax.f32 %v902_v59, 0.0  ;;  %v1183_v23 = vsel %vm7041_vm6, %v1067_v18, %v1182_v14  ;;  %v1323_v27 = vpop.f32.mrb[20].mxu0  ;;  %v918_v31 = vadd.f32 %v7036_v35, %v917_v8 }
 0x25f   : > { %1191 = vst [vmem:[#allocation2 + $0x48] sm:$0xf] %v1190_v17  ;;  %1377 = vst [vmem:[#allocation2 + $0x24] sm:$0x1] %v1376_v19  ;;  %v1089_v28 = vrot.slane %v1087_v21, 7  ;;  %v1090_v29 = vshll.u32 %v5064_v7, 16  ;;  %v1324_v38 = vadd.f32 %v7036_v35, %v1323_v27 }
 0x260   : > { %1184 = vst [vmem:[#allocation2 + $0x3c] sm:$0xf] %v1183_v23  ;;  %v5062_v30 = vpack.c.bf16 %v938_v22, %v938_v22  ;;  %v5375_v32 = vpop.f32.mrb[21].mxu0  ;;  %v943_v34 = vmax.f32 %v923_v24, 0.0  ;;  %v941_v36 = vmax.f32 %v915_v25, 0.0  ;;  %v944_v37 = vmax.f32 %v926_v26, 0.0 }
 0x261   : > { %v1326_v39 = vpop.f32.mrb[22].mxu0  ;;  %v1068_v40 = vrot.slane %v7117_v5, 4  ;;  %v1092_v41 = vor.u32 %v1090_v29, %v1089_v28  ;;  %v1094_v42 = vrot.slane %v1089_v28, 4  ;;  %v942_v58 = vmax.f32 %v918_v31, 0.0  ;;  %v1203_v13 = vld [vmem:[#allocation2 + $0x60] sm:$0xf] }
 0x262   : > { %v1070_v43 = vshrl.u32 %v5062_v30, 16  ;;  %v5376_v44 = vpop.f32.mrb[23].mxu0  ;;  %v1073_v45 = vshll.u32 %v5062_v30, 16  ;;  %v5067_v47 = vpack.c.bf16 %v943_v34, %v943_v34  ;;  %v5065_v48 = vpack.c.bf16 %v941_v36, %v941_v36  ;;  %v1196_v16 = vld [vmem:[#allocation2 + $0x54] sm:$0xf] }
 0x263   : > { %v5068_v49 = vpack.c.bf16 %v944_v37, %v944_v37  ;;  %v1093_v53 = vsel %vm7050_vm8, %v1085_v20, %v1092_v41  ;;  %v1194_v55 = vsel %vm7046_vm7, %v1094_v42, %v1193_v33  ;;  %v1330_v63 = vmax.f32 %v1324_v38, 0.0  ;;  %v1207_v22 = vld [vmem:[#allocation2 + $0x68] sm:$0x1]  ;;  %v1200_v37 = vld [vmem:[#allocation2 + $0x5c] sm:$0x1] }
 0x264   : > { %v1409_v51 = vld [vmem:[#allocation2 + $0x38] sm:$0x1]  ;;  %v1072_v56 = vrot.slane %v1070_v43, 7  ;;  %1192 = vst [vmem:[#allocation2 + $0x4c] sm:$0xf] %v1093_v53  ;;  %v1113_v62 = vshrl.u32 %v5067_v47, 16  ;;  %v5066_v19 = vpack.c.bf16 %v942_v58, %v942_v58  ;;  %v1327_v24 = vadd.f32 %v7036_v35, %v1326_v39 }
 0x265   : > { %v1406_v52 = vld [vmem:[#allocation2 + $0x2c] sm:$0x1]  ;;  %v1410_v59 = vsel %vm7062_vm9, 0, %v1409_v51  ;;  %1195 = vst [vmem:[#allocation2 + $0x50] sm:$0x1] %v1194_v55  ;;  %v1096_v4 = vshrl.u32 %v5065_v48, 16  ;;  %v5069_v23 = vpack.c.bf16 %v1330_v63, %v1330_v63 }
 0x266   : > { %v1407_v60 = vsel %vm7062_vm9, 0, %v1406_v52  ;;  %v1384_v61 = vld [vmem:[#allocation2 + $0x48] sm:$0x1]  ;;  %1411 = vst [vmem:[#allocation2 + $0x38] sm:$0x1] %v1410_v59  ;;  %v1075_v2 = vor.u32 %v1073_v45, %v1072_v56  ;;  %v1077_v3 = vrot.slane %v1072_v56, 4 }
 0x267   : > { %1408 = vst [vmem:[#allocation2 + $0x2c] sm:$0x1] %v1407_v60  ;;  %v1385_v0 = vsel %vm7046_vm7, 0, %v1384_v61  ;;  %v1381_v5 = vld [vmem:[#allocation2 + $0x3c] sm:$0x1]  ;;  %v1115_v6 = vrot.slane %v1113_v62, 7 }
 0x268   : > { %1386 = vst [vmem:[#allocation2 + $0x48] sm:$0x1] %v1385_v0  ;;  %v1116_v7 = vshll.u32 %v5067_v47, 16  ;;  %v1099_v8 = vshll.u32 %v5065_v48, 16  ;;  %v1121_v9 = vshrl.u32 %v5068_v49, 16  ;;  %v1382_v10 = vsel %vm7046_vm7, 0, %v1381_v5 }
 0x269   : > { %v1076_v11 = vsel %vm7050_vm8, %v1068_v40, %v1075_v2  ;;  %v1187_v12 = vsel %vm7046_vm7, %v1077_v3, %v1186_v46  ;;  %v1098_v14 = vrot.slane %v1096_v4, 7  ;;  %1383 = vst [vmem:[#allocation2 + $0x3c] sm:$0x1] %v1382_v10  ;;  %v1124_v18 = vshll.u32 %v5068_v49, 16  ;;  %v1359_v44 = vld [vmem:[#allocation2 + $0x6c] sm:$0xf] }
 0x26a   : > { %1185 = vst [vmem:[#allocation2 + $0x40] sm:$0xf] %v1076_v11  ;;  %1188 = vst [vmem:[#allocation2 + $0x44] sm:$0x1] %v1187_v12  ;;  %v1118_v15 = vor.u32 %v1116_v7, %v1115_v6  ;;  %v1123_v17 = vrot.slane %v1121_v9, 7  ;;  %v1119_v20 = vrot.slane %v1115_v6, 4 }
 0x26b   : > { %v1101_v21 = vor.u32 %v1099_v8, %v1098_v14  ;;  %v1104_v28 = vshrl.u32 %v5066_v19, 16  ;;  %v1107_v31 = vshll.u32 %v5066_v19, 16  ;;  %v1339_v32 = vshrl.u32 %v5069_v23, 16  ;;  %v1363_v63 = vld [vmem:[#allocation2 + $0x74] sm:$0x1] }
 0x26c   : > { %v1204_v25 = vsel %vm7041_vm6, %v1118_v15, %v1203_v13  ;;  %v1126_v26 = vor.u32 %v1124_v18, %v1123_v17  ;;  %v1128_v27 = vrot.slane %v1123_v17, 4  ;;  %v1415_v29 = vld [vmem:[#allocation2 + $0x50] sm:$0x1]  ;;  %v1342_v39 = vshll.u32 %v5069_v23, 16 }
 0x26d   : > { %1205 = vst [vmem:[#allocation2 + $0x60] sm:$0xf] %v1204_v25  ;;  %v1197_v30 = vsel %vm7041_vm6, %v1101_v21, %v1196_v16  ;;  %v1416_v33 = vsel %vm7062_vm9, 0, %v1415_v29  ;;  %v1106_v36 = vrot.slane %v1104_v28, 7  ;;  %v1341_v38 = vrot.slane %v1339_v32, 7 }
 0x26e   : > { %1198 = vst [vmem:[#allocation2 + $0x54] sm:$0xf] %v1197_v30  ;;  %v1127_v35 = vsel %vm7050_vm8, %v1119_v20, %v1126_v26  ;;  %v1208_v34 = vsel %vm7046_vm7, %v1128_v27, %v1207_v22  ;;  %1417 = vst [vmem:[#allocation2 + $0x50] sm:$0x1] %v1416_v33  ;;  %v1331_v40 = vmax.f32 %v1327_v24, 0.0  ;;  %v1102_v41 = vrot.slane %v1098_v14, 4 }
 0x26f   : > { %1206 = vst [vmem:[#allocation2 + $0x64] sm:$0xf] %v1127_v35  ;;  %1209 = vst [vmem:[#allocation2 + $0x68] sm:$0x1] %v1208_v34  ;;  %v1109_v42 = vor.u32 %v1107_v31, %v1106_v36  ;;  %v1111_v43 = vrot.slane %v1106_v36, 4  ;;  %v1344_v46 = vor.u32 %v1342_v39, %v1341_v38  ;;  %v1345_v0 = vrot.slane %v1341_v38, 4 }
 0x270   : > { %v5070_v47 = vpack.c.bf16 %v1331_v40, %v1331_v40  ;;  %v6499_v11 = vmov (!%p4863_p12), 0  }
 0x271   : > { %v1412_v45 = vld [vmem:[#allocation2 + $0x44] sm:$0x1]  ;;  %v1110_v49 = vsel %vm7050_vm8, %v1102_v41, %v1109_v42  ;;  %v1201_v51 = vsel %vm7046_vm7, %v1111_v43, %v1200_v37  ;;  %v1360_v52 = vsel %vm7041_vm6, %v1344_v46, %v1359_v44  ;;  %1431 = vst [vmem:[#allocation2] sm:$0xf] (!%p4863_p12), %v6499_v11  ;;  %1432 = vst [vmem:[#allocation2 + $0x4] sm:$0xf] (!%p4863_p12), %v6499_v11 }
 0x272   : > { %v1413_v48 = vsel %vm7062_vm9, 0, %v1412_v45  ;;  %1199 = vst [vmem:[#allocation2 + $0x58] sm:$0xf] %v1110_v49  ;;  %1202 = vst [vmem:[#allocation2 + $0x5c] sm:$0x1] %v1201_v51  ;;  %v1347_v53 = vshrl.u32 %v5070_v47, 16 }
 0x273   : > { %1414 = vst [vmem:[#allocation2 + $0x44] sm:$0x1] %v1413_v48  ;;  %1361 = vst [vmem:[#allocation2 + $0x6c] sm:$0xf] %v1360_v52  ;;  %v1350_v60 = vshll.u32 %v5070_v47, 16 }
 0x274   : > { %v1390_v55 = vld [vmem:[#allocation2 + $0x60] sm:$0x1]  ;;  %v1349_v59 = vrot.slane %v1347_v53, 7  ;;  %1433 = vst [vmem:[#allocation2 + $0x8] sm:$0x1] (!%p4863_p12), %v6499_v11 }
 0x275   : > { %v1391_v56 = vsel %vm7046_vm7, 0, %v1390_v55  ;;  %v1387_v58 = vld [vmem:[#allocation2 + $0x54] sm:$0x1] }
 0x276   : > { %1392 = vst [vmem:[#allocation2 + $0x60] sm:$0x1] %v1391_v56  ;;  %v1388_v61 = vsel %vm7046_vm7, 0, %v1387_v58  ;;  %v1421_v62 = vld [vmem:[#allocation2 + $0x68] sm:$0x1]  ;;  %v1352_v2 = vor.u32 %v1350_v60, %v1349_v59  ;;  %v1354_v3 = vrot.slane %v1349_v59, 4 }
 0x277   : > { %1389 = vst [vmem:[#allocation2 + $0x54] sm:$0x1] %v1388_v61  ;;  %v1422_v50 = vsel %vm7062_vm9, 0, %v1421_v62 }
 0x278   : > { %1423 = vst [vmem:[#allocation2 + $0x68] sm:$0x1] %v1422_v50  ;;  %v1353_v4 = vsel %vm7050_vm8, %v1345_v0, %v1352_v2  ;;  %v1364_v5 = vsel %vm7046_vm7, %v1354_v3, %v1363_v63 }
 0x279   : > { %v1418_v6 = vld [vmem:[#allocation2 + $0x5c] sm:$0x1]  ;;  %1362 = vst [vmem:[#allocation2 + $0x70] sm:$0xf] %v1353_v4  ;;  %1365 = vst [vmem:[#allocation2 + $0x74] sm:$0x1] %v1364_v5 }
 0x27a   : > { %v1419_v7 = vsel %vm7062_vm9, 0, %v1418_v6  ;;  %v1393_v8 = vld [vmem:[#allocation2 + $0x6c] sm:$0x1] }
 0x27b   : > { %1420 = vst [vmem:[#allocation2 + $0x5c] sm:$0x1] %v1419_v7  ;;  %v1394_v9 = vsel %vm7046_vm7, 0, %v1393_v8 }
 0x27c   : > { %1395 = vst [vmem:[#allocation2 + $0x6c] sm:$0x1] %v1394_v9  ;;  %1430 = sbr.rel (%p4863_p12) target bundleno = 643 (0x283), region = 84 }
 0x280   : > { %v1424_v10 = vld [vmem:[#allocation2 + $0x74] sm:$0x1] }
 0x281   : > { %v1425_v57 = vsel %vm7062_vm9, 0, %v1424_v10 }
 0x282   : > { %1426 = vst [vmem:[#allocation2 + $0x74] sm:$0x1] %v1425_v57 }
 0x283 PF: > { %s8189_s29 = sld [smem:[#allocation25_spill]] }
 0x289   : > { %p4864_p4 = scmp.ne.s32.totalorder %s8189_s29, 1 }
 0x28a   : > { %v6500_v54 = vmov (!%p4864_p4), 0  }
 0x28b   : > { %1437 = sbr.rel (%p4864_p4) target bundleno = 658 (0x292), region = 88  ;;  %1438 = vst [vmem:[#allocation2 + $0x6c] sm:$0xf] (!%p4864_p4), %v6500_v54  ;;  %1439 = vst [vmem:[#allocation2 + $0x70] sm:$0xf] (!%p4864_p4), %v6500_v54 }
 0x28c   : > { %1440 = vst [vmem:[#allocation2 + $0x74] sm:$0x1] (!%p4864_p4), %v6500_v54 }
 0x292 PF: > { %v6034_v1 = vld [vmem:[#allocation11 + $0x80] sm:$0xff]   ;;  %v6035_v12 = vld [vmem:[#allocation11 + $0x88] sm:$0xff]   ;;  %v6036_v13 = vld [vmem:[#allocation11 + $0x90] sm:$0xff]   ;;  %vm2087_vm10 = vcmask 1042432   ;;  %vm2088_vm11 = vcmask 1046532   ;;  %s8212_s0 = sld [smem:[#allocation52_spill]] }
 0x293   : > { %5441 = vmatprep.subr.bf16.mxu1 %v6034_v1  ;;  %v6037_v14 = vld [vmem:[#allocation11 + $0x98] sm:$0xff]   ;;  %v7200_v15 = vld [vmem:[#allocation2 + $0x4] sm:$0xf]  ;;  %v7202_v16 = vld [vmem:[#allocation2 + $0x8] sm:$0x1]  ;;  %s8213_s26 = sld [smem:[#allocation54_spill]] }
 0x294   : > { %5442 = vmatpush3.bf16.msra.mxu1 %v6034_v1  ;;  %v2063_v17 = vld [vmem:[#allocation2] sm:$0xe]  ;;  %vm7204_vm12 = vmor %vm2087_vm10, %vm2088_vm11  ;;  %v2092_v20 = vrot.slane %v7200_v15, 5  ;;  %v2095_v21 = vrot.slane %v7202_v16, 5  ;;  %v6038_v24 = vld [vmem:[#allocation11 + $0xa0] sm:$0xff]   ;;  %s8214_s6 = sld [smem:[#allocation25_spill]] }
 0x295   : > { %5443 = vmatprep.subr.bf16.mxu1 %v6035_v12  ;;  %v4897_v19 = vrot.slane %v2063_v17, 9  ;;  %v6039_v27 = vld [vmem:[#allocation11 + $0xa8] sm:$0xff]   ;;  %v7214_v28 = vld [vmem:[#allocation2 + $0x10] sm:$0xf]  ;;  %v2064_v29 = vld [vmem:[#allocation2 + $0xc] sm:$0xe] }
 0x296   : > { %v2094_v23 = vrot.slane %v2092_v20, 4  ;;  %v7216_v30 = vld [vmem:[#allocation2 + $0x1c] sm:$0xf]  ;;  %v7218_v31 = vld [vmem:[#allocation2 + $0x14] sm:$0x1]  ;;  %v2099_v32 = vrot.slane %v7214_v28, 5 }
 0x297   : > { %v2093_v22 = vsel %vm7204_vm12, %v4897_v19, %v2092_v20  ;;  %v1448_v33 = vld [vmem:[#allocation2 + $0x28] sm:$0xf]  ;;  %v4898_v34 = vrot.slane %v2064_v29, 9  ;;  %v7221_v36 = vld [vmem:[#allocation2 + $0x20] sm:$0x1]  ;;  %v2106_v37 = vrot.slane %v7216_v30, 5 }
 0x298   : > { %5444 = vmatpush3.bf16.msra.mxu1 %v6035_v12  ;;  %v2096_v25 = vsel %vm7204_vm12, %v2094_v23, %v2095_v21  ;;  %v6040_v35 = vld [vmem:[#allocation11 + $0xb0] sm:$0xff]   ;;  %8192 = vst [vmem:[#allocation37_spill] sm:$0xff] %v7221_v36  ;;  %v2065_v38 = vld [vmem:[#allocation2 + $0x18] sm:$0xe]  ;;  %v2066_v39 = vld [vmem:[#allocation2 + $0x24] sm:$0xe] }
 0x299   : > { %5445 = vmatprep.subr.bf16.mxu1 %v6036_v13  ;;  %v4905_v26 = vcombine.low %v2093_v22, %v2096_v25  ;;  %v6041_v40 = vld [vmem:[#allocation11 + $0xb8] sm:$0xff]   ;;  %v2102_v41 = vrot.slane %v7218_v31, 5  ;;  %v2113_v42 = vrot.slane %v1448_v33, 5  ;;  %v2101_v43 = vrot.slane %v2099_v32, 4  ;;  %v1476_v45 = vld [vmem:[#allocation2 + $0x2c] sm:$0x1] }
 0x29a   : > { %v2109_v44 = vrot.slane %v7221_v36, 5  ;;  %v4899_v46 = vrot.slane %v2065_v38, 9  ;;  %v2108_v47 = vrot.slane %v2106_v37, 4  ;;  %v1450_v48 = vld [vmem:[#allocation2 + $0x34] sm:$0xf]  ;;  %v4900_v51 = vrot.slane %v2066_v39, 9 }
 0x29b   : > { %5457 = vmatprep.mubr.bf16.mxu1 %v4905_v26  ;;  %v1477_v49 = vld [vmem:[#allocation2 + $0x38] sm:$0x1]  ;;  %v2115_v53 = vrot.slane %v2113_v42, 4  ;;  %v2116_v55 = vrot.slane %v1476_v45, 5  ;;  %v2067_v56 = vld [vmem:[#allocation2 + $0x30] sm:$0xe]  ;;  %v2100_v58 = vsel %vm7204_vm12, %v4898_v34, %v2099_v32  ;;  %v2103_v59 = vsel %vm7204_vm12, %v2101_v43, %v2102_v41 }
 0x29c   : > { %5446 = vmatpush3.bf16.msra.mxu1 %v6036_v13  ;;  %v6042_v52 = vld [vmem:[#allocation11 + $0xc0] sm:$0xff]   ;;  %v2120_v60 = vrot.slane %v1450_v48, 5  ;;  %v2123_v61 = vrot.slane %v1477_v49, 5  ;;  %v2107_v62 = vsel %vm7204_vm12, %v4899_v46, %v2106_v37  ;;  %v2110_v63 = vsel %vm7204_vm12, %v2108_v47, %v2109_v44  ;;  %v1452_v50 = vld [vmem:[#allocation2 + $0x40] sm:$0xf]  ;;  %v6044_v57 = vld [vmem:[#allocation11 + $0xd0] sm:$0xff]  }
 0x29d   : > { %5447 = vmatprep.subr.bf16.mxu1 %v6037_v14  ;;  %v4906_v0 = vcombine.low %v2100_v58, %v2103_v59  ;;  %v6043_v2 = vld [vmem:[#allocation11 + $0xc8] sm:$0xff]   ;;  %v2068_v4 = vld [vmem:[#allocation2 + $0x3c] sm:$0xe]  ;;  %v4907_v5 = vcombine.low %v2107_v62, %v2110_v63  ;;  %v4901_v6 = vrot.slane %v2067_v56, 9  ;;  %v1454_v8 = vld [vmem:[#allocation2 + $0x4c] sm:$0xf]  ;;  %v2114_v54 = vsel %vm7204_vm12, %v4900_v51, %v2113_v42 }
 0x29e   : > { %v1478_v3 = vld [vmem:[#allocation2 + $0x44] sm:$0x1]  ;;  %v2122_v7 = vrot.slane %v2120_v60, 4  ;;  %v4902_v9 = vrot.slane %v2068_v4, 9  ;;  %v2127_v10 = vrot.slane %v1452_v50, 5  ;;  %v2117_v1 = vsel %vm7204_vm12, %v2115_v53, %v2116_v55  ;;  %v6045_v23 = vld [vmem:[#allocation11 + $0xd8] sm:$0xff]  }
 0x29f   : > { %v1479_v11 = vld [vmem:[#allocation2 + $0x50] sm:$0x1]  ;;  %v2130_v12 = vrot.slane %v1478_v3, 5  ;;  %v2134_v13 = vrot.slane %v1454_v8, 5  ;;  %v2069_v19 = vld [vmem:[#allocation2 + $0x48] sm:$0xe]  ;;  %v4908_v22 = vcombine.low %v2114_v54, %v2117_v1 }
 0x2a0   : > { %5448 = vmatpush3.bf16.msra.mxu1 %v6037_v14  ;;  %v2121_v14 = vsel %vm7204_vm12, %v4901_v6, %v2120_v60  ;;  %v2124_v17 = vsel %vm7204_vm12, %v2122_v7, %v2123_v61  ;;  %v2129_v20 = vrot.slane %v2127_v10, 4  ;;  %v2137_v21 = vrot.slane %v1479_v11, 5  ;;  %v1480_v29 = vld [vmem:[#allocation2 + $0x5c] sm:$0x1]  ;;  %v2070_v34 = vld [vmem:[#allocation2 + $0x54] sm:$0xe] }
 0x2a1   : > { %5449 = vmatprep.subr.bf16.mxu1 %v6038_v24  ;;  %v4909_v25 = vcombine.low %v2121_v14, %v2124_v17  ;;  %v4903_v26 = vrot.slane %v2069_v19, 9  ;;  %v1494_v32 = vshll.u32 %v7200_v15, 16  ;;  %v1498_v33 = vshrl.u32 %v7200_v15, 16  ;;  %v6046_v39 = vld [vmem:[#allocation11 + $0xe0] sm:$0xff]   ;;  %v6047_v49 = vld [vmem:[#allocation11 + $0xe8] sm:$0xff]   ;;  %v6048_v59 = vld [vmem:[#allocation11 + $0xf0] sm:$0xff]  }
 0x2a2   : > { %v2128_v37 = vsel %vm7204_vm12, %v4902_v9, %v2127_v10  ;;  %v2131_v38 = vsel %vm7204_vm12, %v2129_v20, %v2130_v12  ;;  %v4904_v43 = vrot.slane %v2070_v34, 9  ;;  %v2144_v45 = vrot.slane %v1480_v29, 5  ;;  %v2598_v58 = vld [vmem:[#allocation2 + $0xc] sm:$0xf]  ;;  %v2601_v60 = vld [vmem:[#allocation2 + $0x18] sm:$0xf] }
 0x2a3   : > { %v7252_v15 = vrot.slane %v1494_v32, 5  ;;  %v1500_v42 = vrot.slane %v1498_v33, 4  ;;  %v4910_v46 = vcombine.low %v2128_v37, %v2131_v38  ;;  %v1504_v48 = vshll.u32 %v7202_v16, 16  ;;  %v7262_v16 = vld [vmem:[#allocation2 + $0x10] sm:$0xf]  ;;  %v6051_v34 = vld [vmem:[#allocation2 + $0x18] sm:$0xff]  }
 0x2a4   : > { %5450 = vmatpush3.bf16.msra.mxu1 %v6038_v24  ;;  %v1456_v24 = vld [vmem:[#allocation2 + $0x58] sm:$0xf]  ;;  %v1522_v56 = vshrl.u32 %v7214_v28, 16  ;;  %v7266_v63 = vld [vmem:[#allocation2 + $0x1c] sm:$0xf]  ;;  %v2623_v3 = vshrl.u32 %v2598_v58, 16 }
 0x2a5   : > { %5451 = vmatprep.subr.bf16.mxu1 %v6039_v27  ;;  %8193 = vst [vmem:[#allocation38_spill] sm:$0xff] %v7252_v15  ;;  %v1501_v51 = vor.u32 %v1500_v42, %v7252_v15  ;;  %v7264_v61 = vrot.slane %v1504_v48, 5  ;;  %v2604_v50 = vld [vmem:[#allocation2 + $0x24] sm:$0xf]  ;;  %v2626_v4 = vshll.u32 %v2598_v58, 16  ;;  %v1528_v7 = vshll.u32 %v7218_v31, 16 }
 0x2a6   : > { %v7274_v6 = vrot.slane %v1522_v56, 4  ;;  %v6049_v8 = vld [vmem:[#allocation11 + $0xf8] sm:$0xff]   ;;  %v2632_v9 = vshll.u32 %v7262_v16, 16  ;;  %v2636_v10 = vshrl.u32 %v7262_v16, 16  ;;  %v2650_v11 = vshll.u32 %v2601_v60, 16  ;;  %v6052_v37 = vld [vmem:[#allocation11 + $0x100] sm:$0xff]  }
 0x2a7   : > { %v2607_v54 = vld [vmem:[#allocation2 + $0x30] sm:$0xf]  ;;  %v2656_v1 = vshll.u32 %v7266_v63, 16  ;;  %v2660_v12 = vshrl.u32 %v7266_v63, 16  ;;  %v2674_v14 = vshll.u32 %v2604_v50, 16  ;;  %v6054_v48 = vld [vmem:[#allocation2 + $0x24] sm:$0xff]  }
 0x2a8   : > { %5452 = vmatpush3.bf16.msra.mxu1 %v6039_v27  ;;  %v2136_v27 = vrot.slane %v2134_v13, 4  ;;  %v7283_v19 = vld [vmem:[#allocation2 + $0x14] sm:$0x1]  ;;  %v2695_v20 = vshrl.u32 %v2607_v54, 16  ;;  %v2652_v29 = vrot.slane %v2650_v11, 5  ;;  %v6082_v15 = vld [vmem:[#allocation11 + $0x60] sm:$0xff]  }
 0x2a9   : > { %5453 = vmatprep.subr.bf16.mxu1 %v6040_v35  ;;  %v7289_v32 = vrot.slane %v2656_v1, 5  ;;  %v2662_v33 = vrot.slane %v2660_v12, 4  ;;  %v2642_v42 = vshll.u32 %v7283_v19, 16  ;;  %vm1481_vm13 = vsmask.f32 3328  ;;  %v6136_v18 = vld [vmem:[#allocation12 + $0x30] sm:$0xff]  }
 0x2aa   : > { %v2138_v41 = vsel %vm7204_vm12, %v2136_v27, %v2137_v21  ;;  %v2698_v21 = vshll.u32 %v2607_v54, 16  ;;  %vm1482_vm14 = vsmask.f32 7440  ;;  %v7318_v54 = vld [vmem:[#allocation2 + $0x40] sm:$0xf]  ;;  %s8215_s7 = sld [smem:[#allocation26_spill]] }
 0x2ab   : > { %v2663_v58 = vor.u32 %v2662_v33, %v7289_v32  ;;  %8195 = vst [vmem:[#allocation40_spill] sm:$0xff] %v7318_v54  ;;  %vm7353_vm15 = vmor %vm1481_vm13, %vm1482_vm14  ;;  %s5071_s21 = sshll.u32 %s8214_s6, 4  ;;  %s4601_s9 = sshll.u32 %s7196_s24, 4  ;;  %s7972_s9 = int_to_ptr.vmem [resolvable:$true] %s4601_s9 }
 0x2ac   : > { %5454 = vmatpush3.bf16.msra.mxu1 %v6040_v35  ;;  %v2141_v35 = vrot.slane %v1456_v24, 5  ;;  %v7285_v24 = vrot.slane %v2632_v9, 5  ;;  %v6056_v9 = vld [vmem:[#allocation11 + $0x110] sm:$0xff]   ;;  %s8216_s23 = sld [smem:[#allocation55_spill]]  ;;  %s4585_s1 = scalar_lea.sflag [#allocation5], %s6965_s4 }
 0x2ad   : > { %5455 = vmatprep.subr.bf16.mxu1 %v6041_v40  ;;  %s6325_s25 = scalar_lea.vmem %s7972_s9, 2048  ;;  %p8217_p10 = scmp.ne.s32.totalorder %s8148_s19, 0 }
 0x2ae   : > { %v2143_v44 = vrot.slane %v2141_v35, 4  ;;  %v2142_v53 = vsel %vm7204_vm12, %v4904_v43, %v2141_v35  ;;  %v7291_v35 = vld [vmem:[#allocation2 + $0x2c] sm:$0x1]  ;;  %v7296_v43 = vld [vmem:[#allocation2 + $0x34] sm:$0xf]  ;;  %p6326_p5 = scmp.ne.s32.totalorder %s7972_s9, %s6325_s25  ;;  %s6501_s29 = smov [#allocation14]  }
 0x2af   : > { %s6329_s30 = sshll.u32 %s6501_s29, 4  ;;  %s6330_s30 = int_to_ptr.vmem [resolvable:$false] %s6329_s30 }
 0x2b0   : > { %5456 = vmatpush3.bf16.msra.mxu1 %v6041_v40  ;;  %v2135_v40 = vsel %vm7204_vm12, %v4903_v26, %v2134_v13  ;;  %v2145_v55 = vsel %vm7204_vm12, %v2143_v44, %v2144_v45  ;;  %v2671_v13 = vshrl.u32 %v2604_v50, 16  ;;  %v7287_v26 = vld [vmem:[#allocation2 + $0x20] sm:$0x1]  ;;  %v2697_v44 = vrot.slane %v2695_v20, 4  ;;  %v6055_v20 = vld [vmem:[#allocation2 + $0x30] sm:$0xff]   ;;  %s5046_s11 = sshll.u32 %s8215_s7, 5  ;;  %p6327_p8 = pnand %p6326_p5, %p8217_p10 }
 0x2b1   : > { %5473 = vmatprep.subr.bf16.mxu1 %v6042_v52  ;;  %v4911_v47 = vcombine.low %v2135_v40, %v2138_v41  ;;  %v4912_v62 = vcombine.low %v2142_v53, %v2145_v55  ;;  %v2700_v45 = vrot.slane %v2698_v21, 5  ;;  %v2690_v53 = vshll.u32 %v7291_v35, 16  ;;  %v7303_v55 = vld [vmem:[#allocation2 + $0x38] sm:$0x1]  ;;  %s4598_s10 = sadd.s32 %s5071_s21, %s5046_s11  ;;  %s6331_s28 = scalar_lea.vmem %s6330_s30, 4096 }
 0x2b2   : > { %v2673_v38 = vrot.slane %v2671_v13, 4  ;;  %v2704_v50 = vshll.u32 %v7296_v43, 16  ;;  %v7322_v13 = vrot.slane %v2663_v58, 4  ;;  %p6328_p2 = pneg %p6327_p8  ;;  %p6332_p9 = scmp.lt.s32.totalorder %s7972_s9, %s6330_s30 }
 0x2b3   : > { %5458 = vmatmul.mubr.bf16.vlgmr.msra.gmra.mrb[0].mxu1 %v4906_v0  ;;  %v7268_v0 = vrot.slane %v1501_v51, 4  ;;  %p6333_p7 = scmp.lt.s32.totalorder %s6331_s28, %s6325_s25 }
 0x2b4   : > { %5474 = vmatpush3.bf16.msra.mxu1 %v6042_v52  ;;  %5461 = vmatprep.mubr.bf16.mxu1 %v4907_v5  ;;  %v1518_v52 = vshll.u32 %v7214_v28, 16  ;;  %v6050_v28 = vld [vmem:[#allocation2 + $0xc] sm:$0xff]   ;;  %v7272_v5 = vld [vmem:[#allocation2 + $0x28] sm:$0xf] }
 0x2b5   : > { %5475 = vmatprep.subr.bf16.mxu1 %v6043_v2  ;;  %v2680_v17 = vshll.u32 %v7272_v5, 16  ;;  %v2684_v31 = vshrl.u32 %v7272_v5, 16  ;;  %p6334_p6 = por %p6333_p7, %p6332_p9 }
 0x2b7   : > { %v7293_v40 = vrot.slane %v2680_v17, 5  ;;  %v2686_v41 = vrot.slane %v2684_v31, 4  ;;  %v2613_v17 = vld [vmem:[#allocation2 + $0x48] sm:$0xf]  ;;  %v6076_v31 = vld [vmem:[#allocation11 + $0x48] sm:$0xff]   ;;  %p6335_p13 = pnand %p6334_p6, %p6328_p2 }
 0x2b8   : > { %5476 = vmatpush3.bf16.msra.mxu1 %v6043_v2  ;;  %v7270_v2 = vrot.slane %v1518_v52, 5  ;;  %v2666_v52 = vshll.u32 %v7287_v26, 16 }
 0x2b9   : > { %5477 = vmatprep.subr.bf16.mxu1 %v6044_v57 }
 0x2ba   : > { %v7316_v11 = vrot.slane %v2666_v52, 5 }
 0x2bb   : > { %5462 = vmatmul.mubr.bf16.gmra.mrb[4].mxu1 %v4908_v22  ;;  %v2625_v22 = vrot.slane %v2623_v3, 4  ;;  %v7308_v3 = vrot.slane %v2642_v42, 5 }
 0x2bc   : > { %5478 = vmatpush3.bf16.msra.mxu1 %v6044_v57  ;;  %5465 = vmatprep.mubr.bf16.mxu1 %v4909_v25  ;;  %v2647_v57 = vshrl.u32 %v2601_v60, 16  ;;  %v2638_v25 = vrot.slane %v2636_v10, 4 }
 0x2bd   : > { %5479 = vmatprep.subr.bf16.mxu1 %v6045_v23 }
 0x2be   : > { %v2649_v27 = vrot.slane %v2647_v57, 4  ;;  %v2639_v51 = vor.u32 %v2638_v25, %v7285_v24  ;;  %v7332_v25 = vld [vmem:[#allocation2 + $0x44] sm:$0x1] }
 0x2bf   : > { %8196 = vst [vmem:[#allocation41_spill] sm:$0xff] %v7332_v25 }
 0x2c0   : > { %5480 = vmatpush3.bf16.msra.mxu1 %v6045_v23  ;;  %v2628_v23 = vrot.slane %v2626_v4, 5  ;;  %v2653_v56 = vor.u32 %v2652_v29, %v2649_v27  ;;  %v2701_v4 = vor.u32 %v2700_v45, %v2697_v44  ;;  %v7314_v57 = vrot.slane %v2639_v51, 4  ;;  %v6058_v29 = vld [vmem:[#allocation2 + $0x3c] sm:$0xff]  }
 0x2c1   : > { %5481 = vmatprep.subr.bf16.mxu1 %v6046_v39  ;;  %v2732_v44 = vshrl.u32 %v7318_v54, 16  ;;  %v2743_v45 = vshrl.u32 %v2613_v17, 16  ;;  %v2746_v51 = vshll.u32 %v2613_v17, 16  ;;  %v6080_v17 = vld [vmem:[#allocation11 + $0x58] sm:$0xff]  }
 0x2c2   : > { %v7320_v12 = vrot.slane %v2653_v56, 4  ;;  %v7334_v33 = vrot.slane %v2701_v4, 4 }
 0x2c3   : > { %5466 = vmatmul.mubr.bf16.gmra.mrb[8].mxu1 %v4910_v46  ;;  %v7298_v46 = vrot.slane %v1528_v7, 5  ;;  %v2708_v7 = vshrl.u32 %v7296_v43, 16  ;;  %v2734_v4 = vrot.slane %v2732_v44, 4  ;;  %v6062_v44 = vld [vmem:[#allocation2 + $0x54] sm:$0xff]  }
 0x2c4   : > { %5482 = vmatpush3.bf16.msra.mxu1 %v6046_v39  ;;  %5469 = vmatprep.mubr.bf16.mxu1 %v4911_v47  ;;  %v2676_v39 = vrot.slane %v2674_v14, 5  ;;  %v6053_v47 = vld [vmem:[#allocation11 + $0x108] sm:$0xff]   ;;  %v7324_v14 = vrot.slane %v2690_v53, 5  ;;  %v7343_v53 = vld [vmem:[#allocation2 + $0x58] sm:$0xf] }
 0x2c5   : > { %5483 = vmatprep.subr.bf16.mxu1 %v6047_v49  ;;  %8194 = vst [vmem:[#allocation39_spill] sm:$0xff] %v7298_v46  ;;  %8198 = vst [vmem:[#allocation43_spill] sm:$0xff] %v7343_v53  ;;  %v6061_v46 = vld [vmem:[#allocation11 + $0x128] sm:$0xff]  }
 0x2c6   : > { %v2677_v60 = vor.u32 %v2676_v39, %v2673_v38  ;;  %v2728_v38 = vshll.u32 %v7318_v54, 16  ;;  %v7339_v39 = vld [vmem:[#allocation2 + $0x4c] sm:$0xf] }
 0x2c7   : > { %8197 = vst [vmem:[#allocation42_spill] sm:$0xff] %v7339_v39  ;;  %v2752_v52 = vshll.u32 %v7339_v39, 16 }
 0x2c8   : > { %5484 = vmatpush3.bf16.msra.mxu1 %v6047_v49  ;;  %v2629_v49 = vor.u32 %v2628_v23, %v2625_v22  ;;  %v7326_v21 = vrot.slane %v2677_v60, 4  ;;  %v7330_v23 = vrot.slane %v2704_v50, 5  ;;  %v7345_v58 = vrot.slane %v2728_v38, 5  ;;  %v7360_v38 = vld [vmem:[#allocation2 + $0x64] sm:$0xf] }
 0x2c9   : > { %5485 = vmatprep.subr.bf16.mxu1 %v6048_v59  ;;  %v2756_v60 = vshrl.u32 %v7339_v39, 16  ;;  %8201 = vst [vmem:[#allocation44_spill] sm:$0xff] %v7360_v38  ;;  %v7364_v39 = vld [vmem:[#allocation2 + $0x5c] sm:$0x1] }
 0x2ca   : > { %v7312_v10 = vrot.slane %v2629_v49, 4  ;;  %v2616_v49 = vld [vmem:[#allocation2 + $0x54] sm:$0xf]  ;;  %8202 = vst [vmem:[#allocation45_spill] sm:$0xff] %v7364_v39 }
 0x2cb   : > { %5470 = vmatmul.mubr.bf16.gmra.mrb[12].mxu1 %v4912_v62  ;;  %v2687_v62 = vor.u32 %v2686_v41, %v7293_v40  ;;  %v6057_v41 = vld [vmem:[#allocation11 + $0x118] sm:$0xff]   ;;  %v2770_v50 = vshll.u32 %v2616_v49, 16 }
 0x2cc   : > { %5486 = vmatpush3.bf16.msra.mxu1 %v6048_v59  ;;  %5489 = vmatprep.mubr.bf16.mxu1 %v6050_v28  ;;  %v2610_v59 = vld [vmem:[#allocation2 + $0x3c] sm:$0xf] }
 0x2cd   : > { %5487 = vmatprep.subr.bf16.mxu1 %v6049_v8  ;;  %v6074_v28 = vld [vmem:[#allocation11 + $0x40] sm:$0xff]   ;;  %v2719_v1 = vshrl.u32 %v2610_v59, 16  ;;  %v7328_v22 = vrot.slane %v2687_v62, 4  ;;  %v2722_v27 = vshll.u32 %v2610_v59, 16  ;;  %v2738_v59 = vshll.u32 %v7332_v25, 16 }
 0x2ce   : > { %5377 = vmatprep.subr.bf16.mxu0 %v6074_v28  ;;  %v2767_v62 = vshrl.u32 %v2616_v49, 16  ;;  %v7362_v49 = vld [vmem:[#allocation2 + $0x50] sm:$0x1] }
 0x2cf   : > { %5378 = vmatpush3.bf16.msra.mxu0 %v6074_v28  ;;  %v2721_v42 = vrot.slane %v2719_v1, 4  ;;  %v2724_v56 = vrot.slane %v2722_v27, 5  ;;  %v6060_v28 = vld [vmem:[#allocation11 + $0x120] sm:$0xff]   ;;  %v2780_v1 = vshrl.u32 %v7343_v53, 16 }
 0x2d0   : > { %5488 = vmatpush3.bf16.msra.mxu1 %v6049_v8  ;;  %v2714_v8 = vshll.u32 %v7303_v55, 16  ;;  %5379 = vmatprep.subr.bf16.mxu0 %v6076_v31  ;;  %v2769_v54 = vrot.slane %v2767_v62, 4  ;;  %v2804_v62 = vshrl.u32 %v7360_v38, 16 }
 0x2d1   : > { %5505 = vmatprep.subr.bf16.mxu1 %v6052_v37 }
 0x2d3   : > { %5490 = vmatmul.mubr.bf16.vlgmr.msra.gmra.mrb[0].mxu1 %v6051_v34  ;;  %v2710_v34 = vrot.slane %v2708_v7, 4  ;;  %5380 = vmatpush3.bf16.msra.mxu0 %v6076_v31  ;;  %v2745_v7 = vrot.slane %v2743_v45, 4  ;;  %v6059_v31 = vld [vmem:[#allocation2 + $0x48] sm:$0xff]   ;;  %v2725_v45 = vor.u32 %v2724_v56, %v2721_v42  ;;  %v2645_v42 = vsel %vm7353_vm15, %v7314_v57, %v7308_v3 }
 0x2d4   : > { %5506 = vmatpush3.bf16.msra.mxu1 %v6052_v37  ;;  %5493 = vmatprep.mubr.bf16.mxu1 %v6054_v48  ;;  %v7336_v37 = vrot.slane %v2714_v8, 5  ;;  %v6078_v48 = vld [vmem:[#allocation11 + $0x50] sm:$0xff]   ;;  %v2776_v8 = vshll.u32 %v7343_v53, 16  ;;  %v2758_v53 = vrot.slane %v2756_v60, 4  ;;  %v7378_v60 = vrot.slane %v2738_v59, 5 }
 0x2d5   : > { %5507 = vmatprep.subr.bf16.mxu1 %v6053_v47  ;;  %5381 = vmatprep.subr.bf16.mxu0 %v6078_v48  ;;  %v6064_v3 = vld [vmem:[#allocation11 + $0x130] sm:$0xff]   ;;  %v2762_v59 = vshll.u32 %v7362_v49, 16 }
 0x2d7   : > { %5382 = vmatpush3.bf16.msra.mxu0 %v6078_v48  ;;  %v2635_v48 = vsel %vm7353_vm15, %v7312_v10, %v7285_v24  ;;  %v2735_v24 = vor.u32 %v2734_v4, %v7345_v58  ;;  %v7391_v4 = vld [vmem:[#allocation2 + $0xc] sm:$0xe] }
 0x2d8   : > { %5508 = vmatpush3.bf16.msra.mxu1 %v6053_v47  ;;  %v2619_v47 = vld [vmem:[#allocation2 + $0x60] sm:$0xf]  ;;  %5383 = vmatprep.subr.bf16.mxu0 %v6080_v17 }
 0x2d9   : > { %5509 = vmatprep.subr.bf16.mxu1 %v6056_v9  ;;  %v2791_v25 = vshrl.u32 %v2619_v47, 16  ;;  %v2794_v36 = vshll.u32 %v2619_v47, 16 }
 0x2db   : > { %5494 = vmatmul.mubr.bf16.gmra.mrb[4].mxu1 %v6055_v20  ;;  %v2711_v20 = vor.u32 %v2710_v34, %v7330_v23  ;;  %v2772_v34 = vrot.slane %v2770_v50, 5  ;;  %5384 = vmatpush3.bf16.msra.mxu0 %v6080_v17  ;;  %v7382_v50 = vrot.slane %v2725_v45, 4  ;;  %v2793_v10 = vrot.slane %v2791_v25, 4 }
 0x2dc   : > { %5510 = vmatpush3.bf16.msra.mxu1 %v6056_v9  ;;  %5497 = vmatprep.mubr.bf16.mxu1 %v6058_v29  ;;  %v2748_v9 = vrot.slane %v2746_v51, 5  ;;  %v7358_v29 = vrot.slane %v2752_v52, 5  ;;  %v7374_v51 = vrot.slane %v2776_v8, 5  ;;  %v2782_v52 = vrot.slane %v2780_v1, 4 }
 0x2dd   : > { %5511 = vmatprep.subr.bf16.mxu1 %v6057_v41  ;;  %v7376_v56 = vrot.slane %v2711_v20, 4  ;;  %v2796_v47 = vrot.slane %v2794_v36, 5  ;;  %5385 = vmatprep.subr.bf16.mxu0 %v6082_v15  ;;  %v2786_v1 = vshll.u32 %v7364_v39, 16  ;;  %v7388_v20 = vld [vmem:[#allocation2 + $0x68] sm:$0x1]  ;;  %v2773_v17 = vor.u32 %v2772_v34, %v2769_v54  ;;  %v6063_v36 = vld [vmem:[#allocation2 + $0x60] sm:$0xff]  }
 0x2de   : > { %v2749_v57 = vor.u32 %v2748_v9, %v2745_v7  ;;  %v2759_v8 = vor.u32 %v2758_v53, %v7358_v29  ;;  %v2783_v45 = vor.u32 %v2782_v52, %v7374_v51  ;;  %v2806_v7 = vrot.slane %v2804_v62, 4  ;;  %v6065_v34 = vld [vmem:[#allocation11 + $0x138] sm:$0xff]   ;;  %v6084_v62 = vld [vmem:[#allocation11 + $0x68] sm:$0xff]  }
 0x2df   : > { %5386 = vmatpush3.bf16.msra.mxu0 %v6082_v15  ;;  %v4937_v53 = vcombine.low %v2635_v48, %v2645_v42  ;;  %v2797_v9 = vor.u32 %v2796_v47, %v2793_v10  ;;  %v2764_v54 = vrot.slane %v2762_v59, 5  ;;  %v7402_v52 = vrot.slane %v2773_v17, 4  ;;  %v7408_v42 = vld [vmem:[#allocation2 + $0x18] sm:$0xe]  ;;  %v7429_v17 = vld [vmem:[#allocation2 + $0x24] sm:$0xe] }
 0x2e0   : > { %5512 = vmatpush3.bf16.msra.mxu1 %v6057_v41  ;;  %v2800_v41 = vshll.u32 %v7360_v38, 16  ;;  %v2810_v38 = vshll.u32 %v7388_v20, 16  ;;  %v7396_v39 = vrot.slane %v2749_v57, 4  ;;  %v4953_v15 = vrot.slane %v7391_v4, 9  ;;  %5387 = vmatprep.subr.bf16.mxu0 %v6084_v62 }
 0x2e1   : > { %5513 = vmatprep.subr.bf16.mxu1 %v6060_v28  ;;  %v3058_v48 = vrot.slane %v7262_v16, 5  ;;  %v3061_v10 = vrot.slane %v7283_v19, 5  ;;  %v3065_v47 = vrot.slane %v7266_v63, 5  ;;  %v2669_v59 = vsel %vm7353_vm15, %v7322_v13, %v7316_v11  ;;  %v6086_v13 = vld [vmem:[#allocation11 + $0x70] sm:$0xff]  }
 0x2e2   : > { %v7393_v25 = vrot.slane %v2800_v41, 5  ;;  %v7404_v41 = vrot.slane %v2783_v45, 4  ;;  %v7415_v57 = vrot.slane %v2810_v38, 5  ;;  %v2707_v11 = vsel %vm7353_vm15, %v7334_v33, %v7330_v23  ;;  %v7462_v45 = vld [vmem:[#allocation2 + $0x30] sm:$0xe] }
 0x2e3   : > { %5498 = vmatmul.mubr.bf16.gmra.mrb[8].mxu1 %v6059_v31  ;;  %v2736_v31 = vrot.slane %v2735_v24, 4  ;;  %5388 = vmatpush3.bf16.msra.mxu0 %v6084_v62  ;;  %v3068_v23 = vrot.slane %v7287_v26, 5  ;;  %v2731_v33 = vsel %vm7353_vm15, %v7382_v50, %v7345_v58  ;;  %v6088_v50 = vld [vmem:[#allocation11 + $0x78] sm:$0xff]   ;;  %v4956_v62 = vrot.slane %v7462_v45, 9 }
 0x2e4   : > { %5514 = vmatpush3.bf16.msra.mxu1 %v6060_v28  ;;  %5501 = vmatprep.mubr.bf16.mxu1 %v6062_v44  ;;  %v7398_v28 = vrot.slane %v2759_v8, 4  ;;  %v7400_v44 = vrot.slane %v2786_v1, 5  ;;  %v2807_v24 = vor.u32 %v2806_v7, %v7393_v25  ;;  %v2659_v8 = vsel %vm7353_vm15, %v7320_v12, %v7289_v32  ;;  %v6067_v7 = vld [vmem:[#allocation11 + $0x148] sm:$0xff]  }
 0x2e5   : > { %5515 = vmatprep.subr.bf16.mxu1 %v6061_v46  ;;  %v2683_v1 = vsel %vm7353_vm15, %v7326_v21, %v7293_v40  ;;  %v2693_v32 = vsel %vm7353_vm15, %v7328_v22, %v7324_v14  ;;  %v2717_v40 = vsel %vm7353_vm15, %v7376_v56, %v7336_v37  ;;  %v3060_v12 = vrot.slane %v3058_v48, 4  ;;  %v6066_v21 = vld [vmem:[#allocation11 + $0x140] sm:$0xff]   ;;  %5389 = vmatprep.subr.bf16.mxu0 %v6086_v13 }
 0x2e6   : > { %v7445_v38 = vrot.slane %v2807_v24, 4  ;;  %v4954_v14 = vrot.slane %v7408_v42, 9  ;;  %v7450_v22 = vrot.slane %v3065_v47, 4  ;;  %v2741_v37 = vsel %vm7353_vm15, %v2736_v31, %v7378_v60 }
 0x2e7   : > { %v4955_v56 = vrot.slane %v7429_v17, 9  ;;  %v2765_v58 = vsel %vm7353_vm15, %v7398_v28, %v2764_v54  ;;  %v3075_v60 = vrot.slane %v7291_v35, 5  ;;  %5390 = vmatpush3.bf16.msra.mxu0 %v6086_v13  ;;  %v4939_v31 = vcombine.low %v2683_v1, %v2693_v32  ;;  %v7480_v54 = vld [vmem:[#allocation2] sm:$0xf] }
 0x2e8   : > { %5516 = vmatpush3.bf16.msra.mxu1 %v6061_v46  ;;  %v7413_v46 = vrot.slane %v2797_v9, 4  ;;  %v1507_v9 = vsel %vm7353_vm15, %v7268_v0, %v7264_v61  ;;  %v1525_v42 = vor.u32 %v7274_v6, %v7270_v2  ;;  %v3079_v28 = vrot.slane %v7296_v43, 5  ;;  %5391 = vmatprep.subr.bf16.mxu0 %v6088_v50  ;;  %v7489_v6 = vld [vmem:[#allocation11] sm:$0xff]   ;;  %v6106_v43 = vld [vmem:[#allocation11 + $0x28] sm:$0xff]  }
 0x2e9   : > { %5517 = vmatprep.subr.bf16.mxu1 %v6064_v3  ;;  %v1488_v61 = vshll.u32 %v7480_v54, 16  ;;  %v2779_v1 = vsel %vm7353_vm15, %v7402_v52, %v7374_v51  ;;  %v2789_v32 = vsel %vm7353_vm15, %v7404_v41, %v7400_v44  ;;  %v7510_v51 = vsel %vm7204_vm12, %v4953_v15, %v3058_v48  ;;  %v6069_v15 = vld [vmem:[#allocation11 + $0x158] sm:$0xff]  }
 0x2ea   : > { %v7516_v44 = vsel %vm7204_vm12, %v3060_v12, %v3061_v10  ;;  %v3082_v52 = vrot.slane %v7303_v55, 5  ;;  %v2803_v16 = vsel %vm7353_vm15, %v7413_v46, %v7393_v25  ;;  %v7530_v19 = vsel %vm7204_vm12, %v4954_v14, %v3065_v47  ;;  %v7540_v12 = vld [vmem:[#allocation2 + $0x3c] sm:$0xe]  ;;  %v8203_v46 = vld [vmem:[#allocation40_spill] sm:$0xff] }
 0x2eb   : > { %5502 = vmatmul.mubr.bf16.gmra.mrb[12].mxu1 %v6063_v36  ;;  %v4938_v36 = vcombine.low %v2659_v8, %v2669_v59  ;;  %v1485_v8 = vshrl.u32 %v7480_v54, 16  ;;  %v6068_v59 = vld [vmem:[#allocation11 + $0x150] sm:$0xff]   ;;  %5392 = vmatpush3.bf16.msra.mxu0 %v6088_v50  ;;  %v2813_v48 = vsel %vm7353_vm15, %v7445_v38, %v7415_v57  ;;  %v7538_v10 = vrot.slane %v3079_v28, 4  ;;  %v7549_v38 = vld [vmem:[#allocation2 + $0x18] sm:$0xf] }
 0x2ec   : > { %5518 = vmatpush3.bf16.msra.mxu1 %v6064_v3  ;;  %5521 = vmatprep.mubr.bf16.mxu1 %v4937_v53  ;;  %v3072_v3 = vrot.slane %v7272_v5, 5  ;;  %v2755_v53 = vsel %vm7353_vm15, %v7396_v39, %v7358_v29  ;;  %v4940_v39 = vcombine.low %v2707_v11, %v2717_v40  ;;  %v4941_v29 = vcombine.low %v2731_v33, %v2741_v37 }
 0x2ed   : > { %5519 = vmatprep.subr.bf16.mxu1 %v6065_v34  ;;  %v7484_v24 = vcombine.low %v2755_v53, %v2765_v58  ;;  %v1487_v13 = vrot.slane %v1485_v8, 4  ;;  %v1490_v33 = vrot.slane %v1488_v61, 5  ;;  %5409 = vmatprep.subr.bf16.mxu0 %v7489_v6  ;;  %v1542_v63 = vshll.u32 %v7216_v30, 16  ;;  %v8204_v58 = vld [vmem:[#allocation39_spill] sm:$0xff]  ;;  %v8205_v8 = vld [vmem:[#allocation38_spill] sm:$0xff] }
 0x2ee   : > { %v7501_v11 = vrot.slane %v3072_v3, 4  ;;  %v4961_v47 = vcombine.low %v7510_v51, %v7516_v44  ;;  %v3086_v14 = vrot.slane %v8203_v46, 5 }
 0x2ef   : > { %v1491_v4 = vor.u32 %v1490_v33, %v1487_v13  ;;  %v7553_v30 = vrot.slane %v1542_v63, 5  ;;  %v6094_v63 = vld [vmem:[#allocation11 + $0x8] sm:$0xff]  }
 0x2f0   : > { %5520 = vmatpush3.bf16.msra.mxu1 %v6065_v34  ;;  %v7482_v34 = vld [vmem:[#allocation2 + $0xc] sm:$0xf] }
 0x2f1   : > { %5537 = vmatprep.subr.bf16.mxu1 %v6066_v21  ;;  %v1509_v0 = vshrl.u32 %v7482_v34, 16  ;;  %v1512_v40 = vshll.u32 %v7482_v34, 16  ;;  %v1492_v53 = vrot.slane %v1491_v4, 4  ;;  %v4957_v4 = vrot.slane %v7540_v12, 9 }
 0x2f3   : > { %5522 = vmatmul.mubr.bf16.vlgmr.msra.gmra.mrb[0].mxu1 %v4938_v36  ;;  %v1511_v37 = vrot.slane %v1509_v0, 4  ;;  %v1526_v36 = vrot.slane %v1525_v42, 4  ;;  %v1514_v41 = vrot.slane %v1512_v40, 5  ;;  %v1536_v42 = vshll.u32 %v7549_v38, 16  ;;  %v7560_v0 = vld [vmem:[#allocation2 + $0x1c] sm:$0xf] }
 0x2f4   : > { %5538 = vmatpush3.bf16.msra.mxu1 %v6066_v21  ;;  %5525 = vmatprep.mubr.bf16.mxu1 %v4939_v31  ;;  %v7520_v21 = vcombine.low %v2779_v1, %v2789_v32  ;;  %v1533_v31 = vshrl.u32 %v7549_v38, 16  ;;  %v1497_v61 = vsel %vm7353_vm15, %v1492_v53, %v8205_v8  ;;  %v1546_v1 = vshrl.u32 %v7560_v0, 16  ;;  %v8206_v32 = vld [vmem:[#allocation37_spill] sm:$0xff] }
 0x2f5   : > { %5539 = vmatprep.subr.bf16.mxu1 %v6067_v7  ;;  %v1515_v25 = vor.u32 %v1514_v41, %v1511_v37  ;;  %v1531_v57 = vsel %vm7353_vm15, %v1526_v36, %v8204_v58  ;;  %v1552_v40 = vshll.u32 %v8206_v32, 16  ;;  %v4865_v33 = vcombine.low %v1497_v61, %v1507_v9  ;;  %v6070_v8 = vld [vmem:[#allocation11 + $0x160] sm:$0xff]  }
 0x2f6   : > { %v1535_v36 = vrot.slane %v1533_v31, 4  ;;  %v1538_v41 = vrot.slane %v1536_v42, 5  ;;  %v1548_v53 = vrot.slane %v1546_v1, 4  ;;  %v6140_v31 = vld [vmem:[#allocation2 + $0x2c] sm:$0x1] }
 0x2f7   : > { %v1516_v50 = vrot.slane %v1515_v25, 4  ;;  %5393 = vmatprep.mubr.bf16.mxu0 %v4865_v33  ;;  %v1576_v42 = vshll.u32 %v6140_v31, 16 }
 0x2f8   : > { %5540 = vmatpush3.bf16.msra.mxu1 %v6067_v7  ;;  %v7555_v7 = vld [vmem:[#allocation2 + $0x24] sm:$0xf]  ;;  %v1539_v32 = vor.u32 %v1538_v41, %v1535_v36  ;;  %v6142_v41 = vld [vmem:[#allocation2 + $0x38] sm:$0x1] }
 0x2f9   : > { %5541 = vmatprep.subr.bf16.mxu1 %v6068_v59  ;;  %v1557_v13 = vshrl.u32 %v7555_v7, 16  ;;  %v1521_v37 = vsel %vm7353_vm15, %v1516_v50, %v7270_v2  ;;  %v1560_v9 = vshll.u32 %v7555_v7, 16 }
 0x2fa   : > { %v4866_v25 = vcombine.low %v1521_v37, %v1531_v57  ;;  %v1554_v57 = vrot.slane %v1552_v40, 5  ;;  %v1540_v61 = vrot.slane %v1539_v32, 4  ;;  %v1578_v40 = vrot.slane %v1576_v42, 5 }
 0x2fb   : > { %5526 = vmatmul.mubr.bf16.gmra.mrb[4].mxu1 %v4940_v39  ;;  %v1559_v58 = vrot.slane %v1557_v13, 4  ;;  %v7570_v39 = vld [vmem:[#allocation2 + $0x28] sm:$0xf]  ;;  %v1562_v1 = vrot.slane %v1560_v9, 5 }
 0x2fc   : > { %5542 = vmatpush3.bf16.msra.mxu1 %v6068_v59  ;;  %5529 = vmatprep.mubr.bf16.mxu1 %v4941_v29  ;;  %v1566_v2 = vshll.u32 %v7570_v39, 16  ;;  %v1570_v50 = vshrl.u32 %v7570_v39, 16  ;;  %v7574_v59 = vcombine.low %v2803_v16, %v2813_v48  ;;  %v1549_v29 = vor.u32 %v1548_v53, %v7553_v30  ;;  %v7604_v53 = vld [vmem:[#allocation2 + $0x40] sm:$0xf] }
 0x2fd   : > { %5543 = vmatprep.subr.bf16.mxu1 %v6069_v15  ;;  %5394 = vmatmul.mubr.bf16.vlgmr.msra.gmra.mrb[24].mxu0 %v4866_v25  ;;  %v7583_v16 = vsel %vm7204_vm12, %v7450_v22, %v3068_v23  ;;  %v7591_v48 = vsel %vm7204_vm12, %v4955_v56, %v3072_v3  ;;  %v1545_v26 = vsel %vm7353_vm15, %v1540_v61, %v7553_v30  ;;  %v7596_v23 = vld [vmem:[#allocation2 + $0x34] sm:$0xf]  ;;  %v6096_v56 = vld [vmem:[#allocation11 + $0x10] sm:$0xff]   ;;  %v7601_v3 = vld [vmem:[#allocation2 + $0x30] sm:$0xf]  ;;  %v1600_v25 = vshll.u32 %v6142_v41, 16 }
 0x2fe   : > { %5410 = vmatpush3.bf16.msra.mxu0 %v7489_v6  ;;  %v1568_v13 = vrot.slane %v1566_v2, 5  ;;  %v1572_v33 = vrot.slane %v1570_v50, 4  ;;  %v1550_v6 = vrot.slane %v1549_v29, 4  ;;  %v1563_v37 = vor.u32 %v1562_v1, %v1559_v58  ;;  %v6072_v58 = vld [vmem:[#allocation11 + $0x170] sm:$0xff]   ;;  %v6100_v50 = vld [vmem:[#allocation11 + $0x18] sm:$0xff]  }
 0x2ff   : > { %5411 = vmatprep.subr.bf16.mxu0 %v6094_v63  ;;  %v1590_v5 = vshll.u32 %v7596_v23, 16  ;;  %v1594_v36 = vshrl.u32 %v7596_v23, 16  ;;  %v1614_v30 = vshll.u32 %v7604_v53, 16  ;;  %v1581_v29 = vshrl.u32 %v7601_v3, 16  ;;  %v6144_v41 = vld [vmem:[#allocation2 + $0x44] sm:$0x1] }
 0x300   : > { %5544 = vmatpush3.bf16.msra.mxu1 %v6069_v15  ;;  %v6071_v15 = vld [vmem:[#allocation11 + $0x168] sm:$0xff]   ;;  %v1573_v22 = vor.u32 %v1572_v33, %v1568_v13  ;;  %v1555_v17 = vsel %vm7353_vm15, %v1550_v6, %v1554_v57  ;;  %v1564_v9 = vrot.slane %v1563_v37, 4  ;;  %v7609_v57 = vld [vmem:[#allocation2 + $0x3c] sm:$0xf]  ;;  %v1584_v31 = vshll.u32 %v7601_v3, 16 }
 0x301   : > { %5545 = vmatprep.subr.bf16.mxu1 %v6070_v8  ;;  %v4867_v32 = vcombine.low %v1545_v26, %v1555_v17  ;;  %v1592_v42 = vrot.slane %v1590_v5, 5  ;;  %v1596_v61 = vrot.slane %v1594_v36, 4  ;;  %v1602_v1 = vrot.slane %v1600_v25, 5 }
 0x302   : > { %5412 = vmatpush3.bf16.msra.mxu0 %v6094_v63  ;;  %v1574_v2 = vrot.slane %v1573_v22, 4  ;;  %v1583_v33 = vrot.slane %v1581_v29, 4  ;;  %v1605_v6 = vshrl.u32 %v7609_v57, 16  ;;  %v1608_v37 = vshll.u32 %v7609_v57, 16  ;;  %v6073_v22 = vld [vmem:[#allocation11 + $0x178] sm:$0xff]   ;;  %v6102_v29 = vld [vmem:[#allocation11 + $0x20] sm:$0xff]  }
 0x303   : > { %5530 = vmatmul.mubr.bf16.gmra.mrb[8].mxu1 %v7484_v24  ;;  %5397 = vmatprep.mubr.bf16.mxu0 %v4867_v32  ;;  %v1569_v24 = vsel %vm7353_vm15, %v1564_v9, %v1568_v13  ;;  %v1616_v17 = vrot.slane %v1614_v30, 5  ;;  %v1618_v36 = vshrl.u32 %v7604_v53, 16  ;;  %v1624_v13 = vshll.u32 %v6144_v41, 16 }
 0x304   : > { %5546 = vmatpush3.bf16.msra.mxu1 %v6070_v8  ;;  %5533 = vmatprep.mubr.bf16.mxu1 %v7520_v21  ;;  %v1579_v63 = vsel %vm7353_vm15, %v1574_v2, %v1578_v40  ;;  %v1586_v8 = vrot.slane %v1584_v31, 5  ;;  %v1597_v21 = vor.u32 %v1596_v61, %v1592_v42  ;;  %v1607_v5 = vrot.slane %v1605_v6, 4  ;;  %v7647_v6 = vld [vmem:[#allocation2 + $0x48] sm:$0xf] }
 0x305   : > { %5547 = vmatprep.subr.bf16.mxu1 %v6071_v15  ;;  %v4868_v26 = vcombine.low %v1569_v24, %v1579_v63  ;;  %5413 = vmatprep.subr.bf16.mxu0 %v6096_v56  ;;  %v7625_v40 = vsel %vm7204_vm12, %v7501_v11, %v3075_v60  ;;  %v1610_v9 = vrot.slane %v1608_v37, 5  ;;  %v7631_v30 = vrot.slane %v3086_v14, 4 }
 0x306   : > { %5414 = vmatpush3.bf16.msra.mxu0 %v6096_v56  ;;  %v1587_v25 = vor.u32 %v1586_v8, %v1583_v33  ;;  %v1598_v32 = vrot.slane %v1597_v21, 4  ;;  %v4962_v56 = vcombine.low %v7530_v19, %v7583_v16  ;;  %v1620_v35 = vrot.slane %v1618_v36, 4  ;;  %v6146_v21 = vld [vmem:[#allocation2 + $0x50] sm:$0x1]  ;;  %v8209_v16 = vld [vmem:[#allocation43_spill] sm:$0xff] }
 0x307   : > { %5398 = vmatmul.mubr.bf16.gmra.mrb[28].mxu0 %v4868_v26  ;;  %5415 = vmatprep.subr.bf16.mxu0 %v6100_v50  ;;  %v1611_v11 = vor.u32 %v1610_v9, %v1607_v5  ;;  %v1626_v61 = vrot.slane %v1624_v13, 5  ;;  %v4963_v24 = vcombine.low %v7591_v48, %v7625_v40  ;;  %v7645_v63 = vsel %vm7204_vm12, %v4956_v62, %v3079_v28  ;;  %v7656_v62 = vld [vmem:[#allocation2 + $0x54] sm:$0xf]  ;;  %v6075_v28 = vld [vmem:[#allocation11 + $0x180] sm:$0xff]   ;;  %v6077_v5 = vld [vmem:[#allocation11 + $0x188] sm:$0xff]  }
 0x308   : > { %5548 = vmatpush3.bf16.msra.mxu1 %v6071_v15  ;;  %v8207_v15 = vld [vmem:[#allocation41_spill] sm:$0xff]  ;;  %v1588_v31 = vrot.slane %v1587_v25, 4  ;;  %v1603_v60 = vsel %vm7353_vm15, %v1598_v32, %v1602_v1  ;;  %v1621_v33 = vor.u32 %v1620_v35, %v1616_v17  ;;  %v1629_v45 = vshrl.u32 %v7647_v6, 16 }
 0x309   : > { %5549 = vmatprep.subr.bf16.mxu1 %v6072_v58  ;;  %v3089_v2 = vrot.slane %v8207_v15, 5  ;;  %v1612_v48 = vrot.slane %v1611_v11, 4  ;;  %v1632_v1 = vshll.u32 %v7647_v6, 16  ;;  %v1648_v37 = vshll.u32 %v6146_v21, 16 }
 0x30a   : > { %5416 = vmatpush3.bf16.msra.mxu0 %v6100_v50  ;;  %v1622_v26 = vrot.slane %v1621_v33, 4  ;;  %v1653_v40 = vshrl.u32 %v7656_v62, 16  ;;  %v3029_v33 = vld [vmem:[#allocation2 + $0x48] sm:$0xe]  ;;  %v3087_v19 = vsel %vm7204_vm12, %v4957_v4, %v3086_v14  ;;  %v3100_v55 = vrot.slane %v8209_v16, 5  ;;  %v6112_v14 = vld [vmem:[#allocation11 + $0x38] sm:$0xff]  }
 0x30b   : > { %5534 = vmatmul.mubr.bf16.gmra.mrb[12].mxu1 %v7574_v59  ;;  %v1593_v59 = vsel %vm7353_vm15, %v1588_v31, %v1592_v42  ;;  %5417 = vmatprep.subr.bf16.mxu0 %v6102_v29  ;;  %v1631_v42 = vrot.slane %v1629_v45, 4  ;;  %v1634_v8 = vrot.slane %v1632_v1, 5  ;;  %v1650_v9 = vrot.slane %v1648_v37, 5  ;;  %v6148_v1 = vld [vmem:[#allocation2 + $0x5c] sm:$0x1] }
 0x30c   : > { %5550 = vmatpush3.bf16.msra.mxu1 %v6072_v58  ;;  %5553 = vmatprep.mubr.bf16.mxu1 %v4961_v47  ;;  %v4869_v50 = vcombine.low %v1593_v59, %v1603_v60  ;;  %v7658_v58 = vld [vmem:[#allocation2 + $0x4c] sm:$0xf]  ;;  %v1617_v47 = vsel %vm7353_vm15, %v1612_v48, %v1616_v17  ;;  %v1627_v36 = vsel %vm7353_vm15, %v1622_v26, %v1626_v61  ;;  %v1656_v17 = vshll.u32 %v7656_v62, 16  ;;  %v7668_v60 = vld [vmem:[#allocation2 + $0x58] sm:$0xf]  ;;  %v8208_v59 = vld [vmem:[#allocation42_spill] sm:$0xff] }
 0x30d   : > { %5551 = vmatprep.subr.bf16.mxu1 %v6073_v22  ;;  %v1638_v51 = vshll.u32 %v7658_v58, 16  ;;  %v1642_v44 = vshrl.u32 %v7658_v58, 16  ;;  %v4870_v25 = vcombine.low %v1617_v47, %v1627_v36  ;;  %v1635_v32 = vor.u32 %v1634_v8, %v1631_v42  ;;  %v6108_v61 = vld [vmem:[#allocation11 + $0x30] sm:$0xff]   ;;  %v3030_v4 = vld [vmem:[#allocation2 + $0x54] sm:$0xe]  ;;  %v6091_v16 = vld [vmem:[#allocation2 + $0x18] sm:$0xff]  }
 0x30e   : > { %5401 = vmatprep.mubr.bf16.mxu0 %v4869_v50  ;;  %5418 = vmatpush3.bf16.msra.mxu0 %v6102_v29  ;;  %v1655_v31 = vrot.slane %v1653_v40, 4  ;;  %v1662_v11 = vshll.u32 %v7668_v60, 16  ;;  %v1666_v29 = vshrl.u32 %v7668_v60, 16  ;;  %v3093_v48 = vrot.slane %v8208_v59, 5  ;;  %v6079_v42 = vld [vmem:[#allocation11 + $0x190] sm:$0xff]  }
 0x30f   : > { %v1640_v41 = vrot.slane %v1638_v51, 5  ;;  %v1644_v13 = vrot.slane %v1642_v44, 4  ;;  %5419 = vmatprep.subr.bf16.mxu0 %v6106_v43  ;;  %5402 = vmatmul.mubr.bf16.gmra.mrb[32].mxu0 %v4870_v25  ;;  %v1658_v45 = vrot.slane %v1656_v17, 5  ;;  %v1672_v50 = vshll.u32 %v6148_v1, 16  ;;  %v8210_v25 = vld [vmem:[#allocation45_spill] sm:$0xff] }
 0x310   : > { %5552 = vmatpush3.bf16.msra.mxu1 %v6073_v22  ;;  %v1636_v22 = vrot.slane %v1635_v32, 4  ;;  %v3083_v26 = vsel %vm7204_vm12, %v7538_v10, %v3082_v52  ;;  %v1664_v44 = vrot.slane %v1662_v11, 5  ;;  %v1668_v47 = vrot.slane %v1666_v29, 4  ;;  %v6083_v29 = vld [vmem:[#allocation11 + $0x1a0] sm:$0xff]  }
 0x311   : > { %5569 = vmatprep.subr.bf16.mxu1 %v6075_v28  ;;  %v1645_v35 = vor.u32 %v1644_v13, %v1640_v41  ;;  %v1659_v52 = vor.u32 %v1658_v45, %v1655_v31  ;;  %v3090_v10 = vsel %vm7204_vm12, %v7631_v30, %v3089_v2  ;;  %v4964_v8 = vcombine.low %v7645_v63, %v3083_v26  ;;  %v8211_v31 = vld [vmem:[#allocation44_spill] sm:$0xff] }
 0x312   : > { %5420 = vmatpush3.bf16.msra.mxu0 %v6106_v43  ;;  %v1669_v12 = vor.u32 %v1668_v47, %v1664_v44  ;;  %v4958_v21 = vrot.slane %v3029_v33, 9  ;;  %v4965_v15 = vcombine.low %v3087_v19, %v3090_v10  ;;  %v3095_v36 = vrot.slane %v3093_v48, 4  ;;  %v3031_v33 = vld [vmem:[#allocation2 + $0x60] sm:$0xe]  ;;  %v6150_v26 = vld [vmem:[#allocation2 + $0x10] sm:$0xf] }
 0x313   : > { %5554 = vmatmul.mubr.bf16.vlgmr.msra.gmra.mrb[0].mxu1 %v4962_v56  ;;  %v1646_v51 = vrot.slane %v1645_v35, 4  ;;  %v1641_v56 = vsel %vm7353_vm15, %v1636_v22, %v1640_v41  ;;  %5421 = vmatprep.subr.bf16.mxu0 %v6108_v61  ;;  %v3096_v30 = vrot.slane %v7362_v49, 5  ;;  %v6081_v41 = vld [vmem:[#allocation11 + $0x198] sm:$0xff]   ;;  %v4959_v13 = vrot.slane %v3030_v4, 9  ;;  %v6087_v19 = vld [vmem:[#allocation11 + $0x1b0] sm:$0xff]  }
 0x314   : > { %5570 = vmatpush3.bf16.msra.mxu1 %v6075_v28  ;;  %5557 = vmatprep.mubr.bf16.mxu1 %v4963_v24  ;;  %v1674_v24 = vrot.slane %v1672_v50, 5  ;;  %v1660_v28 = vrot.slane %v1659_v52, 4  ;;  %v1670_v37 = vrot.slane %v1669_v12, 4  ;;  %v3102_v40 = vrot.slane %v3100_v55, 4  ;;  %v6085_v50 = vld [vmem:[#allocation11 + $0x1a8] sm:$0xff]  }
 0x315   : > { %5571 = vmatprep.subr.bf16.mxu1 %v6077_v5  ;;  %v1651_v46 = vsel %vm7353_vm15, %v1646_v51, %v1650_v9  ;;  %v3103_v32 = vrot.slane %v8210_v25, 5  ;;  %v3094_v49 = vsel %vm7204_vm12, %v4958_v21, %v3093_v48  ;;  %v3097_v35 = vsel %vm7204_vm12, %v3095_v36, %v3096_v30  ;;  %v7726_v52 = vld [vmem:[#allocation2 + $0x1c] sm:$0xf]  ;;  %v3568_v10 = vld [vmem:[#allocation2 + $0x24] sm:$0xf]  ;;  %v6099_v36 = vld [vmem:[#allocation11 + $0x1d0] sm:$0xff]  }
 0x316   : > { %v4871_v43 = vcombine.low %v1641_v56, %v1651_v46  ;;  %5422 = vmatpush3.bf16.msra.mxu0 %v6108_v61  ;;  %v1665_v2 = vsel %vm7353_vm15, %v1660_v28, %v1664_v44  ;;  %v1675_v63 = vsel %vm7353_vm15, %v1670_v37, %v1674_v24  ;;  %v3107_v11 = vrot.slane %v8211_v31, 5  ;;  %v6093_v56 = vld [vmem:[#allocation11 + $0x1c0] sm:$0xff]   ;;  %v6092_v46 = vld [vmem:[#allocation2 + $0x24] sm:$0xff]   ;;  %v7736_v21 = vld [vmem:[#allocation2 + $0x20] sm:$0x1] }
 0x317   : > { %5423 = vmatprep.subr.bf16.mxu0 %v6112_v14  ;;  %v4872_v9 = vcombine.low %v1665_v2, %v1675_v63  ;;  %v3101_v61 = vsel %vm7204_vm12, %v4959_v13, %v3100_v55  ;;  %v4966_v59 = vcombine.low %v3094_v49, %v3097_v35  ;;  %v4960_v48 = vrot.slane %v3031_v33, 9  ;;  %v3565_v55 = vld [vmem:[#allocation2 + $0x18] sm:$0xf]  ;;  %v7732_v28 = vld [vmem:[#allocation2 + $0x28] sm:$0xf]  ;;  %v6101_v63 = vld [vmem:[#allocation11 + $0x1d8] sm:$0xff]  }
 0x318   : > { %5572 = vmatpush3.bf16.msra.mxu1 %v6077_v5  ;;  %5405 = vmatprep.mubr.bf16.mxu0 %v4871_v43  ;;  %v6149_v5 = vld [vmem:[#allocation2 + $0x4] sm:$0xf]  ;;  %v3109_v45 = vrot.slane %v3107_v11, 4  ;;  %v3110_v1 = vrot.slane %v7388_v20, 5  ;;  %v4882_v51 = vcombine.low %v7482_v34, %v6150_v26  ;;  %v4883_v44 = vcombine.low %v7549_v38, %v7560_v0  ;;  %v6089_v34 = vld [vmem:[#allocation11 + $0x1b8] sm:$0xff]  }
 0x319   : > { %5573 = vmatprep.subr.bf16.mxu1 %v6079_v42  ;;  %v4881_v17 = vcombine.low %v7480_v54, %v6149_v5  ;;  %v3104_v54 = vsel %vm7204_vm12, %v3102_v40, %v3103_v32  ;;  %5406 = vmatmul.mubr.bf16.gmra.mrb[36].mxu0 %v4872_v9  ;;  %v3108_v47 = vsel %vm7204_vm12, %v4960_v48, %v3107_v11  ;;  %v3590_v12 = vshrl.u32 %v3565_v55, 16  ;;  %v6098_v40 = vld [vmem:[#allocation2 + $0x3c] sm:$0xff]   ;;  %v3571_v32 = vld [vmem:[#allocation2 + $0x30] sm:$0xf]  ;;  %v6103_v9 = vld [vmem:[#allocation2 + $0x48] sm:$0xff]  }
 0x31a   : > { %5424 = vmatpush3.bf16.msra.mxu0 %v6112_v14  ;;  %v4967_v22 = vcombine.low %v3101_v61, %v3104_v54  ;;  %v4884_v38 = vcombine.low %v7555_v7, %v7570_v39  ;;  %v4885_v0 = vcombine.low %v7601_v3, %v7596_v23  ;;  %v3593_v24 = vshll.u32 %v3565_v55, 16  ;;  %v6095_v14 = vld [vmem:[#allocation11 + $0x1c8] sm:$0xff]   ;;  %v6097_v7 = vld [vmem:[#allocation2 + $0x30] sm:$0xff]  }
 0x31b   : > { %5558 = vmatmul.mubr.bf16.gmra.mrb[4].mxu1 %v4964_v8  ;;  %5425 = vmatprep.mubr.bf16.mxu0 %v4881_v17  ;;  %v3599_v39 = vshll.u32 %v7726_v52, 16  ;;  %v3603_v23 = vshrl.u32 %v7726_v52, 16  ;;  %v3614_v3 = vshrl.u32 %v3568_v10, 16  ;;  %v3617_v4 = vshll.u32 %v3568_v10, 16  ;;  %v7747_v49 = vld [vmem:[#allocation2 + $0x34] sm:$0xf] }
 0x31c   : > { %5574 = vmatpush3.bf16.msra.mxu1 %v6079_v42  ;;  %5561 = vmatprep.mubr.bf16.mxu1 %v4965_v15  ;;  %v3111_v42 = vsel %vm7204_vm12, %v3109_v45, %v3110_v1  ;;  %v4886_v43 = vcombine.low %v7609_v57, %v7604_v53  ;;  %v4887_v8 = vcombine.low %v7647_v6, %v7658_v58  ;;  %v3592_v37 = vrot.slane %v3590_v12, 4  ;;  %v3574_v45 = vld [vmem:[#allocation2 + $0x3c] sm:$0xf]  ;;  %v7762_v10 = vld [vmem:[#allocation2 + $0x4c] sm:$0xf] }
 0x31d   : > { %5575 = vmatprep.subr.bf16.mxu1 %v6081_v41  ;;  %v4968_v20 = vcombine.low %v3108_v47, %v3111_v42  ;;  %v3595_v15 = vrot.slane %v3593_v24, 5  ;;  %v7738_v30 = vrot.slane %v3599_v39, 5  ;;  %v3605_v2 = vrot.slane %v3603_v23, 4  ;;  %v7758_v47 = vld [vmem:[#allocation2 + $0x40] sm:$0xf] }
 0x31e   : > { %v3616_v53 = vrot.slane %v3614_v3, 4  ;;  %v3619_v57 = vrot.slane %v3617_v4, 5  ;;  %v3623_v13 = vshll.u32 %v7732_v28, 16  ;;  %v3627_v6 = vshrl.u32 %v7732_v28, 16  ;;  %v6109_v42 = vld [vmem:[#allocation2 + $0x60] sm:$0xff]  }
 0x31f   : > { %v3609_v58 = vshll.u32 %v7736_v21, 16  ;;  %v3596_v25 = vor.u32 %v3595_v15, %v3592_v37  ;;  %v3606_v5 = vor.u32 %v3605_v2, %v7738_v30  ;;  %v3638_v54 = vshrl.u32 %v3571_v32, 16  ;;  %v6111_v2 = vld [vmem:[#allocation11 + $0x1f0] sm:$0xff]  }
 0x320   : > { %5576 = vmatpush3.bf16.msra.mxu1 %v6081_v41  ;;  %v7740_v41 = vld [vmem:[#allocation2 + $0x2c] sm:$0x1]  ;;  %v3620_v35 = vor.u32 %v3619_v57, %v3616_v53  ;;  %v7749_v31 = vrot.slane %v3623_v13, 5  ;;  %v3629_v11 = vrot.slane %v3627_v6, 4  ;;  %v3641_v33 = vshll.u32 %v3571_v32, 16 }
 0x321   : > { %5577 = vmatprep.subr.bf16.mxu1 %v6083_v29  ;;  %5426 = vmatmul.mubr.bf16.vlgmr.msra.gmra.mrb[24].mxu0 %v4882_v51  ;;  %v3633_v17 = vshll.u32 %v7740_v41, 16  ;;  %v3611_v61 = vrot.slane %v3609_v58, 5  ;;  %v3647_v48 = vshll.u32 %v7747_v49, 16  ;;  %v3607_v1 = vrot.slane %v3606_v5, 4  ;;  %v6104_v51 = vld [vmem:[#allocation2 + $0x54] sm:$0xff]   ;;  %v6110_v6 = vld [vmem:[#allocation2 + $0x6c] sm:$0xff]  }
 0x322   : > { %5429 = vmatprep.mubr.bf16.mxu0 %v4883_v44  ;;  %v3651_v26 = vshrl.u32 %v7747_v49, 16  ;;  %v3621_v44 = vrot.slane %v3620_v35, 4  ;;  %v3671_v24 = vshll.u32 %v7758_v47, 16  ;;  %v3695_v4 = vshll.u32 %v7762_v10, 16  ;;  %v7780_v13 = vld [vmem:[#allocation2 + $0x44] sm:$0x1] }
 0x323   : > { %5562 = vmatmul.mubr.bf16.gmra.mrb[8].mxu1 %v4966_v59  ;;  %v6105_v59 = vld [vmem:[#allocation11 + $0x1e0] sm:$0xff]   ;;  %v3612_v3 = vsel %vm7353_vm15, %v3607_v1, %v3611_v61  ;;  %v3580_v35 = vld [vmem:[#allocation2 + $0x54] sm:$0xf]  ;;  %v3681_v61 = vshll.u32 %v7780_v13, 16 }
 0x324   : > { %5578 = vmatpush3.bf16.msra.mxu1 %v6083_v29  ;;  %5565 = vmatprep.mubr.bf16.mxu1 %v4967_v22  ;;  %v4888_v29 = vcombine.low %v7656_v62, %v7668_v60  ;;  %v3597_v22 = vrot.slane %v3596_v25, 4  ;;  %v3630_v62 = vor.u32 %v3629_v11, %v7749_v31  ;;  %v3635_v60 = vrot.slane %v3633_v17, 5 }
 0x325   : > { %5579 = vmatprep.subr.bf16.mxu1 %v6085_v50  ;;  %v3653_v55 = vrot.slane %v3651_v26, 4  ;;  %v7782_v58 = vrot.slane %v3671_v24, 5  ;;  %v7786_v5 = vrot.slane %v3695_v4, 5  ;;  %v3710_v1 = vshrl.u32 %v3580_v35, 16  ;;  %v3583_v26 = vld [vmem:[#allocation2 + $0x60] sm:$0xf] }
 0x326   : > { %v3602_v23 = vsel %vm7353_vm15, %v3597_v22, %v7738_v30  ;;  %v3626_v30 = vsel %vm7353_vm15, %v3621_v44, %v7749_v31 }
 0x328   : > { %5580 = vmatpush3.bf16.msra.mxu1 %v6085_v50  ;;  %v7754_v50 = vld [vmem:[#allocation2 + $0x38] sm:$0x1] }
 0x329   : > { %5581 = vmatprep.subr.bf16.mxu1 %v6087_v19  ;;  %5430 = vmatmul.mubr.bf16.gmra.mrb[28].mxu0 %v4884_v38  ;;  %v3662_v38 = vshrl.u32 %v3574_v45, 16  ;;  %v3657_v12 = vshll.u32 %v7754_v50, 16 }
 0x32a   : > { %5433 = vmatprep.mubr.bf16.mxu0 %v4885_v0  ;;  %v3577_v0 = vld [vmem:[#allocation2 + $0x48] sm:$0xf] }
 0x32b   : > { %5566 = vmatmul.mubr.bf16.gmra.mrb[12].mxu1 %v4968_v20  ;;  %v3643_v20 = vrot.slane %v3641_v33, 5  ;;  %v3689_v39 = vshll.u32 %v3577_v0, 16  ;;  %v3664_v15 = vrot.slane %v3662_v38, 4  ;;  %v3659_v57 = vrot.slane %v3657_v12, 5  ;;  %v6113_v33 = vld [vmem:[#allocation11 + $0x1f8] sm:$0xff]  }
 0x32c   : > { %5582 = vmatpush3.bf16.msra.mxu1 %v6087_v19  ;;  %5585 = vmatprep.mubr.bf16.mxu1 %v6091_v16  ;;  %v3640_v19 = vrot.slane %v3638_v54, 4  ;;  %v6107_v16 = vld [vmem:[#allocation11 + $0x1e8] sm:$0xff]   ;;  %v7789_v54 = vld [vmem:[#allocation2 + $0x58] sm:$0xf]  ;;  %v3683_v38 = vrot.slane %v3681_v61, 5 }
 0x32d   : > { %5583 = vmatprep.subr.bf16.mxu1 %v6089_v34  ;;  %v3691_v32 = vrot.slane %v3689_v39, 5  ;;  %v3712_v39 = vrot.slane %v3710_v1, 4 }
 0x330   : > { %5584 = vmatpush3.bf16.msra.mxu1 %v6089_v34  ;;  %v7760_v34 = vrot.slane %v3647_v48, 5 }
 0x331   : > { %5601 = vmatprep.subr.bf16.mxu1 %v6093_v56  ;;  %5434 = vmatmul.mubr.bf16.gmra.mrb[32].mxu0 %v4886_v43  ;;  %v3699_v43 = vshrl.u32 %v7762_v10, 16 }
 0x332   : > { %5437 = vmatprep.mubr.bf16.mxu0 %v4887_v8  ;;  %v3644_v8 = vor.u32 %v3643_v20, %v3640_v19  ;;  %v3654_v37 = vor.u32 %v3653_v55, %v7760_v34  ;;  %v3734_v55 = vshrl.u32 %v3583_v26, 16 }
 0x333   : > { %5586 = vmatmul.mubr.bf16.vlgmr.msra.gmra.mrb[0].mxu1 %v6092_v46  ;;  %v3631_v46 = vrot.slane %v3630_v62, 4  ;;  %v3701_v17 = vrot.slane %v3699_v43, 4  ;;  %v3713_v62 = vshll.u32 %v3580_v35, 16 }
 0x334   : > { %5602 = vmatpush3.bf16.msra.mxu1 %v6093_v56  ;;  %5589 = vmatprep.mubr.bf16.mxu1 %v6097_v7  ;;  %v3665_v56 = vshll.u32 %v3574_v45, 16  ;;  %v3686_v7 = vshrl.u32 %v3577_v0, 16  ;;  %v3645_v31 = vrot.slane %v3644_v8, 4  ;;  %v3655_v11 = vrot.slane %v3654_v37, 4  ;;  %v6116_v0 = vld [vmem:[#allocation11 + $0x200] sm:$0xff]   ;;  %v6117_v8 = vld [vmem:[#allocation11 + $0x208] sm:$0xff]  }
 0x335   : > { %5603 = vmatprep.subr.bf16.mxu1 %v6095_v14  ;;  %v3636_v53 = vsel %vm7353_vm15, %v3631_v46, %v3635_v60  ;;  %v3702_v44 = vor.u32 %v3701_v17, %v7786_v5  ;;  %v3719_v60 = vshll.u32 %v7789_v54, 16 }
 0x336   : > { %v3688_v25 = vrot.slane %v3686_v7, 4  ;;  %v3650_v19 = vsel %vm7353_vm15, %v3645_v31, %v7760_v34  ;;  %v3660_v20 = vsel %vm7353_vm15, %v3655_v11, %v3659_v57  ;;  %v3715_v34 = vrot.slane %v3713_v62, 5  ;;  %v7809_v57 = vld [vmem:[#allocation2 + $0x70] sm:$0xf] }
 0x337   : > { %v7807_v4 = vrot.slane %v3719_v60, 5  ;;  %v4995_v37 = vcombine.low %v3650_v19, %v3660_v20  ;;  %v3771_v61 = vshrl.u32 %v7809_v57, 16  ;;  %v6121_v20 = vld [vmem:[#allocation11 + $0x218] sm:$0xff]  }
 0x338   : > { %5604 = vmatpush3.bf16.msra.mxu1 %v6095_v14  ;;  %v3675_v14 = vshrl.u32 %v7758_v47, 16  ;;  %v3692_v48 = vor.u32 %v3691_v32, %v3688_v25  ;;  %v7817_v32 = vld [vmem:[#allocation2 + $0x68] sm:$0x1]  ;;  %v3716_v35 = vor.u32 %v3715_v34, %v3712_v39  ;;  %v4025_v34 = vrot.slane %v7726_v52, 5 }
 0x339   : > { %5605 = vmatprep.subr.bf16.mxu1 %v6099_v36  ;;  %5438 = vmatmul.mubr.bf16.gmra.mrb[36].mxu0 %v4888_v29  ;;  %v3773_v19 = vrot.slane %v3771_v61, 4 }
 0x33a   : > { %v3717_v1 = vrot.slane %v3716_v35, 4 }
 0x33b   : > { %5590 = vmatmul.mubr.bf16.gmra.mrb[4].mxu1 %v6098_v40  ;;  %v3677_v40 = vrot.slane %v3675_v14, 4  ;;  %v3693_v14 = vrot.slane %v3692_v48, 4 }
 0x33c   : > { %5606 = vmatpush3.bf16.msra.mxu1 %v6099_v36  ;;  %5593 = vmatprep.mubr.bf16.mxu1 %v6103_v9  ;;  %v3667_v36 = vrot.slane %v3665_v56, 5  ;;  %v7784_v9 = vld [vmem:[#allocation2 + $0x50] sm:$0x1]  ;;  %v3737_v56 = vshll.u32 %v3583_v26, 16 }
 0x33d   : > { %5607 = vmatprep.subr.bf16.mxu1 %v6101_v63  ;;  %v3678_v22 = vor.u32 %v3677_v40, %v7782_v58  ;;  %v3705_v45 = vshll.u32 %v7784_v9, 16 }
 0x33e   : > { %v3668_v29 = vor.u32 %v3667_v36, %v3664_v15  ;;  %v3586_v15 = vld [vmem:[#allocation2 + $0x6c] sm:$0xf]  ;;  %v3736_v36 = vrot.slane %v3734_v55, 4  ;;  %v7828_v55 = vld [vmem:[#allocation2 + $0x74] sm:$0x1] }
 0x33f   : > { %v3679_v24 = vrot.slane %v3678_v22, 4  ;;  %v3707_v7 = vrot.slane %v3705_v45, 5  ;;  %v3761_v11 = vshll.u32 %v3586_v15, 16 }
 0x340   : > { %5608 = vmatpush3.bf16.msra.mxu1 %v6101_v63  ;;  %v4993_v63 = vcombine.low %v3602_v23, %v3612_v3  ;;  %v3703_v23 = vrot.slane %v3702_v44, 4  ;;  %v7805_v3 = vld [vmem:[#allocation2 + $0x5c] sm:$0x1] }
 0x341   : > { %5609 = vmatprep.subr.bf16.mxu1 %v6105_v59  ;;  %v3684_v40 = vsel %vm7353_vm15, %v3679_v24, %v3683_v38  ;;  %v3729_v25 = vshll.u32 %v7805_v3, 16  ;;  %v3763_v60 = vrot.slane %v3761_v11, 5 }
 0x342   : > { %v3708_v17 = vsel %vm7353_vm15, %v3703_v23, %v3707_v7  ;;  %v6124_v7 = vld [vmem:[#allocation11 + $0x220] sm:$0xff]  }
 0x343   : > { %5594 = vmatmul.mubr.bf16.gmra.mrb[8].mxu1 %v6104_v51  ;;  %v7793_v51 = vld [vmem:[#allocation2 + $0x64] sm:$0xf]  ;;  %v3731_v44 = vrot.slane %v3729_v25, 5  ;;  %v4032_v25 = vrot.slane %v7732_v28, 5  ;;  %v6129_v28 = vld [vmem:[#allocation11 + $0x238] sm:$0xff]  }
 0x344   : > { %5610 = vmatpush3.bf16.msra.mxu1 %v6105_v59  ;;  %5597 = vmatprep.mubr.bf16.mxu1 %v6109_v42  ;;  %v4994_v59 = vcombine.low %v3626_v30, %v3636_v53  ;;  %v3723_v42 = vshrl.u32 %v7789_v54, 16  ;;  %v3743_v46 = vshll.u32 %v7793_v51, 16  ;;  %v3747_v12 = vshrl.u32 %v7793_v51, 16 }
 0x345   : > { %5611 = vmatprep.subr.bf16.mxu1 %v6107_v16  ;;  %v4034_v27 = vrot.slane %v4032_v25, 4 }
 0x346   : > { %v3725_v43 = vrot.slane %v3723_v42, 4  ;;  %v3745_v30 = vrot.slane %v3743_v46, 5  ;;  %v3749_v53 = vrot.slane %v3747_v12, 4 }
 0x348   : > { %5612 = vmatpush3.bf16.msra.mxu1 %v6107_v16  ;;  %v3669_v16 = vrot.slane %v3668_v29, 4  ;;  %v3726_v31 = vor.u32 %v3725_v43, %v7807_v4  ;;  %v3767_v29 = vshll.u32 %v7809_v57, 16  ;;  %v3750_v22 = vor.u32 %v3749_v53, %v3745_v30 }
 0x349   : > { %5613 = vmatprep.subr.bf16.mxu1 %v6111_v2 }
 0x34a   : > { %v3727_v26 = vrot.slane %v3726_v31, 4  ;;  %v3769_v42 = vrot.slane %v3767_v29, 5  ;;  %v3751_v38 = vrot.slane %v3750_v22, 4  ;;  %v4039_v31 = vrot.slane %v7747_v49, 5 }
 0x34b   : > { %5598 = vmatmul.mubr.bf16.gmra.mrb[12].mxu1 %v6110_v6  ;;  %v3674_v6 = vsel %vm7353_vm15, %v3669_v16, %v7782_v58  ;;  %v3758_v58 = vshrl.u32 %v3586_v15, 16 }
 0x34c   : > { %5614 = vmatpush3.bf16.msra.mxu1 %v6111_v2  ;;  %5617 = vmatprep.mubr.bf16.mxu1 %v4993_v63  ;;  %v3739_v2 = vrot.slane %v3737_v56, 5  ;;  %v3698_v63 = vsel %vm7353_vm15, %v3693_v14, %v7786_v5  ;;  %v3753_v5 = vshll.u32 %v7817_v32, 16  ;;  %v4996_v48 = vcombine.low %v3674_v6, %v3684_v40 }
 0x34d   : > { %5615 = vmatprep.subr.bf16.mxu1 %v6113_v33  ;;  %v4997_v45 = vcombine.low %v3698_v63, %v3708_v17  ;;  %v3760_v62 = vrot.slane %v3758_v58, 4  ;;  %v3722_v56 = vsel %vm7353_vm15, %v3717_v1, %v7807_v4  ;;  %v3732_v46 = vsel %vm7353_vm15, %v3727_v26, %v3731_v44  ;;  %v3991_v4 = vld [vmem:[#allocation2 + $0x18] sm:$0xe]  ;;  %v6128_v63 = vld [vmem:[#allocation11 + $0x230] sm:$0xff]   ;;  %v3993_v58 = vld [vmem:[#allocation2 + $0x30] sm:$0xe] }
 0x34e   : > { %v3774_v24 = vor.u32 %v3773_v19, %v3769_v42  ;;  %v3777_v14 = vshll.u32 %v7828_v55, 16  ;;  %v4998_v43 = vcombine.low %v3722_v56, %v3732_v46  ;;  %v5009_v53 = vrot.slane %v3991_v4, 9  ;;  %v3994_v26 = vld [vmem:[#allocation2 + $0x3c] sm:$0xe]  ;;  %v3995_v44 = vld [vmem:[#allocation2 + $0x48] sm:$0xe] }
 0x34f   : > { %v3764_v12 = vor.u32 %v3763_v60, %v3760_v62  ;;  %v4027_v6 = vrot.slane %v4025_v34, 4  ;;  %v4028_v40 = vrot.slane %v7736_v21, 5  ;;  %v3992_v21 = vld [vmem:[#allocation2 + $0x24] sm:$0xe]  ;;  %v4041_v22 = vrot.slane %v4039_v31, 4 }
 0x350   : > { %5616 = vmatpush3.bf16.msra.mxu1 %v6113_v33  ;;  %v6120_v33 = vld [vmem:[#allocation11 + $0x210] sm:$0xff]   ;;  %v3775_v15 = vrot.slane %v3774_v24, 4  ;;  %v4026_v17 = vsel %vm7204_vm12, %v5009_v53, %v4025_v34  ;;  %v5010_v61 = vrot.slane %v3992_v21, 9  ;;  %v4060_v56 = vrot.slane %v7789_v54, 5  ;;  %v6135_v21 = vld [vmem:[#allocation12 + $0x28] sm:$0xff]  }
 0x351   : > { %5633 = vmatprep.subr.bf16.mxu1 %v6116_v0  ;;  %v4029_v35 = vsel %vm7204_vm12, %v4027_v6, %v4028_v40  ;;  %v4067_v24 = vrot.slane %v7793_v51, 5  ;;  %v4063_v34 = vrot.slane %v7805_v3, 5  ;;  %v4070_v54 = vrot.slane %v7817_v32, 5 }
 0x352   : > { %v5017_v29 = vcombine.low %v4026_v17, %v4029_v35  ;;  %v4033_v49 = vsel %vm7204_vm12, %v5010_v61, %v4032_v25  ;;  %v4074_v51 = vrot.slane %v7809_v57, 5  ;;  %v4077_v40 = vrot.slane %v7828_v55, 5  ;;  %v6132_v17 = vld [vmem:[#allocation12 + $0x10] sm:$0xff]   ;;  %v6133_v55 = vld [vmem:[#allocation12 + $0x18] sm:$0xff]   ;;  %v6134_v35 = vld [vmem:[#allocation12 + $0x20] sm:$0xff]  }
 0x353   : > { %5618 = vmatmul.mubr.bf16.vlgmr.msra.gmra.mrb[0].mxu1 %v4994_v59  ;;  %v3740_v59 = vor.u32 %v3739_v2, %v3736_v36  ;;  %v3779_v36 = vrot.slane %v3777_v14, 5  ;;  %v6125_v2 = vld [vmem:[#allocation11 + $0x228] sm:$0xff]  }
 0x354   : > { %5634 = vmatpush3.bf16.msra.mxu1 %v6116_v0  ;;  %5621 = vmatprep.mubr.bf16.mxu1 %v4995_v37  ;;  %v3755_v0 = vrot.slane %v3753_v5, 5  ;;  %v3765_v37 = vrot.slane %v3764_v12, 4  ;;  %v4042_v5 = vrot.slane %v7754_v50, 5  ;;  %v4053_v50 = vrot.slane %v7762_v10, 5  ;;  %v3996_v12 = vld [vmem:[#allocation2 + $0x54] sm:$0xe] }
 0x355   : > { %5635 = vmatprep.subr.bf16.mxu1 %v6117_v8  ;;  %v3741_v16 = vrot.slane %v3740_v59, 4  ;;  %v3780_v52 = vsel %vm7353_vm15, %v3775_v15, %v3779_v36  ;;  %v5011_v59 = vrot.slane %v3993_v58, 9  ;;  %v3998_v36 = vld [vmem:[#allocation2 + $0x6c] sm:$0xe]  ;;  %v4076_v6 = vrot.slane %v4074_v51, 4 }
 0x356   : > { %v3756_v23 = vsel %vm7353_vm15, %v3751_v38, %v3755_v0  ;;  %v4043_v1 = vsel %vm7204_vm12, %v4041_v22, %v4042_v5  ;;  %v4056_v38 = vrot.slane %v7784_v9, 5  ;;  %v3997_v9 = vld [vmem:[#allocation2 + $0x60] sm:$0xe]  ;;  %v5016_v32 = vrot.slane %v3998_v36, 9 }
 0x357   : > { %v3746_v39 = vsel %vm7353_vm15, %v3741_v16, %v3745_v30  ;;  %v3770_v30 = vsel %vm7353_vm15, %v3765_v37, %v3769_v42  ;;  %v5012_v42 = vrot.slane %v3994_v26, 9  ;;  %v5013_v16 = vrot.slane %v3995_v44, 9  ;;  %v7901_v44 = vld [vmem:[%s8212_s0] ss:$0 sm:$0xff] }
 0x358   : > { %5636 = vmatpush3.bf16.msra.mxu1 %v6117_v8  ;;  %v4999_v8 = vcombine.low %v3746_v39, %v3756_v23  ;;  %v5000_v11 = vcombine.low %v3770_v30, %v3780_v52  ;;  %v5014_v39 = vrot.slane %v3996_v12, 9  ;;  %v4062_v23 = vrot.slane %v4060_v56, 4  ;;  %v6130_v30 = vld [vmem:[#allocation12] sm:$0xff]  }
 0x359   : > { %5637 = vmatprep.subr.bf16.mxu1 %v6120_v33  ;;  %v4054_v46 = vsel %vm7204_vm12, %v5013_v16, %v4053_v50  ;;  %v5015_v4 = vrot.slane %v3997_v9, 9  ;;  %v4075_v52 = vsel %vm7204_vm12, %v5016_v32, %v4074_v51  ;;  %v4078_v57 = vsel %vm7204_vm12, %v4076_v6, %v4077_v40  ;;  %5665 = vmatprep.subr.bf16.mxu0 %v6130_v30 }
 0x35a   : > { %v4064_v37 = vsel %vm7204_vm12, %v4062_v23, %v4063_v34  ;;  %5666 = vmatpush3.bf16.msra.mxu0 %v6130_v30  ;;  %v5024_v25 = vcombine.low %v4075_v52, %v4078_v57 }
 0x35b   : > { %5622 = vmatmul.mubr.bf16.gmra.mrb[4].mxu1 %v4996_v48  ;;  %v4068_v15 = vsel %vm7204_vm12, %v5015_v4, %v4067_v24 }
 0x35c   : > { %5638 = vmatpush3.bf16.msra.mxu1 %v6120_v33  ;;  %5625 = vmatprep.mubr.bf16.mxu1 %v4997_v45  ;;  %v4035_v33 = vrot.slane %v7740_v41, 5  ;;  %v4046_v45 = vrot.slane %v7758_v47, 5  ;;  %v4040_v41 = vsel %vm7204_vm12, %v5011_v59, %v4039_v31  ;;  %v4055_v47 = vrot.slane %v4053_v50, 4  ;;  %v6137_v31 = vld [vmem:[#allocation12 + $0x38] sm:$0xff]  }
 0x35d   : > { %5639 = vmatprep.subr.bf16.mxu1 %v6121_v20  ;;  %v5019_v60 = vcombine.low %v4040_v41, %v4043_v1 }
 0x35e   : > { %v4036_v48 = vsel %vm7204_vm12, %v4034_v27, %v4035_v33  ;;  %v4048_v19 = vrot.slane %v4046_v45, 4  ;;  %v4047_v0 = vsel %vm7204_vm12, %v5012_v42, %v4046_v45 }
 0x35f   : > { %v5018_v62 = vcombine.low %v4033_v49, %v4036_v48 }
 0x360   : > { %5640 = vmatpush3.bf16.msra.mxu1 %v6121_v20  ;;  %v4049_v20 = vrot.slane %v7780_v13, 5  ;;  %v4057_v13 = vsel %vm7204_vm12, %v4055_v47, %v4056_v38 }
 0x361   : > { %5641 = vmatprep.subr.bf16.mxu1 %v6124_v7 }
 0x362   : > { %v4050_v10 = vsel %vm7204_vm12, %v4048_v19, %v4049_v20 }
 0x363   : > { %5626 = vmatmul.mubr.bf16.gmra.mrb[8].mxu1 %v4998_v43  ;;  %v5020_v14 = vcombine.low %v4047_v0, %v4050_v10  ;;  %v4069_v43 = vrot.slane %v4067_v24, 4 }
 0x364   : > { %5642 = vmatpush3.bf16.msra.mxu1 %v6124_v7  ;;  %5629 = vmatprep.mubr.bf16.mxu1 %v4999_v8  ;;  %v5021_v7 = vcombine.low %v4054_v46, %v4057_v13  ;;  %v4061_v8 = vsel %vm7204_vm12, %v5014_v39, %v4060_v56 }
 0x365   : > { %5643 = vmatprep.subr.bf16.mxu1 %v6125_v2  ;;  %v4071_v3 = vsel %vm7204_vm12, %v4069_v43, %v4070_v54 }
 0x366   : > { %v5023_v53 = vcombine.low %v4068_v15, %v4071_v3 }
 0x368   : > { %5644 = vmatpush3.bf16.msra.mxu1 %v6125_v2  ;;  %v5022_v2 = vcombine.low %v4061_v8, %v4064_v37 }
 0x369   : > { %5645 = vmatprep.subr.bf16.mxu1 %v6128_v63 }
 0x36b   : > { %5630 = vmatmul.mubr.bf16.gmra.mrb[12].mxu1 %v5000_v11 }
 0x36c   : > { %5646 = vmatpush3.bf16.msra.mxu1 %v6128_v63  ;;  %5649 = vmatprep.mubr.bf16.mxu1 %v5017_v29  ;;  %v6131_v63 = vld [vmem:[#allocation12 + $0x8] sm:$0xff]  }
 0x36d   : > { %5647 = vmatprep.subr.bf16.mxu1 %v6129_v28  ;;  %5667 = vmatprep.subr.bf16.mxu0 %v6131_v63 }
 0x36e   : > { %5668 = vmatpush3.bf16.msra.mxu0 %v6131_v63 }
 0x36f   : > { %5669 = vmatprep.subr.bf16.mxu0 %v6132_v17 }
 0x370   : > { %5648 = vmatpush3.bf16.msra.mxu1 %v6129_v28 }
 0x372   : > { %5670 = vmatpush3.bf16.msra.mxu0 %v6132_v17 }
 0x373   : > { %5650 = vmatmul.mubr.bf16.vlgmr.msra.gmra.mrb[0].mxu1 %v5018_v62  ;;  %5671 = vmatprep.subr.bf16.mxu0 %v6133_v55 }
 0x374   : > { %5653 = vmatprep.mubr.bf16.mxu1 %v5019_v60 }
 0x376   : > { %5672 = vmatpush3.bf16.msra.mxu0 %v6133_v55 }
 0x377   : > { %5673 = vmatprep.subr.bf16.mxu0 %v6134_v35 }
 0x37a   : > { %5674 = vmatpush3.bf16.msra.mxu0 %v6134_v35 }
 0x37b   : > { %5654 = vmatmul.mubr.bf16.gmra.mrb[4].mxu1 %v5020_v14  ;;  %5675 = vmatprep.subr.bf16.mxu0 %v6135_v21 }
 0x37c   : > { %5657 = vmatprep.mubr.bf16.mxu1 %v5021_v7 }
 0x37e   : > { %5676 = vmatpush3.bf16.msra.mxu0 %v6135_v21 }
 0x37f   : > { %5677 = vmatprep.subr.bf16.mxu0 %v6136_v18 }
 0x382   : > { %5678 = vmatpush3.bf16.msra.mxu0 %v6136_v18 }
 0x383   : > { %5658 = vmatmul.mubr.bf16.gmra.mrb[8].mxu1 %v5022_v2  ;;  %5679 = vmatprep.subr.bf16.mxu0 %v6137_v31 }
 0x384   : > { %5661 = vmatprep.mubr.bf16.mxu1 %v5023_v53 }
 0x386   : > { %5680 = vmatpush3.bf16.msra.mxu0 %v6137_v31 }
 0x38b   : > { %5662 = vmatmul.mubr.bf16.gmra.mrb[12].mxu1 %v5024_v25 }
 0x3f4   : > { %v5427_v58 = vpop.f32.mrb[24].mxu0 }
 0x3f5   : > { %v2000_v11 = vpop.f32.mrb[25].mxu0 }
 0x3f6   : > { %v5428_v29 = vpop.f32.mrb[26].mxu0 }
 0x3f7   : > { %v2003_v61 = vpop.f32.mrb[27].mxu0 }
 0x3fc   : > { %v5431_v27 = vpop.f32.mrb[28].mxu0 }
 0x3fd   : > { %v2016_v33 = vpop.f32.mrb[29].mxu0 }
 0x3fe   : > { %v5432_v28 = vpop.f32.mrb[30].mxu0 }
 0x3ff   : > { %v2019_v59 = vpop.f32.mrb[31].mxu0 }
 0x404   : > { %v5435_v22 = vpop.f32.mrb[32].mxu0 }
 0x405   : > { %v2032_v5 = vpop.f32.mrb[33].mxu0 }
 0x406   : > { %v5436_v49 = vpop.f32.mrb[34].mxu0 }
 0x407   : > { %v2035_v48 = vpop.f32.mrb[35].mxu0 }
 0x40c   : > { %v5439_v45 = vpop.f32.mrb[36].mxu0 }
 0x40d   : > { %v7892_v41 = vpop.f32.mrb[37].mxu0 }
 0x40e   : > { %v7894_v1 = vpop.f32.mrb[38].mxu0 }
 0x40f   : > { %v7896_v26 = vpop.f32.mrb[39].mxu0 }
 0x446   : > { %v5651_v50 = vpop.f32.mrb[0].mxu1 }
 0x447   : > { %v5697_v62 = vadd.f32 %v5651_v50, %v5427_v58  ;;  %v4210_v60 = vpop.f32.mrb[1].mxu1 }
 0x448   : > { %v5698_v42 = vadd.f32 %v4210_v60, %v2000_v11  ;;  %v5652_v19 = vpop.f32.mrb[2].mxu1 }
 0x449   : > { %v4298_v20 = vadd.f32 %v5697_v62, %v7901_v44  ;;  %v5699_v16 = vadd.f32 %v5652_v19, %v5428_v29  ;;  %v4213_v47 = vpop.f32.mrb[3].mxu1 }
 0x44a   : > { %v4296_v38 = vadd.f32 %v5698_v42, %v7901_v44  ;;  %v5700_v0 = vadd.f32 %v4213_v47, %v2003_v61 }
 0x44b   : > { %v4299_v10 = vadd.f32 %v5699_v16, %v7901_v44  ;;  %v4314_v46 = vmax.f32 %v4298_v20, 0.0 }
 0x44c   : > { %v4297_v56 = vadd.f32 %v5700_v0, %v7901_v44  ;;  %v4312_v12 = vmax.f32 %v4296_v38, 0.0 }
 0x44d   : > { %v4315_v13 = vmax.f32 %v4299_v10, 0.0 }
 0x44e   : > { %v4313_v24 = vmax.f32 %v4297_v56, 0.0  ;;  %v5655_v9 = vpop.f32.mrb[4].mxu1  ;;  %v5073_v56 = vld [vmem:[%s6969_s20] sm:$0xff]  }
 0x44f   : > { %v4329_v14 = vpack.c.bf16 %v4315_v13, %v4314_v46  ;;  %v5701_v7 = vadd.f32 %v5655_v9, %v5431_v27  ;;  %v4226_v39 = vpop.f32.mrb[5].mxu1 }
 0x450   : > { %v5702_v23 = vadd.f32 %v4226_v39, %v2016_v33  ;;  %v5656_v34 = vpop.f32.mrb[6].mxu1  ;;  %v4328_v4 = vpack.c.bf16 %v4313_v24, %v4312_v12  ;;  %v5075_v39 = vunpack.c.h.bf16 %v5073_v56 }
 0x451   : > { %v4302_v43 = vadd.f32 %v5701_v7, %v7901_v44  ;;  %v5703_v54 = vadd.f32 %v5656_v34, %v5432_v28  ;;  %v4229_v8 = vpop.f32.mrb[7].mxu1 }
 0x452   : > { %v4300_v37 = vadd.f32 %v5702_v23, %v7901_v44  ;;  %v5704_v51 = vadd.f32 %v4229_v8, %v2019_v59  ;;  %5681 = vmatprep.mubr.bf16.mxu0 %v4328_v4  ;;  %v5106_v8 = vld [vmem:[%s6969_s20 + $0x18] sm:$0xff]  }
 0x453   : > { %v4303_v15 = vadd.f32 %v5703_v54, %v7901_v44  ;;  %5682 = vmatmul.mubr.bf16.vlgmr.msra.gmra.mrb[40].mxu0 %v4329_v14  ;;  %v4318_v36 = vmax.f32 %v4302_v43, 0.0 }
 0x454   : > { %v4301_v3 = vadd.f32 %v5704_v51, %v7901_v44  ;;  %v4316_v53 = vmax.f32 %v4300_v37, 0.0 }
 0x455   : > { %v4319_v2 = vmax.f32 %v4303_v15, 0.0  ;;  %v5105_v15 = vld [vmem:[%s6969_s20 + $0x10] sm:$0xff]  }
 0x456   : > { %v4317_v32 = vmax.f32 %v4301_v3, 0.0  ;;  %v5659_v6 = vpop.f32.mrb[8].mxu1 }
 0x457   : > { %v5705_v40 = vadd.f32 %v5659_v6, %v5435_v22  ;;  %v4242_v30 = vpop.f32.mrb[9].mxu1  ;;  %v4331_v52 = vpack.c.bf16 %v4319_v2, %v4318_v36 }
 0x458   : > { %v5706_v57 = vadd.f32 %v4242_v30, %v2032_v5  ;;  %v5660_v25 = vpop.f32.mrb[10].mxu1  ;;  %v4330_v63 = vpack.c.bf16 %v4317_v32, %v4316_v53  ;;  %v5086_v53 = vunpack.c.l.bf16 %v5106_v8 }
 0x459   : > { %v4306_v17 = vadd.f32 %v5705_v40, %v7901_v44  ;;  %v5707_v55 = vadd.f32 %v5660_v25, %v5436_v49  ;;  %v4245_v35 = vpop.f32.mrb[11].mxu1  ;;  %v5082_v40 = vunpack.c.l.bf16 %v5105_v15 }
 0x45a   : > { %v4304_v21 = vadd.f32 %v5706_v57, %v7901_v44  ;;  %v5708_v18 = vadd.f32 %v4245_v35, %v2035_v48  ;;  %5685 = vmatprep.mubr.bf16.mxu0 %v4330_v63  ;;  %v5087_v57 = vunpack.c.h.bf16 %v5106_v8 }
 0x45b   : > { %v4307_v31 = vadd.f32 %v5707_v55, %v7901_v44  ;;  %5686 = vmatmul.mubr.bf16.gmra.mrb[44].mxu0 %v4331_v52  ;;  %v4322_v11 = vmax.f32 %v4306_v17, 0.0  ;;  %v5083_v17 = vunpack.c.h.bf16 %v5105_v15 }
 0x45c   : > { %v4305_v58 = vadd.f32 %v5708_v18, %v7901_v44  ;;  %v4320_v61 = vmax.f32 %v4304_v21, 0.0 }
 0x45d   : > { %v4323_v29 = vmax.f32 %v4307_v31, 0.0 }
 0x45e   : > { %v4321_v27 = vmax.f32 %v4305_v58, 0.0  ;;  %v5663_v33 = vpop.f32.mrb[12].mxu1  ;;  %v5108_v58 = vld [vmem:[%s6969_s20 + $0x28] sm:$0xff]  }
 0x45f   : > { %v5709_v28 = vadd.f32 %v5663_v33, %v5439_v45  ;;  %v4258_v59 = vpop.f32.mrb[13].mxu1  ;;  %v4333_v22 = vpack.c.bf16 %v4323_v29, %v4322_v11 }
 0x460   : > { %v5710_v5 = vadd.f32 %v4258_v59, %v7892_v41  ;;  %v5664_v49 = vpop.f32.mrb[14].mxu1  ;;  %v4332_v50 = vpack.c.bf16 %v4321_v27, %v4320_v61  ;;  %v5107_v61 = vld [vmem:[%s6969_s20 + $0x20] sm:$0xff]   ;;  %v5094_v59 = vunpack.c.l.bf16 %v5108_v58 }
 0x461   : > { %v4310_v48 = vadd.f32 %v5709_v28, %v7901_v44  ;;  %v5711_v62 = vadd.f32 %v5664_v49, %v7894_v1  ;;  %v4261_v60 = vpop.f32.mrb[15].mxu1  ;;  %v5104_v1 = vld [vmem:[%s6969_s20 + $0x8] sm:$0xff]   ;;  %v5090_v49 = vunpack.c.l.bf16 %v5107_v61 }
 0x462   : > { %v4308_v42 = vadd.f32 %v5710_v5, %v7901_v44  ;;  %v5712_v19 = vadd.f32 %v4261_v60, %v7896_v26  ;;  %5689 = vmatprep.mubr.bf16.mxu0 %v4332_v50  ;;  %v7927_v26 = vld [vmem:[%s8213_s26] ss:$0 sm:$0xff]  ;;  %v5078_v46 = vunpack.c.l.bf16 %v5104_v1  ;;  %v5079_v9 = vunpack.c.h.bf16 %v5104_v1  ;;  %v5109_v1 = vld [vmem:[%s6969_s20 + $0x30] sm:$0xff]  }
 0x463   : > { %v4311_v45 = vadd.f32 %v5711_v62, %v7901_v44  ;;  %5690 = vmatmul.mubr.bf16.gmra.mrb[48].mxu0 %v4333_v22  ;;  %v4326_v41 = vmax.f32 %v4310_v48, 0.0  ;;  %v5095_v62 = vunpack.c.h.bf16 %v5108_v58 }
 0x464   : > { %v4309_v20 = vadd.f32 %v5712_v19, %v7901_v44  ;;  %v4324_v47 = vmax.f32 %v4308_v42, 0.0  ;;  %v5074_v44 = vunpack.c.l.bf16 %v5073_v56  ;;  %v5091_v19 = vunpack.c.h.bf16 %v5107_v61 }
 0x465   : > { %v4327_v16 = vmax.f32 %v4311_v45, 0.0 }
 0x466   : > { %v4325_v38 = vmax.f32 %v4309_v20, 0.0 }
 0x467   : > { %v4335_v0 = vpack.c.bf16 %v4327_v16, %v4326_v41 }
 0x468   : > { %v4334_v10 = vpack.c.bf16 %v4325_v38, %v4324_v47  ;;  %v5110_v38 = vld [vmem:[%s6969_s20 + $0x38] sm:$0xff]   ;;  %s5047_s20 = sshll.u32 %s4598_s10, 7 }
 0x469   : > { %s7970_s27 = scalar_lea.hbm %s8216_s23, %s5047_s20 }
 0x46a   : > { %5693 = vmatprep.mubr.bf16.mxu0 %v4334_v10 }
 0x46b   : > { %5694 = vmatmul.mubr.bf16.gmra.mrb[52].mxu0 %v4335_v0 }
 0x526   : > { %v5683_v13 = vpop.f32.mrb[40].mxu0 }
 0x527   : > { %v4450_v12 = vadd.f32 %v5683_v13, %v7927_v26  ;;  %v4441_v24 = vpop.f32.mrb[41].mxu0 }
 0x528   : > { %v4442_v14 = vadd.f32 %v7927_v26, %v4441_v24  ;;  %v5684_v7 = vpop.f32.mrb[42].mxu0 }
 0x529   : > { %v4538_v23 = vadd.f32 %v5078_v46, %v4450_v12  ;;  %v4453_v34 = vadd.f32 %v5684_v7, %v7927_v26  ;;  %v4444_v4 = vpop.f32.mrb[43].mxu0 }
 0x52a   : > { %v4536_v43 = vadd.f32 %v5074_v44, %v4442_v14  ;;  %v4445_v54 = vadd.f32 %v7927_v26, %v4444_v4  ;;  %v5102_v44 = vunpack.c.l.bf16 %v5110_v38  ;;  %v5099_v4 = vunpack.c.h.bf16 %v5109_v1 }
 0x52b   : > { %v4554_v37 = vmax.f32 %v4538_v23, 0.0  ;;  %v4539_v51 = vadd.f32 %v5079_v9, %v4453_v34  ;;  %v5098_v9 = vunpack.c.l.bf16 %v5109_v1 }
 0x52c   : > { %v4552_v3 = vmax.f32 %v4536_v43, 0.0  ;;  %v4537_v36 = vadd.f32 %v5075_v39, %v4445_v54  ;;  %v5103_v39 = vunpack.c.h.bf16 %v5110_v38 }
 0x52d   : > { %4570 = vst [vmem:[%s7196_s24 + $0x10] sm:$0xff] %v4554_v37  ;;  %v4555_v2 = vmax.f32 %v4539_v51, 0.0 }
 0x52e   : > { %4568 = vst [vmem:[%s7196_s24] sm:$0xff] %v4552_v3  ;;  %v4553_v32 = vmax.f32 %v4537_v36, 0.0  ;;  %v5687_v6 = vpop.f32.mrb[44].mxu0 }
 0x52f   : > { %4571 = vst [vmem:[%s7196_s24 + $0x18] sm:$0xff] %v4555_v2  ;;  %v4466_v30 = vadd.f32 %v5687_v6, %v7927_v26  ;;  %v4457_v52 = vpop.f32.mrb[45].mxu0 }
 0x530   : > { %4569 = vst [vmem:[%s7196_s24 + $0x8] sm:$0xff] %v4553_v32  ;;  %v4458_v25 = vadd.f32 %v7927_v26, %v4457_v52  ;;  %v5688_v63 = vpop.f32.mrb[46].mxu0 }
 0x531   : > { %v4542_v55 = vadd.f32 %v5086_v53, %v4466_v30  ;;  %v4469_v35 = vadd.f32 %v5688_v63, %v7927_v26  ;;  %v4460_v21 = vpop.f32.mrb[47].mxu0 }
 0x532   : > { %v4540_v18 = vadd.f32 %v5082_v40, %v4458_v25  ;;  %v4461_v31 = vadd.f32 %v7927_v26, %v4460_v21 }
 0x533   : > { %v4558_v11 = vmax.f32 %v4542_v55, 0.0  ;;  %v4543_v29 = vadd.f32 %v5087_v57, %v4469_v35 }
 0x534   : > { %v4556_v27 = vmax.f32 %v4540_v18, 0.0  ;;  %v4541_v33 = vadd.f32 %v5083_v17, %v4461_v31 }
 0x535   : > { %4574 = vst [vmem:[%s7196_s24 + $0x30] sm:$0xff] %v4558_v11  ;;  %v4559_v28 = vmax.f32 %v4543_v29, 0.0 }
 0x536   : > { %4572 = vst [vmem:[%s7196_s24 + $0x20] sm:$0xff] %v4556_v27  ;;  %v4557_v22 = vmax.f32 %v4541_v33, 0.0  ;;  %v5691_v5 = vpop.f32.mrb[48].mxu0 }
 0x537   : > { %4575 = vst [vmem:[%s7196_s24 + $0x38] sm:$0xff] %v4559_v28  ;;  %v4482_v50 = vadd.f32 %v5691_v5, %v7927_v26  ;;  %v4473_v48 = vpop.f32.mrb[49].mxu0 }
 0x538   : > { %4573 = vst [vmem:[%s7196_s24 + $0x28] sm:$0xff] %v4557_v22  ;;  %v4474_v60 = vadd.f32 %v7927_v26, %v4473_v48  ;;  %v5692_v42 = vpop.f32.mrb[50].mxu0 }
 0x539   : > { %v4546_v45 = vadd.f32 %v5094_v59, %v4482_v50  ;;  %v4485_v20 = vadd.f32 %v5692_v42, %v7927_v26  ;;  %v4476_v41 = vpop.f32.mrb[51].mxu0 }
 0x53a   : > { %v4544_v16 = vadd.f32 %v5090_v49, %v4474_v60  ;;  %v4477_v47 = vadd.f32 %v7927_v26, %v4476_v41 }
 0x53b   : > { %v4562_v0 = vmax.f32 %v4546_v45, 0.0  ;;  %v4547_v10 = vadd.f32 %v5095_v62, %v4485_v20 }
 0x53c   : > { %v4560_v56 = vmax.f32 %v4544_v16, 0.0  ;;  %v4545_v46 = vadd.f32 %v5091_v19, %v4477_v47 }
 0x53d   : > { %4578 = vst [vmem:[%s7196_s24 + $0x50] sm:$0xff] %v4562_v0  ;;  %v4563_v13 = vmax.f32 %v4547_v10, 0.0 }
 0x53e   : > { %4576 = vst [vmem:[%s7196_s24 + $0x40] sm:$0xff] %v4560_v56  ;;  %v4561_v12 = vmax.f32 %v4545_v46, 0.0  ;;  %v5695_v24 = vpop.f32.mrb[52].mxu0 }
 0x53f   : > { %4579 = vst [vmem:[%s7196_s24 + $0x58] sm:$0xff] %v4563_v13  ;;  %v4498_v14 = vadd.f32 %v5695_v24, %v7927_v26  ;;  %v4489_v7 = vpop.f32.mrb[53].mxu0 }
 0x540   : > { %4577 = vst [vmem:[%s7196_s24 + $0x48] sm:$0xff] %v4561_v12  ;;  %v4490_v23 = vadd.f32 %v7927_v26, %v4489_v7  ;;  %v5696_v34 = vpop.f32.mrb[54].mxu0 }
 0x541   : > { %v4550_v43 = vadd.f32 %v5102_v44, %v4498_v14  ;;  %v4501_v54 = vadd.f32 %v5696_v34, %v7927_v26  ;;  %v4492_v8 = vpop.f32.mrb[55].mxu0 }
 0x542   : > { %v4548_v37 = vadd.f32 %v5098_v9, %v4490_v23  ;;  %v4493_v51 = vadd.f32 %v7927_v26, %v4492_v8 }
 0x543   : > { %v4566_v15 = vmax.f32 %v4550_v43, 0.0  ;;  %v4551_v3 = vadd.f32 %v5103_v39, %v4501_v54 }
 0x544   : > { %v4564_v36 = vmax.f32 %v4548_v37, 0.0  ;;  %v4549_v2 = vadd.f32 %v5099_v4, %v4493_v51 }
 0x545   : > { %4582 = vst [vmem:[%s7196_s24 + $0x70] sm:$0xff] %v4566_v15  ;;  %v4567_v53 = vmax.f32 %v4551_v3, 0.0 }
 0x546   : > { %4580 = vst [vmem:[%s7196_s24 + $0x60] sm:$0xff] %v4564_v36  ;;  %v4565_v26 = vmax.f32 %v4549_v2, 0.0 }
 0x547   : > { %4583 = vst [vmem:[%s7196_s24 + $0x78] sm:$0xff] %v4567_v53 }
 0x548   : > { %4581 = vst [vmem:[%s7196_s24 + $0x68] sm:$0xff] %v4565_v26 }
 0x549   : > { %6338 = shalt.err (!%p6335_p13)
}
 0x54a   : > { %s6339_s24 = scalar_lea.hbm %s7970_s27, 2048  ;;  %s6343_s13 = scalar_lea.hbm %s8216_s23, 8192 }
 0x54b   : > { %p6340_p11 = scmp.ne.s32.totalorder %s7970_s27, %s6339_s24  ;;  %p6344_p3 = scmp.lt.u32.totalorder %s7970_s27, %s8216_s23 }
 0x54c   : > { %p6345_p12 = scmp.lt.u32.totalorder %s6343_s13, %s6339_s24  ;;  %p6347_p5 = scmp.lt.u32.totalorder %s6339_s24, %s7970_s27 }
 0x54d   : > { %p6341_p0 = pnand %p6340_p11, %p8217_p10 }
 0x54e   : > { %p6346_p4 = por %p6345_p12, %p6344_p3 }
 0x54f   : > { %p6342_p1 = pneg %p6341_p0 }
 0x550   : > { %p6348_p8 = por %p6347_p5, %p6346_p4 }
 0x552   : > { %p6349_p2 = pnand %p6348_p8, %p6342_p1 }
 0x554   : > { %6352 = shalt.err (!%p6349_p2)
}
 0x555   : > { %s6502_s7 = smov 128   ;;  %s6503_s21 = smov 8  }
 0x556   : > { %5843 = dma.vmem_to_hbm [thread:$0]  (%p8217_p10), %s7972_s9, 2048, %s7970_s27, %s4585_s1, %s6502_s7, %s6502_s7, %s6503_s21  }
 0x557 PF: > { %s8218_s11 = sld [smem:[#allocation36_spill]]  ;;  %p5876_p9 = scmp.ge.s32.totalorder %s6487_s22, 2 }
 0x558   : > { %s4616_s10 = sand.u32 1, %s6459_s15  }
 0x559   : > { %s4617_s20 = scalar_lea.sflag [#allocation5], %s4616_s10 }
 0x55d   : > { %p8219_p7 = scmp.ne.s32.totalorder %s8218_s11, 0 }
 0x55f   : > { %p5866_p6 = pnand %p5876_p9, %p8219_p7 }
 0x561   : > { %6430 = dma.done.wait (!%p5866_p6), %s4617_s20, 2048  }
 0x562   : > { %6432 = vsyncadd (!%p5866_p6), %s4617_s20, 4294965248  ;;  %s30_s22 = sadd.s32 1, %s6487_s22   ;;  %s8221_s30 = sld [smem:[#allocation22_spill]] }
 0x563   : > { %p8006_p13 = scmp.ge.s32.totalorder %s30_s22, 6   ;;  %s8222_s10 = sld [smem:[#allocation23_spill]] }
 0x564   : > { %s8223_s19 = sld [smem:[#allocation24_spill]]  ;;  %s8224_s4 = smov %s6716_s12 }
 0x565   : > { %s8225_s9 = sld [smem:[#allocation35_spill]]  ;;  %s8226_s18 = sld [smem:[#allocation27_spill]] }
 0x566   : > { %s8227_s27 = sld [smem:[#allocation28_spill]]  ;;  %s8228_s20 = sld [smem:[#allocation30_spill]] }
 0x567   : > { %s8229_s21 = sld [smem:[#allocation31_spill]]  ;;  %s8230_s11 = smov %s8253_s2 }
 0x568   : > { %s8232_s13 = smov %s6455_s14  ;;  %s8233_s14 = smov %s8224_s4 }
 0x569   : > { %s8234_s15 = smov %s6463_s16  ;;  %s8235_s16 = smov %s6467_s17 }
 0x56a   : > { %s8231_s12 = smov %s8223_s19  ;;  %29 = sbr.rel (!%p8006_p13) target bundleno = 25 (0x19), region = 156 }
 0x56b   : > { %s8236_s17 = smov %s8225_s9 }
 0x56c   : > { %s8237_s19 = smov %s8227_s27 }
 0x571   :  { %4622 = vsyncpa [#allocation4], 1 }
 0x572   :  { %4624 = vsyncpa [#allocation4 + $0x1], 1 }
 0x573   :  { %4625 = vsyncpa [#allocation7], 1 }
 0x574   :  { %4627 = vsyncpa [#allocation7 + $0x1], 1 }
 0x575   :  { %4628 = vsyncpa [#allocation10], 1 }
 0x576   :  { %4629 = vsyncpa [#allocation13], 1 }
 0x577   :  { %4630 = vsyncpa [#allocation5], 1 }
 0x578   :  { %4632 = vsyncpa [#allocation5 + $0x1], 1 }

// kernel: tpu_custom_call.1
= control target key start
LH: loop header
LB: loop body
LE: loop exit
PB: predicated region body
PF: predicated region fallthrough
CT: control target
= control target key end

     0   :  { %s8053_s0 = inlined_call_operand.hbm [shape: bf16[2,16,16,128], index: 0, kind: input, shape index: {}]   ;;  %s8054_s1 = inlined_call_operand.hbm [shape: bf16[2,16,16,128], index: 1, kind: input, shape index: {}]   ;;  %s8055_s2 = inlined_call_operand.hbm [shape: bf16[2,16,16,128], index: 2, kind: input, shape index: {}]   ;;  %s8056_s3 = inlined_call_operand.hbm [shape: bf16[128,128], index: 3, kind: input, shape index: {}]   ;;  %s8057_s4 = inlined_call_operand.vmem [shape: f32[1,128], index: 4, kind: input, shape index: {}]   ;;  %s8058_s5 = inlined_call_operand.hbm [shape: bf16[3,3,128,128], index: 5, kind: input, shape index: {}]   ;;  %s8059_s6 = inlined_call_operand.vmem [shape: f32[1,128], index: 6, kind: input, shape index: {}]   ;;  %s8060_s7 = inlined_call_operand.hbm [shape: bf16[128,128], index: 7, kind: input, shape index: {}]   ;;  %s8061_s8 = inlined_call_operand.vmem [shape: f32[1,128], index: 8, kind: input, shape index: {}]   ;;  %s8062_s9 = inlined_call_operand.hbm [shape: f32[2,16,16,128], index: 9, kind: output, shape index: {}]  }
   0x1   :  { %8104 = sst [smem:[#allocation46_spill]] %s8053_s0 }
   0x2   :  { %8105 = sst [smem:[#allocation47_spill]] %s8054_s1 }
   0x3   :  { %8106 = sst [smem:[#allocation48_spill]] %s8055_s2 }
   0x4   :  { %8107 = sst [smem:[#allocation49_spill]] %s8056_s3 }
   0x5   :  { %8108 = sst [smem:[#allocation50_spill]] %s8057_s4 }
   0x6   :  { %8109 = sst [smem:[#allocation51_spill]] %s8058_s5 }
   0x7   :  { %8110 = sst [smem:[#allocation52_spill]] %s8059_s6 }
   0x8   :  { %8111 = sst [smem:[#allocation53_spill]] %s8060_s7 }
   0x9   :  { %8112 = sst [smem:[#allocation54_spill]] %s8061_s8 }
   0xa   :  { %8113 = sst [smem:[#allocation55_spill]] %s8062_s9 }
   0xb   :  { %14 = vsyncpa [#allocation4], 0 }
   0xc   :  { %16 = vsyncpa [#allocation4 + $0x1], 0 }
   0xd   :  { %17 = vsyncpa [#allocation7], 0 }
   0xe   :  { %19 = vsyncpa [#allocation7 + $0x1], 0 }
   0xf   :  { %20 = vsyncpa [#allocation10], 0 }
  0x10   :  { %21 = vsyncpa [#allocation13], 0 }
  0x11   :  { %22 = vsyncpa [#allocation5], 0 }
  0x12   :  { %24 = vsyncpa [#allocation5 + $0x1], 0  ;;  %s6554_s30 = smov 0   ;;  %s6556_s10 = smov 0  }
  0x13   :  { %s6558_s11 = smov 0   ;;  %s6560_s12 = smov 0  }
  0x14   :  { %s6562_s13 = smov 0   ;;  %s6564_s14 = smov 0  }
  0x15   :  { %s6566_s15 = smov 0   ;;  %s6568_s16 = smov 0  }
  0x16   :  { %s6570_s17 = smov 0   ;;  %s6572_s18 = smov 0  }
  0x17   :  { %s6574_s19 = smov 0   ;;  %s6576_s20 = smov 0  }
  0x18   :  { %s6578_s21 = smov 0   ;;  %s6580_s22 = smov 0  }
  0x19 LB: > { %8114 = sst [smem:[#allocation21_spill]] %s6435_s30  ;;  %s6625_s23 = sadd.s32 4294967295, %s6487_s22   ;;  %s6487_s22 = sphi %s6580_s22, %s30_s22   ;;  %s6483_s21 = sphi %s6578_s21, %s8229_s21   ;;  %s6479_s20 = sphi %s6576_s20, %s8228_s20   ;;  %s6475_s19 = sphi %s6574_s19, %s8237_s19   ;;  %s6471_s18 = sphi %s6572_s18, %s8226_s18   ;;  %s6467_s17 = sphi %s6570_s17, %s8236_s17   ;;  %s6463_s16 = sphi %s6568_s16, %s8235_s16   ;;  %s6459_s15 = sphi %s6566_s15, %s8234_s15   ;;  %s6455_s14 = sphi %s6564_s14, %s8233_s14   ;;  %s6451_s13 = sphi %s6562_s13, %s8232_s13   ;;  %s6447_s12 = sphi %s6560_s12, %s8231_s12   ;;  %s6443_s11 = sphi %s6558_s11, %s8230_s11   ;;  %s6439_s10 = sphi %s6556_s10, %s8222_s10   ;;  %s6435_s30 = sphi %s6554_s30, %s8221_s30  }
  0x1a   : > { %8115 = sst [smem:[#allocation22_spill]] %s6439_s10  ;;  %p4777_p0 = scmp.ge.s32.totalorder %s6487_s22, 1 }
  0x1b   : > { %8116 = sst [smem:[#allocation23_spill]] %s6443_s11  ;;  %p8064_p1 = scmp.eq.s32.totalorder %s6625_s23, 0 }
  0x1c   : > { %8117 = sst [smem:[#allocation24_spill]] %s6451_s13  ;;  %p301_p3 = scmp.lt.s32.totalorder %s6487_s22, 5 }
  0x1d   : > { %8118 = sst [smem:[#allocation25_spill]] %s6471_s18  ;;  %s6489_s25 = smov [#allocation9]  }
  0x1e   : > { %8119 = sst [smem:[#allocation26_spill]] %s6475_s19  ;;  %p6631_p4 = pnand %p4777_p0, %p301_p3 }
  0x1f   : > { %8120 = sst [smem:[#allocation27_spill]] %s6479_s20  ;;  %s313_s26 = sshll.u32 %s6489_s25, 4  ;;  %s314_s26 = int_to_ptr.vmem [resolvable:$true] %s313_s26 }
  0x20   : > { %8121 = sst [smem:[#allocation28_spill]] %s6483_s21  ;;  %p5845_p5 = pneg %p6631_p4 }
  0x21   : > { %s8122_s24 = scalar_select %p6631_p4, 1, 0 }
  0x22   : > { %p6639_p6 = pnand %p5845_p5, %p8064_p1  ;;  %s8125_s3 = sld [smem:[#allocation49_spill]] }
  0x23   : > { %8123 = sst [smem:[#allocation29_spill]] %s8122_s24 }
  0x24   : > { %s8124_s27 = scalar_select %p6639_p6, 1, 0 }
  0x25   : > { %p6651_p8 = pneg %p6639_p6 }
  0x28   : > { %s6151_s9 = scalar_lea.hbm %s8125_s3, 1024 }
  0x29   : > { %p6152_p7 = scmp.ne.s32.totalorder %s8125_s3, %s6151_s9  ;;  %p6158_p11 = scmp.lt.u32.totalorder %s6151_s9, %s8125_s3 }
  0x2b   : > { %p6154_p9 = pnand %p6651_p8, %p6152_p7 }
  0x2d   : > { %p6155_p10 = pneg %p6154_p9 }
  0x2f   : > { %p6160_p12 = pnand %p6158_p11, %p6155_p10 }
  0x31   : > { %6163 = shalt.err (!%p6160_p12)
}
  0x32   : > { %s6164_s28 = scalar_lea.vmem %s314_s26, 1024  ;;  %p6172_p5 = scmp.lt.s32.totalorder %s314_s26, %s314_s26 }
  0x33   : > { %p6165_p13 = scmp.ne.s32.totalorder %s314_s26, %s6164_s28  ;;  %p6173_p2 = scmp.lt.s32.totalorder %s6164_s28, %s6164_s28 }
  0x35   : > { %p6167_p0 = pnand %p6165_p13, %p6651_p8  ;;  %p6174_p1 = por %p6173_p2, %p6172_p5 }
  0x37   : > { %p6168_p3 = pneg %p6167_p0 }
  0x39   : > { %p6175_p4 = pnand %p6174_p1, %p6168_p3 }
  0x3b   : > { %6178 = shalt.err (!%p6175_p4)
}
  0x3c   : > { %s8068_s8 = smov 64   ;;  %s8070_s6 = smov 4  }
  0x3d   : > { %5848 = dma.hbm_to_vmem [thread:$0]  (!%p6639_p6), %s8125_s3, 1024, %s314_s26, [#allocation10], %s8068_s8, %s8068_s8, %s8070_s6  }
  0x3e   : > { %s39_s19 = sadd.s32 1, %s6479_s20  ;;  %s42_s29 = sadd.s32 1, %s6483_s21 }
  0x3f   : > { %p40_p1 = scmp.ge.s32.totalorder %s39_s19, 2  ;;  %p8084_p2 = scmp.eq.s32.totalorder %s6487_s22, 0 }
  0x40   : > { %s4771_s28 = sshll.u32 %s6479_s20, 3  ;;  %s87_s4 = sadd.s32 1, %s6455_s14 }
  0x41   : > { %s8239_s19 = smov (%p40_p1, %s39_s19), 0  ;;  %s8241_s29 = smov (!%p40_p1, %s42_s29), %s6483_s21 }
  0x42   : > { %8127 = sst [smem:[#allocation30_spill]] %s8239_s19  ;;  %s47_s24 = ssub.s32 %s6479_s20, %s8239_s19 }
  0x43   : > { %s4772_s2 = sadd.s32 4294967295, %s4771_s28  ;;  %p44_p4 = scmp.ge.s32.totalorder %s8241_s29, 2 }
  0x44   : > { %p76_p7 = scmp.gt.s32.totalorder %s4772_s2, 0  ;;  %s4773_s26 = sshll.u32 %s8239_s19, 3 }
  0x45   : > { %p94_p9 = scmp.ne.s32.totalorder %s6455_s14, %s6451_s13  ;;  %s8243_s29 = smov (%p44_p4, %s8241_s29), 0 }
  0x46   : > { %8128 = sst [smem:[#allocation31_spill]] %s8243_s29  ;;  %s8245_s2 = smov (!%p76_p7, %s4772_s2), 0 }
  0x47   : > { %s6687_s9 = ssub.s32 %s6483_s21, %s8243_s29  ;;  %s4774_s18 = sadd.s32 4294967295, %s4773_s26 }
  0x48   : > { %8129 = sst [smem:[#allocation32_spill]] %s6687_s9  ;;  %s6690_s8 = sor.u32 %s47_s24, %s6687_s9 }
  0x49   : > { %p80_p10 = scmp.gt.s32.totalorder %s4774_s18, 0  ;;  %p6695_p12 = por %p94_p9, %p8084_p2 }
  0x4a   : > { %p100_p13 = scmp.ne.s32.totalorder %s6451_s13, %s6447_s12  ;;  %s6701_s3 = sadd.s32 8, %s4771_s28 }
  0x4b   : > { %s8247_s18 = smov (!%p80_p10, %s4774_s18), 0  ;;  %8131 = sst [smem:[#allocation33_spill]] %s6701_s3 }
  0x4c   : > { %s83_s29 = ssub.s32 %s8245_s2, %s8247_s18  ;;  %p8132_p3 = scmp.eq.s32.totalorder %s6625_s23, 0 }
  0x4d   : > { %s84_s24 = sor.u32 %s83_s29, %s6687_s9  ;;  %s6711_s30 = sadd.s32 8, %s4773_s26 }
  0x4e   : > { %p6707_p5 = por %p100_p13, %p8132_p3  ;;  %p85_p1 = scmp.eq.s32.totalorder %s84_s24, 0 }
  0x4f   : > { %p8083_p7 = scmp.lt.s32.totalorder %s6487_s22, 4  ;;  %s6719_s28 = sshll.u32 %s6483_s21, 5 }
  0x50   : > { %s8133_s19 = scalar_select %p6707_p5, 1, 0 }
  0x51   : > { %s6716_s12 = scalar_select %p85_p1, %s6455_s14, %s87_s4  }
  0x52   : > { %8134 = sst [smem:[#allocation34_spill]] %s8133_s19  ;;  %s386_s18 = sand.u32 1, %s6487_s22  }
  0x53   : > { %s388_s29 = sand.u32 1, %s6455_s14   ;;  %s4790_s9 = sshll.u32 %s8245_s2, 1 }
  0x54   : > { %s4787_s13 = sshll.u32 %s388_s29, 3  ;;  %s400_s10 = sadd.s32 %s4790_s9, %s6719_s28 }
  0x55   : > { %s4792_s3 = sshll.u32 %s400_s10, 6  ;;  %s390_s19 = scalar_lea.vmem [#allocation6], %s4787_s13 }
  0x56   : > { %s403_s24 = sshll.u32 %s390_s19, 4  ;;  %s8135_s1 = sld [smem:[#allocation47_spill]]  ;;  %s6729_s24 = int_to_ptr.vmem [resolvable:$true] %s403_s24 }
  0x57   : > { %p6735_p9 = pnand %p8083_p7, %p6695_p12  ;;  %s6492_s2 = smov [#allocation11]  }
  0x58   : > { %s329_s10 = sshll.u32 %s6492_s2, 4  ;;  %s6741_s0 = scalar_lea.sflag [#allocation7], %s386_s18  ;;  %s6739_s10 = int_to_ptr.vmem [resolvable:$true] %s329_s10 }
  0x59   : > { %p6181_p13 = pneg %p6735_p9 }
  0x5c   : > { %s6727_s26 = scalar_lea.hbm %s8135_s1, %s4792_s3  ;;  %s6184_s6 = scalar_lea.hbm %s8135_s1, 4096 }
  0x5d   : > { %s6179_s3 = scalar_lea.hbm %s6727_s26, 128  ;;  %p6185_p12 = scmp.lt.u32.totalorder %s6727_s26, %s8135_s1 }
  0x5e   : > { %p6180_p10 = scmp.ne.s32.totalorder %s6727_s26, %s6179_s3  ;;  %p6186_p4 = scmp.lt.u32.totalorder %s6184_s6, %s6179_s3 }
  0x5f   : > { %p6188_p7 = scmp.lt.u32.totalorder %s6179_s3, %s6727_s26 }
  0x60   : > { %p6182_p3 = pnand %p6181_p13, %p6180_p10  ;;  %p6187_p0 = por %p6186_p4, %p6185_p12 }
  0x62   : > { %p6183_p1 = pneg %p6182_p3  ;;  %p6189_p2 = por %p6188_p7, %p6187_p0 }
  0x64   : > { %p6190_p11 = pnand %p6189_p2, %p6183_p1 }
  0x66   : > { %6193 = shalt.err (!%p6190_p11)
}
  0x67   : > { %s6194_s18 = scalar_lea.vmem %s6729_s24, 128  ;;  %s6493_s29 = smov [#allocation6]  }
  0x68   : > { %p6195_p10 = scmp.ne.s32.totalorder %s6729_s24, %s6194_s18  ;;  %s6199_s2 = sshll.u32 %s6493_s29, 4  ;;  %s6200_s2 = int_to_ptr.vmem [resolvable:$false] %s6199_s2 }
  0x69   : > { %s6201_s11 = scalar_lea.vmem %s6200_s2, 256  ;;  %p6202_p6 = scmp.lt.s32.totalorder %s6729_s24, %s6200_s2 }
  0x6a   : > { %p6197_p3 = pnand %p6195_p10, %p6181_p13  ;;  %p6203_p4 = scmp.lt.s32.totalorder %s6201_s11, %s6194_s18 }
  0x6c   : > { %p6198_p5 = pneg %p6197_p3  ;;  %p6204_p12 = por %p6203_p4, %p6202_p6 }
  0x6e   : > { %p6205_p0 = pnand %p6204_p12, %p6198_p5 }
  0x70   : > { %6208 = shalt.err (!%p6205_p0)
}
  0x71   : > { %s8137_s3 = smov 4   ;;  %s8138_s13 = smov 64  }
  0x72   : > { %5861 = dma.hbm_to_vmem [thread:$0]  (!%p6735_p9), %s6727_s26, 128, %s6729_s24, %s6741_s0, %s8138_s13, %s8138_s13, %s8137_s3  }
  0x73   : > { %s8139_s5 = sld [smem:[#allocation51_spill]] }
  0x79   : > { %s6209_s9 = scalar_lea.hbm %s8139_s5, 9216 }
  0x7a   : > { %p6210_p6 = scmp.ne.s32.totalorder %s8139_s5, %s6209_s9  ;;  %p6216_p5 = scmp.lt.u32.totalorder %s6209_s9, %s8139_s5 }
  0x7c   : > { %p6212_p2 = pnand %p6210_p6, %p6651_p8 }
  0x7e   : > { %p6213_p11 = pneg %p6212_p2 }
  0x80   : > { %p6218_p7 = pnand %p6216_p5, %p6213_p11 }
  0x82   : > { %6221 = shalt.err (!%p6218_p7)
}
  0x83   : > { %s6222_s24 = scalar_lea.vmem %s6739_s10, 9216  ;;  %p6230_p10 = scmp.lt.s32.totalorder %s6739_s10, %s6739_s10 }
  0x84   : > { %p6223_p9 = scmp.ne.s32.totalorder %s6739_s10, %s6222_s24  ;;  %p6231_p3 = scmp.lt.s32.totalorder %s6222_s24, %s6222_s24 }
  0x86   : > { %p6225_p13 = pnand %p6223_p9, %p6651_p8  ;;  %p6232_p4 = por %p6231_p3, %p6230_p10 }
  0x88   : > { %p6226_p1 = pneg %p6225_p13 }
  0x8a   : > { %p6233_p12 = pnand %p6232_p4, %p6226_p1 }
  0x8c   : > { %6236 = shalt.err (!%p6233_p12)
}
  0x8d   : > { %p8140_p0 = scmp.ne.s32.totalorder %s8124_s27, 0  ;;  %s6494_s6 = smov [#allocation12]  }
  0x8e   : > { %s345_s19 = sshll.u32 %s6494_s6, 4  ;;  %s8141_s7 = sld [smem:[#allocation53_spill]]  ;;  %s346_s19 = int_to_ptr.vmem [resolvable:$true] %s345_s19 }
  0x8f   : > { %5851 = dma.hbm_to_vmem [thread:$0]  (!%p8140_p0), %s8139_s5, 9216, %s6739_s10, [#allocation10], %s8138_s13, %s8138_s13, %s8137_s3  }
  0x94   : > { %s6237_s2 = scalar_lea.hbm %s8141_s7, 1024 }
  0x95   : > { %p6238_p6 = scmp.ne.s32.totalorder %s8141_s7, %s6237_s2  ;;  %p6244_p5 = scmp.lt.u32.totalorder %s6237_s2, %s8141_s7 }
  0x97   : > { %p6240_p2 = pnand %p6238_p6, %p6651_p8 }
  0x99   : > { %p6241_p11 = pneg %p6240_p2 }
  0x9b   : > { %p6246_p7 = pnand %p6244_p5, %p6241_p11 }
  0x9d   : > { %6249 = shalt.err (!%p6246_p7)
}
  0x9e   : > { %s6250_s10 = scalar_lea.vmem %s346_s19, 1024  ;;  %p6258_p10 = scmp.lt.s32.totalorder %s346_s19, %s346_s19 }
  0x9f   : > { %p6251_p9 = scmp.ne.s32.totalorder %s346_s19, %s6250_s10  ;;  %p6259_p3 = scmp.lt.s32.totalorder %s6250_s10, %s6250_s10 }
  0xa1   : > { %p6253_p13 = pnand %p6251_p9, %p6651_p8  ;;  %p6260_p4 = por %p6259_p3, %p6258_p10 }
  0xa3   : > { %p6254_p1 = pneg %p6253_p13 }
  0xa5   : > { %p6261_p12 = pnand %p6260_p4, %p6254_p1 }
  0xa7   : > { %6264 = shalt.err (!%p6261_p12)
}
  0xa8   : > { %5854 = dma.hbm_to_vmem [thread:$0]  (!%p8140_p0), %s8141_s7, 1024, %s346_s19, [#allocation13], %s8138_s13, %s8138_s13, %s8137_s3  }
  0xa9   : > { %s4770_s27 = sadd.s32 4294967294, %s6487_s22   ;;  %s51_s25 = sadd.s32 1, %s6467_s17 }
  0xaa   : > { %p8142_p8 = scmp.eq.s32.totalorder %s6690_s8, 0  ;;  %p58_p6 = scmp.ne.s32.totalorder %s6467_s17, %s6463_s16 }
  0xab   : > { %p64_p2 = scmp.ne.s32.totalorder %s6463_s16, %s6459_s15  ;;  %p294_p11 = scmp.eq.s32.totalorder %s4770_s27, 3 }
  0xac   : > { %s6824_s11 = scalar_select %p8142_p8, %s6467_s17, %s51_s25  }
  0xad   : > { %s362_s6 = sand.u32 1, %s6467_s17   ;;  %p8144_p5 = scmp.eq.s32.totalorder %s6487_s22, 0 }
  0xae   : > { %8143 = sst [smem:[#allocation35_spill]] %s6824_s11  ;;  %p8145_p9 = scmp.eq.s32.totalorder %s6625_s23, 0 }
  0xaf   : > { %p60_p7 = por %p8144_p5, %p58_p6  ;;  %p8147_p1 = scmp.eq.s32.totalorder %s6625_s23, 3 }
  0xb0   : > { %p6835_p13 = por %p8145_p9, %p64_p2  ;;  %p6845_p0 = por %p294_p11, %p64_p2 }
  0xb1   : > { %p6841_p10 = por %p8147_p1, %p58_p6  ;;  %s4782_s29 = sshll.u32 %s362_s6, 6 }
  0xb2   : > { %s8149_s8 = scalar_select %p6845_p0, 1, 0 }
  0xb3   : > { %s8148_s19 = scalar_select %p6841_p10, 1, 0 }
  0xb4   : > { %8150 = sst [smem:[#allocation36_spill]] %s8149_s8  ;;  %s5050_s2 = sshll.u32 %s6479_s20, 4 }
  0xb5   : > { %s373_s4 = sadd.s32 %s5050_s2, %s6719_s28  ;;  %s366_s18 = scalar_lea.vmem [#allocation3], %s4782_s29 }
  0xb6   : > { %s376_s24 = sshll.u32 %s366_s18, 4  ;;  %s4786_s10 = sshll.u32 %s373_s4, 6  ;;  %s6851_s24 = int_to_ptr.vmem [resolvable:$true] %s376_s24 }
  0xb7   : > { %s8151_s27 = sld [smem:[#allocation46_spill]]  ;;  %p8152_p3 = scmp.lt.s32.totalorder %s6487_s22, 4 }
  0xb8   : > { %s6864_s29 = scalar_lea.sflag [#allocation4], %s362_s6 }
  0xb9   : > { %p6860_p4 = pnand %p8152_p3, %p60_p7 }
  0xbb   : > { %p6267_p8 = pneg %p6860_p4 }
  0xbd   : > { %s6856_s25 = scalar_lea.hbm %s8151_s27, %s4786_s10  ;;  %s6270_s10 = scalar_lea.hbm %s8151_s27, 4096 }
  0xbe   : > { %s6265_s2 = scalar_lea.hbm %s6856_s25, 1024  ;;  %p6271_p11 = scmp.lt.u32.totalorder %s6856_s25, %s8151_s27 }
  0xbf   : > { %p6266_p12 = scmp.ne.s32.totalorder %s6856_s25, %s6265_s2  ;;  %p6272_p5 = scmp.lt.u32.totalorder %s6270_s10, %s6265_s2 }
  0xc0   : > { %p6274_p9 = scmp.lt.u32.totalorder %s6265_s2, %s6856_s25 }
  0xc1   : > { %p6268_p6 = pnand %p6267_p8, %p6266_p12  ;;  %p6273_p7 = por %p6272_p5, %p6271_p11 }
  0xc3   : > { %p6269_p2 = pneg %p6268_p6  ;;  %p6275_p1 = por %p6274_p9, %p6273_p7 }
  0xc5   : > { %p6276_p3 = pnand %p6275_p1, %p6269_p2 }
  0xc7   : > { %6279 = shalt.err (!%p6276_p3)
}
  0xc8   : > { %s6280_s6 = scalar_lea.vmem %s6851_s24, 1024  ;;  %s6495_s4 = smov [#allocation3]  }
  0xc9   : > { %p6281_p12 = scmp.ne.s32.totalorder %s6851_s24, %s6280_s6  ;;  %s6285_s18 = sshll.u32 %s6495_s4, 4  ;;  %s6286_s18 = int_to_ptr.vmem [resolvable:$false] %s6285_s18 }
  0xca   : > { %s6287_s1 = scalar_lea.vmem %s6286_s18, 2048  ;;  %p6288_p10 = scmp.lt.s32.totalorder %s6851_s24, %s6286_s18 }
  0xcb   : > { %p6283_p6 = pnand %p6281_p12, %p6267_p8  ;;  %p6289_p11 = scmp.lt.s32.totalorder %s6287_s1, %s6280_s6 }
  0xcd   : > { %p6284_p0 = pneg %p6283_p6  ;;  %p6290_p5 = por %p6289_p11, %p6288_p10 }
  0xcf   : > { %p6291_p7 = pnand %p6290_p5, %p6284_p0 }
  0xd1   : > { %6294 = shalt.err (!%p6291_p7)
}
  0xd2   : > { %s8154_s2 = sld [smem:[#allocation23_spill]]  ;;  %s8155_s10 = sld [smem:[#allocation33_spill]] }
  0xd3   : > { %s8156_s26 = sld [smem:[#allocation22_spill]]  ;;  %s8158_s6 = sld [smem:[#allocation32_spill]] }
  0xd4   : > { %s8157_s4 = sld [smem:[#allocation21_spill]]  ;;  %p8160_p0 = scmp.lt.s32.totalorder %s6711_s30, 15 }
  0xd5   : > { %5858 = dma.hbm_to_vmem [thread:$0]  (!%p6860_p4), %s6856_s25, 1024, %s6851_s24, %s6864_s29, %s8138_s13, %s8138_s13, %s8137_s3  }
  0xd6   : > { %s8251_s30 = smov (!%p8160_p0, %s6711_s30), 15  ;;  %p8161_p9 = scmp.eq.s32.totalorder %s6487_s22, 0 }
  0xd7   : > { %p8162_p12 = scmp.eq.s32.totalorder %s6625_s23, 0  ;;  %s8164_s11 = sld [smem:[#allocation48_spill]] }
  0xd8   : > { %s123_s5 = sadd.s32 1, %s8154_s2  ;;  %p8159_p10 = scmp.lt.s32.totalorder %s8155_s10, 15 }
  0xd9   : > { %p130_p8 = scmp.ne.s32.totalorder %s8154_s2, %s8156_s26  ;;  %s415_s1 = sand.u32 1, %s8154_s2  }
  0xda   : > { %s8249_s10 = smov (!%p8159_p10, %s8155_s10), 15  ;;  %p136_p2 = scmp.ne.s32.totalorder %s8156_s26, %s8157_s4 }
  0xdb   : > { %s119_s18 = ssub.s32 %s8249_s10, %s8251_s30  ;;  %p132_p1 = por %p130_p8, %p8161_p9 }
  0xdc   : > { %s120_s7 = sor.u32 %s119_s18, %s8158_s6  ;;  %p6912_p6 = por %p136_p2, %p8162_p12 }
  0xdd   : > { %p121_p3 = scmp.eq.s32.totalorder %s120_s7, 0  ;;  %s4793_s24 = sshll.u32 %s415_s1, 3 }
  0xde   : > { %s8163_s27 = scalar_select %p6912_p6, 1, 0 }
  0xdf   : > { %s4795_s25 = sshll.u32 %s8249_s10, 1  ;;  %s8253_s2 = smov (!%p121_p3, %s8154_s2), %s123_s5 }
  0xe0   : > { %s427_s29 = sadd.s32 %s4795_s25, %s6719_s28  ;;  %s417_s20 = scalar_lea.vmem [#allocation8], %s4793_s24 }
  0xe1   : > { %s4797_s21 = sshll.u32 %s427_s29, 6  ;;  %s430_s26 = sshll.u32 %s417_s20, 4  ;;  %s6925_s26 = int_to_ptr.vmem [resolvable:$true] %s430_s26 }
  0xe2   : > { %s8165_s8 = smov %s8164_s11  ;;  %s6923_s6 = scalar_lea.hbm %s8164_s11, %s4797_s21 }
  0xe3   : > { %p8166_p4 = scmp.lt.s32.totalorder %s6487_s22, 4  ;;  %s6295_s28 = scalar_lea.hbm %s6923_s6, 128 }
  0xe4   : > { %p6296_p5 = scmp.ne.s32.totalorder %s6923_s6, %s6295_s28  ;;  %s6300_s11 = scalar_lea.hbm %s8165_s8, 4096 }
  0xe5   : > { %p6929_p11 = pnand %p8166_p4, %p132_p1  ;;  %p6301_p8 = scmp.lt.u32.totalorder %s6923_s6, %s8165_s8 }
  0xe6   : > { %p6302_p2 = scmp.lt.u32.totalorder %s6300_s11, %s6295_s28  ;;  %p6304_p1 = scmp.lt.u32.totalorder %s6295_s28, %s6923_s6 }
  0xe7   : > { %p6297_p7 = pneg %p6929_p11 }
  0xe8   : > { %p6303_p9 = por %p6302_p2, %p6301_p8 }
  0xe9   : > { %p6298_p10 = pnand %p6297_p7, %p6296_p5 }
  0xea   : > { %p6305_p3 = por %p6304_p1, %p6303_p9 }
  0xeb   : > { %p6299_p0 = pneg %p6298_p10 }
  0xed   : > { %p6306_p12 = pnand %p6305_p3, %p6299_p0 }
  0xef   : > { %6309 = shalt.err (!%p6306_p12)
}
  0xf0   : > { %s6310_s18 = scalar_lea.vmem %s6925_s26, 128  ;;  %s6496_s1 = smov [#allocation8]  }
  0xf1   : > { %p6311_p4 = scmp.ne.s32.totalorder %s6925_s26, %s6310_s18  ;;  %s6315_s24 = sshll.u32 %s6496_s1, 4  ;;  %s6316_s24 = int_to_ptr.vmem [resolvable:$false] %s6315_s24 }
  0xf2   : > { %s6317_s25 = scalar_lea.vmem %s6316_s24, 256  ;;  %p6318_p6 = scmp.lt.s32.totalorder %s6925_s26, %s6316_s24 }
  0xf3   : > { %p6313_p5 = pnand %p6311_p4, %p6297_p7  ;;  %p6319_p8 = scmp.lt.s32.totalorder %s6317_s25, %s6310_s18 }
  0xf5   : > { %p6314_p10 = pneg %p6313_p5  ;;  %p6320_p2 = por %p6319_p8, %p6318_p6 }
  0xf7   : > { %p6321_p9 = pnand %p6320_p2, %p6314_p10 }
  0xf9   : > { %6324 = shalt.err (!%p6321_p9)
}
  0xfa   : > { %5864 = dma.hbm_to_vmem [thread:$0]  (!%p6929_p11), %s6923_s6, 128, %s6925_s26, %s6741_s0, %s8138_s13, %s8138_s13, %s8137_s3  }
  0xfb   : > { %s8168_s29 = sld [smem:[#allocation29_spill]] }
 0x101   : > { %p8169_p7 = scmp.ne.s32.totalorder %s8168_s29, 0 }
 0x103   : > { %442 = sbr.rel (%p8169_p7) target bundleno = 1367 (0x557), region = 56 }
 0x10a   : > { %s6965_s4 = sand.u32 1, %s6463_s16  }
 0x10b   : > { %s4799_s30 = sshll.u32 %s6965_s4, 6  ;;  %s445_s28 = scalar_lea.sflag [#allocation4], %s6965_s4 }
 0x10c   : > { %s6969_s20 = scalar_lea.vmem [#allocation3], %s4799_s30 }
 0x10d   : > { %6410 = dma.done.wait (%p6835_p13), %s445_s28, 1024  }
 0x10e   : > { %6412 = vsyncadd (%p6835_p13), %s445_s28, 4294966272  ;;  %s8170_s0 = sld [smem:[#allocation24_spill]]  ;;  %s8171_s3 = sld [smem:[#allocation34_spill]] }
 0x10f   : > { %s453_s13 = sand.u32 1, %s6625_s23  }
 0x110   : > { %s454_s7 = scalar_lea.sflag [#allocation7], %s453_s13 }
 0x114   : > { %s455_s26 = sand.u32 1, %s8170_s0   ;;  %p8172_p6 = scmp.ne.s32.totalorder %s8171_s3, 0 }
 0x115   : > { %s6977_s6 = sshll.u32 %s455_s26, 3 }
 0x116   : > { %s457_s21 = scalar_lea.vmem [#allocation6], %s6977_s6 }
 0x117   : > { %6414 = dma.done.wait (%p8172_p6), %s454_s7, 128  }
 0x118   : > { %6416 = vsyncadd (%p8172_p6), %s454_s7, 4294967168  ;;  %s8173_s11 = sld [smem:[#allocation22_spill]]  ;;  %p8174_p13 = scmp.ne.s32.totalorder %s8163_s27, 0 }
 0x11e   : > { %s464_s10 = sand.u32 1, %s8173_s11  }
 0x11f   : > { %s6985_s9 = sshll.u32 %s464_s10, 3 }
 0x120   : > { %s466_s5 = scalar_lea.vmem [#allocation8], %s6985_s9 }
 0x121   : > { %6418 = dma.done.wait (%p8174_p13), %s454_s7, 128  }
 0x122   : > { %6420 = vsyncadd (%p8174_p13), %s454_s7, 4294967168  ;;  %p8175_p11 = scmp.eq.s32.totalorder %s6625_s23, 0 }
 0x124   : > { %6422 = dma.done.wait (%p8175_p11), [#allocation10], 10240   ;;  %p8176_p0 = pmov %p8175_p11 }
 0x126   : > { %6424 = vsyncadd (%p8176_p0), [#allocation10], 4294957056  ;;  %p8177_p1 = pmov %p8176_p0 }
 0x127   : > { %p8178_p3 = pmov %p8176_p0 }
 0x128   : > { %6426 = dma.done.wait (%p8177_p1), [#allocation13], 1024  }
 0x129   : > { %6428 = vsyncadd (%p8178_p3), [#allocation13], 4294966272  ;;  %s4805_s18 = sshll.u32 %s6965_s4, 7  ;;  %v6497_v0 = vmov 0.0   ;;  %vm6498_vm0 = vmmov 0   ;;  %v6000_v1 = vld [vmem:[#allocation9] sm:$0xff]  }
 0x12a   : > { %5305 = vmatprep.subr.bf16.mxu0 %v6497_v0  ;;  %5321 = vmatprep.mubr.msk.bf16.mxu0 %vm6498_vm0, %v6497_v0  ;;  %v6001_v2 = vld [vmem:[#allocation9 + $0x8] sm:$0xff]   ;;  %v6002_v3 = vld [vmem:[#allocation9 + $0x10] sm:$0xff]   ;;  %v6003_v4 = vld [vmem:[#allocation9 + $0x18] sm:$0xff]   ;;  %s8179_s1 = sld [smem:[#allocation50_spill]]  ;;  %vm685_vm1 = vcmask 1043456   ;;  %vm692_vm4 = vcmask 1040384  }
 0x12b   : > { %5306 = vmatpush3.bf16.msra.mxu0 %v6000_v1  ;;  %v6004_v5 = vld [vmem:[#allocation9 + $0x20] sm:$0xff]   ;;  %v6005_v6 = vld [vmem:[#allocation9 + $0x28] sm:$0xff]   ;;  %v6006_v7 = vld [vmem:[#allocation9 + $0x30] sm:$0xff]   ;;  %vm686_vm2 = vsmask.f32 7938  ;;  %s7196_s24 = scalar_lea.vmem [#allocation14], %s4805_s18 }
 0x12c   : > { %5307 = vmatprep.subr.bf16.mxu0 %v6497_v0  ;;  %v6007_v8 = vld [vmem:[#allocation9 + $0x38] sm:$0xff]   ;;  %v6009_v9 = vld [vmem:[#allocation9] sm:$0xff]   ;;  %v6010_v12 = vld [vmem:[#allocation9 + $0x8] sm:$0xff]   ;;  %vm662_vm3 = vsmask.f32 256  ;;  %s8188_s25 = sld [smem:[#allocation25_spill]] }
 0x12d   : > { %v6008_v10 = vld [vmem:[%s457_s21] sm:$0xff]   ;;  %v6011_v13 = vld [vmem:[#allocation9 + $0x10] sm:$0xff]   ;;  %v6012_v14 = vld [vmem:[#allocation9 + $0x18] sm:$0xff]   ;;  %vm663_vm5 = vsmask.f32 4368 }
 0x12e   : > { %v6017_v11 = vld [vmem:[%s6969_s20] sm:$0xff]   ;;  %v6014_v16 = vld [vmem:[#allocation9 + $0x28] sm:$0xff]   ;;  %v6015_v17 = vld [vmem:[#allocation9 + $0x30] sm:$0xff]  }
 0x12f   : > { %5308 = vmatpush3.bf16.msra.mxu0 %v6001_v2  ;;  %v6013_v15 = vld [vmem:[#allocation9 + $0x20] sm:$0xff]   ;;  %v6016_v18 = vld [vmem:[#allocation9 + $0x38] sm:$0xff]   ;;  %v6018_v19 = vld [vmem:[%s6969_s20 + $0x8] sm:$0xff]  }
 0x130   : > { %5309 = vmatprep.subr.bf16.mxu0 %v6497_v0  ;;  %v6019_v20 = vld [vmem:[#allocation9] sm:$0xff]   ;;  %v6021_v21 = vld [vmem:[%s6969_s20 + $0x10] sm:$0xff]   ;;  %v6020_v22 = vld [vmem:[#allocation9 + $0x8] sm:$0xff]  }
 0x131   : > { %v6022_v23 = vld [vmem:[%s6969_s20 + $0x18] sm:$0xff]   ;;  %v6023_v24 = vld [vmem:[#allocation9 + $0x10] sm:$0xff]   ;;  %v6025_v25 = vld [vmem:[%s6969_s20 + $0x20] sm:$0xff]  }
 0x132   : > { %v6024_v26 = vld [vmem:[#allocation9 + $0x18] sm:$0xff]   ;;  %v6026_v27 = vld [vmem:[%s6969_s20 + $0x28] sm:$0xff]   ;;  %v6027_v28 = vld [vmem:[#allocation9 + $0x20] sm:$0xff]   ;;  %p4863_p12 = scmp.ne.s32.totalorder %s8188_s25, 0 }
 0x133   : > { %5310 = vmatpush3.bf16.msra.mxu0 %v6002_v3  ;;  %v6029_v29 = vld [vmem:[%s6969_s20 + $0x30] sm:$0xff]   ;;  %v6028_v30 = vld [vmem:[#allocation9 + $0x28] sm:$0xff]   ;;  %v6030_v31 = vld [vmem:[%s6969_s20 + $0x38] sm:$0xff]  }
 0x134   : > { %5311 = vmatprep.subr.bf16.mxu0 %v6497_v0  ;;  %v6031_v32 = vld [vmem:[#allocation9 + $0x30] sm:$0xff]   ;;  %v6032_v33 = vld [vmem:[#allocation9 + $0x38] sm:$0xff]   ;;  %v7036_v35 = vld [vmem:[%s8179_s1] ss:$0 sm:$0xff] }
 0x135   : > { %v6033_v34 = vld [vmem:[%s466_s5] sm:$0xff]   ;;  %vm7041_vm6 = vmand %vm685_vm1, %vm686_vm2  ;;  %v688_v51 = vld [vmem:[#allocation2] sm:$0xf] }
 0x136   : > { %vm7046_vm7 = vmand %vm692_vm4, %vm662_vm3  ;;  %v694_v58 = vld [vmem:[#allocation2 + $0x8] sm:$0x1] }
 0x137   : > { %5312 = vmatpush3.bf16.msra.mxu0 %v6003_v4  ;;  %vm7050_vm8 = vmor %vm662_vm3, %vm663_vm5 }
 0x138   : > { %5313 = vmatprep.subr.bf16.mxu0 %v6497_v0  ;;  %vm7062_vm9 = vmand %vm692_vm4, %vm686_vm2 }
 0x13b   : > { %5314 = vmatpush3.bf16.msra.mxu0 %v6004_v5 }
 0x13c   : > { %5315 = vmatprep.subr.bf16.mxu0 %v6497_v0 }
 0x13f   : > { %5316 = vmatpush3.bf16.msra.mxu0 %v6005_v6 }
 0x140   : > { %5317 = vmatprep.subr.bf16.mxu0 %v6497_v0 }
 0x143   : > { %5318 = vmatpush3.bf16.msra.mxu0 %v6006_v7 }
 0x144   : > { %5319 = vmatprep.subr.bf16.mxu0 %v6497_v0 }
 0x147   : > { %5320 = vmatpush3.bf16.msra.mxu0 %v6007_v8 }
 0x148   : > { %5325 = vmatprep.subr.bf16.mxu0 %v6009_v9 }
 0x14a   : > { %5322 = vmatmul.mubr.bf16.vlgmr.msra.gmra.mrb[0].mxu0 %v6008_v10 }
 0x14b   : > { %5326 = vmatpush3.bf16.msra.mxu0 %v6009_v9  ;;  %5341 = vmatprep.mubr.bf16.mxu0 %v6017_v11 }
 0x14c   : > { %5327 = vmatprep.subr.bf16.mxu0 %v6010_v12 }
 0x14f   : > { %5328 = vmatpush3.bf16.msra.mxu0 %v6010_v12 }
 0x150   : > { %5329 = vmatprep.subr.bf16.mxu0 %v6011_v13 }
 0x153   : > { %5330 = vmatpush3.bf16.msra.mxu0 %v6011_v13 }
 0x154   : > { %5331 = vmatprep.subr.bf16.mxu0 %v6012_v14 }
 0x157   : > { %5332 = vmatpush3.bf16.msra.mxu0 %v6012_v14 }
 0x158   : > { %5333 = vmatprep.subr.bf16.mxu0 %v6013_v15 }
 0x15b   : > { %5334 = vmatpush3.bf16.msra.mxu0 %v6013_v15 }
 0x15c   : > { %5335 = vmatprep.subr.bf16.mxu0 %v6014_v16 }
 0x15f   : > { %5336 = vmatpush3.bf16.msra.mxu0 %v6014_v16 }
 0x160   : > { %5337 = vmatprep.subr.bf16.mxu0 %v6015_v17 }
 0x163   : > { %5338 = vmatpush3.bf16.msra.mxu0 %v6015_v17 }
 0x164   : > { %5339 = vmatprep.subr.bf16.mxu0 %v6016_v18 }
 0x167   : > { %5340 = vmatpush3.bf16.msra.mxu0 %v6016_v18 }
 0x168   : > { %5357 = vmatprep.subr.bf16.mxu0 %v6497_v0 }
 0x16a   : > { %5342 = vmatmul.mubr.bf16.vlgmr.msra.gmra.mrb[4].mxu0 %v6018_v19 }
 0x16b   : > { %5358 = vmatpush3.bf16.msra.mxu0 %v6019_v20  ;;  %5345 = vmatprep.mubr.bf16.mxu0 %v6021_v21 }
 0x16c   : > { %5359 = vmatprep.subr.bf16.mxu0 %v6497_v0 }
 0x16f   : > { %5360 = vmatpush3.bf16.msra.mxu0 %v6020_v22 }
 0x170   : > { %5361 = vmatprep.subr.bf16.mxu0 %v6497_v0 }
 0x172   : > { %5346 = vmatmul.mubr.bf16.gmra.mrb[8].mxu0 %v6022_v23 }
 0x173   : > { %5362 = vmatpush3.bf16.msra.mxu0 %v6023_v24  ;;  %5349 = vmatprep.mubr.bf16.mxu0 %v6025_v25 }
 0x174   : > { %5363 = vmatprep.subr.bf16.mxu0 %v6497_v0 }
 0x177   : > { %5364 = vmatpush3.bf16.msra.mxu0 %v6024_v26 }
 0x178   : > { %5365 = vmatprep.subr.bf16.mxu0 %v6497_v0 }
 0x17a   : > { %5350 = vmatmul.mubr.bf16.gmra.mrb[12].mxu0 %v6026_v27 }
 0x17b   : > { %5366 = vmatpush3.bf16.msra.mxu0 %v6027_v28  ;;  %5353 = vmatprep.mubr.bf16.mxu0 %v6029_v29 }
 0x17c   : > { %5367 = vmatprep.subr.bf16.mxu0 %v6497_v0 }
 0x17f   : > { %5368 = vmatpush3.bf16.msra.mxu0 %v6028_v30 }
 0x180   : > { %5369 = vmatprep.subr.bf16.mxu0 %v6497_v0 }
 0x182   : > { %5354 = vmatmul.mubr.bf16.gmra.mrb[16].mxu0 %v6030_v31  ;;  %v1161_v31 = vld [vmem:[#allocation2 + $0x18] sm:$0xf] }
 0x183   : > { %5370 = vmatpush3.bf16.msra.mxu0 %v6031_v32  ;;  %5373 = vmatprep.mubr.msk.bf16.mxu0 %vm6498_vm0, %v6497_v0 }
 0x184   : > { %5371 = vmatprep.subr.bf16.mxu0 %v6497_v0 }
 0x187   : > { %5372 = vmatpush3.bf16.msra.mxu0 %v6032_v33 }
 0x18a   : > { %5374 = vmatmul.mubr.bf16.vlgmr.msra.gmra.mrb[20].mxu0 %v6033_v34 }
 0x21d   : > { %v647_v36 = vpop.f32.mrb[0].mxu0 }
 0x21e   : > { %v648_v37 = vadd.f32 %v7036_v35, %v647_v36  ;;  %v5323_v38 = vpop.f32.mrb[1].mxu0 }
 0x21f   : > { %v650_v39 = vpop.f32.mrb[2].mxu0 }
 0x220   : > { %v654_v40 = vmax.f32 %v648_v37, 0.0  ;;  %v651_v41 = vadd.f32 %v7036_v35, %v650_v39  ;;  %v5324_v42 = vpop.f32.mrb[3].mxu0 }
 0x222   : > { %v5051_v43 = vpack.c.bf16 %v654_v40, %v654_v40  ;;  %v655_v44 = vmax.f32 %v651_v41, 0.0  ;;  %v1154_v40 = vld [vmem:[#allocation2 + $0xc] sm:$0xf] }
 0x224   : > { %v666_v45 = vshrl.u32 %v5051_v43, 16  ;;  %v669_v46 = vshll.u32 %v5051_v43, 16  ;;  %v5052_v47 = vpack.c.bf16 %v655_v44, %v655_v44 }
 0x226   : > { %v668_v48 = vrot.slane %v666_v45, 7  ;;  %v674_v49 = vshrl.u32 %v5052_v47, 16  ;;  %v677_v56 = vshll.u32 %v5052_v47, 16 }
 0x228   : > { %v671_v52 = vor.u32 %v669_v46, %v668_v48  ;;  %v672_v53 = vrot.slane %v668_v48, 4  ;;  %v676_v55 = vrot.slane %v674_v49, 7  ;;  %v1165_v46 = vld [vmem:[#allocation2 + $0x20] sm:$0x1] }
 0x22a   : > { %v689_v59 = vsel %vm7041_vm6, %v671_v52, %v688_v51  ;;  %v679_v60 = vor.u32 %v677_v56, %v676_v55  ;;  %v681_v61 = vrot.slane %v676_v55, 4 }
 0x22b   : > { %690 = vst [vmem:[#allocation2] sm:$0xf] %v689_v59 }
 0x22c   : > { %v680_v62 = vsel %vm7050_vm8, %v672_v53, %v679_v60  ;;  %v695_v63 = vsel %vm7046_vm7, %v681_v61, %v694_v58  ;;  %v1158_v53 = vld [vmem:[#allocation2 + $0x14] sm:$0x1] }
 0x22d   : > { %691 = vst [vmem:[#allocation2 + $0x4] sm:$0xf] %v680_v62  ;;  %696 = vst [vmem:[#allocation2 + $0x8] sm:$0x1] %v695_v63 }
 0x232   : > { %v1366_v0 = vld [vmem:[#allocation2] sm:$0x1] }
 0x233   : > { %v1367_v2 = vsel %vm7046_vm7, 0, %v1366_v0 }
 0x234   : > { %1368 = vst [vmem:[#allocation2] sm:$0x1] %v1367_v2  ;;  %v1397_v3 = vld [vmem:[#allocation2 + $0x8] sm:$0x1] }
 0x235   : > { %v1398_v4 = vsel %vm7062_vm9, 0, %v1397_v3 }
 0x236   : > { %1399 = vst [vmem:[#allocation2 + $0x8] sm:$0x1] %v1398_v4 }
 0x23d   : > { %v5343_v5 = vpop.f32.mrb[4].mxu0 }
 0x23e   : > { %v875_v6 = vadd.f32 %v5343_v5, %v7036_v35  ;;  %v866_v7 = vpop.f32.mrb[5].mxu0 }
 0x23f   : > { %v867_v8 = vadd.f32 %v7036_v35, %v866_v7  ;;  %v5344_v9 = vpop.f32.mrb[6].mxu0 }
 0x240   : > { %v931_v10 = vmax.f32 %v875_v6, 0.0  ;;  %v878_v11 = vadd.f32 %v5344_v9, %v7036_v35  ;;  %v869_v12 = vpop.f32.mrb[7].mxu0 }
 0x241   : > { %v929_v13 = vmax.f32 %v867_v8, 0.0  ;;  %v870_v14 = vadd.f32 %v7036_v35, %v869_v12 }
 0x242   : > { %v5055_v15 = vpack.c.bf16 %v931_v10, %v931_v10  ;;  %v932_v16 = vmax.f32 %v878_v11, 0.0  ;;  %v1175_v11 = vld [vmem:[#allocation2 + $0x30] sm:$0xf] }
 0x243   : > { %v5053_v17 = vpack.c.bf16 %v929_v13, %v929_v13  ;;  %v930_v18 = vmax.f32 %v870_v14, 0.0 }
 0x244   : > { %v1011_v19 = vshrl.u32 %v5055_v15, 16  ;;  %v5056_v20 = vpack.c.bf16 %v932_v16, %v932_v16  ;;  %v1014_v21 = vshll.u32 %v5055_v15, 16 }
 0x245   : > { %v994_v22 = vshrl.u32 %v5053_v17, 16  ;;  %v997_v23 = vshll.u32 %v5053_v17, 16  ;;  %v5054_v24 = vpack.c.bf16 %v930_v18, %v930_v18  ;;  %v5347_v25 = vpop.f32.mrb[8].mxu0  ;;  %v1168_v17 = vld [vmem:[#allocation2 + $0x24] sm:$0xf] }
 0x246   : > { %v1013_v26 = vrot.slane %v1011_v19, 7  ;;  %v1019_v27 = vshrl.u32 %v5056_v20, 16  ;;  %v1022_v28 = vshll.u32 %v5056_v20, 16  ;;  %v891_v29 = vadd.f32 %v5347_v25, %v7036_v35  ;;  %v882_v30 = vpop.f32.mrb[9].mxu0 }
 0x247   : > { %v996_v32 = vrot.slane %v994_v22, 7  ;;  %v1002_v33 = vshrl.u32 %v5054_v24, 16  ;;  %v1005_v34 = vshll.u32 %v5054_v24, 16  ;;  %v883_v36 = vadd.f32 %v7036_v35, %v882_v30  ;;  %v5348_v37 = vpop.f32.mrb[10].mxu0 }
 0x248   : > { %v1016_v38 = vor.u32 %v1014_v21, %v1013_v26  ;;  %v1017_v39 = vrot.slane %v1013_v26, 4  ;;  %v1021_v41 = vrot.slane %v1019_v27, 7  ;;  %v935_v42 = vmax.f32 %v891_v29, 0.0  ;;  %v885_v43 = vpop.f32.mrb[11].mxu0 }
 0x249   : > { %v999_v44 = vor.u32 %v997_v23, %v996_v32  ;;  %v1000_v45 = vrot.slane %v996_v32, 4  ;;  %v1004_v47 = vrot.slane %v1002_v33, 7  ;;  %v933_v48 = vmax.f32 %v883_v36, 0.0 }
 0x24a   : > { %v1162_v49 = vsel %vm7041_vm6, %v1016_v38, %v1161_v31  ;;  %v1024_v51 = vor.u32 %v1022_v28, %v1021_v41  ;;  %v1026_v52 = vrot.slane %v1021_v41, 4  ;;  %v5059_v55 = vpack.c.bf16 %v935_v42, %v935_v42 }
 0x24b   : > { %1163 = vst [vmem:[#allocation2 + $0x18] sm:$0xf] %v1162_v49  ;;  %v1155_v56 = vsel %vm7041_vm6, %v999_v44, %v1154_v40  ;;  %v1007_v58 = vor.u32 %v1005_v34, %v1004_v47  ;;  %v1009_v59 = vrot.slane %v1004_v47, 4  ;;  %v5057_v60 = vpack.c.bf16 %v933_v48, %v933_v48  ;;  %v1179_v44 = vld [vmem:[#allocation2 + $0x38] sm:$0x1] }
 0x24c   : > { %1156 = vst [vmem:[#allocation2 + $0xc] sm:$0xf] %v1155_v56  ;;  %v1025_v61 = vsel %vm7050_vm8, %v1017_v39, %v1024_v51  ;;  %v1166_v62 = vsel %vm7046_vm7, %v1026_v52, %v1165_v46  ;;  %v1045_v63 = vshrl.u32 %v5059_v55, 16  ;;  %v1048_v3 = vshll.u32 %v5059_v55, 16 }
 0x24d   : > { %1164 = vst [vmem:[#allocation2 + $0x1c] sm:$0xf] %v1025_v61  ;;  %1167 = vst [vmem:[#allocation2 + $0x20] sm:$0x1] %v1166_v62  ;;  %v1008_v0 = vsel %vm7050_vm8, %v1000_v45, %v1007_v58  ;;  %v1159_v2 = vsel %vm7046_vm7, %v1009_v59, %v1158_v53  ;;  %v1028_v4 = vshrl.u32 %v5057_v60, 16  ;;  %v5351_v5 = vpop.f32.mrb[12].mxu0  ;;  %v894_v7 = vadd.f32 %v5348_v37, %v7036_v35 }
 0x24e   : > { %1157 = vst [vmem:[#allocation2 + $0x10] sm:$0xf] %v1008_v0  ;;  %1160 = vst [vmem:[#allocation2 + $0x14] sm:$0x1] %v1159_v2  ;;  %v7088_v6 = vrot.slane %v1045_v63, 7  ;;  %v886_v8 = vadd.f32 %v7036_v35, %v885_v43  ;;  %v907_v9 = vadd.f32 %v5351_v5, %v7036_v35  ;;  %v898_v10 = vpop.f32.mrb[13].mxu0 }
 0x24f   : > { %v7093_v12 = vrot.slane %v1028_v4, 7  ;;  %v1031_v13 = vshll.u32 %v5057_v60, 16  ;;  %v899_v14 = vadd.f32 %v7036_v35, %v898_v10  ;;  %v5352_v15 = vpop.f32.mrb[14].mxu0  ;;  %v936_v18 = vmax.f32 %v894_v7, 0.0  ;;  %v1172_v53 = vld [vmem:[#allocation2 + $0x2c] sm:$0x1] }
 0x250   : > { %v1050_v16 = vor.u32 %v1048_v3, %v7088_v6  ;;  %v934_v19 = vmax.f32 %v886_v8, 0.0  ;;  %v901_v20 = vpop.f32.mrb[15].mxu0  ;;  %v1051_v21 = vrot.slane %v7088_v6, 4  ;;  %v939_v23 = vmax.f32 %v907_v9, 0.0  ;;  %v1189_v2 = vld [vmem:[#allocation2 + $0x48] sm:$0xf] }
 0x251   : > { %v1033_v22 = vor.u32 %v1031_v13, %v7093_v12  ;;  %v937_v24 = vmax.f32 %v899_v14, 0.0  ;;  %v5060_v27 = vpack.c.bf16 %v936_v18, %v936_v18  ;;  %v910_v29 = vadd.f32 %v5352_v15, %v7036_v35  ;;  %v1182_v14 = vld [vmem:[#allocation2 + $0x3c] sm:$0xf] }
 0x252   : > { %v1372_v25 = vld [vmem:[#allocation2 + $0x18] sm:$0x1]  ;;  %v1176_v26 = vsel %vm7041_vm6, %v1050_v16, %v1175_v11  ;;  %v5058_v28 = vpack.c.bf16 %v934_v19, %v934_v19  ;;  %v5063_v33 = vpack.c.bf16 %v939_v23, %v939_v23  ;;  %v1034_v38 = vrot.slane %v7093_v12, 4 }
 0x253   : > { %v1373_v30 = vsel %vm7046_vm7, 0, %v1372_v25  ;;  %v1369_v31 = vld [vmem:[#allocation2 + $0xc] sm:$0x1]  ;;  %1177 = vst [vmem:[#allocation2 + $0x30] sm:$0xf] %v1176_v26  ;;  %v1169_v32 = vsel %vm7041_vm6, %v1033_v22, %v1168_v17  ;;  %v5061_v34 = vpack.c.bf16 %v937_v24, %v937_v24  ;;  %v1053_v39 = vshrl.u32 %v5060_v27, 16 }
 0x254   : > { %1374 = vst [vmem:[#allocation2 + $0x18] sm:$0x1] %v1373_v30  ;;  %v1370_v36 = vsel %vm7046_vm7, 0, %v1369_v31  ;;  %v1403_v37 = vld [vmem:[#allocation2 + $0x20] sm:$0x1]  ;;  %v1036_v40 = vshrl.u32 %v5058_v28, 16  ;;  %v902_v59 = vadd.f32 %v7036_v35, %v901_v20 }
 0x255   : > { %1170 = vst [vmem:[#allocation2 + $0x24] sm:$0xf] %v1169_v32  ;;  %1371 = vst [vmem:[#allocation2 + $0xc] sm:$0x1] %v1370_v36  ;;  %v1404_v41 = vsel %vm7062_vm9, 0, %v1403_v37  ;;  %v1056_v43 = vshll.u32 %v5060_v27, 16 }
 0x256   : > { %v1400_v42 = vld [vmem:[#allocation2 + $0x14] sm:$0x1]  ;;  %v1039_v45 = vshll.u32 %v5058_v28, 16  ;;  %v1079_v46 = vshrl.u32 %v5063_v33, 16  ;;  %1405 = vst [vmem:[#allocation2 + $0x20] sm:$0x1] %v1404_v41 }
 0x257   : > { %v1401_v47 = vsel %vm7062_vm9, 0, %v1400_v42  ;;  %v1055_v48 = vrot.slane %v1053_v39, 7  ;;  %v1038_v49 = vrot.slane %v1036_v40, 7  ;;  %v1062_v51 = vshrl.u32 %v5061_v34, 16  ;;  %v5355_v52 = vpop.f32.mrb[16].mxu0 }
 0x258   : > { %1402 = vst [vmem:[#allocation2 + $0x14] sm:$0x1] %v1401_v47  ;;  %v7113_v55 = vrot.slane %v1079_v46, 7  ;;  %v1082_v56 = vshll.u32 %v5063_v33, 16  ;;  %v940_v58 = vmax.f32 %v910_v29, 0.0  ;;  %v914_v60 = vpop.f32.mrb[17].mxu0  ;;  %v923_v24 = vadd.f32 %v5355_v52, %v7036_v35 }
 0x259   : > { %v1058_v61 = vor.u32 %v1056_v43, %v1055_v48  ;;  %v1060_v62 = vrot.slane %v1055_v48, 4  ;;  %v1041_v63 = vor.u32 %v1039_v45, %v1038_v49  ;;  %v1043_v0 = vrot.slane %v1038_v49, 4  ;;  %v5356_v3 = vpop.f32.mrb[18].mxu0  ;;  %v1193_v33 = vld [vmem:[#allocation2 + $0x50] sm:$0x1] }
 0x25a   : > { %v1084_v4 = vor.u32 %v1082_v56, %v7113_v55  ;;  %v7117_v5 = vrot.slane %v1062_v51, 7  ;;  %v1065_v6 = vshll.u32 %v5061_v34, 16  ;;  %v5064_v7 = vpack.c.bf16 %v940_v58, %v940_v58  ;;  %v917_v8 = vpop.f32.mrb[19].mxu0  ;;  %v1378_v9 = vld [vmem:[#allocation2 + $0x30] sm:$0x1] }
 0x25b   : > { %v1059_v10 = vsel %vm7050_vm8, %v1051_v21, %v1058_v61  ;;  %v1180_v11 = vsel %vm7046_vm7, %v1060_v62, %v1179_v44  ;;  %v1042_v12 = vsel %vm7050_vm8, %v1034_v38, %v1041_v63  ;;  %v1173_v13 = vsel %vm7046_vm7, %v1043_v0, %v1172_v53  ;;  %v1186_v46 = vld [vmem:[#allocation2 + $0x44] sm:$0x1] }
 0x25c   : > { %v1379_v15 = vsel %vm7046_vm7, 0, %v1378_v9  ;;  %v1375_v16 = vld [vmem:[#allocation2 + $0x24] sm:$0x1]  ;;  %1178 = vst [vmem:[#allocation2 + $0x34] sm:$0xf] %v1059_v10  ;;  %v1190_v17 = vsel %vm7041_vm6, %v1084_v4, %v1189_v2  ;;  %v1067_v18 = vor.u32 %v1065_v6, %v7117_v5  ;;  %v1085_v20 = vrot.slane %v7113_v55, 4 }
 0x25d   : > { %1181 = vst [vmem:[#allocation2 + $0x38] sm:$0x1] %v1180_v11  ;;  %1171 = vst [vmem:[#allocation2 + $0x28] sm:$0xf] %v1042_v12  ;;  %v1376_v19 = vsel %vm7046_vm7, 0, %v1375_v16  ;;  %v1087_v21 = vshrl.u32 %v5064_v7, 16  ;;  %v915_v25 = vadd.f32 %v7036_v35, %v914_v60  ;;  %v926_v26 = vadd.f32 %v5356_v3, %v7036_v35 }
 0x25e   : > { %1174 = vst [vmem:[#allocation2 + $0x2c] sm:$0x1] %v1173_v13  ;;  %1380 = vst [vmem:[#allocation2 + $0x30] sm:$0x1] %v1379_v15  ;;  %v938_v22 = vmax.f32 %v902_v59, 0.0  ;;  %v1183_v23 = vsel %vm7041_vm6, %v1067_v18, %v1182_v14  ;;  %v1323_v27 = vpop.f32.mrb[20].mxu0  ;;  %v918_v31 = vadd.f32 %v7036_v35, %v917_v8 }
 0x25f   : > { %1191 = vst [vmem:[#allocation2 + $0x48] sm:$0xf] %v1190_v17  ;;  %1377 = vst [vmem:[#allocation2 + $0x24] sm:$0x1] %v1376_v19  ;;  %v1089_v28 = vrot.slane %v1087_v21, 7  ;;  %v1090_v29 = vshll.u32 %v5064_v7, 16  ;;  %v1324_v38 = vadd.f32 %v7036_v35, %v1323_v27 }
 0x260   : > { %1184 = vst [vmem:[#allocation2 + $0x3c] sm:$0xf] %v1183_v23  ;;  %v5062_v30 = vpack.c.bf16 %v938_v22, %v938_v22  ;;  %v5375_v32 = vpop.f32.mrb[21].mxu0  ;;  %v943_v34 = vmax.f32 %v923_v24, 0.0  ;;  %v941_v36 = vmax.f32 %v915_v25, 0.0  ;;  %v944_v37 = vmax.f32 %v926_v26, 0.0 }
 0x261   : > { %v1326_v39 = vpop.f32.mrb[22].mxu0  ;;  %v1068_v40 = vrot.slane %v7117_v5, 4  ;;  %v1092_v41 = vor.u32 %v1090_v29, %v1089_v28  ;;  %v1094_v42 = vrot.slane %v1089_v28, 4  ;;  %v942_v58 = vmax.f32 %v918_v31, 0.0  ;;  %v1203_v13 = vld [vmem:[#allocation2 + $0x60] sm:$0xf] }
 0x262   : > { %v1070_v43 = vshrl.u32 %v5062_v30, 16  ;;  %v5376_v44 = vpop.f32.mrb[23].mxu0  ;;  %v1073_v45 = vshll.u32 %v5062_v30, 16  ;;  %v5067_v47 = vpack.c.bf16 %v943_v34, %v943_v34  ;;  %v5065_v48 = vpack.c.bf16 %v941_v36, %v941_v36  ;;  %v1196_v16 = vld [vmem:[#allocation2 + $0x54] sm:$0xf] }
 0x263   : > { %v5068_v49 = vpack.c.bf16 %v944_v37, %v944_v37  ;;  %v1093_v53 = vsel %vm7050_vm8, %v1085_v20, %v1092_v41  ;;  %v1194_v55 = vsel %vm7046_vm7, %v1094_v42, %v1193_v33  ;;  %v1330_v63 = vmax.f32 %v1324_v38, 0.0  ;;  %v1207_v22 = vld [vmem:[#allocation2 + $0x68] sm:$0x1]  ;;  %v1200_v37 = vld [vmem:[#allocation2 + $0x5c] sm:$0x1] }
 0x264   : > { %v1409_v51 = vld [vmem:[#allocation2 + $0x38] sm:$0x1]  ;;  %v1072_v56 = vrot.slane %v1070_v43, 7  ;;  %1192 = vst [vmem:[#allocation2 + $0x4c] sm:$0xf] %v1093_v53  ;;  %v1113_v62 = vshrl.u32 %v5067_v47, 16  ;;  %v5066_v19 = vpack.c.bf16 %v942_v58, %v942_v58  ;;  %v1327_v24 = vadd.f32 %v7036_v35, %v1326_v39 }
 0x265   : > { %v1406_v52 = vld [vmem:[#allocation2 + $0x2c] sm:$0x1]  ;;  %v1410_v59 = vsel %vm7062_vm9, 0, %v1409_v51  ;;  %1195 = vst [vmem:[#allocation2 + $0x50] sm:$0x1] %v1194_v55  ;;  %v1096_v4 = vshrl.u32 %v5065_v48, 16  ;;  %v5069_v23 = vpack.c.bf16 %v1330_v63, %v1330_v63 }
 0x266   : > { %v1407_v60 = vsel %vm7062_vm9, 0, %v1406_v52  ;;  %v1384_v61 = vld [vmem:[#allocation2 + $0x48] sm:$0x1]  ;;  %1411 = vst [vmem:[#allocation2 + $0x38] sm:$0x1] %v1410_v59  ;;  %v1075_v2 = vor.u32 %v1073_v45, %v1072_v56  ;;  %v1077_v3 = vrot.slane %v1072_v56, 4 }
 0x267   : > { %1408 = vst [vmem:[#allocation2 + $0x2c] sm:$0x1] %v1407_v60  ;;  %v1385_v0 = vsel %vm7046_vm7, 0, %v1384_v61  ;;  %v1381_v5 = vld [vmem:[#allocation2 + $0x3c] sm:$0x1]  ;;  %v1115_v6 = vrot.slane %v1113_v62, 7 }
 0x268   : > { %1386 = vst [vmem:[#allocation2 + $0x48] sm:$0x1] %v1385_v0  ;;  %v1116_v7 = vshll.u32 %v5067_v47, 16  ;;  %v1099_v8 = vshll.u32 %v5065_v48, 16  ;;  %v1121_v9 = vshrl.u32 %v5068_v49, 16  ;;  %v1382_v10 = vsel %vm7046_vm7, 0, %v1381_v5 }
 0x269   : > { %v1076_v11 = vsel %vm7050_vm8, %v1068_v40, %v1075_v2  ;;  %v1187_v12 = vsel %vm7046_vm7, %v1077_v3, %v1186_v46  ;;  %v1098_v14 = vrot.slane %v1096_v4, 7  ;;  %1383 = vst [vmem:[#allocation2 + $0x3c] sm:$0x1] %v1382_v10  ;;  %v1124_v18 = vshll.u32 %v5068_v49, 16  ;;  %v1359_v44 = vld [vmem:[#allocation2 + $0x6c] sm:$0xf] }
 0x26a   : > { %1185 = vst [vmem:[#allocation2 + $0x40] sm:$0xf] %v1076_v11  ;;  %1188 = vst [vmem:[#allocation2 + $0x44] sm:$0x1] %v1187_v12  ;;  %v1118_v15 = vor.u32 %v1116_v7, %v1115_v6  ;;  %v1123_v17 = vrot.slane %v1121_v9, 7  ;;  %v1119_v20 = vrot.slane %v1115_v6, 4 }
 0x26b   : > { %v1101_v21 = vor.u32 %v1099_v8, %v1098_v14  ;;  %v1104_v28 = vshrl.u32 %v5066_v19, 16  ;;  %v1107_v31 = vshll.u32 %v5066_v19, 16  ;;  %v1339_v32 = vshrl.u32 %v5069_v23, 16  ;;  %v1363_v63 = vld [vmem:[#allocation2 + $0x74] sm:$0x1] }
 0x26c   : > { %v1204_v25 = vsel %vm7041_vm6, %v1118_v15, %v1203_v13  ;;  %v1126_v26 = vor.u32 %v1124_v18, %v1123_v17  ;;  %v1128_v27 = vrot.slane %v1123_v17, 4  ;;  %v1415_v29 = vld [vmem:[#allocation2 + $0x50] sm:$0x1]  ;;  %v1342_v39 = vshll.u32 %v5069_v23, 16 }
 0x26d   : > { %1205 = vst [vmem:[#allocation2 + $0x60] sm:$0xf] %v1204_v25  ;;  %v1197_v30 = vsel %vm7041_vm6, %v1101_v21, %v1196_v16  ;;  %v1416_v33 = vsel %vm7062_vm9, 0, %v1415_v29  ;;  %v1106_v36 = vrot.slane %v1104_v28, 7  ;;  %v1341_v38 = vrot.slane %v1339_v32, 7 }
 0x26e   : > { %1198 = vst [vmem:[#allocation2 + $0x54] sm:$0xf] %v1197_v30  ;;  %v1127_v35 = vsel %vm7050_vm8, %v1119_v20, %v1126_v26  ;;  %v1208_v34 = vsel %vm7046_vm7, %v1128_v27, %v1207_v22  ;;  %1417 = vst [vmem:[#allocation2 + $0x50] sm:$0x1] %v1416_v33  ;;  %v1331_v40 = vmax.f32 %v1327_v24, 0.0  ;;  %v1102_v41 = vrot.slane %v1098_v14, 4 }
 0x26f   : > { %1206 = vst [vmem:[#allocation2 + $0x64] sm:$0xf] %v1127_v35  ;;  %1209 = vst [vmem:[#allocation2 + $0x68] sm:$0x1] %v1208_v34  ;;  %v1109_v42 = vor.u32 %v1107_v31, %v1106_v36  ;;  %v1111_v43 = vrot.slane %v1106_v36, 4  ;;  %v1344_v46 = vor.u32 %v1342_v39, %v1341_v38  ;;  %v1345_v0 = vrot.slane %v1341_v38, 4 }
 0x270   : > { %v5070_v47 = vpack.c.bf16 %v1331_v40, %v1331_v40  ;;  %v6499_v11 = vmov (!%p4863_p12), 0  }
 0x271   : > { %v1412_v45 = vld [vmem:[#allocation2 + $0x44] sm:$0x1]  ;;  %v1110_v49 = vsel %vm7050_vm8, %v1102_v41, %v1109_v42  ;;  %v1201_v51 = vsel %vm7046_vm7, %v1111_v43, %v1200_v37  ;;  %v1360_v52 = vsel %vm7041_vm6, %v1344_v46, %v1359_v44  ;;  %1431 = vst [vmem:[#allocation2] sm:$0xf] (!%p4863_p12), %v6499_v11  ;;  %1432 = vst [vmem:[#allocation2 + $0x4] sm:$0xf] (!%p4863_p12), %v6499_v11 }
 0x272   : > { %v1413_v48 = vsel %vm7062_vm9, 0, %v1412_v45  ;;  %1199 = vst [vmem:[#allocation2 + $0x58] sm:$0xf] %v1110_v49  ;;  %1202 = vst [vmem:[#allocation2 + $0x5c] sm:$0x1] %v1201_v51  ;;  %v1347_v53 = vshrl.u32 %v5070_v47, 16 }
 0x273   : > { %1414 = vst [vmem:[#allocation2 + $0x44] sm:$0x1] %v1413_v48  ;;  %1361 = vst [vmem:[#allocation2 + $0x6c] sm:$0xf] %v1360_v52  ;;  %v1350_v60 = vshll.u32 %v5070_v47, 16 }
 0x274   : > { %v1390_v55 = vld [vmem:[#allocation2 + $0x60] sm:$0x1]  ;;  %v1349_v59 = vrot.slane %v1347_v53, 7  ;;  %1433 = vst [vmem:[#allocation2 + $0x8] sm:$0x1] (!%p4863_p12), %v6499_v11 }
 0x275   : > { %v1391_v56 = vsel %vm7046_vm7, 0, %v1390_v55  ;;  %v1387_v58 = vld [vmem:[#allocation2 + $0x54] sm:$0x1] }
 0x276   : > { %1392 = vst [vmem:[#allocation2 + $0x60] sm:$0x1] %v1391_v56  ;;  %v1388_v61 = vsel %vm7046_vm7, 0, %v1387_v58  ;;  %v1421_v62 = vld [vmem:[#allocation2 + $0x68] sm:$0x1]  ;;  %v1352_v2 = vor.u32 %v1350_v60, %v1349_v59  ;;  %v1354_v3 = vrot.slane %v1349_v59, 4 }
 0x277   : > { %1389 = vst [vmem:[#allocation2 + $0x54] sm:$0x1] %v1388_v61  ;;  %v1422_v50 = vsel %vm7062_vm9, 0, %v1421_v62 }
 0x278   : > { %1423 = vst [vmem:[#allocation2 + $0x68] sm:$0x1] %v1422_v50  ;;  %v1353_v4 = vsel %vm7050_vm8, %v1345_v0, %v1352_v2  ;;  %v1364_v5 = vsel %vm7046_vm7, %v1354_v3, %v1363_v63 }
 0x279   : > { %v1418_v6 = vld [vmem:[#allocation2 + $0x5c] sm:$0x1]  ;;  %1362 = vst [vmem:[#allocation2 + $0x70] sm:$0xf] %v1353_v4  ;;  %1365 = vst [vmem:[#allocation2 + $0x74] sm:$0x1] %v1364_v5 }
 0x27a   : > { %v1419_v7 = vsel %vm7062_vm9, 0, %v1418_v6  ;;  %v1393_v8 = vld [vmem:[#allocation2 + $0x6c] sm:$0x1] }
 0x27b   : > { %1420 = vst [vmem:[#allocation2 + $0x5c] sm:$0x1] %v1419_v7  ;;  %v1394_v9 = vsel %vm7046_vm7, 0, %v1393_v8 }
 0x27c   : > { %1395 = vst [vmem:[#allocation2 + $0x6c] sm:$0x1] %v1394_v9  ;;  %1430 = sbr.rel (%p4863_p12) target bundleno = 643 (0x283), region = 84 }
 0x280   : > { %v1424_v10 = vld [vmem:[#allocation2 + $0x74] sm:$0x1] }
 0x281   : > { %v1425_v57 = vsel %vm7062_vm9, 0, %v1424_v10 }
 0x282   : > { %1426 = vst [vmem:[#allocation2 + $0x74] sm:$0x1] %v1425_v57 }
 0x283 PF: > { %s8189_s29 = sld [smem:[#allocation25_spill]] }
 0x289   : > { %p4864_p4 = scmp.ne.s32.totalorder %s8189_s29, 1 }
 0x28a   : > { %v6500_v54 = vmov (!%p4864_p4), 0  }
 0x28b   : > { %1437 = sbr.rel (%p4864_p4) target bundleno = 658 (0x292), region = 88  ;;  %1438 = vst [vmem:[#allocation2 + $0x6c] sm:$0xf] (!%p4864_p4), %v6500_v54  ;;  %1439 = vst [vmem:[#allocation2 + $0x70] sm:$0xf] (!%p4864_p4), %v6500_v54 }
 0x28c   : > { %1440 = vst [vmem:[#allocation2 + $0x74] sm:$0x1] (!%p4864_p4), %v6500_v54 }
 0x292 PF: > { %v6034_v1 = vld [vmem:[#allocation11 + $0x80] sm:$0xff]   ;;  %v6035_v12 = vld [vmem:[#allocation11 + $0x88] sm:$0xff]   ;;  %v6036_v13 = vld [vmem:[#allocation11 + $0x90] sm:$0xff]   ;;  %vm2087_vm10 = vcmask 1042432   ;;  %vm2088_vm11 = vcmask 1046532   ;;  %s8212_s0 = sld [smem:[#allocation52_spill]] }
 0x293   : > { %5441 = vmatprep.subr.bf16.mxu1 %v6034_v1  ;;  %v6037_v14 = vld [vmem:[#allocation11 + $0x98] sm:$0xff]   ;;  %v7200_v15 = vld [vmem:[#allocation2 + $0x4] sm:$0xf]  ;;  %v7202_v16 = vld [vmem:[#allocation2 + $0x8] sm:$0x1]  ;;  %s8213_s26 = sld [smem:[#allocation54_spill]] }
 0x294   : > { %5442 = vmatpush3.bf16.msra.mxu1 %v6034_v1  ;;  %v2063_v17 = vld [vmem:[#allocation2] sm:$0xe]  ;;  %vm7204_vm12 = vmor %vm2087_vm10, %vm2088_vm11  ;;  %v2092_v20 = vrot.slane %v7200_v15, 5  ;;  %v2095_v21 = vrot.slane %v7202_v16, 5  ;;  %v6038_v24 = vld [vmem:[#allocation11 + $0xa0] sm:$0xff]   ;;  %s8214_s6 = sld [smem:[#allocation25_spill]] }
 0x295   : > { %5443 = vmatprep.subr.bf16.mxu1 %v6035_v12  ;;  %v4897_v19 = vrot.slane %v2063_v17, 9  ;;  %v6039_v27 = vld [vmem:[#allocation11 + $0xa8] sm:$0xff]   ;;  %v7214_v28 = vld [vmem:[#allocation2 + $0x10] sm:$0xf]  ;;  %v2064_v29 = vld [vmem:[#allocation2 + $0xc] sm:$0xe] }
 0x296   : > { %v2094_v23 = vrot.slane %v2092_v20, 4  ;;  %v7216_v30 = vld [vmem:[#allocation2 + $0x1c] sm:$0xf]  ;;  %v7218_v31 = vld [vmem:[#allocation2 + $0x14] sm:$0x1]  ;;  %v2099_v32 = vrot.slane %v7214_v28, 5 }
 0x297   : > { %v2093_v22 = vsel %vm7204_vm12, %v4897_v19, %v2092_v20  ;;  %v1448_v33 = vld [vmem:[#allocation2 + $0x28] sm:$0xf]  ;;  %v4898_v34 = vrot.slane %v2064_v29, 9  ;;  %v7221_v36 = vld [vmem:[#allocation2 + $0x20] sm:$0x1]  ;;  %v2106_v37 = vrot.slane %v7216_v30, 5 }
 0x298   : > { %5444 = vmatpush3.bf16.msra.mxu1 %v6035_v12  ;;  %v2096_v25 = vsel %vm7204_vm12, %v2094_v23, %v2095_v21  ;;  %v6040_v35 = vld [vmem:[#allocation11 + $0xb0] sm:$0xff]   ;;  %8192 = vst [vmem:[#allocation37_spill] sm:$0xff] %v7221_v36  ;;  %v2065_v38 = vld [vmem:[#allocation2 + $0x18] sm:$0xe]  ;;  %v2066_v39 = vld [vmem:[#allocation2 + $0x24] sm:$0xe] }
 0x299   : > { %5445 = vmatprep.subr.bf16.mxu1 %v6036_v13  ;;  %v4905_v26 = vcombine.low %v2093_v22, %v2096_v25  ;;  %v6041_v40 = vld [vmem:[#allocation11 + $0xb8] sm:$0xff]   ;;  %v2102_v41 = vrot.slane %v7218_v31, 5  ;;  %v2113_v42 = vrot.slane %v1448_v33, 5  ;;  %v2101_v43 = vrot.slane %v2099_v32, 4  ;;  %v1476_v45 = vld [vmem:[#allocation2 + $0x2c] sm:$0x1] }
 0x29a   : > { %v2109_v44 = vrot.slane %v7221_v36, 5  ;;  %v4899_v46 = vrot.slane %v2065_v38, 9  ;;  %v2108_v47 = vrot.slane %v2106_v37, 4  ;;  %v1450_v48 = vld [vmem:[#allocation2 + $0x34] sm:$0xf]  ;;  %v4900_v51 = vrot.slane %v2066_v39, 9 }
 0x29b   : > { %5457 = vmatprep.mubr.bf16.mxu1 %v4905_v26  ;;  %v1477_v49 = vld [vmem:[#allocation2 + $0x38] sm:$0x1]  ;;  %v2115_v53 = vrot.slane %v2113_v42, 4  ;;  %v2116_v55 = vrot.slane %v1476_v45, 5  ;;  %v2067_v56 = vld [vmem:[#allocation2 + $0x30] sm:$0xe]  ;;  %v2100_v58 = vsel %vm7204_vm12, %v4898_v34, %v2099_v32  ;;  %v2103_v59 = vsel %vm7204_vm12, %v2101_v43, %v2102_v41 }
 0x29c   : > { %5446 = vmatpush3.bf16.msra.mxu1 %v6036_v13  ;;  %v6042_v52 = vld [vmem:[#allocation11 + $0xc0] sm:$0xff]   ;;  %v2120_v60 = vrot.slane %v1450_v48, 5  ;;  %v2123_v61 = vrot.slane %v1477_v49, 5  ;;  %v2107_v62 = vsel %vm7204_vm12, %v4899_v46, %v2106_v37  ;;  %v2110_v63 = vsel %vm7204_vm12, %v2108_v47, %v2109_v44  ;;  %v1452_v50 = vld [vmem:[#allocation2 + $0x40] sm:$0xf]  ;;  %v6044_v57 = vld [vmem:[#allocation11 + $0xd0] sm:$0xff]  }
 0x29d   : > { %5447 = vmatprep.subr.bf16.mxu1 %v6037_v14  ;;  %v4906_v0 = vcombine.low %v2100_v58, %v2103_v59  ;;  %v6043_v2 = vld [vmem:[#allocation11 + $0xc8] sm:$0xff]   ;;  %v2068_v4 = vld [vmem:[#allocation2 + $0x3c] sm:$0xe]  ;;  %v4907_v5 = vcombine.low %v2107_v62, %v2110_v63  ;;  %v4901_v6 = vrot.slane %v2067_v56, 9  ;;  %v1454_v8 = vld [vmem:[#allocation2 + $0x4c] sm:$0xf]  ;;  %v2114_v54 = vsel %vm7204_vm12, %v4900_v51, %v2113_v42 }
 0x29e   : > { %v1478_v3 = vld [vmem:[#allocation2 + $0x44] sm:$0x1]  ;;  %v2122_v7 = vrot.slane %v2120_v60, 4  ;;  %v4902_v9 = vrot.slane %v2068_v4, 9  ;;  %v2127_v10 = vrot.slane %v1452_v50, 5  ;;  %v2117_v1 = vsel %vm7204_vm12, %v2115_v53, %v2116_v55  ;;  %v6045_v23 = vld [vmem:[#allocation11 + $0xd8] sm:$0xff]  }
 0x29f   : > { %v1479_v11 = vld [vmem:[#allocation2 + $0x50] sm:$0x1]  ;;  %v2130_v12 = vrot.slane %v1478_v3, 5  ;;  %v2134_v13 = vrot.slane %v1454_v8, 5  ;;  %v2069_v19 = vld [vmem:[#allocation2 + $0x48] sm:$0xe]  ;;  %v4908_v22 = vcombine.low %v2114_v54, %v2117_v1 }
 0x2a0   : > { %5448 = vmatpush3.bf16.msra.mxu1 %v6037_v14  ;;  %v2121_v14 = vsel %vm7204_vm12, %v4901_v6, %v2120_v60  ;;  %v2124_v17 = vsel %vm7204_vm12, %v2122_v7, %v2123_v61  ;;  %v2129_v20 = vrot.slane %v2127_v10, 4  ;;  %v2137_v21 = vrot.slane %v1479_v11, 5  ;;  %v1480_v29 = vld [vmem:[#allocation2 + $0x5c] sm:$0x1]  ;;  %v2070_v34 = vld [vmem:[#allocation2 + $0x54] sm:$0xe] }
 0x2a1   : > { %5449 = vmatprep.subr.bf16.mxu1 %v6038_v24  ;;  %v4909_v25 = vcombine.low %v2121_v14, %v2124_v17  ;;  %v4903_v26 = vrot.slane %v2069_v19, 9  ;;  %v1494_v32 = vshll.u32 %v7200_v15, 16  ;;  %v1498_v33 = vshrl.u32 %v7200_v15, 16  ;;  %v6046_v39 = vld [vmem:[#allocation11 + $0xe0] sm:$0xff]   ;;  %v6047_v49 = vld [vmem:[#allocation11 + $0xe8] sm:$0xff]   ;;  %v6048_v59 = vld [vmem:[#allocation11 + $0xf0] sm:$0xff]  }
 0x2a2   : > { %v2128_v37 = vsel %vm7204_vm12, %v4902_v9, %v2127_v10  ;;  %v2131_v38 = vsel %vm7204_vm12, %v2129_v20, %v2130_v12  ;;  %v4904_v43 = vrot.slane %v2070_v34, 9  ;;  %v2144_v45 = vrot.slane %v1480_v29, 5  ;;  %v2598_v58 = vld [vmem:[#allocation2 + $0xc] sm:$0xf]  ;;  %v2601_v60 = vld [vmem:[#allocation2 + $0x18] sm:$0xf] }
 0x2a3   : > { %v7252_v15 = vrot.slane %v1494_v32, 5  ;;  %v1500_v42 = vrot.slane %v1498_v33, 4  ;;  %v4910_v46 = vcombine.low %v2128_v37, %v2131_v38  ;;  %v1504_v48 = vshll.u32 %v7202_v16, 16  ;;  %v7262_v16 = vld [vmem:[#allocation2 + $0x10] sm:$0xf]  ;;  %v6051_v34 = vld [vmem:[#allocation2 + $0x18] sm:$0xff]  }
 0x2a4   : > { %5450 = vmatpush3.bf16.msra.mxu1 %v6038_v24  ;;  %v1456_v24 = vld [vmem:[#allocation2 + $0x58] sm:$0xf]  ;;  %v1522_v56 = vshrl.u32 %v7214_v28, 16  ;;  %v7266_v63 = vld [vmem:[#allocation2 + $0x1c] sm:$0xf]  ;;  %v2623_v3 = vshrl.u32 %v2598_v58, 16 }
 0x2a5   : > { %5451 = vmatprep.subr.bf16.mxu1 %v6039_v27  ;;  %8193 = vst [vmem:[#allocation38_spill] sm:$0xff] %v7252_v15  ;;  %v1501_v51 = vor.u32 %v1500_v42, %v7252_v15  ;;  %v7264_v61 = vrot.slane %v1504_v48, 5  ;;  %v2604_v50 = vld [vmem:[#allocation2 + $0x24] sm:$0xf]  ;;  %v2626_v4 = vshll.u32 %v2598_v58, 16  ;;  %v1528_v7 = vshll.u32 %v7218_v31, 16 }
 0x2a6   : > { %v7274_v6 = vrot.slane %v1522_v56, 4  ;;  %v6049_v8 = vld [vmem:[#allocation11 + $0xf8] sm:$0xff]   ;;  %v2632_v9 = vshll.u32 %v7262_v16, 16  ;;  %v2636_v10 = vshrl.u32 %v7262_v16, 16  ;;  %v2650_v11 = vshll.u32 %v2601_v60, 16  ;;  %v6052_v37 = vld [vmem:[#allocation11 + $0x100] sm:$0xff]  }
 0x2a7   : > { %v2607_v54 = vld [vmem:[#allocation2 + $0x30] sm:$0xf]  ;;  %v2656_v1 = vshll.u32 %v7266_v63, 16  ;;  %v2660_v12 = vshrl.u32 %v7266_v63, 16  ;;  %v2674_v14 = vshll.u32 %v2604_v50, 16  ;;  %v6054_v48 = vld [vmem:[#allocation2 + $0x24] sm:$0xff]  }
 0x2a8   : > { %5452 = vmatpush3.bf16.msra.mxu1 %v6039_v27  ;;  %v2136_v27 = vrot.slane %v2134_v13, 4  ;;  %v7283_v19 = vld [vmem:[#allocation2 + $0x14] sm:$0x1]  ;;  %v2695_v20 = vshrl.u32 %v2607_v54, 16  ;;  %v2652_v29 = vrot.slane %v2650_v11, 5  ;;  %v6082_v15 = vld [vmem:[#allocation11 + $0x60] sm:$0xff]  }
 0x2a9   : > { %5453 = vmatprep.subr.bf16.mxu1 %v6040_v35  ;;  %v7289_v32 = vrot.slane %v2656_v1, 5  ;;  %v2662_v33 = vrot.slane %v2660_v12, 4  ;;  %v2642_v42 = vshll.u32 %v7283_v19, 16  ;;  %vm1481_vm13 = vsmask.f32 3328  ;;  %v6136_v18 = vld [vmem:[#allocation12 + $0x30] sm:$0xff]  }
 0x2aa   : > { %v2138_v41 = vsel %vm7204_vm12, %v2136_v27, %v2137_v21  ;;  %v2698_v21 = vshll.u32 %v2607_v54, 16  ;;  %vm1482_vm14 = vsmask.f32 7440  ;;  %v7318_v54 = vld [vmem:[#allocation2 + $0x40] sm:$0xf]  ;;  %s8215_s7 = sld [smem:[#allocation26_spill]] }
 0x2ab   : > { %v2663_v58 = vor.u32 %v2662_v33, %v7289_v32  ;;  %8195 = vst [vmem:[#allocation40_spill] sm:$0xff] %v7318_v54  ;;  %vm7353_vm15 = vmor %vm1481_vm13, %vm1482_vm14  ;;  %s5071_s21 = sshll.u32 %s8214_s6, 4  ;;  %s4601_s9 = sshll.u32 %s7196_s24, 4  ;;  %s7972_s9 = int_to_ptr.vmem [resolvable:$true] %s4601_s9 }
 0x2ac   : > { %5454 = vmatpush3.bf16.msra.mxu1 %v6040_v35  ;;  %v2141_v35 = vrot.slane %v1456_v24, 5  ;;  %v7285_v24 = vrot.slane %v2632_v9, 5  ;;  %v6056_v9 = vld [vmem:[#allocation11 + $0x110] sm:$0xff]   ;;  %s8216_s23 = sld [smem:[#allocation55_spill]]  ;;  %s4585_s1 = scalar_lea.sflag [#allocation5], %s6965_s4 }
 0x2ad   : > { %5455 = vmatprep.subr.bf16.mxu1 %v6041_v40  ;;  %s6325_s25 = scalar_lea.vmem %s7972_s9, 2048  ;;  %p8217_p10 = scmp.ne.s32.totalorder %s8148_s19, 0 }
 0x2ae   : > { %v2143_v44 = vrot.slane %v2141_v35, 4  ;;  %v2142_v53 = vsel %vm7204_vm12, %v4904_v43, %v2141_v35  ;;  %v7291_v35 = vld [vmem:[#allocation2 + $0x2c] sm:$0x1]  ;;  %v7296_v43 = vld [vmem:[#allocation2 + $0x34] sm:$0xf]  ;;  %p6326_p5 = scmp.ne.s32.totalorder %s7972_s9, %s6325_s25  ;;  %s6501_s29 = smov [#allocation14]  }
 0x2af   : > { %s6329_s30 = sshll.u32 %s6501_s29, 4  ;;  %s6330_s30 = int_to_ptr.vmem [resolvable:$false] %s6329_s30 }
 0x2b0   : > { %5456 = vmatpush3.bf16.msra.mxu1 %v6041_v40  ;;  %v2135_v40 = vsel %vm7204_vm12, %v4903_v26, %v2134_v13  ;;  %v2145_v55 = vsel %vm7204_vm12, %v2143_v44, %v2144_v45  ;;  %v2671_v13 = vshrl.u32 %v2604_v50, 16  ;;  %v7287_v26 = vld [vmem:[#allocation2 + $0x20] sm:$0x1]  ;;  %v2697_v44 = vrot.slane %v2695_v20, 4  ;;  %v6055_v20 = vld [vmem:[#allocation2 + $0x30] sm:$0xff]   ;;  %s5046_s11 = sshll.u32 %s8215_s7, 5  ;;  %p6327_p8 = pnand %p6326_p5, %p8217_p10 }
 0x2b1   : > { %5473 = vmatprep.subr.bf16.mxu1 %v6042_v52  ;;  %v4911_v47 = vcombine.low %v2135_v40, %v2138_v41  ;;  %v4912_v62 = vcombine.low %v2142_v53, %v2145_v55  ;;  %v2700_v45 = vrot.slane %v2698_v21, 5  ;;  %v2690_v53 = vshll.u32 %v7291_v35, 16  ;;  %v7303_v55 = vld [vmem:[#allocation2 + $0x38] sm:$0x1]  ;;  %s4598_s10 = sadd.s32 %s5071_s21, %s5046_s11  ;;  %s6331_s28 = scalar_lea.vmem %s6330_s30, 4096 }
 0x2b2   : > { %v2673_v38 = vrot.slane %v2671_v13, 4  ;;  %v2704_v50 = vshll.u32 %v7296_v43, 16  ;;  %v7322_v13 = vrot.slane %v2663_v58, 4  ;;  %p6328_p2 = pneg %p6327_p8  ;;  %p6332_p9 = scmp.lt.s32.totalorder %s7972_s9, %s6330_s30 }
 0x2b3   : > { %5458 = vmatmul.mubr.bf16.vlgmr.msra.gmra.mrb[0].mxu1 %v4906_v0  ;;  %v7268_v0 = vrot.slane %v1501_v51, 4  ;;  %p6333_p7 = scmp.lt.s32.totalorder %s6331_s28, %s6325_s25 }
 0x2b4   : > { %5474 = vmatpush3.bf16.msra.mxu1 %v6042_v52  ;;  %5461 = vmatprep.mubr.bf16.mxu1 %v4907_v5  ;;  %v1518_v52 = vshll.u32 %v7214_v28, 16  ;;  %v6050_v28 = vld [vmem:[#allocation2 + $0xc] sm:$0xff]   ;;  %v7272_v5 = vld [vmem:[#allocation2 + $0x28] sm:$0xf] }
 0x2b5   : > { %5475 = vmatprep.subr.bf16.mxu1 %v6043_v2  ;;  %v2680_v17 = vshll.u32 %v7272_v5, 16  ;;  %v2684_v31 = vshrl.u32 %v7272_v5, 16  ;;  %p6334_p6 = por %p6333_p7, %p6332_p9 }
 0x2b7   : > { %v7293_v40 = vrot.slane %v2680_v17, 5  ;;  %v2686_v41 = vrot.slane %v2684_v31, 4  ;;  %v2613_v17 = vld [vmem:[#allocation2 + $0x48] sm:$0xf]  ;;  %v6076_v31 = vld [vmem:[#allocation11 + $0x48] sm:$0xff]   ;;  %p6335_p13 = pnand %p6334_p6, %p6328_p2 }
 0x2b8   : > { %5476 = vmatpush3.bf16.msra.mxu1 %v6043_v2  ;;  %v7270_v2 = vrot.slane %v1518_v52, 5  ;;  %v2666_v52 = vshll.u32 %v7287_v26, 16 }
 0x2b9   : > { %5477 = vmatprep.subr.bf16.mxu1 %v6044_v57 }
 0x2ba   : > { %v7316_v11 = vrot.slane %v2666_v52, 5 }
 0x2bb   : > { %5462 = vmatmul.mubr.bf16.gmra.mrb[4].mxu1 %v4908_v22  ;;  %v2625_v22 = vrot.slane %v2623_v3, 4  ;;  %v7308_v3 = vrot.slane %v2642_v42, 5 }
 0x2bc   : > { %5478 = vmatpush3.bf16.msra.mxu1 %v6044_v57  ;;  %5465 = vmatprep.mubr.bf16.mxu1 %v4909_v25  ;;  %v2647_v57 = vshrl.u32 %v2601_v60, 16  ;;  %v2638_v25 = vrot.slane %v2636_v10, 4 }
 0x2bd   : > { %5479 = vmatprep.subr.bf16.mxu1 %v6045_v23 }
 0x2be   : > { %v2649_v27 = vrot.slane %v2647_v57, 4  ;;  %v2639_v51 = vor.u32 %v2638_v25, %v7285_v24  ;;  %v7332_v25 = vld [vmem:[#allocation2 + $0x44] sm:$0x1] }
 0x2bf   : > { %8196 = vst [vmem:[#allocation41_spill] sm:$0xff] %v7332_v25 }
 0x2c0   : > { %5480 = vmatpush3.bf16.msra.mxu1 %v6045_v23  ;;  %v2628_v23 = vrot.slane %v2626_v4, 5  ;;  %v2653_v56 = vor.u32 %v2652_v29, %v2649_v27  ;;  %v2701_v4 = vor.u32 %v2700_v45, %v2697_v44  ;;  %v7314_v57 = vrot.slane %v2639_v51, 4  ;;  %v6058_v29 = vld [vmem:[#allocation2 + $0x3c] sm:$0xff]  }
 0x2c1   : > { %5481 = vmatprep.subr.bf16.mxu1 %v6046_v39  ;;  %v2732_v44 = vshrl.u32 %v7318_v54, 16  ;;  %v2743_v45 = vshrl.u32 %v2613_v17, 16  ;;  %v2746_v51 = vshll.u32 %v2613_v17, 16  ;;  %v6080_v17 = vld [vmem:[#allocation11 + $0x58] sm:$0xff]  }
 0x2c2   : > { %v7320_v12 = vrot.slane %v2653_v56, 4  ;;  %v7334_v33 = vrot.slane %v2701_v4, 4 }
 0x2c3   : > { %5466 = vmatmul.mubr.bf16.gmra.mrb[8].mxu1 %v4910_v46  ;;  %v7298_v46 = vrot.slane %v1528_v7, 5  ;;  %v2708_v7 = vshrl.u32 %v7296_v43, 16  ;;  %v2734_v4 = vrot.slane %v2732_v44, 4  ;;  %v6062_v44 = vld [vmem:[#allocation2 + $0x54] sm:$0xff]  }
 0x2c4   : > { %5482 = vmatpush3.bf16.msra.mxu1 %v6046_v39  ;;  %5469 = vmatprep.mubr.bf16.mxu1 %v4911_v47  ;;  %v2676_v39 = vrot.slane %v2674_v14, 5  ;;  %v6053_v47 = vld [vmem:[#allocation11 + $0x108] sm:$0xff]   ;;  %v7324_v14 = vrot.slane %v2690_v53, 5  ;;  %v7343_v53 = vld [vmem:[#allocation2 + $0x58] sm:$0xf] }
 0x2c5   : > { %5483 = vmatprep.subr.bf16.mxu1 %v6047_v49  ;;  %8194 = vst [vmem:[#allocation39_spill] sm:$0xff] %v7298_v46  ;;  %8198 = vst [vmem:[#allocation43_spill] sm:$0xff] %v7343_v53  ;;  %v6061_v46 = vld [vmem:[#allocation11 + $0x128] sm:$0xff]  }
 0x2c6   : > { %v2677_v60 = vor.u32 %v2676_v39, %v2673_v38  ;;  %v2728_v38 = vshll.u32 %v7318_v54, 16  ;;  %v7339_v39 = vld [vmem:[#allocation2 + $0x4c] sm:$0xf] }
 0x2c7   : > { %8197 = vst [vmem:[#allocation42_spill] sm:$0xff] %v7339_v39  ;;  %v2752_v52 = vshll.u32 %v7339_v39, 16 }
 0x2c8   : > { %5484 = vmatpush3.bf16.msra.mxu1 %v6047_v49  ;;  %v2629_v49 = vor.u32 %v2628_v23, %v2625_v22  ;;  %v7326_v21 = vrot.slane %v2677_v60, 4  ;;  %v7330_v23 = vrot.slane %v2704_v50, 5  ;;  %v7345_v58 = vrot.slane %v2728_v38, 5  ;;  %v7360_v38 = vld [vmem:[#allocation2 + $0x64] sm:$0xf] }
 0x2c9   : > { %5485 = vmatprep.subr.bf16.mxu1 %v6048_v59  ;;  %v2756_v60 = vshrl.u32 %v7339_v39, 16  ;;  %8201 = vst [vmem:[#allocation44_spill] sm:$0xff] %v7360_v38  ;;  %v7364_v39 = vld [vmem:[#allocation2 + $0x5c] sm:$0x1] }
 0x2ca   : > { %v7312_v10 = vrot.slane %v2629_v49, 4  ;;  %v2616_v49 = vld [vmem:[#allocation2 + $0x54] sm:$0xf]  ;;  %8202 = vst [vmem:[#allocation45_spill] sm:$0xff] %v7364_v39 }
 0x2cb   : > { %5470 = vmatmul.mubr.bf16.gmra.mrb[12].mxu1 %v4912_v62  ;;  %v2687_v62 = vor.u32 %v2686_v41, %v7293_v40  ;;  %v6057_v41 = vld [vmem:[#allocation11 + $0x118] sm:$0xff]   ;;  %v2770_v50 = vshll.u32 %v2616_v49, 16 }
 0x2cc   : > { %5486 = vmatpush3.bf16.msra.mxu1 %v6048_v59  ;;  %5489 = vmatprep.mubr.bf16.mxu1 %v6050_v28  ;;  %v2610_v59 = vld [vmem:[#allocation2 + $0x3c] sm:$0xf] }
 0x2cd   : > { %5487 = vmatprep.subr.bf16.mxu1 %v6049_v8  ;;  %v6074_v28 = vld [vmem:[#allocation11 + $0x40] sm:$0xff]   ;;  %v2719_v1 = vshrl.u32 %v2610_v59, 16  ;;  %v7328_v22 = vrot.slane %v2687_v62, 4  ;;  %v2722_v27 = vshll.u32 %v2610_v59, 16  ;;  %v2738_v59 = vshll.u32 %v7332_v25, 16 }
 0x2ce   : > { %5377 = vmatprep.subr.bf16.mxu0 %v6074_v28  ;;  %v2767_v62 = vshrl.u32 %v2616_v49, 16  ;;  %v7362_v49 = vld [vmem:[#allocation2 + $0x50] sm:$0x1] }
 0x2cf   : > { %5378 = vmatpush3.bf16.msra.mxu0 %v6074_v28  ;;  %v2721_v42 = vrot.slane %v2719_v1, 4  ;;  %v2724_v56 = vrot.slane %v2722_v27, 5  ;;  %v6060_v28 = vld [vmem:[#allocation11 + $0x120] sm:$0xff]   ;;  %v2780_v1 = vshrl.u32 %v7343_v53, 16 }
 0x2d0   : > { %5488 = vmatpush3.bf16.msra.mxu1 %v6049_v8  ;;  %v2714_v8 = vshll.u32 %v7303_v55, 16  ;;  %5379 = vmatprep.subr.bf16.mxu0 %v6076_v31  ;;  %v2769_v54 = vrot.slane %v2767_v62, 4  ;;  %v2804_v62 = vshrl.u32 %v7360_v38, 16 }
 0x2d1   : > { %5505 = vmatprep.subr.bf16.mxu1 %v6052_v37 }
 0x2d3   : > { %5490 = vmatmul.mubr.bf16.vlgmr.msra.gmra.mrb[0].mxu1 %v6051_v34  ;;  %v2710_v34 = vrot.slane %v2708_v7, 4  ;;  %5380 = vmatpush3.bf16.msra.mxu0 %v6076_v31  ;;  %v2745_v7 = vrot.slane %v2743_v45, 4  ;;  %v6059_v31 = vld [vmem:[#allocation2 + $0x48] sm:$0xff]   ;;  %v2725_v45 = vor.u32 %v2724_v56, %v2721_v42  ;;  %v2645_v42 = vsel %vm7353_vm15, %v7314_v57, %v7308_v3 }
 0x2d4   : > { %5506 = vmatpush3.bf16.msra.mxu1 %v6052_v37  ;;  %5493 = vmatprep.mubr.bf16.mxu1 %v6054_v48  ;;  %v7336_v37 = vrot.slane %v2714_v8, 5  ;;  %v6078_v48 = vld [vmem:[#allocation11 + $0x50] sm:$0xff]   ;;  %v2776_v8 = vshll.u32 %v7343_v53, 16  ;;  %v2758_v53 = vrot.slane %v2756_v60, 4  ;;  %v7378_v60 = vrot.slane %v2738_v59, 5 }
 0x2d5   : > { %5507 = vmatprep.subr.bf16.mxu1 %v6053_v47  ;;  %5381 = vmatprep.subr.bf16.mxu0 %v6078_v48  ;;  %v6064_v3 = vld [vmem:[#allocation11 + $0x130] sm:$0xff]   ;;  %v2762_v59 = vshll.u32 %v7362_v49, 16 }
 0x2d7   : > { %5382 = vmatpush3.bf16.msra.mxu0 %v6078_v48  ;;  %v2635_v48 = vsel %vm7353_vm15, %v7312_v10, %v7285_v24  ;;  %v2735_v24 = vor.u32 %v2734_v4, %v7345_v58  ;;  %v7391_v4 = vld [vmem:[#allocation2 + $0xc] sm:$0xe] }
 0x2d8   : > { %5508 = vmatpush3.bf16.msra.mxu1 %v6053_v47  ;;  %v2619_v47 = vld [vmem:[#allocation2 + $0x60] sm:$0xf]  ;;  %5383 = vmatprep.subr.bf16.mxu0 %v6080_v17 }
 0x2d9   : > { %5509 = vmatprep.subr.bf16.mxu1 %v6056_v9  ;;  %v2791_v25 = vshrl.u32 %v2619_v47, 16  ;;  %v2794_v36 = vshll.u32 %v2619_v47, 16 }
 0x2db   : > { %5494 = vmatmul.mubr.bf16.gmra.mrb[4].mxu1 %v6055_v20  ;;  %v2711_v20 = vor.u32 %v2710_v34, %v7330_v23  ;;  %v2772_v34 = vrot.slane %v2770_v50, 5  ;;  %5384 = vmatpush3.bf16.msra.mxu0 %v6080_v17  ;;  %v7382_v50 = vrot.slane %v2725_v45, 4  ;;  %v2793_v10 = vrot.slane %v2791_v25, 4 }
 0x2dc   : > { %5510 = vmatpush3.bf16.msra.mxu1 %v6056_v9  ;;  %5497 = vmatprep.mubr.bf16.mxu1 %v6058_v29  ;;  %v2748_v9 = vrot.slane %v2746_v51, 5  ;;  %v7358_v29 = vrot.slane %v2752_v52, 5  ;;  %v7374_v51 = vrot.slane %v2776_v8, 5  ;;  %v2782_v52 = vrot.slane %v2780_v1, 4 }
 0x2dd   : > { %5511 = vmatprep.subr.bf16.mxu1 %v6057_v41  ;;  %v7376_v56 = vrot.slane %v2711_v20, 4  ;;  %v2796_v47 = vrot.slane %v2794_v36, 5  ;;  %5385 = vmatprep.subr.bf16.mxu0 %v6082_v15  ;;  %v2786_v1 = vshll.u32 %v7364_v39, 16  ;;  %v7388_v20 = vld [vmem:[#allocation2 + $0x68] sm:$0x1]  ;;  %v2773_v17 = vor.u32 %v2772_v34, %v2769_v54  ;;  %v6063_v36 = vld [vmem:[#allocation2 + $0x60] sm:$0xff]  }
 0x2de   : > { %v2749_v57 = vor.u32 %v2748_v9, %v2745_v7  ;;  %v2759_v8 = vor.u32 %v2758_v53, %v7358_v29  ;;  %v2783_v45 = vor.u32 %v2782_v52, %v7374_v51  ;;  %v2806_v7 = vrot.slane %v2804_v62, 4  ;;  %v6065_v34 = vld [vmem:[#allocation11 + $0x138] sm:$0xff]   ;;  %v6084_v62 = vld [vmem:[#allocation11 + $0x68] sm:$0xff]  }
 0x2df   : > { %5386 = vmatpush3.bf16.msra.mxu0 %v6082_v15  ;;  %v4937_v53 = vcombine.low %v2635_v48, %v2645_v42  ;;  %v2797_v9 = vor.u32 %v2796_v47, %v2793_v10  ;;  %v2764_v54 = vrot.slane %v2762_v59, 5  ;;  %v7402_v52 = vrot.slane %v2773_v17, 4  ;;  %v7408_v42 = vld [vmem:[#allocation2 + $0x18] sm:$0xe]  ;;  %v7429_v17 = vld [vmem:[#allocation2 + $0x24] sm:$0xe] }
 0x2e0   : > { %5512 = vmatpush3.bf16.msra.mxu1 %v6057_v41  ;;  %v2800_v41 = vshll.u32 %v7360_v38, 16  ;;  %v2810_v38 = vshll.u32 %v7388_v20, 16  ;;  %v7396_v39 = vrot.slane %v2749_v57, 4  ;;  %v4953_v15 = vrot.slane %v7391_v4, 9  ;;  %5387 = vmatprep.subr.bf16.mxu0 %v6084_v62 }
 0x2e1   : > { %5513 = vmatprep.subr.bf16.mxu1 %v6060_v28  ;;  %v3058_v48 = vrot.slane %v7262_v16, 5  ;;  %v3061_v10 = vrot.slane %v7283_v19, 5  ;;  %v3065_v47 = vrot.slane %v7266_v63, 5  ;;  %v2669_v59 = vsel %vm7353_vm15, %v7322_v13, %v7316_v11  ;;  %v6086_v13 = vld [vmem:[#allocation11 + $0x70] sm:$0xff]  }
 0x2e2   : > { %v7393_v25 = vrot.slane %v2800_v41, 5  ;;  %v7404_v41 = vrot.slane %v2783_v45, 4  ;;  %v7415_v57 = vrot.slane %v2810_v38, 5  ;;  %v2707_v11 = vsel %vm7353_vm15, %v7334_v33, %v7330_v23  ;;  %v7462_v45 = vld [vmem:[#allocation2 + $0x30] sm:$0xe] }
 0x2e3   : > { %5498 = vmatmul.mubr.bf16.gmra.mrb[8].mxu1 %v6059_v31  ;;  %v2736_v31 = vrot.slane %v2735_v24, 4  ;;  %5388 = vmatpush3.bf16.msra.mxu0 %v6084_v62  ;;  %v3068_v23 = vrot.slane %v7287_v26, 5  ;;  %v2731_v33 = vsel %vm7353_vm15, %v7382_v50, %v7345_v58  ;;  %v6088_v50 = vld [vmem:[#allocation11 + $0x78] sm:$0xff]   ;;  %v4956_v62 = vrot.slane %v7462_v45, 9 }
 0x2e4   : > { %5514 = vmatpush3.bf16.msra.mxu1 %v6060_v28  ;;  %5501 = vmatprep.mubr.bf16.mxu1 %v6062_v44  ;;  %v7398_v28 = vrot.slane %v2759_v8, 4  ;;  %v7400_v44 = vrot.slane %v2786_v1, 5  ;;  %v2807_v24 = vor.u32 %v2806_v7, %v7393_v25  ;;  %v2659_v8 = vsel %vm7353_vm15, %v7320_v12, %v7289_v32  ;;  %v6067_v7 = vld [vmem:[#allocation11 + $0x148] sm:$0xff]  }
 0x2e5   : > { %5515 = vmatprep.subr.bf16.mxu1 %v6061_v46  ;;  %v2683_v1 = vsel %vm7353_vm15, %v7326_v21, %v7293_v40  ;;  %v2693_v32 = vsel %vm7353_vm15, %v7328_v22, %v7324_v14  ;;  %v2717_v40 = vsel %vm7353_vm15, %v7376_v56, %v7336_v37  ;;  %v3060_v12 = vrot.slane %v3058_v48, 4  ;;  %v6066_v21 = vld [vmem:[#allocation11 + $0x140] sm:$0xff]   ;;  %5389 = vmatprep.subr.bf16.mxu0 %v6086_v13 }
 0x2e6   : > { %v7445_v38 = vrot.slane %v2807_v24, 4  ;;  %v4954_v14 = vrot.slane %v7408_v42, 9  ;;  %v7450_v22 = vrot.slane %v3065_v47, 4  ;;  %v2741_v37 = vsel %vm7353_vm15, %v2736_v31, %v7378_v60 }
 0x2e7   : > { %v4955_v56 = vrot.slane %v7429_v17, 9  ;;  %v2765_v58 = vsel %vm7353_vm15, %v7398_v28, %v2764_v54  ;;  %v3075_v60 = vrot.slane %v7291_v35, 5  ;;  %5390 = vmatpush3.bf16.msra.mxu0 %v6086_v13  ;;  %v4939_v31 = vcombine.low %v2683_v1, %v2693_v32  ;;  %v7480_v54 = vld [vmem:[#allocation2] sm:$0xf] }
 0x2e8   : > { %5516 = vmatpush3.bf16.msra.mxu1 %v6061_v46  ;;  %v7413_v46 = vrot.slane %v2797_v9, 4  ;;  %v1507_v9 = vsel %vm7353_vm15, %v7268_v0, %v7264_v61  ;;  %v1525_v42 = vor.u32 %v7274_v6, %v7270_v2  ;;  %v3079_v28 = vrot.slane %v7296_v43, 5  ;;  %5391 = vmatprep.subr.bf16.mxu0 %v6088_v50  ;;  %v7489_v6 = vld [vmem:[#allocation11] sm:$0xff]   ;;  %v6106_v43 = vld [vmem:[#allocation11 + $0x28] sm:$0xff]  }
 0x2e9   : > { %5517 = vmatprep.subr.bf16.mxu1 %v6064_v3  ;;  %v1488_v61 = vshll.u32 %v7480_v54, 16  ;;  %v2779_v1 = vsel %vm7353_vm15, %v7402_v52, %v7374_v51  ;;  %v2789_v32 = vsel %vm7353_vm15, %v7404_v41, %v7400_v44  ;;  %v7510_v51 = vsel %vm7204_vm12, %v4953_v15, %v3058_v48  ;;  %v6069_v15 = vld [vmem:[#allocation11 + $0x158] sm:$0xff]  }
 0x2ea   : > { %v7516_v44 = vsel %vm7204_vm12, %v3060_v12, %v3061_v10  ;;  %v3082_v52 = vrot.slane %v7303_v55, 5  ;;  %v2803_v16 = vsel %vm7353_vm15, %v7413_v46, %v7393_v25  ;;  %v7530_v19 = vsel %vm7204_vm12, %v4954_v14, %v3065_v47  ;;  %v7540_v12 = vld [vmem:[#allocation2 + $0x3c] sm:$0xe]  ;;  %v8203_v46 = vld [vmem:[#allocation40_spill] sm:$0xff] }
 0x2eb   : > { %5502 = vmatmul.mubr.bf16.gmra.mrb[12].mxu1 %v6063_v36  ;;  %v4938_v36 = vcombine.low %v2659_v8, %v2669_v59  ;;  %v1485_v8 = vshrl.u32 %v7480_v54, 16  ;;  %v6068_v59 = vld [vmem:[#allocation11 + $0x150] sm:$0xff]   ;;  %5392 = vmatpush3.bf16.msra.mxu0 %v6088_v50  ;;  %v2813_v48 = vsel %vm7353_vm15, %v7445_v38, %v7415_v57  ;;  %v7538_v10 = vrot.slane %v3079_v28, 4  ;;  %v7549_v38 = vld [vmem:[#allocation2 + $0x18] sm:$0xf] }
 0x2ec   : > { %5518 = vmatpush3.bf16.msra.mxu1 %v6064_v3  ;;  %5521 = vmatprep.mubr.bf16.mxu1 %v4937_v53  ;;  %v3072_v3 = vrot.slane %v7272_v5, 5  ;;  %v2755_v53 = vsel %vm7353_vm15, %v7396_v39, %v7358_v29  ;;  %v4940_v39 = vcombine.low %v2707_v11, %v2717_v40  ;;  %v4941_v29 = vcombine.low %v2731_v33, %v2741_v37 }
 0x2ed   : > { %5519 = vmatprep.subr.bf16.mxu1 %v6065_v34  ;;  %v7484_v24 = vcombine.low %v2755_v53, %v2765_v58  ;;  %v1487_v13 = vrot.slane %v1485_v8, 4  ;;  %v1490_v33 = vrot.slane %v1488_v61, 5  ;;  %5409 = vmatprep.subr.bf16.mxu0 %v7489_v6  ;;  %v1542_v63 = vshll.u32 %v7216_v30, 16  ;;  %v8204_v58 = vld [vmem:[#allocation39_spill] sm:$0xff]  ;;  %v8205_v8 = vld [vmem:[#allocation38_spill] sm:$0xff] }
 0x2ee   : > { %v7501_v11 = vrot.slane %v3072_v3, 4  ;;  %v4961_v47 = vcombine.low %v7510_v51, %v7516_v44  ;;  %v3086_v14 = vrot.slane %v8203_v46, 5 }
 0x2ef   : > { %v1491_v4 = vor.u32 %v1490_v33, %v1487_v13  ;;  %v7553_v30 = vrot.slane %v1542_v63, 5  ;;  %v6094_v63 = vld [vmem:[#allocation11 + $0x8] sm:$0xff]  }
 0x2f0   : > { %5520 = vmatpush3.bf16.msra.mxu1 %v6065_v34  ;;  %v7482_v34 = vld [vmem:[#allocation2 + $0xc] sm:$0xf] }
 0x2f1   : > { %5537 = vmatprep.subr.bf16.mxu1 %v6066_v21  ;;  %v1509_v0 = vshrl.u32 %v7482_v34, 16  ;;  %v1512_v40 = vshll.u32 %v7482_v34, 16  ;;  %v1492_v53 = vrot.slane %v1491_v4, 4  ;;  %v4957_v4 = vrot.slane %v7540_v12, 9 }
 0x2f3   : > { %5522 = vmatmul.mubr.bf16.vlgmr.msra.gmra.mrb[0].mxu1 %v4938_v36  ;;  %v1511_v37 = vrot.slane %v1509_v0, 4  ;;  %v1526_v36 = vrot.slane %v1525_v42, 4  ;;  %v1514_v41 = vrot.slane %v1512_v40, 5  ;;  %v1536_v42 = vshll.u32 %v7549_v38, 16  ;;  %v7560_v0 = vld [vmem:[#allocation2 + $0x1c] sm:$0xf] }
 0x2f4   : > { %5538 = vmatpush3.bf16.msra.mxu1 %v6066_v21  ;;  %5525 = vmatprep.mubr.bf16.mxu1 %v4939_v31  ;;  %v7520_v21 = vcombine.low %v2779_v1, %v2789_v32  ;;  %v1533_v31 = vshrl.u32 %v7549_v38, 16  ;;  %v1497_v61 = vsel %vm7353_vm15, %v1492_v53, %v8205_v8  ;;  %v1546_v1 = vshrl.u32 %v7560_v0, 16  ;;  %v8206_v32 = vld [vmem:[#allocation37_spill] sm:$0xff] }
 0x2f5   : > { %5539 = vmatprep.subr.bf16.mxu1 %v6067_v7  ;;  %v1515_v25 = vor.u32 %v1514_v41, %v1511_v37  ;;  %v1531_v57 = vsel %vm7353_vm15, %v1526_v36, %v8204_v58  ;;  %v1552_v40 = vshll.u32 %v8206_v32, 16  ;;  %v4865_v33 = vcombine.low %v1497_v61, %v1507_v9  ;;  %v6070_v8 = vld [vmem:[#allocation11 + $0x160] sm:$0xff]  }
 0x2f6   : > { %v1535_v36 = vrot.slane %v1533_v31, 4  ;;  %v1538_v41 = vrot.slane %v1536_v42, 5  ;;  %v1548_v53 = vrot.slane %v1546_v1, 4  ;;  %v6140_v31 = vld [vmem:[#allocation2 + $0x2c] sm:$0x1] }
 0x2f7   : > { %v1516_v50 = vrot.slane %v1515_v25, 4  ;;  %5393 = vmatprep.mubr.bf16.mxu0 %v4865_v33  ;;  %v1576_v42 = vshll.u32 %v6140_v31, 16 }
 0x2f8   : > { %5540 = vmatpush3.bf16.msra.mxu1 %v6067_v7  ;;  %v7555_v7 = vld [vmem:[#allocation2 + $0x24] sm:$0xf]  ;;  %v1539_v32 = vor.u32 %v1538_v41, %v1535_v36  ;;  %v6142_v41 = vld [vmem:[#allocation2 + $0x38] sm:$0x1] }
 0x2f9   : > { %5541 = vmatprep.subr.bf16.mxu1 %v6068_v59  ;;  %v1557_v13 = vshrl.u32 %v7555_v7, 16  ;;  %v1521_v37 = vsel %vm7353_vm15, %v1516_v50, %v7270_v2  ;;  %v1560_v9 = vshll.u32 %v7555_v7, 16 }
 0x2fa   : > { %v4866_v25 = vcombine.low %v1521_v37, %v1531_v57  ;;  %v1554_v57 = vrot.slane %v1552_v40, 5  ;;  %v1540_v61 = vrot.slane %v1539_v32, 4  ;;  %v1578_v40 = vrot.slane %v1576_v42, 5 }
 0x2fb   : > { %5526 = vmatmul.mubr.bf16.gmra.mrb[4].mxu1 %v4940_v39  ;;  %v1559_v58 = vrot.slane %v1557_v13, 4  ;;  %v7570_v39 = vld [vmem:[#allocation2 + $0x28] sm:$0xf]  ;;  %v1562_v1 = vrot.slane %v1560_v9, 5 }
 0x2fc   : > { %5542 = vmatpush3.bf16.msra.mxu1 %v6068_v59  ;;  %5529 = vmatprep.mubr.bf16.mxu1 %v4941_v29  ;;  %v1566_v2 = vshll.u32 %v7570_v39, 16  ;;  %v1570_v50 = vshrl.u32 %v7570_v39, 16  ;;  %v7574_v59 = vcombine.low %v2803_v16, %v2813_v48  ;;  %v1549_v29 = vor.u32 %v1548_v53, %v7553_v30  ;;  %v7604_v53 = vld [vmem:[#allocation2 + $0x40] sm:$0xf] }
 0x2fd   : > { %5543 = vmatprep.subr.bf16.mxu1 %v6069_v15  ;;  %5394 = vmatmul.mubr.bf16.vlgmr.msra.gmra.mrb[24].mxu0 %v4866_v25  ;;  %v7583_v16 = vsel %vm7204_vm12, %v7450_v22, %v3068_v23  ;;  %v7591_v48 = vsel %vm7204_vm12, %v4955_v56, %v3072_v3  ;;  %v1545_v26 = vsel %vm7353_vm15, %v1540_v61, %v7553_v30  ;;  %v7596_v23 = vld [vmem:[#allocation2 + $0x34] sm:$0xf]  ;;  %v6096_v56 = vld [vmem:[#allocation11 + $0x10] sm:$0xff]   ;;  %v7601_v3 = vld [vmem:[#allocation2 + $0x30] sm:$0xf]  ;;  %v1600_v25 = vshll.u32 %v6142_v41, 16 }
 0x2fe   : > { %5410 = vmatpush3.bf16.msra.mxu0 %v7489_v6  ;;  %v1568_v13 = vrot.slane %v1566_v2, 5  ;;  %v1572_v33 = vrot.slane %v1570_v50, 4  ;;  %v1550_v6 = vrot.slane %v1549_v29, 4  ;;  %v1563_v37 = vor.u32 %v1562_v1, %v1559_v58  ;;  %v6072_v58 = vld [vmem:[#allocation11 + $0x170] sm:$0xff]   ;;  %v6100_v50 = vld [vmem:[#allocation11 + $0x18] sm:$0xff]  }
 0x2ff   : > { %5411 = vmatprep.subr.bf16.mxu0 %v6094_v63  ;;  %v1590_v5 = vshll.u32 %v7596_v23, 16  ;;  %v1594_v36 = vshrl.u32 %v7596_v23, 16  ;;  %v1614_v30 = vshll.u32 %v7604_v53, 16  ;;  %v1581_v29 = vshrl.u32 %v7601_v3, 16  ;;  %v6144_v41 = vld [vmem:[#allocation2 + $0x44] sm:$0x1] }
 0x300   : > { %5544 = vmatpush3.bf16.msra.mxu1 %v6069_v15  ;;  %v6071_v15 = vld [vmem:[#allocation11 + $0x168] sm:$0xff]   ;;  %v1573_v22 = vor.u32 %v1572_v33, %v1568_v13  ;;  %v1555_v17 = vsel %vm7353_vm15, %v1550_v6, %v1554_v57  ;;  %v1564_v9 = vrot.slane %v1563_v37, 4  ;;  %v7609_v57 = vld [vmem:[#allocation2 + $0x3c] sm:$0xf]  ;;  %v1584_v31 = vshll.u32 %v7601_v3, 16 }
 0x301   : > { %5545 = vmatprep.subr.bf16.mxu1 %v6070_v8  ;;  %v4867_v32 = vcombine.low %v1545_v26, %v1555_v17  ;;  %v1592_v42 = vrot.slane %v1590_v5, 5  ;;  %v1596_v61 = vrot.slane %v1594_v36, 4  ;;  %v1602_v1 = vrot.slane %v1600_v25, 5 }
 0x302   : > { %5412 = vmatpush3.bf16.msra.mxu0 %v6094_v63  ;;  %v1574_v2 = vrot.slane %v1573_v22, 4  ;;  %v1583_v33 = vrot.slane %v1581_v29, 4  ;;  %v1605_v6 = vshrl.u32 %v7609_v57, 16  ;;  %v1608_v37 = vshll.u32 %v7609_v57, 16  ;;  %v6073_v22 = vld [vmem:[#allocation11 + $0x178] sm:$0xff]   ;;  %v6102_v29 = vld [vmem:[#allocation11 + $0x20] sm:$0xff]  }
 0x303   : > { %5530 = vmatmul.mubr.bf16.gmra.mrb[8].mxu1 %v7484_v24  ;;  %5397 = vmatprep.mubr.bf16.mxu0 %v4867_v32  ;;  %v1569_v24 = vsel %vm7353_vm15, %v1564_v9, %v1568_v13  ;;  %v1616_v17 = vrot.slane %v1614_v30, 5  ;;  %v1618_v36 = vshrl.u32 %v7604_v53, 16  ;;  %v1624_v13 = vshll.u32 %v6144_v41, 16 }
 0x304   : > { %5546 = vmatpush3.bf16.msra.mxu1 %v6070_v8  ;;  %5533 = vmatprep.mubr.bf16.mxu1 %v7520_v21  ;;  %v1579_v63 = vsel %vm7353_vm15, %v1574_v2, %v1578_v40  ;;  %v1586_v8 = vrot.slane %v1584_v31, 5  ;;  %v1597_v21 = vor.u32 %v1596_v61, %v1592_v42  ;;  %v1607_v5 = vrot.slane %v1605_v6, 4  ;;  %v7647_v6 = vld [vmem:[#allocation2 + $0x48] sm:$0xf] }
 0x305   : > { %5547 = vmatprep.subr.bf16.mxu1 %v6071_v15  ;;  %v4868_v26 = vcombine.low %v1569_v24, %v1579_v63  ;;  %5413 = vmatprep.subr.bf16.mxu0 %v6096_v56  ;;  %v7625_v40 = vsel %vm7204_vm12, %v7501_v11, %v3075_v60  ;;  %v1610_v9 = vrot.slane %v1608_v37, 5  ;;  %v7631_v30 = vrot.slane %v3086_v14, 4 }
 0x306   : > { %5414 = vmatpush3.bf16.msra.mxu0 %v6096_v56  ;;  %v1587_v25 = vor.u32 %v1586_v8, %v1583_v33  ;;  %v1598_v32 = vrot.slane %v1597_v21, 4  ;;  %v4962_v56 = vcombine.low %v7530_v19, %v7583_v16  ;;  %v1620_v35 = vrot.slane %v1618_v36, 4  ;;  %v6146_v21 = vld [vmem:[#allocation2 + $0x50] sm:$0x1]  ;;  %v8209_v16 = vld [vmem:[#allocation43_spill] sm:$0xff] }
 0x307   : > { %5398 = vmatmul.mubr.bf16.gmra.mrb[28].mxu0 %v4868_v26  ;;  %5415 = vmatprep.subr.bf16.mxu0 %v6100_v50  ;;  %v1611_v11 = vor.u32 %v1610_v9, %v1607_v5  ;;  %v1626_v61 = vrot.slane %v1624_v13, 5  ;;  %v4963_v24 = vcombine.low %v7591_v48, %v7625_v40  ;;  %v7645_v63 = vsel %vm7204_vm12, %v4956_v62, %v3079_v28  ;;  %v7656_v62 = vld [vmem:[#allocation2 + $0x54] sm:$0xf]  ;;  %v6075_v28 = vld [vmem:[#allocation11 + $0x180] sm:$0xff]   ;;  %v6077_v5 = vld [vmem:[#allocation11 + $0x188] sm:$0xff]  }
 0x308   : > { %5548 = vmatpush3.bf16.msra.mxu1 %v6071_v15  ;;  %v8207_v15 = vld [vmem:[#allocation41_spill] sm:$0xff]  ;;  %v1588_v31 = vrot.slane %v1587_v25, 4  ;;  %v1603_v60 = vsel %vm7353_vm15, %v1598_v32, %v1602_v1  ;;  %v1621_v33 = vor.u32 %v1620_v35, %v1616_v17  ;;  %v1629_v45 = vshrl.u32 %v7647_v6, 16 }
 0x309   : > { %5549 = vmatprep.subr.bf16.mxu1 %v6072_v58  ;;  %v3089_v2 = vrot.slane %v8207_v15, 5  ;;  %v1612_v48 = vrot.slane %v1611_v11, 4  ;;  %v1632_v1 = vshll.u32 %v7647_v6, 16  ;;  %v1648_v37 = vshll.u32 %v6146_v21, 16 }
 0x30a   : > { %5416 = vmatpush3.bf16.msra.mxu0 %v6100_v50  ;;  %v1622_v26 = vrot.slane %v1621_v33, 4  ;;  %v1653_v40 = vshrl.u32 %v7656_v62, 16  ;;  %v3029_v33 = vld [vmem:[#allocation2 + $0x48] sm:$0xe]  ;;  %v3087_v19 = vsel %vm7204_vm12, %v4957_v4, %v3086_v14  ;;  %v3100_v55 = vrot.slane %v8209_v16, 5  ;;  %v6112_v14 = vld [vmem:[#allocation11 + $0x38] sm:$0xff]  }
 0x30b   : > { %5534 = vmatmul.mubr.bf16.gmra.mrb[12].mxu1 %v7574_v59  ;;  %v1593_v59 = vsel %vm7353_vm15, %v1588_v31, %v1592_v42  ;;  %5417 = vmatprep.subr.bf16.mxu0 %v6102_v29  ;;  %v1631_v42 = vrot.slane %v1629_v45, 4  ;;  %v1634_v8 = vrot.slane %v1632_v1, 5  ;;  %v1650_v9 = vrot.slane %v1648_v37, 5  ;;  %v6148_v1 = vld [vmem:[#allocation2 + $0x5c] sm:$0x1] }
 0x30c   : > { %5550 = vmatpush3.bf16.msra.mxu1 %v6072_v58  ;;  %5553 = vmatprep.mubr.bf16.mxu1 %v4961_v47  ;;  %v4869_v50 = vcombine.low %v1593_v59, %v1603_v60  ;;  %v7658_v58 = vld [vmem:[#allocation2 + $0x4c] sm:$0xf]  ;;  %v1617_v47 = vsel %vm7353_vm15, %v1612_v48, %v1616_v17  ;;  %v1627_v36 = vsel %vm7353_vm15, %v1622_v26, %v1626_v61  ;;  %v1656_v17 = vshll.u32 %v7656_v62, 16  ;;  %v7668_v60 = vld [vmem:[#allocation2 + $0x58] sm:$0xf]  ;;  %v8208_v59 = vld [vmem:[#allocation42_spill] sm:$0xff] }
 0x30d   : > { %5551 = vmatprep.subr.bf16.mxu1 %v6073_v22  ;;  %v1638_v51 = vshll.u32 %v7658_v58, 16  ;;  %v1642_v44 = vshrl.u32 %v7658_v58, 16  ;;  %v4870_v25 = vcombine.low %v1617_v47, %v1627_v36  ;;  %v1635_v32 = vor.u32 %v1634_v8, %v1631_v42  ;;  %v6108_v61 = vld [vmem:[#allocation11 + $0x30] sm:$0xff]   ;;  %v3030_v4 = vld [vmem:[#allocation2 + $0x54] sm:$0xe]  ;;  %v6091_v16 = vld [vmem:[#allocation2 + $0x18] sm:$0xff]  }
 0x30e   : > { %5401 = vmatprep.mubr.bf16.mxu0 %v4869_v50  ;;  %5418 = vmatpush3.bf16.msra.mxu0 %v6102_v29  ;;  %v1655_v31 = vrot.slane %v1653_v40, 4  ;;  %v1662_v11 = vshll.u32 %v7668_v60, 16  ;;  %v1666_v29 = vshrl.u32 %v7668_v60, 16  ;;  %v3093_v48 = vrot.slane %v8208_v59, 5  ;;  %v6079_v42 = vld [vmem:[#allocation11 + $0x190] sm:$0xff]  }
 0x30f   : > { %v1640_v41 = vrot.slane %v1638_v51, 5  ;;  %v1644_v13 = vrot.slane %v1642_v44, 4  ;;  %5419 = vmatprep.subr.bf16.mxu0 %v6106_v43  ;;  %5402 = vmatmul.mubr.bf16.gmra.mrb[32].mxu0 %v4870_v25  ;;  %v1658_v45 = vrot.slane %v1656_v17, 5  ;;  %v1672_v50 = vshll.u32 %v6148_v1, 16  ;;  %v8210_v25 = vld [vmem:[#allocation45_spill] sm:$0xff] }
 0x310   : > { %5552 = vmatpush3.bf16.msra.mxu1 %v6073_v22  ;;  %v1636_v22 = vrot.slane %v1635_v32, 4  ;;  %v3083_v26 = vsel %vm7204_vm12, %v7538_v10, %v3082_v52  ;;  %v1664_v44 = vrot.slane %v1662_v11, 5  ;;  %v1668_v47 = vrot.slane %v1666_v29, 4  ;;  %v6083_v29 = vld [vmem:[#allocation11 + $0x1a0] sm:$0xff]  }
 0x311   : > { %5569 = vmatprep.subr.bf16.mxu1 %v6075_v28  ;;  %v1645_v35 = vor.u32 %v1644_v13, %v1640_v41  ;;  %v1659_v52 = vor.u32 %v1658_v45, %v1655_v31  ;;  %v3090_v10 = vsel %vm7204_vm12, %v7631_v30, %v3089_v2  ;;  %v4964_v8 = vcombine.low %v7645_v63, %v3083_v26  ;;  %v8211_v31 = vld [vmem:[#allocation44_spill] sm:$0xff] }
 0x312   : > { %5420 = vmatpush3.bf16.msra.mxu0 %v6106_v43  ;;  %v1669_v12 = vor.u32 %v1668_v47, %v1664_v44  ;;  %v4958_v21 = vrot.slane %v3029_v33, 9  ;;  %v4965_v15 = vcombine.low %v3087_v19, %v3090_v10  ;;  %v3095_v36 = vrot.slane %v3093_v48, 4  ;;  %v3031_v33 = vld [vmem:[#allocation2 + $0x60] sm:$0xe]  ;;  %v6150_v26 = vld [vmem:[#allocation2 + $0x10] sm:$0xf] }
 0x313   : > { %5554 = vmatmul.mubr.bf16.vlgmr.msra.gmra.mrb[0].mxu1 %v4962_v56  ;;  %v1646_v51 = vrot.slane %v1645_v35, 4  ;;  %v1641_v56 = vsel %vm7353_vm15, %v1636_v22, %v1640_v41  ;;  %5421 = vmatprep.subr.bf16.mxu0 %v6108_v61  ;;  %v3096_v30 = vrot.slane %v7362_v49, 5  ;;  %v6081_v41 = vld [vmem:[#allocation11 + $0x198] sm:$0xff]   ;;  %v4959_v13 = vrot.slane %v3030_v4, 9  ;;  %v6087_v19 = vld [vmem:[#allocation11 + $0x1b0] sm:$0xff]  }
 0x314   : > { %5570 = vmatpush3.bf16.msra.mxu1 %v6075_v28  ;;  %5557 = vmatprep.mubr.bf16.mxu1 %v4963_v24  ;;  %v1674_v24 = vrot.slane %v1672_v50, 5  ;;  %v1660_v28 = vrot.slane %v1659_v52, 4  ;;  %v1670_v37 = vrot.slane %v1669_v12, 4  ;;  %v3102_v40 = vrot.slane %v3100_v55, 4  ;;  %v6085_v50 = vld [vmem:[#allocation11 + $0x1a8] sm:$0xff]  }
 0x315   : > { %5571 = vmatprep.subr.bf16.mxu1 %v6077_v5  ;;  %v1651_v46 = vsel %vm7353_vm15, %v1646_v51, %v1650_v9  ;;  %v3103_v32 = vrot.slane %v8210_v25, 5  ;;  %v3094_v49 = vsel %vm7204_vm12, %v4958_v21, %v3093_v48  ;;  %v3097_v35 = vsel %vm7204_vm12, %v3095_v36, %v3096_v30  ;;  %v7726_v52 = vld [vmem:[#allocation2 + $0x1c] sm:$0xf]  ;;  %v3568_v10 = vld [vmem:[#allocation2 + $0x24] sm:$0xf]  ;;  %v6099_v36 = vld [vmem:[#allocation11 + $0x1d0] sm:$0xff]  }
 0x316   : > { %v4871_v43 = vcombine.low %v1641_v56, %v1651_v46  ;;  %5422 = vmatpush3.bf16.msra.mxu0 %v6108_v61  ;;  %v1665_v2 = vsel %vm7353_vm15, %v1660_v28, %v1664_v44  ;;  %v1675_v63 = vsel %vm7353_vm15, %v1670_v37, %v1674_v24  ;;  %v3107_v11 = vrot.slane %v8211_v31, 5  ;;  %v6093_v56 = vld [vmem:[#allocation11 + $0x1c0] sm:$0xff]   ;;  %v6092_v46 = vld [vmem:[#allocation2 + $0x24] sm:$0xff]   ;;  %v7736_v21 = vld [vmem:[#allocation2 + $0x20] sm:$0x1] }
 0x317   : > { %5423 = vmatprep.subr.bf16.mxu0 %v6112_v14  ;;  %v4872_v9 = vcombine.low %v1665_v2, %v1675_v63  ;;  %v3101_v61 = vsel %vm7204_vm12, %v4959_v13, %v3100_v55  ;;  %v4966_v59 = vcombine.low %v3094_v49, %v3097_v35  ;;  %v4960_v48 = vrot.slane %v3031_v33, 9  ;;  %v3565_v55 = vld [vmem:[#allocation2 + $0x18] sm:$0xf]  ;;  %v7732_v28 = vld [vmem:[#allocation2 + $0x28] sm:$0xf]  ;;  %v6101_v63 = vld [vmem:[#allocation11 + $0x1d8] sm:$0xff]  }
 0x318   : > { %5572 = vmatpush3.bf16.msra.mxu1 %v6077_v5  ;;  %5405 = vmatprep.mubr.bf16.mxu0 %v4871_v43  ;;  %v6149_v5 = vld [vmem:[#allocation2 + $0x4] sm:$0xf]  ;;  %v3109_v45 = vrot.slane %v3107_v11, 4  ;;  %v3110_v1 = vrot.slane %v7388_v20, 5  ;;  %v4882_v51 = vcombine.low %v7482_v34, %v6150_v26  ;;  %v4883_v44 = vcombine.low %v7549_v38, %v7560_v0  ;;  %v6089_v34 = vld [vmem:[#allocation11 + $0x1b8] sm:$0xff]  }
 0x319   : > { %5573 = vmatprep.subr.bf16.mxu1 %v6079_v42  ;;  %v4881_v17 = vcombine.low %v7480_v54, %v6149_v5  ;;  %v3104_v54 = vsel %vm7204_vm12, %v3102_v40, %v3103_v32  ;;  %5406 = vmatmul.mubr.bf16.gmra.mrb[36].mxu0 %v4872_v9  ;;  %v3108_v47 = vsel %vm7204_vm12, %v4960_v48, %v3107_v11  ;;  %v3590_v12 = vshrl.u32 %v3565_v55, 16  ;;  %v6098_v40 = vld [vmem:[#allocation2 + $0x3c] sm:$0xff]   ;;  %v3571_v32 = vld [vmem:[#allocation2 + $0x30] sm:$0xf]  ;;  %v6103_v9 = vld [vmem:[#allocation2 + $0x48] sm:$0xff]  }
 0x31a   : > { %5424 = vmatpush3.bf16.msra.mxu0 %v6112_v14  ;;  %v4967_v22 = vcombine.low %v3101_v61, %v3104_v54  ;;  %v4884_v38 = vcombine.low %v7555_v7, %v7570_v39  ;;  %v4885_v0 = vcombine.low %v7601_v3, %v7596_v23  ;;  %v3593_v24 = vshll.u32 %v3565_v55, 16  ;;  %v6095_v14 = vld [vmem:[#allocation11 + $0x1c8] sm:$0xff]   ;;  %v6097_v7 = vld [vmem:[#allocation2 + $0x30] sm:$0xff]  }
 0x31b   : > { %5558 = vmatmul.mubr.bf16.gmra.mrb[4].mxu1 %v4964_v8  ;;  %5425 = vmatprep.mubr.bf16.mxu0 %v4881_v17  ;;  %v3599_v39 = vshll.u32 %v7726_v52, 16  ;;  %v3603_v23 = vshrl.u32 %v7726_v52, 16  ;;  %v3614_v3 = vshrl.u32 %v3568_v10, 16  ;;  %v3617_v4 = vshll.u32 %v3568_v10, 16  ;;  %v7747_v49 = vld [vmem:[#allocation2 + $0x34] sm:$0xf] }
 0x31c   : > { %5574 = vmatpush3.bf16.msra.mxu1 %v6079_v42  ;;  %5561 = vmatprep.mubr.bf16.mxu1 %v4965_v15  ;;  %v3111_v42 = vsel %vm7204_vm12, %v3109_v45, %v3110_v1  ;;  %v4886_v43 = vcombine.low %v7609_v57, %v7604_v53  ;;  %v4887_v8 = vcombine.low %v7647_v6, %v7658_v58  ;;  %v3592_v37 = vrot.slane %v3590_v12, 4  ;;  %v3574_v45 = vld [vmem:[#allocation2 + $0x3c] sm:$0xf]  ;;  %v7762_v10 = vld [vmem:[#allocation2 + $0x4c] sm:$0xf] }
 0x31d   : > { %5575 = vmatprep.subr.bf16.mxu1 %v6081_v41  ;;  %v4968_v20 = vcombine.low %v3108_v47, %v3111_v42  ;;  %v3595_v15 = vrot.slane %v3593_v24, 5  ;;  %v7738_v30 = vrot.slane %v3599_v39, 5  ;;  %v3605_v2 = vrot.slane %v3603_v23, 4  ;;  %v7758_v47 = vld [vmem:[#allocation2 + $0x40] sm:$0xf] }
 0x31e   : > { %v3616_v53 = vrot.slane %v3614_v3, 4  ;;  %v3619_v57 = vrot.slane %v3617_v4, 5  ;;  %v3623_v13 = vshll.u32 %v7732_v28, 16  ;;  %v3627_v6 = vshrl.u32 %v7732_v28, 16  ;;  %v6109_v42 = vld [vmem:[#allocation2 + $0x60] sm:$0xff]  }
 0x31f   : > { %v3609_v58 = vshll.u32 %v7736_v21, 16  ;;  %v3596_v25 = vor.u32 %v3595_v15, %v3592_v37  ;;  %v3606_v5 = vor.u32 %v3605_v2, %v7738_v30  ;;  %v3638_v54 = vshrl.u32 %v3571_v32, 16  ;;  %v6111_v2 = vld [vmem:[#allocation11 + $0x1f0] sm:$0xff]  }
 0x320   : > { %5576 = vmatpush3.bf16.msra.mxu1 %v6081_v41  ;;  %v7740_v41 = vld [vmem:[#allocation2 + $0x2c] sm:$0x1]  ;;  %v3620_v35 = vor.u32 %v3619_v57, %v3616_v53  ;;  %v7749_v31 = vrot.slane %v3623_v13, 5  ;;  %v3629_v11 = vrot.slane %v3627_v6, 4  ;;  %v3641_v33 = vshll.u32 %v3571_v32, 16 }
 0x321   : > { %5577 = vmatprep.subr.bf16.mxu1 %v6083_v29  ;;  %5426 = vmatmul.mubr.bf16.vlgmr.msra.gmra.mrb[24].mxu0 %v4882_v51  ;;  %v3633_v17 = vshll.u32 %v7740_v41, 16  ;;  %v3611_v61 = vrot.slane %v3609_v58, 5  ;;  %v3647_v48 = vshll.u32 %v7747_v49, 16  ;;  %v3607_v1 = vrot.slane %v3606_v5, 4  ;;  %v6104_v51 = vld [vmem:[#allocation2 + $0x54] sm:$0xff]   ;;  %v6110_v6 = vld [vmem:[#allocation2 + $0x6c] sm:$0xff]  }
 0x322   : > { %5429 = vmatprep.mubr.bf16.mxu0 %v4883_v44  ;;  %v3651_v26 = vshrl.u32 %v7747_v49, 16  ;;  %v3621_v44 = vrot.slane %v3620_v35, 4  ;;  %v3671_v24 = vshll.u32 %v7758_v47, 16  ;;  %v3695_v4 = vshll.u32 %v7762_v10, 16  ;;  %v7780_v13 = vld [vmem:[#allocation2 + $0x44] sm:$0x1] }
 0x323   : > { %5562 = vmatmul.mubr.bf16.gmra.mrb[8].mxu1 %v4966_v59  ;;  %v6105_v59 = vld [vmem:[#allocation11 + $0x1e0] sm:$0xff]   ;;  %v3612_v3 = vsel %vm7353_vm15, %v3607_v1, %v3611_v61  ;;  %v3580_v35 = vld [vmem:[#allocation2 + $0x54] sm:$0xf]  ;;  %v3681_v61 = vshll.u32 %v7780_v13, 16 }
 0x324   : > { %5578 = vmatpush3.bf16.msra.mxu1 %v6083_v29  ;;  %5565 = vmatprep.mubr.bf16.mxu1 %v4967_v22  ;;  %v4888_v29 = vcombine.low %v7656_v62, %v7668_v60  ;;  %v3597_v22 = vrot.slane %v3596_v25, 4  ;;  %v3630_v62 = vor.u32 %v3629_v11, %v7749_v31  ;;  %v3635_v60 = vrot.slane %v3633_v17, 5 }
 0x325   : > { %5579 = vmatprep.subr.bf16.mxu1 %v6085_v50  ;;  %v3653_v55 = vrot.slane %v3651_v26, 4  ;;  %v7782_v58 = vrot.slane %v3671_v24, 5  ;;  %v7786_v5 = vrot.slane %v3695_v4, 5  ;;  %v3710_v1 = vshrl.u32 %v3580_v35, 16  ;;  %v3583_v26 = vld [vmem:[#allocation2 + $0x60] sm:$0xf] }
 0x326   : > { %v3602_v23 = vsel %vm7353_vm15, %v3597_v22, %v7738_v30  ;;  %v3626_v30 = vsel %vm7353_vm15, %v3621_v44, %v7749_v31 }
 0x328   : > { %5580 = vmatpush3.bf16.msra.mxu1 %v6085_v50  ;;  %v7754_v50 = vld [vmem:[#allocation2 + $0x38] sm:$0x1] }
 0x329   : > { %5581 = vmatprep.subr.bf16.mxu1 %v6087_v19  ;;  %5430 = vmatmul.mubr.bf16.gmra.mrb[28].mxu0 %v4884_v38  ;;  %v3662_v38 = vshrl.u32 %v3574_v45, 16  ;;  %v3657_v12 = vshll.u32 %v7754_v50, 16 }
 0x32a   : > { %5433 = vmatprep.mubr.bf16.mxu0 %v4885_v0  ;;  %v3577_v0 = vld [vmem:[#allocation2 + $0x48] sm:$0xf] }
 0x32b   : > { %5566 = vmatmul.mubr.bf16.gmra.mrb[12].mxu1 %v4968_v20  ;;  %v3643_v20 = vrot.slane %v3641_v33, 5  ;;  %v3689_v39 = vshll.u32 %v3577_v0, 16  ;;  %v3664_v15 = vrot.slane %v3662_v38, 4  ;;  %v3659_v57 = vrot.slane %v3657_v12, 5  ;;  %v6113_v33 = vld [vmem:[#allocation11 + $0x1f8] sm:$0xff]  }
 0x32c   : > { %5582 = vmatpush3.bf16.msra.mxu1 %v6087_v19  ;;  %5585 = vmatprep.mubr.bf16.mxu1 %v6091_v16  ;;  %v3640_v19 = vrot.slane %v3638_v54, 4  ;;  %v6107_v16 = vld [vmem:[#allocation11 + $0x1e8] sm:$0xff]   ;;  %v7789_v54 = vld [vmem:[#allocation2 + $0x58] sm:$0xf]  ;;  %v3683_v38 = vrot.slane %v3681_v61, 5 }
 0x32d   : > { %5583 = vmatprep.subr.bf16.mxu1 %v6089_v34  ;;  %v3691_v32 = vrot.slane %v3689_v39, 5  ;;  %v3712_v39 = vrot.slane %v3710_v1, 4 }
 0x330   : > { %5584 = vmatpush3.bf16.msra.mxu1 %v6089_v34  ;;  %v7760_v34 = vrot.slane %v3647_v48, 5 }
 0x331   : > { %5601 = vmatprep.subr.bf16.mxu1 %v6093_v56  ;;  %5434 = vmatmul.mubr.bf16.gmra.mrb[32].mxu0 %v4886_v43  ;;  %v3699_v43 = vshrl.u32 %v7762_v10, 16 }
 0x332   : > { %5437 = vmatprep.mubr.bf16.mxu0 %v4887_v8  ;;  %v3644_v8 = vor.u32 %v3643_v20, %v3640_v19  ;;  %v3654_v37 = vor.u32 %v3653_v55, %v7760_v34  ;;  %v3734_v55 = vshrl.u32 %v3583_v26, 16 }
 0x333   : > { %5586 = vmatmul.mubr.bf16.vlgmr.msra.gmra.mrb[0].mxu1 %v6092_v46  ;;  %v3631_v46 = vrot.slane %v3630_v62, 4  ;;  %v3701_v17 = vrot.slane %v3699_v43, 4  ;;  %v3713_v62 = vshll.u32 %v3580_v35, 16 }
 0x334   : > { %5602 = vmatpush3.bf16.msra.mxu1 %v6093_v56  ;;  %5589 = vmatprep.mubr.bf16.mxu1 %v6097_v7  ;;  %v3665_v56 = vshll.u32 %v3574_v45, 16  ;;  %v3686_v7 = vshrl.u32 %v3577_v0, 16  ;;  %v3645_v31 = vrot.slane %v3644_v8, 4  ;;  %v3655_v11 = vrot.slane %v3654_v37, 4  ;;  %v6116_v0 = vld [vmem:[#allocation11 + $0x200] sm:$0xff]   ;;  %v6117_v8 = vld [vmem:[#allocation11 + $0x208] sm:$0xff]  }
 0x335   : > { %5603 = vmatprep.subr.bf16.mxu1 %v6095_v14  ;;  %v3636_v53 = vsel %vm7353_vm15, %v3631_v46, %v3635_v60  ;;  %v3702_v44 = vor.u32 %v3701_v17, %v7786_v5  ;;  %v3719_v60 = vshll.u32 %v7789_v54, 16 }
 0x336   : > { %v3688_v25 = vrot.slane %v3686_v7, 4  ;;  %v3650_v19 = vsel %vm7353_vm15, %v3645_v31, %v7760_v34  ;;  %v3660_v20 = vsel %vm7353_vm15, %v3655_v11, %v3659_v57  ;;  %v3715_v34 = vrot.slane %v3713_v62, 5  ;;  %v7809_v57 = vld [vmem:[#allocation2 + $0x70] sm:$0xf] }
 0x337   : > { %v7807_v4 = vrot.slane %v3719_v60, 5  ;;  %v4995_v37 = vcombine.low %v3650_v19, %v3660_v20  ;;  %v3771_v61 = vshrl.u32 %v7809_v57, 16  ;;  %v6121_v20 = vld [vmem:[#allocation11 + $0x218] sm:$0xff]  }
 0x338   : > { %5604 = vmatpush3.bf16.msra.mxu1 %v6095_v14  ;;  %v3675_v14 = vshrl.u32 %v7758_v47, 16  ;;  %v3692_v48 = vor.u32 %v3691_v32, %v3688_v25  ;;  %v7817_v32 = vld [vmem:[#allocation2 + $0x68] sm:$0x1]  ;;  %v3716_v35 = vor.u32 %v3715_v34, %v3712_v39  ;;  %v4025_v34 = vrot.slane %v7726_v52, 5 }
 0x339   : > { %5605 = vmatprep.subr.bf16.mxu1 %v6099_v36  ;;  %5438 = vmatmul.mubr.bf16.gmra.mrb[36].mxu0 %v4888_v29  ;;  %v3773_v19 = vrot.slane %v3771_v61, 4 }
 0x33a   : > { %v3717_v1 = vrot.slane %v3716_v35, 4 }
 0x33b   : > { %5590 = vmatmul.mubr.bf16.gmra.mrb[4].mxu1 %v6098_v40  ;;  %v3677_v40 = vrot.slane %v3675_v14, 4  ;;  %v3693_v14 = vrot.slane %v3692_v48, 4 }
 0x33c   : > { %5606 = vmatpush3.bf16.msra.mxu1 %v6099_v36  ;;  %5593 = vmatprep.mubr.bf16.mxu1 %v6103_v9  ;;  %v3667_v36 = vrot.slane %v3665_v56, 5  ;;  %v7784_v9 = vld [vmem:[#allocation2 + $0x50] sm:$0x1]  ;;  %v3737_v56 = vshll.u32 %v3583_v26, 16 }
 0x33d   : > { %5607 = vmatprep.subr.bf16.mxu1 %v6101_v63  ;;  %v3678_v22 = vor.u32 %v3677_v40, %v7782_v58  ;;  %v3705_v45 = vshll.u32 %v7784_v9, 16 }
 0x33e   : > { %v3668_v29 = vor.u32 %v3667_v36, %v3664_v15  ;;  %v3586_v15 = vld [vmem:[#allocation2 + $0x6c] sm:$0xf]  ;;  %v3736_v36 = vrot.slane %v3734_v55, 4  ;;  %v7828_v55 = vld [vmem:[#allocation2 + $0x74] sm:$0x1] }
 0x33f   : > { %v3679_v24 = vrot.slane %v3678_v22, 4  ;;  %v3707_v7 = vrot.slane %v3705_v45, 5  ;;  %v3761_v11 = vshll.u32 %v3586_v15, 16 }
 0x340   : > { %5608 = vmatpush3.bf16.msra.mxu1 %v6101_v63  ;;  %v4993_v63 = vcombine.low %v3602_v23, %v3612_v3  ;;  %v3703_v23 = vrot.slane %v3702_v44, 4  ;;  %v7805_v3 = vld [vmem:[#allocation2 + $0x5c] sm:$0x1] }
 0x341   : > { %5609 = vmatprep.subr.bf16.mxu1 %v6105_v59  ;;  %v3684_v40 = vsel %vm7353_vm15, %v3679_v24, %v3683_v38  ;;  %v3729_v25 = vshll.u32 %v7805_v3, 16  ;;  %v3763_v60 = vrot.slane %v3761_v11, 5 }
 0x342   : > { %v3708_v17 = vsel %vm7353_vm15, %v3703_v23, %v3707_v7  ;;  %v6124_v7 = vld [vmem:[#allocation11 + $0x220] sm:$0xff]  }
 0x343   : > { %5594 = vmatmul.mubr.bf16.gmra.mrb[8].mxu1 %v6104_v51  ;;  %v7793_v51 = vld [vmem:[#allocation2 + $0x64] sm:$0xf]  ;;  %v3731_v44 = vrot.slane %v3729_v25, 5  ;;  %v4032_v25 = vrot.slane %v7732_v28, 5  ;;  %v6129_v28 = vld [vmem:[#allocation11 + $0x238] sm:$0xff]  }
 0x344   : > { %5610 = vmatpush3.bf16.msra.mxu1 %v6105_v59  ;;  %5597 = vmatprep.mubr.bf16.mxu1 %v6109_v42  ;;  %v4994_v59 = vcombine.low %v3626_v30, %v3636_v53  ;;  %v3723_v42 = vshrl.u32 %v7789_v54, 16  ;;  %v3743_v46 = vshll.u32 %v7793_v51, 16  ;;  %v3747_v12 = vshrl.u32 %v7793_v51, 16 }
 0x345   : > { %5611 = vmatprep.subr.bf16.mxu1 %v6107_v16  ;;  %v4034_v27 = vrot.slane %v4032_v25, 4 }
 0x346   : > { %v3725_v43 = vrot.slane %v3723_v42, 4  ;;  %v3745_v30 = vrot.slane %v3743_v46, 5  ;;  %v3749_v53 = vrot.slane %v3747_v12, 4 }
 0x348   : > { %5612 = vmatpush3.bf16.msra.mxu1 %v6107_v16  ;;  %v3669_v16 = vrot.slane %v3668_v29, 4  ;;  %v3726_v31 = vor.u32 %v3725_v43, %v7807_v4  ;;  %v3767_v29 = vshll.u32 %v7809_v57, 16  ;;  %v3750_v22 = vor.u32 %v3749_v53, %v3745_v30 }
 0x349   : > { %5613 = vmatprep.subr.bf16.mxu1 %v6111_v2 }
 0x34a   : > { %v3727_v26 = vrot.slane %v3726_v31, 4  ;;  %v3769_v42 = vrot.slane %v3767_v29, 5  ;;  %v3751_v38 = vrot.slane %v3750_v22, 4  ;;  %v4039_v31 = vrot.slane %v7747_v49, 5 }
 0x34b   : > { %5598 = vmatmul.mubr.bf16.gmra.mrb[12].mxu1 %v6110_v6  ;;  %v3674_v6 = vsel %vm7353_vm15, %v3669_v16, %v7782_v58  ;;  %v3758_v58 = vshrl.u32 %v3586_v15, 16 }
 0x34c   : > { %5614 = vmatpush3.bf16.msra.mxu1 %v6111_v2  ;;  %5617 = vmatprep.mubr.bf16.mxu1 %v4993_v63  ;;  %v3739_v2 = vrot.slane %v3737_v56, 5  ;;  %v3698_v63 = vsel %vm7353_vm15, %v3693_v14, %v7786_v5  ;;  %v3753_v5 = vshll.u32 %v7817_v32, 16  ;;  %v4996_v48 = vcombine.low %v3674_v6, %v3684_v40 }
 0x34d   : > { %5615 = vmatprep.subr.bf16.mxu1 %v6113_v33  ;;  %v4997_v45 = vcombine.low %v3698_v63, %v3708_v17  ;;  %v3760_v62 = vrot.slane %v3758_v58, 4  ;;  %v3722_v56 = vsel %vm7353_vm15, %v3717_v1, %v7807_v4  ;;  %v3732_v46 = vsel %vm7353_vm15, %v3727_v26, %v3731_v44  ;;  %v3991_v4 = vld [vmem:[#allocation2 + $0x18] sm:$0xe]  ;;  %v6128_v63 = vld [vmem:[#allocation11 + $0x230] sm:$0xff]   ;;  %v3993_v58 = vld [vmem:[#allocation2 + $0x30] sm:$0xe] }
 0x34e   : > { %v3774_v24 = vor.u32 %v3773_v19, %v3769_v42  ;;  %v3777_v14 = vshll.u32 %v7828_v55, 16  ;;  %v4998_v43 = vcombine.low %v3722_v56, %v3732_v46  ;;  %v5009_v53 = vrot.slane %v3991_v4, 9  ;;  %v3994_v26 = vld [vmem:[#allocation2 + $0x3c] sm:$0xe]  ;;  %v3995_v44 = vld [vmem:[#allocation2 + $0x48] sm:$0xe] }
 0x34f   : > { %v3764_v12 = vor.u32 %v3763_v60, %v3760_v62  ;;  %v4027_v6 = vrot.slane %v4025_v34, 4  ;;  %v4028_v40 = vrot.slane %v7736_v21, 5  ;;  %v3992_v21 = vld [vmem:[#allocation2 + $0x24] sm:$0xe]  ;;  %v4041_v22 = vrot.slane %v4039_v31, 4 }
 0x350   : > { %5616 = vmatpush3.bf16.msra.mxu1 %v6113_v33  ;;  %v6120_v33 = vld [vmem:[#allocation11 + $0x210] sm:$0xff]   ;;  %v3775_v15 = vrot.slane %v3774_v24, 4  ;;  %v4026_v17 = vsel %vm7204_vm12, %v5009_v53, %v4025_v34  ;;  %v5010_v61 = vrot.slane %v3992_v21, 9  ;;  %v4060_v56 = vrot.slane %v7789_v54, 5  ;;  %v6135_v21 = vld [vmem:[#allocation12 + $0x28] sm:$0xff]  }
 0x351   : > { %5633 = vmatprep.subr.bf16.mxu1 %v6116_v0  ;;  %v4029_v35 = vsel %vm7204_vm12, %v4027_v6, %v4028_v40  ;;  %v4067_v24 = vrot.slane %v7793_v51, 5  ;;  %v4063_v34 = vrot.slane %v7805_v3, 5  ;;  %v4070_v54 = vrot.slane %v7817_v32, 5 }
 0x352   : > { %v5017_v29 = vcombine.low %v4026_v17, %v4029_v35  ;;  %v4033_v49 = vsel %vm7204_vm12, %v5010_v61, %v4032_v25  ;;  %v4074_v51 = vrot.slane %v7809_v57, 5  ;;  %v4077_v40 = vrot.slane %v7828_v55, 5  ;;  %v6132_v17 = vld [vmem:[#allocation12 + $0x10] sm:$0xff]   ;;  %v6133_v55 = vld [vmem:[#allocation12 + $0x18] sm:$0xff]   ;;  %v6134_v35 = vld [vmem:[#allocation12 + $0x20] sm:$0xff]  }
 0x353   : > { %5618 = vmatmul.mubr.bf16.vlgmr.msra.gmra.mrb[0].mxu1 %v4994_v59  ;;  %v3740_v59 = vor.u32 %v3739_v2, %v3736_v36  ;;  %v3779_v36 = vrot.slane %v3777_v14, 5  ;;  %v6125_v2 = vld [vmem:[#allocation11 + $0x228] sm:$0xff]  }
 0x354   : > { %5634 = vmatpush3.bf16.msra.mxu1 %v6116_v0  ;;  %5621 = vmatprep.mubr.bf16.mxu1 %v4995_v37  ;;  %v3755_v0 = vrot.slane %v3753_v5, 5  ;;  %v3765_v37 = vrot.slane %v3764_v12, 4  ;;  %v4042_v5 = vrot.slane %v7754_v50, 5  ;;  %v4053_v50 = vrot.slane %v7762_v10, 5  ;;  %v3996_v12 = vld [vmem:[#allocation2 + $0x54] sm:$0xe] }
 0x355   : > { %5635 = vmatprep.subr.bf16.mxu1 %v6117_v8  ;;  %v3741_v16 = vrot.slane %v3740_v59, 4  ;;  %v3780_v52 = vsel %vm7353_vm15, %v3775_v15, %v3779_v36  ;;  %v5011_v59 = vrot.slane %v3993_v58, 9  ;;  %v3998_v36 = vld [vmem:[#allocation2 + $0x6c] sm:$0xe]  ;;  %v4076_v6 = vrot.slane %v4074_v51, 4 }
 0x356   : > { %v3756_v23 = vsel %vm7353_vm15, %v3751_v38, %v3755_v0  ;;  %v4043_v1 = vsel %vm7204_vm12, %v4041_v22, %v4042_v5  ;;  %v4056_v38 = vrot.slane %v7784_v9, 5  ;;  %v3997_v9 = vld [vmem:[#allocation2 + $0x60] sm:$0xe]  ;;  %v5016_v32 = vrot.slane %v3998_v36, 9 }
 0x357   : > { %v3746_v39 = vsel %vm7353_vm15, %v3741_v16, %v3745_v30  ;;  %v3770_v30 = vsel %vm7353_vm15, %v3765_v37, %v3769_v42  ;;  %v5012_v42 = vrot.slane %v3994_v26, 9  ;;  %v5013_v16 = vrot.slane %v3995_v44, 9  ;;  %v7901_v44 = vld [vmem:[%s8212_s0] ss:$0 sm:$0xff] }
 0x358   : > { %5636 = vmatpush3.bf16.msra.mxu1 %v6117_v8  ;;  %v4999_v8 = vcombine.low %v3746_v39, %v3756_v23  ;;  %v5000_v11 = vcombine.low %v3770_v30, %v3780_v52  ;;  %v5014_v39 = vrot.slane %v3996_v12, 9  ;;  %v4062_v23 = vrot.slane %v4060_v56, 4  ;;  %v6130_v30 = vld [vmem:[#allocation12] sm:$0xff]  }
 0x359   : > { %5637 = vmatprep.subr.bf16.mxu1 %v6120_v33  ;;  %v4054_v46 = vsel %vm7204_vm12, %v5013_v16, %v4053_v50  ;;  %v5015_v4 = vrot.slane %v3997_v9, 9  ;;  %v4075_v52 = vsel %vm7204_vm12, %v5016_v32, %v4074_v51  ;;  %v4078_v57 = vsel %vm7204_vm12, %v4076_v6, %v4077_v40  ;;  %5665 = vmatprep.subr.bf16.mxu0 %v6130_v30 }
 0x35a   : > { %v4064_v37 = vsel %vm7204_vm12, %v4062_v23, %v4063_v34  ;;  %5666 = vmatpush3.bf16.msra.mxu0 %v6130_v30  ;;  %v5024_v25 = vcombine.low %v4075_v52, %v4078_v57 }
 0x35b   : > { %5622 = vmatmul.mubr.bf16.gmra.mrb[4].mxu1 %v4996_v48  ;;  %v4068_v15 = vsel %vm7204_vm12, %v5015_v4, %v4067_v24 }
 0x35c   : > { %5638 = vmatpush3.bf16.msra.mxu1 %v6120_v33  ;;  %5625 = vmatprep.mubr.bf16.mxu1 %v4997_v45  ;;  %v4035_v33 = vrot.slane %v7740_v41, 5  ;;  %v4046_v45 = vrot.slane %v7758_v47, 5  ;;  %v4040_v41 = vsel %vm7204_vm12, %v5011_v59, %v4039_v31  ;;  %v4055_v47 = vrot.slane %v4053_v50, 4  ;;  %v6137_v31 = vld [vmem:[#allocation12 + $0x38] sm:$0xff]  }
 0x35d   : > { %5639 = vmatprep.subr.bf16.mxu1 %v6121_v20  ;;  %v5019_v60 = vcombine.low %v4040_v41, %v4043_v1 }
 0x35e   : > { %v4036_v48 = vsel %vm7204_vm12, %v4034_v27, %v4035_v33  ;;  %v4048_v19 = vrot.slane %v4046_v45, 4  ;;  %v4047_v0 = vsel %vm7204_vm12, %v5012_v42, %v4046_v45 }
 0x35f   : > { %v5018_v62 = vcombine.low %v4033_v49, %v4036_v48 }
 0x360   : > { %5640 = vmatpush3.bf16.msra.mxu1 %v6121_v20  ;;  %v4049_v20 = vrot.slane %v7780_v13, 5  ;;  %v4057_v13 = vsel %vm7204_vm12, %v4055_v47, %v4056_v38 }
 0x361   : > { %5641 = vmatprep.subr.bf16.mxu1 %v6124_v7 }
 0x362   : > { %v4050_v10 = vsel %vm7204_vm12, %v4048_v19, %v4049_v20 }
 0x363   : > { %5626 = vmatmul.mubr.bf16.gmra.mrb[8].mxu1 %v4998_v43  ;;  %v5020_v14 = vcombine.low %v4047_v0, %v4050_v10  ;;  %v4069_v43 = vrot.slane %v4067_v24, 4 }
 0x364   : > { %5642 = vmatpush3.bf16.msra.mxu1 %v6124_v7  ;;  %5629 = vmatprep.mubr.bf16.mxu1 %v4999_v8  ;;  %v5021_v7 = vcombine.low %v4054_v46, %v4057_v13  ;;  %v4061_v8 = vsel %vm7204_vm12, %v5014_v39, %v4060_v56 }
 0x365   : > { %5643 = vmatprep.subr.bf16.mxu1 %v6125_v2  ;;  %v4071_v3 = vsel %vm7204_vm12, %v4069_v43, %v4070_v54 }
 0x366   : > { %v5023_v53 = vcombine.low %v4068_v15, %v4071_v3 }
 0x368   : > { %5644 = vmatpush3.bf16.msra.mxu1 %v6125_v2  ;;  %v5022_v2 = vcombine.low %v4061_v8, %v4064_v37 }
 0x369   : > { %5645 = vmatprep.subr.bf16.mxu1 %v6128_v63 }
 0x36b   : > { %5630 = vmatmul.mubr.bf16.gmra.mrb[12].mxu1 %v5000_v11 }
 0x36c   : > { %5646 = vmatpush3.bf16.msra.mxu1 %v6128_v63  ;;  %5649 = vmatprep.mubr.bf16.mxu1 %v5017_v29  ;;  %v6131_v63 = vld [vmem:[#allocation12 + $0x8] sm:$0xff]  }
 0x36d   : > { %5647 = vmatprep.subr.bf16.mxu1 %v6129_v28  ;;  %5667 = vmatprep.subr.bf16.mxu0 %v6131_v63 }
 0x36e   : > { %5668 = vmatpush3.bf16.msra.mxu0 %v6131_v63 }
 0x36f   : > { %5669 = vmatprep.subr.bf16.mxu0 %v6132_v17 }
 0x370   : > { %5648 = vmatpush3.bf16.msra.mxu1 %v6129_v28 }
 0x372   : > { %5670 = vmatpush3.bf16.msra.mxu0 %v6132_v17 }
 0x373   : > { %5650 = vmatmul.mubr.bf16.vlgmr.msra.gmra.mrb[0].mxu1 %v5018_v62  ;;  %5671 = vmatprep.subr.bf16.mxu0 %v6133_v55 }
 0x374   : > { %5653 = vmatprep.mubr.bf16.mxu1 %v5019_v60 }
 0x376   : > { %5672 = vmatpush3.bf16.msra.mxu0 %v6133_v55 }
 0x377   : > { %5673 = vmatprep.subr.bf16.mxu0 %v6134_v35 }
 0x37a   : > { %5674 = vmatpush3.bf16.msra.mxu0 %v6134_v35 }
 0x37b   : > { %5654 = vmatmul.mubr.bf16.gmra.mrb[4].mxu1 %v5020_v14  ;;  %5675 = vmatprep.subr.bf16.mxu0 %v6135_v21 }
 0x37c   : > { %5657 = vmatprep.mubr.bf16.mxu1 %v5021_v7 }
 0x37e   : > { %5676 = vmatpush3.bf16.msra.mxu0 %v6135_v21 }
 0x37f   : > { %5677 = vmatprep.subr.bf16.mxu0 %v6136_v18 }
 0x382   : > { %5678 = vmatpush3.bf16.msra.mxu0 %v6136_v18 }
 0x383   : > { %5658 = vmatmul.mubr.bf16.gmra.mrb[8].mxu1 %v5022_v2  ;;  %5679 = vmatprep.subr.bf16.mxu0 %v6137_v31 }
 0x384   : > { %5661 = vmatprep.mubr.bf16.mxu1 %v5023_v53 }
 0x386   : > { %5680 = vmatpush3.bf16.msra.mxu0 %v6137_v31 }
 0x38b   : > { %5662 = vmatmul.mubr.bf16.gmra.mrb[12].mxu1 %v5024_v25 }
 0x3f4   : > { %v5427_v58 = vpop.f32.mrb[24].mxu0 }
 0x3f5   : > { %v2000_v11 = vpop.f32.mrb[25].mxu0 }
 0x3f6   : > { %v5428_v29 = vpop.f32.mrb[26].mxu0 }
 0x3f7   : > { %v2003_v61 = vpop.f32.mrb[27].mxu0 }
 0x3fc   : > { %v5431_v27 = vpop.f32.mrb[28].mxu0 }
 0x3fd   : > { %v2016_v33 = vpop.f32.mrb[29].mxu0 }
 0x3fe   : > { %v5432_v28 = vpop.f32.mrb[30].mxu0 }
 0x3ff   : > { %v2019_v59 = vpop.f32.mrb[31].mxu0 }
 0x404   : > { %v5435_v22 = vpop.f32.mrb[32].mxu0 }
 0x405   : > { %v2032_v5 = vpop.f32.mrb[33].mxu0 }
 0x406   : > { %v5436_v49 = vpop.f32.mrb[34].mxu0 }
 0x407   : > { %v2035_v48 = vpop.f32.mrb[35].mxu0 }
 0x40c   : > { %v5439_v45 = vpop.f32.mrb[36].mxu0 }
 0x40d   : > { %v7892_v41 = vpop.f32.mrb[37].mxu0 }
 0x40e   : > { %v7894_v1 = vpop.f32.mrb[38].mxu0 }
 0x40f   : > { %v7896_v26 = vpop.f32.mrb[39].mxu0 }
 0x446   : > { %v5651_v50 = vpop.f32.mrb[0].mxu1 }
 0x447   : > { %v5697_v62 = vadd.f32 %v5651_v50, %v5427_v58  ;;  %v4210_v60 = vpop.f32.mrb[1].mxu1 }
 0x448   : > { %v5698_v42 = vadd.f32 %v4210_v60, %v2000_v11  ;;  %v5652_v19 = vpop.f32.mrb[2].mxu1 }
 0x449   : > { %v4298_v20 = vadd.f32 %v5697_v62, %v7901_v44  ;;  %v5699_v16 = vadd.f32 %v5652_v19, %v5428_v29  ;;  %v4213_v47 = vpop.f32.mrb[3].mxu1 }
 0x44a   : > { %v4296_v38 = vadd.f32 %v5698_v42, %v7901_v44  ;;  %v5700_v0 = vadd.f32 %v4213_v47, %v2003_v61 }
 0x44b   : > { %v4299_v10 = vadd.f32 %v5699_v16, %v7901_v44  ;;  %v4314_v46 = vmax.f32 %v4298_v20, 0.0 }
 0x44c   : > { %v4297_v56 = vadd.f32 %v5700_v0, %v7901_v44  ;;  %v4312_v12 = vmax.f32 %v4296_v38, 0.0 }
 0x44d   : > { %v4315_v13 = vmax.f32 %v4299_v10, 0.0 }
 0x44e   : > { %v4313_v24 = vmax.f32 %v4297_v56, 0.0  ;;  %v5655_v9 = vpop.f32.mrb[4].mxu1  ;;  %v5073_v56 = vld [vmem:[%s6969_s20] sm:$0xff]  }
 0x44f   : > { %v4329_v14 = vpack.c.bf16 %v4315_v13, %v4314_v46  ;;  %v5701_v7 = vadd.f32 %v5655_v9, %v5431_v27  ;;  %v4226_v39 = vpop.f32.mrb[5].mxu1 }
 0x450   : > { %v5702_v23 = vadd.f32 %v4226_v39, %v2016_v33  ;;  %v5656_v34 = vpop.f32.mrb[6].mxu1  ;;  %v4328_v4 = vpack.c.bf16 %v4313_v24, %v4312_v12  ;;  %v5075_v39 = vunpack.c.h.bf16 %v5073_v56 }
 0x451   : > { %v4302_v43 = vadd.f32 %v5701_v7, %v7901_v44  ;;  %v5703_v54 = vadd.f32 %v5656_v34, %v5432_v28  ;;  %v4229_v8 = vpop.f32.mrb[7].mxu1 }
 0x452   : > { %v4300_v37 = vadd.f32 %v5702_v23, %v7901_v44  ;;  %v5704_v51 = vadd.f32 %v4229_v8, %v2019_v59  ;;  %5681 = vmatprep.mubr.bf16.mxu0 %v4328_v4  ;;  %v5106_v8 = vld [vmem:[%s6969_s20 + $0x18] sm:$0xff]  }
 0x453   : > { %v4303_v15 = vadd.f32 %v5703_v54, %v7901_v44  ;;  %5682 = vmatmul.mubr.bf16.vlgmr.msra.gmra.mrb[40].mxu0 %v4329_v14  ;;  %v4318_v36 = vmax.f32 %v4302_v43, 0.0 }
 0x454   : > { %v4301_v3 = vadd.f32 %v5704_v51, %v7901_v44  ;;  %v4316_v53 = vmax.f32 %v4300_v37, 0.0 }
 0x455   : > { %v4319_v2 = vmax.f32 %v4303_v15, 0.0  ;;  %v5105_v15 = vld [vmem:[%s6969_s20 + $0x10] sm:$0xff]  }
 0x456   : > { %v4317_v32 = vmax.f32 %v4301_v3, 0.0  ;;  %v5659_v6 = vpop.f32.mrb[8].mxu1 }
 0x457   : > { %v5705_v40 = vadd.f32 %v5659_v6, %v5435_v22  ;;  %v4242_v30 = vpop.f32.mrb[9].mxu1  ;;  %v4331_v52 = vpack.c.bf16 %v4319_v2, %v4318_v36 }
 0x458   : > { %v5706_v57 = vadd.f32 %v4242_v30, %v2032_v5  ;;  %v5660_v25 = vpop.f32.mrb[10].mxu1  ;;  %v4330_v63 = vpack.c.bf16 %v4317_v32, %v4316_v53  ;;  %v5086_v53 = vunpack.c.l.bf16 %v5106_v8 }
 0x459   : > { %v4306_v17 = vadd.f32 %v5705_v40, %v7901_v44  ;;  %v5707_v55 = vadd.f32 %v5660_v25, %v5436_v49  ;;  %v4245_v35 = vpop.f32.mrb[11].mxu1  ;;  %v5082_v40 = vunpack.c.l.bf16 %v5105_v15 }
 0x45a   : > { %v4304_v21 = vadd.f32 %v5706_v57, %v7901_v44  ;;  %v5708_v18 = vadd.f32 %v4245_v35, %v2035_v48  ;;  %5685 = vmatprep.mubr.bf16.mxu0 %v4330_v63  ;;  %v5087_v57 = vunpack.c.h.bf16 %v5106_v8 }
 0x45b   : > { %v4307_v31 = vadd.f32 %v5707_v55, %v7901_v44  ;;  %5686 = vmatmul.mubr.bf16.gmra.mrb[44].mxu0 %v4331_v52  ;;  %v4322_v11 = vmax.f32 %v4306_v17, 0.0  ;;  %v5083_v17 = vunpack.c.h.bf16 %v5105_v15 }
 0x45c   : > { %v4305_v58 = vadd.f32 %v5708_v18, %v7901_v44  ;;  %v4320_v61 = vmax.f32 %v4304_v21, 0.0 }
 0x45d   : > { %v4323_v29 = vmax.f32 %v4307_v31, 0.0 }
 0x45e   : > { %v4321_v27 = vmax.f32 %v4305_v58, 0.0  ;;  %v5663_v33 = vpop.f32.mrb[12].mxu1  ;;  %v5108_v58 = vld [vmem:[%s6969_s20 + $0x28] sm:$0xff]  }
 0x45f   : > { %v5709_v28 = vadd.f32 %v5663_v33, %v5439_v45  ;;  %v4258_v59 = vpop.f32.mrb[13].mxu1  ;;  %v4333_v22 = vpack.c.bf16 %v4323_v29, %v4322_v11 }
 0x460   : > { %v5710_v5 = vadd.f32 %v4258_v59, %v7892_v41  ;;  %v5664_v49 = vpop.f32.mrb[14].mxu1  ;;  %v4332_v50 = vpack.c.bf16 %v4321_v27, %v4320_v61  ;;  %v5107_v61 = vld [vmem:[%s6969_s20 + $0x20] sm:$0xff]   ;;  %v5094_v59 = vunpack.c.l.bf16 %v5108_v58 }
 0x461   : > { %v4310_v48 = vadd.f32 %v5709_v28, %v7901_v44  ;;  %v5711_v62 = vadd.f32 %v5664_v49, %v7894_v1  ;;  %v4261_v60 = vpop.f32.mrb[15].mxu1  ;;  %v5104_v1 = vld [vmem:[%s6969_s20 + $0x8] sm:$0xff]   ;;  %v5090_v49 = vunpack.c.l.bf16 %v5107_v61 }
 0x462   : > { %v4308_v42 = vadd.f32 %v5710_v5, %v7901_v44  ;;  %v5712_v19 = vadd.f32 %v4261_v60, %v7896_v26  ;;  %5689 = vmatprep.mubr.bf16.mxu0 %v4332_v50  ;;  %v7927_v26 = vld [vmem:[%s8213_s26] ss:$0 sm:$0xff]  ;;  %v5078_v46 = vunpack.c.l.bf16 %v5104_v1  ;;  %v5079_v9 = vunpack.c.h.bf16 %v5104_v1  ;;  %v5109_v1 = vld [vmem:[%s6969_s20 + $0x30] sm:$0xff]  }
 0x463   : > { %v4311_v45 = vadd.f32 %v5711_v62, %v7901_v44  ;;  %5690 = vmatmul.mubr.bf16.gmra.mrb[48].mxu0 %v4333_v22  ;;  %v4326_v41 = vmax.f32 %v4310_v48, 0.0  ;;  %v5095_v62 = vunpack.c.h.bf16 %v5108_v58 }
 0x464   : > { %v4309_v20 = vadd.f32 %v5712_v19, %v7901_v44  ;;  %v4324_v47 = vmax.f32 %v4308_v42, 0.0  ;;  %v5074_v44 = vunpack.c.l.bf16 %v5073_v56  ;;  %v5091_v19 = vunpack.c.h.bf16 %v5107_v61 }
 0x465   : > { %v4327_v16 = vmax.f32 %v4311_v45, 0.0 }
 0x466   : > { %v4325_v38 = vmax.f32 %v4309_v20, 0.0 }
 0x467   : > { %v4335_v0 = vpack.c.bf16 %v4327_v16, %v4326_v41 }
 0x468   : > { %v4334_v10 = vpack.c.bf16 %v4325_v38, %v4324_v47  ;;  %v5110_v38 = vld [vmem:[%s6969_s20 + $0x38] sm:$0xff]   ;;  %s5047_s20 = sshll.u32 %s4598_s10, 7 }
 0x469   : > { %s7970_s27 = scalar_lea.hbm %s8216_s23, %s5047_s20 }
 0x46a   : > { %5693 = vmatprep.mubr.bf16.mxu0 %v4334_v10 }
 0x46b   : > { %5694 = vmatmul.mubr.bf16.gmra.mrb[52].mxu0 %v4335_v0 }
 0x526   : > { %v5683_v13 = vpop.f32.mrb[40].mxu0 }
 0x527   : > { %v4450_v12 = vadd.f32 %v5683_v13, %v7927_v26  ;;  %v4441_v24 = vpop.f32.mrb[41].mxu0 }
 0x528   : > { %v4442_v14 = vadd.f32 %v7927_v26, %v4441_v24  ;;  %v5684_v7 = vpop.f32.mrb[42].mxu0 }
 0x529   : > { %v4538_v23 = vadd.f32 %v5078_v46, %v4450_v12  ;;  %v4453_v34 = vadd.f32 %v5684_v7, %v7927_v26  ;;  %v4444_v4 = vpop.f32.mrb[43].mxu0 }
 0x52a   : > { %v4536_v43 = vadd.f32 %v5074_v44, %v4442_v14  ;;  %v4445_v54 = vadd.f32 %v7927_v26, %v4444_v4  ;;  %v5102_v44 = vunpack.c.l.bf16 %v5110_v38  ;;  %v5099_v4 = vunpack.c.h.bf16 %v5109_v1 }
 0x52b   : > { %v4554_v37 = vmax.f32 %v4538_v23, 0.0  ;;  %v4539_v51 = vadd.f32 %v5079_v9, %v4453_v34  ;;  %v5098_v9 = vunpack.c.l.bf16 %v5109_v1 }
 0x52c   : > { %v4552_v3 = vmax.f32 %v4536_v43, 0.0  ;;  %v4537_v36 = vadd.f32 %v5075_v39, %v4445_v54  ;;  %v5103_v39 = vunpack.c.h.bf16 %v5110_v38 }
 0x52d   : > { %4570 = vst [vmem:[%s7196_s24 + $0x10] sm:$0xff] %v4554_v37  ;;  %v4555_v2 = vmax.f32 %v4539_v51, 0.0 }
 0x52e   : > { %4568 = vst [vmem:[%s7196_s24] sm:$0xff] %v4552_v3  ;;  %v4553_v32 = vmax.f32 %v4537_v36, 0.0  ;;  %v5687_v6 = vpop.f32.mrb[44].mxu0 }
 0x52f   : > { %4571 = vst [vmem:[%s7196_s24 + $0x18] sm:$0xff] %v4555_v2  ;;  %v4466_v30 = vadd.f32 %v5687_v6, %v7927_v26  ;;  %v4457_v52 = vpop.f32.mrb[45].mxu0 }
 0x530   : > { %4569 = vst [vmem:[%s7196_s24 + $0x8] sm:$0xff] %v4553_v32  ;;  %v4458_v25 = vadd.f32 %v7927_v26, %v4457_v52  ;;  %v5688_v63 = vpop.f32.mrb[46].mxu0 }
 0x531   : > { %v4542_v55 = vadd.f32 %v5086_v53, %v4466_v30  ;;  %v4469_v35 = vadd.f32 %v5688_v63, %v7927_v26  ;;  %v4460_v21 = vpop.f32.mrb[47].mxu0 }
 0x532   : > { %v4540_v18 = vadd.f32 %v5082_v40, %v4458_v25  ;;  %v4461_v31 = vadd.f32 %v7927_v26, %v4460_v21 }
 0x533   : > { %v4558_v11 = vmax.f32 %v4542_v55, 0.0  ;;  %v4543_v29 = vadd.f32 %v5087_v57, %v4469_v35 }
 0x534   : > { %v4556_v27 = vmax.f32 %v4540_v18, 0.0  ;;  %v4541_v33 = vadd.f32 %v5083_v17, %v4461_v31 }
 0x535   : > { %4574 = vst [vmem:[%s7196_s24 + $0x30] sm:$0xff] %v4558_v11  ;;  %v4559_v28 = vmax.f32 %v4543_v29, 0.0 }
 0x536   : > { %4572 = vst [vmem:[%s7196_s24 + $0x20] sm:$0xff] %v4556_v27  ;;  %v4557_v22 = vmax.f32 %v4541_v33, 0.0  ;;  %v5691_v5 = vpop.f32.mrb[48].mxu0 }
 0x537   : > { %4575 = vst [vmem:[%s7196_s24 + $0x38] sm:$0xff] %v4559_v28  ;;  %v4482_v50 = vadd.f32 %v5691_v5, %v7927_v26  ;;  %v4473_v48 = vpop.f32.mrb[49].mxu0 }
 0x538   : > { %4573 = vst [vmem:[%s7196_s24 + $0x28] sm:$0xff] %v4557_v22  ;;  %v4474_v60 = vadd.f32 %v7927_v26, %v4473_v48  ;;  %v5692_v42 = vpop.f32.mrb[50].mxu0 }
 0x539   : > { %v4546_v45 = vadd.f32 %v5094_v59, %v4482_v50  ;;  %v4485_v20 = vadd.f32 %v5692_v42, %v7927_v26  ;;  %v4476_v41 = vpop.f32.mrb[51].mxu0 }
 0x53a   : > { %v4544_v16 = vadd.f32 %v5090_v49, %v4474_v60  ;;  %v4477_v47 = vadd.f32 %v7927_v26, %v4476_v41 }
 0x53b   : > { %v4562_v0 = vmax.f32 %v4546_v45, 0.0  ;;  %v4547_v10 = vadd.f32 %v5095_v62, %v4485_v20 }
 0x53c   : > { %v4560_v56 = vmax.f32 %v4544_v16, 0.0  ;;  %v4545_v46 = vadd.f32 %v5091_v19, %v4477_v47 }
 0x53d   : > { %4578 = vst [vmem:[%s7196_s24 + $0x50] sm:$0xff] %v4562_v0  ;;  %v4563_v13 = vmax.f32 %v4547_v10, 0.0 }
 0x53e   : > { %4576 = vst [vmem:[%s7196_s24 + $0x40] sm:$0xff] %v4560_v56  ;;  %v4561_v12 = vmax.f32 %v4545_v46, 0.0  ;;  %v5695_v24 = vpop.f32.mrb[52].mxu0 }
 0x53f   : > { %4579 = vst [vmem:[%s7196_s24 + $0x58] sm:$0xff] %v4563_v13  ;;  %v4498_v14 = vadd.f32 %v5695_v24, %v7927_v26  ;;  %v4489_v7 = vpop.f32.mrb[53].mxu0 }
 0x540   : > { %4577 = vst [vmem:[%s7196_s24 + $0x48] sm:$0xff] %v4561_v12  ;;  %v4490_v23 = vadd.f32 %v7927_v26, %v4489_v7  ;;  %v5696_v34 = vpop.f32.mrb[54].mxu0 }
 0x541   : > { %v4550_v43 = vadd.f32 %v5102_v44, %v4498_v14  ;;  %v4501_v54 = vadd.f32 %v5696_v34, %v7927_v26  ;;  %v4492_v8 = vpop.f32.mrb[55].mxu0 }
 0x542   : > { %v4548_v37 = vadd.f32 %v5098_v9, %v4490_v23  ;;  %v4493_v51 = vadd.f32 %v7927_v26, %v4492_v8 }
 0x543   : > { %v4566_v15 = vmax.f32 %v4550_v43, 0.0  ;;  %v4551_v3 = vadd.f32 %v5103_v39, %v4501_v54 }
 0x544   : > { %v4564_v36 = vmax.f32 %v4548_v37, 0.0  ;;  %v4549_v2 = vadd.f32 %v5099_v4, %v4493_v51 }
 0x545   : > { %4582 = vst [vmem:[%s7196_s24 + $0x70] sm:$0xff] %v4566_v15  ;;  %v4567_v53 = vmax.f32 %v4551_v3, 0.0 }
 0x546   : > { %4580 = vst [vmem:[%s7196_s24 + $0x60] sm:$0xff] %v4564_v36  ;;  %v4565_v26 = vmax.f32 %v4549_v2, 0.0 }
 0x547   : > { %4583 = vst [vmem:[%s7196_s24 + $0x78] sm:$0xff] %v4567_v53 }
 0x548   : > { %4581 = vst [vmem:[%s7196_s24 + $0x68] sm:$0xff] %v4565_v26 }
 0x549   : > { %6338 = shalt.err (!%p6335_p13)
}
 0x54a   : > { %s6339_s24 = scalar_lea.hbm %s7970_s27, 2048  ;;  %s6343_s13 = scalar_lea.hbm %s8216_s23, 8192 }
 0x54b   : > { %p6340_p11 = scmp.ne.s32.totalorder %s7970_s27, %s6339_s24  ;;  %p6344_p3 = scmp.lt.u32.totalorder %s7970_s27, %s8216_s23 }
 0x54c   : > { %p6345_p12 = scmp.lt.u32.totalorder %s6343_s13, %s6339_s24  ;;  %p6347_p5 = scmp.lt.u32.totalorder %s6339_s24, %s7970_s27 }
 0x54d   : > { %p6341_p0 = pnand %p6340_p11, %p8217_p10 }
 0x54e   : > { %p6346_p4 = por %p6345_p12, %p6344_p3 }
 0x54f   : > { %p6342_p1 = pneg %p6341_p0 }
 0x550   : > { %p6348_p8 = por %p6347_p5, %p6346_p4 }
 0x552   : > { %p6349_p2 = pnand %p6348_p8, %p6342_p1 }
 0x554   : > { %6352 = shalt.err (!%p6349_p2)
}
 0x555   : > { %s6502_s7 = smov 128   ;;  %s6503_s21 = smov 8  }
 0x556   : > { %5843 = dma.vmem_to_hbm [thread:$0]  (%p8217_p10), %s7972_s9, 2048, %s7970_s27, %s4585_s1, %s6502_s7, %s6502_s7, %s6503_s21  }
 0x557 PF: > { %s8218_s11 = sld [smem:[#allocation36_spill]]  ;;  %p5876_p9 = scmp.ge.s32.totalorder %s6487_s22, 2 }
 0x558   : > { %s4616_s10 = sand.u32 1, %s6459_s15  }
 0x559   : > { %s4617_s20 = scalar_lea.sflag [#allocation5], %s4616_s10 }
 0x55d   : > { %p8219_p7 = scmp.ne.s32.totalorder %s8218_s11, 0 }
 0x55f   : > { %p5866_p6 = pnand %p5876_p9, %p8219_p7 }
 0x561   : > { %6430 = dma.done.wait (!%p5866_p6), %s4617_s20, 2048  }
 0x562   : > { %6432 = vsyncadd (!%p5866_p6), %s4617_s20, 4294965248  ;;  %s30_s22 = sadd.s32 1, %s6487_s22   ;;  %s8221_s30 = sld [smem:[#allocation22_spill]] }
 0x563   : > { %p8006_p13 = scmp.ge.s32.totalorder %s30_s22, 6   ;;  %s8222_s10 = sld [smem:[#allocation23_spill]] }
 0x564   : > { %s8223_s19 = sld [smem:[#allocation24_spill]]  ;;  %s8224_s4 = smov %s6716_s12 }
 0x565   : > { %s8225_s9 = sld [smem:[#allocation35_spill]]  ;;  %s8226_s18 = sld [smem:[#allocation27_spill]] }
 0x566   : > { %s8227_s27 = sld [smem:[#allocation28_spill]]  ;;  %s8228_s20 = sld [smem:[#allocation30_spill]] }
 0x567   : > { %s8229_s21 = sld [smem:[#allocation31_spill]]  ;;  %s8230_s11 = smov %s8253_s2 }
 0x568   : > { %s8232_s13 = smov %s6455_s14  ;;  %s8233_s14 = smov %s8224_s4 }
 0x569   : > { %s8234_s15 = smov %s6463_s16  ;;  %s8235_s16 = smov %s6467_s17 }
 0x56a   : > { %s8231_s12 = smov %s8223_s19  ;;  %29 = sbr.rel (!%p8006_p13) target bundleno = 25 (0x19), region = 156 }
 0x56b   : > { %s8236_s17 = smov %s8225_s9 }
 0x56c   : > { %s8237_s19 = smov %s8227_s27 }
 0x571   :  { %4622 = vsyncpa [#allocation4], 1 }
 0x572   :  { %4624 = vsyncpa [#allocation4 + $0x1], 1 }
 0x573   :  { %4625 = vsyncpa [#allocation7], 1 }
 0x574   :  { %4627 = vsyncpa [#allocation7 + $0x1], 1 }
 0x575   :  { %4628 = vsyncpa [#allocation10], 1 }
 0x576   :  { %4629 = vsyncpa [#allocation13], 1 }
 0x577   :  { %4630 = vsyncpa [#allocation5], 1 }
 0x578   :  { %4632 = vsyncpa [#allocation5 + $0x1], 1 }

</bundles_post_ra>
